<compile_context>
chip_gen: v5e
topology: v5e:2x2
jax: 0.10.0
libtpu: 0.0.40
codegen_flags: <defaults>
</compile_context>

<pallas_src>
import functools

import jax
import jax.numpy as jnp
from jax.experimental import pallas as pl
from jax.experimental.pallas import tpu as pltpu

NUM_CLASSES = 10   # num_classes is unbound in the reference source; MNIST default.
_PAD_N = 128       # lane-dense padded logits width
_MAX_BS = 8        # samples per grid step (sublane-friendly, amortizes overhead)


# ----------------------------------------------------------------------------
# Fused Pallas kernel: conv1+relu+pool1 -> conv2+relu+pool2 -> flatten -> dense
# One block of `bs` samples per grid step; everything after the input DMA stays
# in VMEM.  The per-sample body is unrolled (strictly 2D matmuls -> safest
# Mosaic lowering), scratch buffers are reused sample-to-sample.
# ----------------------------------------------------------------------------
def _fused_cnn_kernel(x_ref, a1_ref, b1_ref, a2_ref, b2_ref, wd_ref, bd_ref,
                      out_ref, h1w_ref, h1p_ref, h2w_ref, h2p_ref, *, bs):
    f32 = jnp.float32
    bf16 = jnp.bfloat16

    for s in range(bs):
        # ---- Conv1 (3x3, 1->32) + ReLU: 3 banded matmuls, K=28 --------------
        x = x_ref[s].astype(bf16)                                 # (28, 28)
        h1 = jnp.dot(x[0:26, :], a1_ref[0], preferred_element_type=f32)
        h1 = h1 + jnp.dot(x[1:27, :], a1_ref[1], preferred_element_type=f32)
        h1 = h1 + jnp.dot(x[2:28, :], a1_ref[2], preferred_element_type=f32)
        h1 = jnp.maximum(h1 + b1_ref[...], 0.0)                   # (26, 26*32)

        # ---- MaxPool 2x2 (fused, static slices into VMEM scratch) -----------
        for j in range(13):    # pool along W: pairs of 32-lane channel blocks
            h1w_ref[:, 32 * j:32 * j + 32] = jnp.maximum(
                h1[:, 64 * j:64 * j + 32], h1[:, 64 * j + 32:64 * j + 64])
        for a in range(13):    # pool along H: row pairs
            h1p_ref[a:a + 1, :] = jnp.maximum(
                h1w_ref[2 * a:2 * a + 1, :], h1w_ref[2 * a + 1:2 * a + 2, :])

        # ---- Conv2 (3x3, 32->64) + ReLU: 3 banded matmuls, K=416 ------------
        p1 = h1p_ref[...].astype(bf16)                            # (13, 13*32)
        h2 = jnp.dot(p1[0:11, :], a2_ref[0], preferred_element_type=f32)
        h2 = h2 + jnp.dot(p1[1:12, :], a2_ref[1], preferred_element_type=f32)
        h2 = h2 + jnp.dot(p1[2:13, :], a2_ref[2], preferred_element_type=f32)
        h2 = jnp.maximum(h2 + b2_ref[...], 0.0)                   # (11, 11*64)

        # ---- MaxPool 2x2 (valid: 11 -> 5, last row/col dropped) -------------
        for j in range(5):     # pool along W: pairs of 64-lane channel blocks
            h2w_ref[:, 64 * j:64 * j + 64] = jnp.maximum(
                h2[:, 128 * j:128 * j + 64], h2[:, 128 * j + 64:128 * j + 128])
        for a in range(5):     # pool along H: row pairs
            h2p_ref[a:a + 1, :] = jnp.maximum(
                h2w_ref[2 * a:2 * a + 1, :], h2w_ref[2 * a + 1:2 * a + 2, :])

        # ---- Flatten (row-major (5,5,64) == rows of (5,320)) + Dense ---------
        # Dropout(0.5) is identity at inference (eval mode) -> no-op.
        flat = h2p_ref[...].astype(bf16)                          # (5, 320)
        logits = bd_ref[...]                                      # (1, 128) f32
        for i in range(5):
            logits = logits + jnp.dot(flat[i:i + 1, :], wd_ref[i],
                                      preferred_element_type=f32)
        out_ref[s:s + 1, :] = logits                              # lane-dense 128


# ----------------------------------------------------------------------------
# Host-side one-time weight preparation (banded conv matrices, padding, bf16)
# ----------------------------------------------------------------------------
def prepare_kernel_params(params):
    f32, bf16 = jnp.float32, jnp.bfloat16
    w1, b1 = params["w1"], params["b1"]          # (3,3,1,32), (32,)
    w2, b2 = params["w2"], params["b2"]          # (3,3,32,64), (64,)
    wd, bd = params["wd"], params["bd"]          # (1600,10), (10,)

    # Conv1 banded matrices: a1[di, k, j*32+d] = w1[di, k-j, 0, d] for 0 <= k-j < 3
    sel1 = (jnp.arange(28)[None, :, None]
            == jnp.arange(26)[None, None, :]
            + jnp.arange(3)[:, None, None]).astype(f32)           # (3, 28, 26)
    a1 = jnp.einsum("tkj,atd->akjd", sel1, w1[:, :, 0, :].astype(f32))
    a1 = a1.reshape(3, 28, 26 * 32).astype(bf16)

    # Conv2 banded matrices: a2[di, m*32+c, j*64+d] = w2[di, m-j, c, d] for 0 <= m-j < 3
    sel2 = (jnp.arange(13)[None, :, None]
            == jnp.arange(11)[None, None, :]
            + jnp.arange(3)[:, None, None]).astype(f32)           # (3, 13, 11)
    a2 = jnp.einsum("tmj,atcd->amcjd", sel2, w2.astype(f32))
    a2 = a2.reshape(3, 13 * 32, 11 * 64).astype(bf16)

    b1t = jnp.tile(b1.astype(f32), 26).reshape(1, 26 * 32)
    b2t = jnp.tile(b2.astype(f32), 11).reshape(1, 11 * 64)

    # Dense: flatten order is (H=5, W=5, C=64) row-major == rows of (5, 320).
    wd3 = wd.reshape(5, 320, NUM_CLASSES).astype(f32)
    wd3 = jnp.pad(wd3, ((0, 0), (0, 0), (0, _PAD_N - NUM_CLASSES))).astype(bf16)
    bdp = jnp.pad(bd.astype(f32), (0, _PAD_N - NUM_CLASSES)).reshape(1, _PAD_N)

    return {"a1": a1, "b1t": b1t, "a2": a2, "b2t": b2t, "wd": wd3, "bd": bdp}


@jax.jit
def forward(x, kp):
    """x: (B, 28, 28, 1) float32 NHWC -> (B, NUM_CLASSES) float32 logits."""
    B = x.shape[0]
    x2 = x.reshape(B, 28, 28).astype(jnp.float32)

    bs = _MAX_BS if B >= _MAX_BS else B          # samples per grid step (static)
    bp = ((B + bs - 1) // bs) * bs               # padded batch
    if bp != B:
        x2 = jnp.pad(x2, ((0, bp - B), (0, 0), (0, 0)))

    out = pl.pallas_call(
        functools.partial(_fused_cnn_kernel, bs=bs),
        out_shape=jax.ShapeDtypeStruct((bp, _PAD_N), jnp.float32),
        grid=(bp // bs,),
        in_specs=[
            pl.BlockSpec((bs, 28, 28), lambda b: (b, 0, 0)),          # input block
            pl.BlockSpec((3, 28, 832), lambda b: (0, 0, 0)),          # conv1 banded W
            pl.BlockSpec((1, 832), lambda b: (0, 0)),                 # conv1 bias
            pl.BlockSpec((3, 416, 704), lambda b: (0, 0, 0)),         # conv2 banded W
            pl.BlockSpec((1, 704), lambda b: (0, 0)),                 # conv2 bias
            pl.BlockSpec((5, 320, _PAD_N), lambda b: (0, 0, 0)),      # dense W (padded)
            pl.BlockSpec((1, _PAD_N), lambda b: (0, 0)),              # dense bias
        ],
        out_specs=pl.BlockSpec((bs, _PAD_N), lambda b: (b, 0)),
        scratch_shapes=[
            pltpu.VMEM((26, 416), jnp.float32),   # width-pooled conv1
            pltpu.VMEM((13, 416), jnp.float32),   # pooled conv1  (13,13,32)
            pltpu.VMEM((11, 320), jnp.float32),   # width-pooled conv2
            pltpu.VMEM((5, 320), jnp.float32),    # pooled conv2  (5,5,64) == flatten
        ],
        compiler_params=pltpu.CompilerParams(
            dimension_semantics=("parallel",),
            vmem_limit_bytes=32 * 1024 * 1024,
        ),
    )(x2, kp["a1"], kp["b1t"], kp["a2"], kp["b2t"], kp["wd"], kp["bd"])
    return out[:B, :NUM_CLASSES]


# ----------------------------------------------------------------------------
# Parameter init + pure-JAX reference (for a correctness check in __main__)
# ----------------------------------------------------------------------------
def init_params(key):
    k1, k2, k3, k4, k5, k6 = jax.random.split(key, 6)
    return {
        "w1": jax.random.normal(k1, (3, 3, 1, 32), jnp.float32) * 0.1,
        "b1": jax.random.normal(k2, (32,), jnp.float32) * 0.01,
        "w2": jax.random.normal(k3, (3, 3, 32, 64), jnp.float32) * 0.05,
        "b2": jax.random.normal(k4, (64,), jnp.float32) * 0.01,
        "wd": jax.random.normal(k5, (5 * 5 * 64, NUM_CLASSES), jnp.float32) * 0.02,
        "bd": jax.random.normal(k6, (NUM_CLASSES,), jnp.float32) * 0.01,
    }


def reference_forward(x, params):
    y = jax.lax.conv_general_dilated(
        x.astype(jnp.float32), params["w1"], window_strides=(1, 1), padding="VALID",
        dimension_numbers=("NHWC", "HWIO", "NHWC"))
    y = jnp.maximum(y + params["b1"], 0.0)
    y = jax.lax.reduce_window(y, -jnp.inf, jax.lax.max,
                              (1, 2, 2, 1), (1, 2, 2, 1), "VALID")
    y = jax.lax.conv_general_dilated(
        y, params["w2"], window_strides=(1, 1), padding="VALID",
        dimension_numbers=("NHWC", "HWIO", "NHWC"))
    y = jnp.maximum(y + params["b2"], 0.0)
    y = jax.lax.reduce_window(y, -jnp.inf, jax.lax.max,
                              (1, 2, 2, 1), (1, 2, 2, 1), "VALID")
    y = y.reshape(y.shape[0], -1)
    return y @ params["wd"] + params["bd"]


if __name__ == "__main__":
    key = jax.random.PRNGKey(0)
    kx, kpar = jax.random.split(key)
    x = jax.random.normal(kx, (2, 28, 28, 1), jnp.float32)
    params = init_params(kpar)
    kparams = prepare_kernel_params(params)

    out = forward(x, kparams)
    out = jax.block_until_ready(out)
    assert out.shape == (2, NUM_CLASSES), out.shape
    assert bool(jnp.all(jnp.isfinite(out)))

    ref = reference_forward(x, params)
    max_err = jnp.max(jnp.abs(out - ref))
    assert bool(max_err < 2e-2), f"max abs error vs reference: {max_err}"

    print("KERNEL_OK")
</pallas_src>

<mosaic_0001>
module attributes {stable_mosaic.version = 11 : i64} {
  func.func @_fused_cnn_kernel(%arg0: i32, %arg1: memref<2x28x28xf32, #tpu.memory_space<vmem>>, %arg2: memref<3x28x832xbf16, #tpu.memory_space<vmem>>, %arg3: memref<1x832xf32, #tpu.memory_space<vmem>>, %arg4: memref<3x416x704xbf16, #tpu.memory_space<vmem>>, %arg5: memref<1x704xf32, #tpu.memory_space<vmem>>, %arg6: memref<5x320x128xbf16, #tpu.memory_space<vmem>>, %arg7: memref<1x128xf32, #tpu.memory_space<vmem>>, %arg8: memref<2x128xf32, #tpu.memory_space<vmem>>, %arg9: memref<26x416xf32, #tpu.memory_space<vmem>>, %arg10: memref<13x416xf32, #tpu.memory_space<vmem>>, %arg11: memref<11x320xf32, #tpu.memory_space<vmem>>, %arg12: memref<5x320xf32, #tpu.memory_space<vmem>>) attributes {dimension_semantics = [#tpu.dimension_semantics<parallel>], iteration_bounds = array<i64: 1>, scalar_prefetch = 0 : i64, scratch_operands = 4 : i64, tpu.core_type = #tpu.core_type<tc>, window_params = [{transform_indices = @transform_0, window_bounds = array<i64: 2, 28, 28>}, {pipeline_mode = #tpu.pipeline_mode<synchronous>, transform_indices = @transform_1, window_bounds = array<i64: 3, 28, 832>}, {pipeline_mode = #tpu.pipeline_mode<synchronous>, transform_indices = @transform_2, window_bounds = array<i64: 1, 832>}, {pipeline_mode = #tpu.pipeline_mode<synchronous>, transform_indices = @transform_3, window_bounds = array<i64: 3, 416, 704>}, {pipeline_mode = #tpu.pipeline_mode<synchronous>, transform_indices = @transform_4, window_bounds = array<i64: 1, 704>}, {pipeline_mode = #tpu.pipeline_mode<synchronous>, transform_indices = @transform_5, window_bounds = array<i64: 5, 320, 128>}, {pipeline_mode = #tpu.pipeline_mode<synchronous>, transform_indices = @transform_6, window_bounds = array<i64: 1, 128>}, {transform_indices = @transform_7, window_bounds = array<i64: 2, 128>}]} {
    %c0 = arith.constant 0 : index
    %c0_0 = arith.constant 0 : index
    %c0_1 = arith.constant 0 : index
    %0 = vector.load %arg1[%c0, %c0_0, %c0_1] : memref<2x28x28xf32, #tpu.memory_space<vmem>>, vector<1x28x28xf32>
    %1 = vector.shape_cast %0 : vector<1x28x28xf32> to vector<28x28xf32>
    %2 = arith.truncf %1 : vector<28x28xf32> to vector<28x28xbf16>
    %3 = vector.extract_strided_slice %2 {offsets = [0, 0], sizes = [26, 28], strides = [1, 1]} : vector<28x28xbf16> to vector<26x28xbf16>
    %c0_2 = arith.constant 0 : index
    %c0_3 = arith.constant 0 : index
    %c0_4 = arith.constant 0 : index
    %4 = vector.load %arg2[%c0_2, %c0_3, %c0_4] : memref<3x28x832xbf16, #tpu.memory_space<vmem>>, vector<1x28x832xbf16>
    %5 = vector.shape_cast %4 : vector<1x28x832xbf16> to vector<28x832xbf16>
    %cst = arith.constant dense<0.000000e+00> : vector<26x832xf32>
    %6 = tpu.matmul %3, %5, %cst {dimension_numbers = #tpu.dot_dimension_numbers<[1], [0], [0], [1], [0, 0, 1, 1], [], []>} : vector<26x28xbf16>, vector<28x832xbf16>, vector<26x832xf32> -> vector<26x832xf32>
    %7 = vector.extract_strided_slice %2 {offsets = [1, 0], sizes = [26, 28], strides = [1, 1]} : vector<28x28xbf16> to vector<26x28xbf16>
    %c1 = arith.constant 1 : index
    %c0_5 = arith.constant 0 : index
    %c0_6 = arith.constant 0 : index
    %8 = vector.load %arg2[%c1, %c0_5, %c0_6] : memref<3x28x832xbf16, #tpu.memory_space<vmem>>, vector<1x28x832xbf16>
    %9 = vector.shape_cast %8 : vector<1x28x832xbf16> to vector<28x832xbf16>
    %cst_7 = arith.constant dense<0.000000e+00> : vector<26x832xf32>
    %10 = tpu.matmul %7, %9, %cst_7 {dimension_numbers = #tpu.dot_dimension_numbers<[1], [0], [0], [1], [0, 0, 1, 1], [], []>} : vector<26x28xbf16>, vector<28x832xbf16>, vector<26x832xf32> -> vector<26x832xf32>
    %11 = arith.addf %6, %10 : vector<26x832xf32>
    %12 = vector.extract_strided_slice %2 {offsets = [2, 0], sizes = [26, 28], strides = [1, 1]} : vector<28x28xbf16> to vector<26x28xbf16>
    %c2 = arith.constant 2 : index
    %c0_8 = arith.constant 0 : index
    %c0_9 = arith.constant 0 : index
    %13 = vector.load %arg2[%c2, %c0_8, %c0_9] : memref<3x28x832xbf16, #tpu.memory_space<vmem>>, vector<1x28x832xbf16>
    %14 = vector.shape_cast %13 : vector<1x28x832xbf16> to vector<28x832xbf16>
    %cst_10 = arith.constant dense<0.000000e+00> : vector<26x832xf32>
    %15 = tpu.matmul %12, %14, %cst_10 {dimension_numbers = #tpu.dot_dimension_numbers<[1], [0], [0], [1], [0, 0, 1, 1], [], []>} : vector<26x28xbf16>, vector<28x832xbf16>, vector<26x832xf32> -> vector<26x832xf32>
    %16 = arith.addf %11, %15 : vector<26x832xf32>
    %c0_11 = arith.constant 0 : index
    %c0_12 = arith.constant 0 : index
    %17 = vector.load %arg3[%c0_11, %c0_12] : memref<1x832xf32, #tpu.memory_space<vmem>>, vector<1x832xf32>
    %18 = vector.broadcast %17 : vector<1x832xf32> to vector<26x832xf32>
    %19 = arith.addf %16, %18 : vector<26x832xf32>
    %cst_13 = arith.constant 0.000000e+00 : f32
    %20 = vector.broadcast %cst_13 : f32 to vector<26x832xf32>
    %21 = arith.maximumf %19, %20 : vector<26x832xf32>
    %22 = vector.extract_strided_slice %21 {offsets = [0, 0], sizes = [26, 32], strides = [1, 1]} : vector<26x832xf32> to vector<26x32xf32>
    %23 = vector.extract_strided_slice %21 {offsets = [0, 32], sizes = [26, 32], strides = [1, 1]} : vector<26x832xf32> to vector<26x32xf32>
    %24 = arith.maximumf %22, %23 : vector<26x32xf32>
    %c0_14 = arith.constant 0 : index
    %c0_15 = arith.constant 0 : index
    %25 = vector.load %arg9[%c0_14, %c0_15] : memref<26x416xf32, #tpu.memory_space<vmem>>, vector<26x32xf32>
    tpu.vector_store %arg9[%c0_14, %c0_15], %24 {strides = array<i32>} : memref<26x416xf32, #tpu.memory_space<vmem>>, vector<26x32xf32>,
    %26 = vector.extract_strided_slice %21 {offsets = [0, 64], sizes = [26, 32], strides = [1, 1]} : vector<26x832xf32> to vector<26x32xf32>
    %27 = vector.extract_strided_slice %21 {offsets = [0, 96], sizes = [26, 32], strides = [1, 1]} : vector<26x832xf32> to vector<26x32xf32>
    %28 = arith.maximumf %26, %27 : vector<26x32xf32>
    %c0_16 = arith.constant 0 : index
    %c32 = arith.constant 32 : index
    %29 = vector.load %arg9[%c0_16, %c32] : memref<26x416xf32, #tpu.memory_space<vmem>>, vector<26x32xf32>
    tpu.vector_store %arg9[%c0_16, %c32], %28 {strides = array<i32>} : memref<26x416xf32, #tpu.memory_space<vmem>>, vector<26x32xf32>,
    %30 = vector.extract_strided_slice %21 {offsets = [0, 128], sizes = [26, 32], strides = [1, 1]} : vector<26x832xf32> to vector<26x32xf32>
    %31 = vector.extract_strided_slice %21 {offsets = [0, 160], sizes = [26, 32], strides = [1, 1]} : vector<26x832xf32> to vector<26x32xf32>
    %32 = arith.maximumf %30, %31 : vector<26x32xf32>
    %c0_17 = arith.constant 0 : index
    %c64 = arith.constant 64 : index
    %33 = vector.load %arg9[%c0_17, %c64] : memref<26x416xf32, #tpu.memory_space<vmem>>, vector<26x32xf32>
    tpu.vector_store %arg9[%c0_17, %c64], %32 {strides = array<i32>} : memref<26x416xf32, #tpu.memory_space<vmem>>, vector<26x32xf32>,
    %34 = vector.extract_strided_slice %21 {offsets = [0, 192], sizes = [26, 32], strides = [1, 1]} : vector<26x832xf32> to vector<26x32xf32>
    %35 = vector.extract_strided_slice %21 {offsets = [0, 224], sizes = [26, 32], strides = [1, 1]} : vector<26x832xf32> to vector<26x32xf32>
    %36 = arith.maximumf %34, %35 : vector<26x32xf32>
    %c0_18 = arith.constant 0 : index
    %c96 = arith.constant 96 : index
    %37 = vector.load %arg9[%c0_18, %c96] : memref<26x416xf32, #tpu.memory_space<vmem>>, vector<26x32xf32>
    tpu.vector_store %arg9[%c0_18, %c96], %36 {strides = array<i32>} : memref<26x416xf32, #tpu.memory_space<vmem>>, vector<26x32xf32>,
    %38 = vector.extract_strided_slice %21 {offsets = [0, 256], sizes = [26, 32], strides = [1, 1]} : vector<26x832xf32> to vector<26x32xf32>
    %39 = vector.extract_strided_slice %21 {offsets = [0, 288], sizes = [26, 32], strides = [1, 1]} : vector<26x832xf32> to vector<26x32xf32>
    %40 = arith.maximumf %38, %39 : vector<26x32xf32>
    %c0_19 = arith.constant 0 : index
    %c128 = arith.constant 128 : index
    %41 = vector.load %arg9[%c0_19, %c128] : memref<26x416xf32, #tpu.memory_space<vmem>>, vector<26x32xf32>
    tpu.vector_store %arg9[%c0_19, %c128], %40 {strides = array<i32>} : memref<26x416xf32, #tpu.memory_space<vmem>>, vector<26x32xf32>,
    %42 = vector.extract_strided_slice %21 {offsets = [0, 320], sizes = [26, 32], strides = [1, 1]} : vector<26x832xf32> to vector<26x32xf32>
    %43 = vector.extract_strided_slice %21 {offsets = [0, 352], sizes = [26, 32], strides = [1, 1]} : vector<26x832xf32> to vector<26x32xf32>
    %44 = arith.maximumf %42, %43 : vector<26x32xf32>
    %c0_20 = arith.constant 0 : index
    %c160 = arith.constant 160 : index
    %45 = vector.load %arg9[%c0_20, %c160] : memref<26x416xf32, #tpu.memory_space<vmem>>, vector<26x32xf32>
    tpu.vector_store %arg9[%c0_20, %c160], %44 {strides = array<i32>} : memref<26x416xf32, #tpu.memory_space<vmem>>, vector<26x32xf32>,
    %46 = vector.extract_strided_slice %21 {offsets = [0, 384], sizes = [26, 32], strides = [1, 1]} : vector<26x832xf32> to vector<26x32xf32>
    %47 = vector.extract_strided_slice %21 {offsets = [0, 416], sizes = [26, 32], strides = [1, 1]} : vector<26x832xf32> to vector<26x32xf32>
    %48 = arith.maximumf %46, %47 : vector<26x32xf32>
    %c0_21 = arith.constant 0 : index
    %c192 = arith.constant 192 : index
    %49 = vector.load %arg9[%c0_21, %c192] : memref<26x416xf32, #tpu.memory_space<vmem>>, vector<26x32xf32>
    tpu.vector_store %arg9[%c0_21, %c192], %48 {strides = array<i32>} : memref<26x416xf32, #tpu.memory_space<vmem>>, vector<26x32xf32>,
    %50 = vector.extract_strided_slice %21 {offsets = [0, 448], sizes = [26, 32], strides = [1, 1]} : vector<26x832xf32> to vector<26x32xf32>
    %51 = vector.extract_strided_slice %21 {offsets = [0, 480], sizes = [26, 32], strides = [1, 1]} : vector<26x832xf32> to vector<26x32xf32>
    %52 = arith.maximumf %50, %51 : vector<26x32xf32>
    %c0_22 = arith.constant 0 : index
    %c224 = arith.constant 224 : index
    %53 = vector.load %arg9[%c0_22, %c224] : memref<26x416xf32, #tpu.memory_space<vmem>>, vector<26x32xf32>
    tpu.vector_store %arg9[%c0_22, %c224], %52 {strides = array<i32>} : memref<26x416xf32, #tpu.memory_space<vmem>>, vector<26x32xf32>,
    %54 = vector.extract_strided_slice %21 {offsets = [0, 512], sizes = [26, 32], strides = [1, 1]} : vector<26x832xf32> to vector<26x32xf32>
    %55 = vector.extract_strided_slice %21 {offsets = [0, 544], sizes = [26, 32], strides = [1, 1]} : vector<26x832xf32> to vector<26x32xf32>
    %56 = arith.maximumf %54, %55 : vector<26x32xf32>
    %c0_23 = arith.constant 0 : index
    %c256 = arith.constant 256 : index
    %57 = vector.load %arg9[%c0_23, %c256] : memref<26x416xf32, #tpu.memory_space<vmem>>, vector<26x32xf32>
    tpu.vector_store %arg9[%c0_23, %c256], %56 {strides = array<i32>} : memref<26x416xf32, #tpu.memory_space<vmem>>, vector<26x32xf32>,
    %58 = vector.extract_strided_slice %21 {offsets = [0, 576], sizes = [26, 32], strides = [1, 1]} : vector<26x832xf32> to vector<26x32xf32>
    %59 = vector.extract_strided_slice %21 {offsets = [0, 608], sizes = [26, 32], strides = [1, 1]} : vector<26x832xf32> to vector<26x32xf32>
    %60 = arith.maximumf %58, %59 : vector<26x32xf32>
    %c0_24 = arith.constant 0 : index
    %c288 = arith.constant 288 : index
    %61 = vector.load %arg9[%c0_24, %c288] : memref<26x416xf32, #tpu.memory_space<vmem>>, vector<26x32xf32>
    tpu.vector_store %arg9[%c0_24, %c288], %60 {strides = array<i32>} : memref<26x416xf32, #tpu.memory_space<vmem>>, vector<26x32xf32>,
    %62 = vector.extract_strided_slice %21 {offsets = [0, 640], sizes = [26, 32], strides = [1, 1]} : vector<26x832xf32> to vector<26x32xf32>
    %63 = vector.extract_strided_slice %21 {offsets = [0, 672], sizes = [26, 32], strides = [1, 1]} : vector<26x832xf32> to vector<26x32xf32>
    %64 = arith.maximumf %62, %63 : vector<26x32xf32>
    %c0_25 = arith.constant 0 : index
    %c320 = arith.constant 320 : index
    %65 = vector.load %arg9[%c0_25, %c320] : memref<26x416xf32, #tpu.memory_space<vmem>>, vector<26x32xf32>
    tpu.vector_store %arg9[%c0_25, %c320], %64 {strides = array<i32>} : memref<26x416xf32, #tpu.memory_space<vmem>>, vector<26x32xf32>,
    %66 = vector.extract_strided_slice %21 {offsets = [0, 704], sizes = [26, 32], strides = [1, 1]} : vector<26x832xf32> to vector<26x32xf32>
    %67 = vector.extract_strided_slice %21 {offsets = [0, 736], sizes = [26, 32], strides = [1, 1]} : vector<26x832xf32> to vector<26x32xf32>
    %68 = arith.maximumf %66, %67 : vector<26x32xf32>
    %c0_26 = arith.constant 0 : index
    %c352 = arith.constant 352 : index
    %69 = vector.load %arg9[%c0_26, %c352] : memref<26x416xf32, #tpu.memory_space<vmem>>, vector<26x32xf32>
    tpu.vector_store %arg9[%c0_26, %c352], %68 {strides = array<i32>} : memref<26x416xf32, #tpu.memory_space<vmem>>, vector<26x32xf32>,
    %70 = vector.extract_strided_slice %21 {offsets = [0, 768], sizes = [26, 32], strides = [1, 1]} : vector<26x832xf32> to vector<26x32xf32>
    %71 = vector.extract_strided_slice %21 {offsets = [0, 800], sizes = [26, 32], strides = [1, 1]} : vector<26x832xf32> to vector<26x32xf32>
    %72 = arith.maximumf %70, %71 : vector<26x32xf32>
    %c0_27 = arith.constant 0 : index
    %c384 = arith.constant 384 : index
    %73 = vector.load %arg9[%c0_27, %c384] : memref<26x416xf32, #tpu.memory_space<vmem>>, vector<26x32xf32>
    tpu.vector_store %arg9[%c0_27, %c384], %72 {strides = array<i32>} : memref<26x416xf32, #tpu.memory_space<vmem>>, vector<26x32xf32>,
    %c0_28 = arith.constant 0 : index
    %c0_29 = arith.constant 0 : index
    %74 = vector.load %arg9[%c0_28, %c0_29] : memref<26x416xf32, #tpu.memory_space<vmem>>, vector<1x416xf32>
    %c1_30 = arith.constant 1 : index
    %c0_31 = arith.constant 0 : index
    %75 = vector.load %arg9[%c1_30, %c0_31] : memref<26x416xf32, #tpu.memory_space<vmem>>, vector<1x416xf32>
    %76 = arith.maximumf %74, %75 : vector<1x416xf32>
    %c0_32 = arith.constant 0 : index
    %c0_33 = arith.constant 0 : index
    %77 = vector.load %arg10[%c0_32, %c0_33] : memref<13x416xf32, #tpu.memory_space<vmem>>, vector<1x416xf32>
    tpu.vector_store %arg10[%c0_32, %c0_33], %76 {strides = array<i32>} : memref<13x416xf32, #tpu.memory_space<vmem>>, vector<1x416xf32>,
    %c2_34 = arith.constant 2 : index
    %c0_35 = arith.constant 0 : index
    %78 = vector.load %arg9[%c2_34, %c0_35] : memref<26x416xf32, #tpu.memory_space<vmem>>, vector<1x416xf32>
    %c3 = arith.constant 3 : index
    %c0_36 = arith.constant 0 : index
    %79 = vector.load %arg9[%c3, %c0_36] : memref<26x416xf32, #tpu.memory_space<vmem>>, vector<1x416xf32>
    %80 = arith.maximumf %78, %79 : vector<1x416xf32>
    %c1_37 = arith.constant 1 : index
    %c0_38 = arith.constant 0 : index
    %81 = vector.load %arg10[%c1_37, %c0_38] : memref<13x416xf32, #tpu.memory_space<vmem>>, vector<1x416xf32>
    tpu.vector_store %arg10[%c1_37, %c0_38], %80 {strides = array<i32>} : memref<13x416xf32, #tpu.memory_space<vmem>>, vector<1x416xf32>,
    %c4 = arith.constant 4 : index
    %c0_39 = arith.constant 0 : index
    %82 = vector.load %arg9[%c4, %c0_39] : memref<26x416xf32, #tpu.memory_space<vmem>>, vector<1x416xf32>
    %c5 = arith.constant 5 : index
    %c0_40 = arith.constant 0 : index
    %83 = vector.load %arg9[%c5, %c0_40] : memref<26x416xf32, #tpu.memory_space<vmem>>, vector<1x416xf32>
    %84 = arith.maximumf %82, %83 : vector<1x416xf32>
    %c2_41 = arith.constant 2 : index
    %c0_42 = arith.constant 0 : index
    %85 = vector.load %arg10[%c2_41, %c0_42] : memref<13x416xf32, #tpu.memory_space<vmem>>, vector<1x416xf32>
    tpu.vector_store %arg10[%c2_41, %c0_42], %84 {strides = array<i32>} : memref<13x416xf32, #tpu.memory_space<vmem>>, vector<1x416xf32>,
    %c6 = arith.constant 6 : index
    %c0_43 = arith.constant 0 : index
    %86 = vector.load %arg9[%c6, %c0_43] : memref<26x416xf32, #tpu.memory_space<vmem>>, vector<1x416xf32>
    %c7 = arith.constant 7 : index
    %c0_44 = arith.constant 0 : index
    %87 = vector.load %arg9[%c7, %c0_44] : memref<26x416xf32, #tpu.memory_space<vmem>>, vector<1x416xf32>
    %88 = arith.maximumf %86, %87 : vector<1x416xf32>
    %c3_45 = arith.constant 3 : index
    %c0_46 = arith.constant 0 : index
    %89 = vector.load %arg10[%c3_45, %c0_46] : memref<13x416xf32, #tpu.memory_space<vmem>>, vector<1x416xf32>
    tpu.vector_store %arg10[%c3_45, %c0_46], %88 {strides = array<i32>} : memref<13x416xf32, #tpu.memory_space<vmem>>, vector<1x416xf32>,
    %c8 = arith.constant 8 : index
    %c0_47 = arith.constant 0 : index
    %90 = vector.load %arg9[%c8, %c0_47] : memref<26x416xf32, #tpu.memory_space<vmem>>, vector<1x416xf32>
    %c9 = arith.constant 9 : index
    %c0_48 = arith.constant 0 : index
    %91 = vector.load %arg9[%c9, %c0_48] : memref<26x416xf32, #tpu.memory_space<vmem>>, vector<1x416xf32>
    %92 = arith.maximumf %90, %91 : vector<1x416xf32>
    %c4_49 = arith.constant 4 : index
    %c0_50 = arith.constant 0 : index
    %93 = vector.load %arg10[%c4_49, %c0_50] : memref<13x416xf32, #tpu.memory_space<vmem>>, vector<1x416xf32>
    tpu.vector_store %arg10[%c4_49, %c0_50], %92 {strides = array<i32>} : memref<13x416xf32, #tpu.memory_space<vmem>>, vector<1x416xf32>,
    %c10 = arith.constant 10 : index
    %c0_51 = arith.constant 0 : index
    %94 = vector.load %arg9[%c10, %c0_51] : memref<26x416xf32, #tpu.memory_space<vmem>>, vector<1x416xf32>
    %c11 = arith.constant 11 : index
    %c0_52 = arith.constant 0 : index
    %95 = vector.load %arg9[%c11, %c0_52] : memref<26x416xf32, #tpu.memory_space<vmem>>, vector<1x416xf32>
    %96 = arith.maximumf %94, %95 : vector<1x416xf32>
    %c5_53 = arith.constant 5 : index
    %c0_54 = arith.constant 0 : index
    %97 = vector.load %arg10[%c5_53, %c0_54] : memref<13x416xf32, #tpu.memory_space<vmem>>, vector<1x416xf32>
    tpu.vector_store %arg10[%c5_53, %c0_54], %96 {strides = array<i32>} : memref<13x416xf32, #tpu.memory_space<vmem>>, vector<1x416xf32>,
    %c12 = arith.constant 12 : index
    %c0_55 = arith.constant 0 : index
    %98 = vector.load %arg9[%c12, %c0_55] : memref<26x416xf32, #tpu.memory_space<vmem>>, vector<1x416xf32>
    %c13 = arith.constant 13 : index
    %c0_56 = arith.constant 0 : index
    %99 = vector.load %arg9[%c13, %c0_56] : memref<26x416xf32, #tpu.memory_space<vmem>>, vector<1x416xf32>
    %100 = arith.maximumf %98, %99 : vector<1x416xf32>
    %c6_57 = arith.constant 6 : index
    %c0_58 = arith.constant 0 : index
    %101 = vector.load %arg10[%c6_57, %c0_58] : memref<13x416xf32, #tpu.memory_space<vmem>>, vector<1x416xf32>
    tpu.vector_store %arg10[%c6_57, %c0_58], %100 {strides = array<i32>} : memref<13x416xf32, #tpu.memory_space<vmem>>, vector<1x416xf32>,
    %c14 = arith.constant 14 : index
    %c0_59 = arith.constant 0 : index
    %102 = vector.load %arg9[%c14, %c0_59] : memref<26x416xf32, #tpu.memory_space<vmem>>, vector<1x416xf32>
    %c15 = arith.constant 15 : index
    %c0_60 = arith.constant 0 : index
    %103 = vector.load %arg9[%c15, %c0_60] : memref<26x416xf32, #tpu.memory_space<vmem>>, vector<1x416xf32>
    %104 = arith.maximumf %102, %103 : vector<1x416xf32>
    %c7_61 = arith.constant 7 : index
    %c0_62 = arith.constant 0 : index
    %105 = vector.load %arg10[%c7_61, %c0_62] : memref<13x416xf32, #tpu.memory_space<vmem>>, vector<1x416xf32>
    tpu.vector_store %arg10[%c7_61, %c0_62], %104 {strides = array<i32>} : memref<13x416xf32, #tpu.memory_space<vmem>>, vector<1x416xf32>,
    %c16 = arith.constant 16 : index
    %c0_63 = arith.constant 0 : index
    %106 = vector.load %arg9[%c16, %c0_63] : memref<26x416xf32, #tpu.memory_space<vmem>>, vector<1x416xf32>
    %c17 = arith.constant 17 : index
    %c0_64 = arith.constant 0 : index
    %107 = vector.load %arg9[%c17, %c0_64] : memref<26x416xf32, #tpu.memory_space<vmem>>, vector<1x416xf32>
    %108 = arith.maximumf %106, %107 : vector<1x416xf32>
    %c8_65 = arith.constant 8 : index
    %c0_66 = arith.constant 0 : index
    %109 = vector.load %arg10[%c8_65, %c0_66] : memref<13x416xf32, #tpu.memory_space<vmem>>, vector<1x416xf32>
    tpu.vector_store %arg10[%c8_65, %c0_66], %108 {strides = array<i32>} : memref<13x416xf32, #tpu.memory_space<vmem>>, vector<1x416xf32>,
    %c18 = arith.constant 18 : index
    %c0_67 = arith.constant 0 : index
    %110 = vector.load %arg9[%c18, %c0_67] : memref<26x416xf32, #tpu.memory_space<vmem>>, vector<1x416xf32>
    %c19 = arith.constant 19 : index
    %c0_68 = arith.constant 0 : index
    %111 = vector.load %arg9[%c19, %c0_68] : memref<26x416xf32, #tpu.memory_space<vmem>>, vector<1x416xf32>
    %112 = arith.maximumf %110, %111 : vector<1x416xf32>
    %c9_69 = arith.constant 9 : index
    %c0_70 = arith.constant 0 : index
    %113 = vector.load %arg10[%c9_69, %c0_70] : memref<13x416xf32, #tpu.memory_space<vmem>>, vector<1x416xf32>
    tpu.vector_store %arg10[%c9_69, %c0_70], %112 {strides = array<i32>} : memref<13x416xf32, #tpu.memory_space<vmem>>, vector<1x416xf32>,
    %c20 = arith.constant 20 : index
    %c0_71 = arith.constant 0 : index
    %114 = vector.load %arg9[%c20, %c0_71] : memref<26x416xf32, #tpu.memory_space<vmem>>, vector<1x416xf32>
    %c21 = arith.constant 21 : index
    %c0_72 = arith.constant 0 : index
    %115 = vector.load %arg9[%c21, %c0_72] : memref<26x416xf32, #tpu.memory_space<vmem>>, vector<1x416xf32>
    %116 = arith.maximumf %114, %115 : vector<1x416xf32>
    %c10_73 = arith.constant 10 : index
    %c0_74 = arith.constant 0 : index
    %117 = vector.load %arg10[%c10_73, %c0_74] : memref<13x416xf32, #tpu.memory_space<vmem>>, vector<1x416xf32>
    tpu.vector_store %arg10[%c10_73, %c0_74], %116 {strides = array<i32>} : memref<13x416xf32, #tpu.memory_space<vmem>>, vector<1x416xf32>,
    %c22 = arith.constant 22 : index
    %c0_75 = arith.constant 0 : index
    %118 = vector.load %arg9[%c22, %c0_75] : memref<26x416xf32, #tpu.memory_space<vmem>>, vector<1x416xf32>
    %c23 = arith.constant 23 : index
    %c0_76 = arith.constant 0 : index
    %119 = vector.load %arg9[%c23, %c0_76] : memref<26x416xf32, #tpu.memory_space<vmem>>, vector<1x416xf32>
    %120 = arith.maximumf %118, %119 : vector<1x416xf32>
    %c11_77 = arith.constant 11 : index
    %c0_78 = arith.constant 0 : index
    %121 = vector.load %arg10[%c11_77, %c0_78] : memref<13x416xf32, #tpu.memory_space<vmem>>, vector<1x416xf32>
    tpu.vector_store %arg10[%c11_77, %c0_78], %120 {strides = array<i32>} : memref<13x416xf32, #tpu.memory_space<vmem>>, vector<1x416xf32>,
    %c24 = arith.constant 24 : index
    %c0_79 = arith.constant 0 : index
    %122 = vector.load %arg9[%c24, %c0_79] : memref<26x416xf32, #tpu.memory_space<vmem>>, vector<1x416xf32>
    %c25 = arith.constant 25 : index
    %c0_80 = arith.constant 0 : index
    %123 = vector.load %arg9[%c25, %c0_80] : memref<26x416xf32, #tpu.memory_space<vmem>>, vector<1x416xf32>
    %124 = arith.maximumf %122, %123 : vector<1x416xf32>
    %c12_81 = arith.constant 12 : index
    %c0_82 = arith.constant 0 : index
    %125 = vector.load %arg10[%c12_81, %c0_82] : memref<13x416xf32, #tpu.memory_space<vmem>>, vector<1x416xf32>
    tpu.vector_store %arg10[%c12_81, %c0_82], %124 {strides = array<i32>} : memref<13x416xf32, #tpu.memory_space<vmem>>, vector<1x416xf32>,
    %c0_83 = arith.constant 0 : index
    %c0_84 = arith.constant 0 : index
    %126 = vector.load %arg10[%c0_83, %c0_84] : memref<13x416xf32, #tpu.memory_space<vmem>>, vector<13x416xf32>
    %127 = arith.truncf %126 : vector<13x416xf32> to vector<13x416xbf16>
    %128 = vector.extract_strided_slice %127 {offsets = [0, 0], sizes = [11, 416], strides = [1, 1]} : vector<13x416xbf16> to vector<11x416xbf16>
    %c0_85 = arith.constant 0 : index
    %c0_86 = arith.constant 0 : index
    %c0_87 = arith.constant 0 : index
    %129 = vector.load %arg4[%c0_85, %c0_86, %c0_87] : memref<3x416x704xbf16, #tpu.memory_space<vmem>>, vector<1x416x704xbf16>
    %130 = vector.shape_cast %129 : vector<1x416x704xbf16> to vector<416x704xbf16>
    %cst_88 = arith.constant dense<0.000000e+00> : vector<11x704xf32>
    %131 = tpu.matmul %128, %130, %cst_88 {dimension_numbers = #tpu.dot_dimension_numbers<[1], [0], [0], [1], [0, 0, 1, 1], [], []>} : vector<11x416xbf16>, vector<416x704xbf16>, vector<11x704xf32> -> vector<11x704xf32>
    %132 = vector.extract_strided_slice %127 {offsets = [1, 0], sizes = [11, 416], strides = [1, 1]} : vector<13x416xbf16> to vector<11x416xbf16>
    %c1_89 = arith.constant 1 : index
    %c0_90 = arith.constant 0 : index
    %c0_91 = arith.constant 0 : index
    %133 = vector.load %arg4[%c1_89, %c0_90, %c0_91] : memref<3x416x704xbf16, #tpu.memory_space<vmem>>, vector<1x416x704xbf16>
    %134 = vector.shape_cast %133 : vector<1x416x704xbf16> to vector<416x704xbf16>
    %cst_92 = arith.constant dense<0.000000e+00> : vector<11x704xf32>
    %135 = tpu.matmul %132, %134, %cst_92 {dimension_numbers = #tpu.dot_dimension_numbers<[1], [0], [0], [1], [0, 0, 1, 1], [], []>} : vector<11x416xbf16>, vector<416x704xbf16>, vector<11x704xf32> -> vector<11x704xf32>
    %136 = arith.addf %131, %135 : vector<11x704xf32>
    %137 = vector.extract_strided_slice %127 {offsets = [2, 0], sizes = [11, 416], strides = [1, 1]} : vector<13x416xbf16> to vector<11x416xbf16>
    %c2_93 = arith.constant 2 : index
    %c0_94 = arith.constant 0 : index
    %c0_95 = arith.constant 0 : index
    %138 = vector.load %arg4[%c2_93, %c0_94, %c0_95] : memref<3x416x704xbf16, #tpu.memory_space<vmem>>, vector<1x416x704xbf16>
    %139 = vector.shape_cast %138 : vector<1x416x704xbf16> to vector<416x704xbf16>
    %cst_96 = arith.constant dense<0.000000e+00> : vector<11x704xf32>
    %140 = tpu.matmul %137, %139, %cst_96 {dimension_numbers = #tpu.dot_dimension_numbers<[1], [0], [0], [1], [0, 0, 1, 1], [], []>} : vector<11x416xbf16>, vector<416x704xbf16>, vector<11x704xf32> -> vector<11x704xf32>
    %141 = arith.addf %136, %140 : vector<11x704xf32>
    %c0_97 = arith.constant 0 : index
    %c0_98 = arith.constant 0 : index
    %142 = vector.load %arg5[%c0_97, %c0_98] : memref<1x704xf32, #tpu.memory_space<vmem>>, vector<1x704xf32>
    %143 = vector.broadcast %142 : vector<1x704xf32> to vector<11x704xf32>
    %144 = arith.addf %141, %143 : vector<11x704xf32>
    %cst_99 = arith.constant 0.000000e+00 : f32
    %145 = vector.broadcast %cst_99 : f32 to vector<11x704xf32>
    %146 = arith.maximumf %144, %145 : vector<11x704xf32>
    %147 = vector.extract_strided_slice %146 {offsets = [0, 0], sizes = [11, 64], strides = [1, 1]} : vector<11x704xf32> to vector<11x64xf32>
    %148 = vector.extract_strided_slice %146 {offsets = [0, 64], sizes = [11, 64], strides = [1, 1]} : vector<11x704xf32> to vector<11x64xf32>
    %149 = arith.maximumf %147, %148 : vector<11x64xf32>
    %c0_100 = arith.constant 0 : index
    %c0_101 = arith.constant 0 : index
    %150 = vector.load %arg11[%c0_100, %c0_101] : memref<11x320xf32, #tpu.memory_space<vmem>>, vector<11x64xf32>
    tpu.vector_store %arg11[%c0_100, %c0_101], %149 {strides = array<i32>} : memref<11x320xf32, #tpu.memory_space<vmem>>, vector<11x64xf32>,
    %151 = vector.extract_strided_slice %146 {offsets = [0, 128], sizes = [11, 64], strides = [1, 1]} : vector<11x704xf32> to vector<11x64xf32>
    %152 = vector.extract_strided_slice %146 {offsets = [0, 192], sizes = [11, 64], strides = [1, 1]} : vector<11x704xf32> to vector<11x64xf32>
    %153 = arith.maximumf %151, %152 : vector<11x64xf32>
    %c0_102 = arith.constant 0 : index
    %c64_103 = arith.constant 64 : index
    %154 = vector.load %arg11[%c0_102, %c64_103] : memref<11x320xf32, #tpu.memory_space<vmem>>, vector<11x64xf32>
    tpu.vector_store %arg11[%c0_102, %c64_103], %153 {strides = array<i32>} : memref<11x320xf32, #tpu.memory_space<vmem>>, vector<11x64xf32>,
    %155 = vector.extract_strided_slice %146 {offsets = [0, 256], sizes = [11, 64], strides = [1, 1]} : vector<11x704xf32> to vector<11x64xf32>
    %156 = vector.extract_strided_slice %146 {offsets = [0, 320], sizes = [11, 64], strides = [1, 1]} : vector<11x704xf32> to vector<11x64xf32>
    %157 = arith.maximumf %155, %156 : vector<11x64xf32>
    %c0_104 = arith.constant 0 : index
    %c128_105 = arith.constant 128 : index
    %158 = vector.load %arg11[%c0_104, %c128_105] : memref<11x320xf32, #tpu.memory_space<vmem>>, vector<11x64xf32>
    tpu.vector_store %arg11[%c0_104, %c128_105], %157 {strides = array<i32>} : memref<11x320xf32, #tpu.memory_space<vmem>>, vector<11x64xf32>,
    %159 = vector.extract_strided_slice %146 {offsets = [0, 384], sizes = [11, 64], strides = [1, 1]} : vector<11x704xf32> to vector<11x64xf32>
    %160 = vector.extract_strided_slice %146 {offsets = [0, 448], sizes = [11, 64], strides = [1, 1]} : vector<11x704xf32> to vector<11x64xf32>
    %161 = arith.maximumf %159, %160 : vector<11x64xf32>
    %c0_106 = arith.constant 0 : index
    %c192_107 = arith.constant 192 : index
    %162 = vector.load %arg11[%c0_106, %c192_107] : memref<11x320xf32, #tpu.memory_space<vmem>>, vector<11x64xf32>
    tpu.vector_store %arg11[%c0_106, %c192_107], %161 {strides = array<i32>} : memref<11x320xf32, #tpu.memory_space<vmem>>, vector<11x64xf32>,
    %163 = vector.extract_strided_slice %146 {offsets = [0, 512], sizes = [11, 64], strides = [1, 1]} : vector<11x704xf32> to vector<11x64xf32>
    %164 = vector.extract_strided_slice %146 {offsets = [0, 576], sizes = [11, 64], strides = [1, 1]} : vector<11x704xf32> to vector<11x64xf32>
    %165 = arith.maximumf %163, %164 : vector<11x64xf32>
    %c0_108 = arith.constant 0 : index
    %c256_109 = arith.constant 256 : index
    %166 = vector.load %arg11[%c0_108, %c256_109] : memref<11x320xf32, #tpu.memory_space<vmem>>, vector<11x64xf32>
    tpu.vector_store %arg11[%c0_108, %c256_109], %165 {strides = array<i32>} : memref<11x320xf32, #tpu.memory_space<vmem>>, vector<11x64xf32>,
    %c0_110 = arith.constant 0 : index
    %c0_111 = arith.constant 0 : index
    %167 = vector.load %arg11[%c0_110, %c0_111] : memref<11x320xf32, #tpu.memory_space<vmem>>, vector<1x320xf32>
    %c1_112 = arith.constant 1 : index
    %c0_113 = arith.constant 0 : index
    %168 = vector.load %arg11[%c1_112, %c0_113] : memref<11x320xf32, #tpu.memory_space<vmem>>, vector<1x320xf32>
    %169 = arith.maximumf %167, %168 : vector<1x320xf32>
    %c0_114 = arith.constant 0 : index
    %c0_115 = arith.constant 0 : index
    %170 = vector.load %arg12[%c0_114, %c0_115] : memref<5x320xf32, #tpu.memory_space<vmem>>, vector<1x320xf32>
    tpu.vector_store %arg12[%c0_114, %c0_115], %169 {strides = array<i32>} : memref<5x320xf32, #tpu.memory_space<vmem>>, vector<1x320xf32>,
    %c2_116 = arith.constant 2 : index
    %c0_117 = arith.constant 0 : index
    %171 = vector.load %arg11[%c2_116, %c0_117] : memref<11x320xf32, #tpu.memory_space<vmem>>, vector<1x320xf32>
    %c3_118 = arith.constant 3 : index
    %c0_119 = arith.constant 0 : index
    %172 = vector.load %arg11[%c3_118, %c0_119] : memref<11x320xf32, #tpu.memory_space<vmem>>, vector<1x320xf32>
    %173 = arith.maximumf %171, %172 : vector<1x320xf32>
    %c1_120 = arith.constant 1 : index
    %c0_121 = arith.constant 0 : index
    %174 = vector.load %arg12[%c1_120, %c0_121] : memref<5x320xf32, #tpu.memory_space<vmem>>, vector<1x320xf32>
    tpu.vector_store %arg12[%c1_120, %c0_121], %173 {strides = array<i32>} : memref<5x320xf32, #tpu.memory_space<vmem>>, vector<1x320xf32>,
    %c4_122 = arith.constant 4 : index
    %c0_123 = arith.constant 0 : index
    %175 = vector.load %arg11[%c4_122, %c0_123] : memref<11x320xf32, #tpu.memory_space<vmem>>, vector<1x320xf32>
    %c5_124 = arith.constant 5 : index
    %c0_125 = arith.constant 0 : index
    %176 = vector.load %arg11[%c5_124, %c0_125] : memref<11x320xf32, #tpu.memory_space<vmem>>, vector<1x320xf32>
    %177 = arith.maximumf %175, %176 : vector<1x320xf32>
    %c2_126 = arith.constant 2 : index
    %c0_127 = arith.constant 0 : index
    %178 = vector.load %arg12[%c2_126, %c0_127] : memref<5x320xf32, #tpu.memory_space<vmem>>, vector<1x320xf32>
    tpu.vector_store %arg12[%c2_126, %c0_127], %177 {strides = array<i32>} : memref<5x320xf32, #tpu.memory_space<vmem>>, vector<1x320xf32>,
    %c6_128 = arith.constant 6 : index
    %c0_129 = arith.constant 0 : index
    %179 = vector.load %arg11[%c6_128, %c0_129] : memref<11x320xf32, #tpu.memory_space<vmem>>, vector<1x320xf32>
    %c7_130 = arith.constant 7 : index
    %c0_131 = arith.constant 0 : index
    %180 = vector.load %arg11[%c7_130, %c0_131] : memref<11x320xf32, #tpu.memory_space<vmem>>, vector<1x320xf32>
    %181 = arith.maximumf %179, %180 : vector<1x320xf32>
    %c3_132 = arith.constant 3 : index
    %c0_133 = arith.constant 0 : index
    %182 = vector.load %arg12[%c3_132, %c0_133] : memref<5x320xf32, #tpu.memory_space<vmem>>, vector<1x320xf32>
    tpu.vector_store %arg12[%c3_132, %c0_133], %181 {strides = array<i32>} : memref<5x320xf32, #tpu.memory_space<vmem>>, vector<1x320xf32>,
    %c8_134 = arith.constant 8 : index
    %c0_135 = arith.constant 0 : index
    %183 = vector.load %arg11[%c8_134, %c0_135] : memref<11x320xf32, #tpu.memory_space<vmem>>, vector<1x320xf32>
    %c9_136 = arith.constant 9 : index
    %c0_137 = arith.constant 0 : index
    %184 = vector.load %arg11[%c9_136, %c0_137] : memref<11x320xf32, #tpu.memory_space<vmem>>, vector<1x320xf32>
    %185 = arith.maximumf %183, %184 : vector<1x320xf32>
    %c4_138 = arith.constant 4 : index
    %c0_139 = arith.constant 0 : index
    %186 = vector.load %arg12[%c4_138, %c0_139] : memref<5x320xf32, #tpu.memory_space<vmem>>, vector<1x320xf32>
    tpu.vector_store %arg12[%c4_138, %c0_139], %185 {strides = array<i32>} : memref<5x320xf32, #tpu.memory_space<vmem>>, vector<1x320xf32>,
    %c0_140 = arith.constant 0 : index
    %c0_141 = arith.constant 0 : index
    %187 = vector.load %arg12[%c0_140, %c0_141] : memref<5x320xf32, #tpu.memory_space<vmem>>, vector<5x320xf32>
    %188 = arith.truncf %187 : vector<5x320xf32> to vector<5x320xbf16>
    %c0_142 = arith.constant 0 : index
    %c0_143 = arith.constant 0 : index
    %189 = vector.load %arg7[%c0_142, %c0_143] : memref<1x128xf32, #tpu.memory_space<vmem>>, vector<1x128xf32>
    %190 = vector.extract_strided_slice %188 {offsets = [0, 0], sizes = [1, 320], strides = [1, 1]} : vector<5x320xbf16> to vector<1x320xbf16>
    %c0_144 = arith.constant 0 : index
    %c0_145 = arith.constant 0 : index
    %c0_146 = arith.constant 0 : index
    %191 = vector.load %arg6[%c0_144, %c0_145, %c0_146] : memref<5x320x128xbf16, #tpu.memory_space<vmem>>, vector<1x320x128xbf16>
    %192 = vector.shape_cast %191 : vector<1x320x128xbf16> to vector<320x128xbf16>
    %cst_147 = arith.constant dense<0.000000e+00> : vector<1x128xf32>
    %193 = tpu.matmul %190, %192, %cst_147 {dimension_numbers = #tpu.dot_dimension_numbers<[1], [0], [0], [1], [0, 0, 1, 1], [], []>} : vector<1x320xbf16>, vector<320x128xbf16>, vector<1x128xf32> -> vector<1x128xf32>
    %194 = arith.addf %189, %193 : vector<1x128xf32>
    %195 = vector.extract_strided_slice %188 {offsets = [1, 0], sizes = [1, 320], strides = [1, 1]} : vector<5x320xbf16> to vector<1x320xbf16>
    %c1_148 = arith.constant 1 : index
    %c0_149 = arith.constant 0 : index
    %c0_150 = arith.constant 0 : index
    %196 = vector.load %arg6[%c1_148, %c0_149, %c0_150] : memref<5x320x128xbf16, #tpu.memory_space<vmem>>, vector<1x320x128xbf16>
    %197 = vector.shape_cast %196 : vector<1x320x128xbf16> to vector<320x128xbf16>
    %cst_151 = arith.constant dense<0.000000e+00> : vector<1x128xf32>
    %198 = tpu.matmul %195, %197, %cst_151 {dimension_numbers = #tpu.dot_dimension_numbers<[1], [0], [0], [1], [0, 0, 1, 1], [], []>} : vector<1x320xbf16>, vector<320x128xbf16>, vector<1x128xf32> -> vector<1x128xf32>
    %199 = arith.addf %194, %198 : vector<1x128xf32>
    %200 = vector.extract_strided_slice %188 {offsets = [2, 0], sizes = [1, 320], strides = [1, 1]} : vector<5x320xbf16> to vector<1x320xbf16>
    %c2_152 = arith.constant 2 : index
    %c0_153 = arith.constant 0 : index
    %c0_154 = arith.constant 0 : index
    %201 = vector.load %arg6[%c2_152, %c0_153, %c0_154] : memref<5x320x128xbf16, #tpu.memory_space<vmem>>, vector<1x320x128xbf16>
    %202 = vector.shape_cast %201 : vector<1x320x128xbf16> to vector<320x128xbf16>
    %cst_155 = arith.constant dense<0.000000e+00> : vector<1x128xf32>
    %203 = tpu.matmul %200, %202, %cst_155 {dimension_numbers = #tpu.dot_dimension_numbers<[1], [0], [0], [1], [0, 0, 1, 1], [], []>} : vector<1x320xbf16>, vector<320x128xbf16>, vector<1x128xf32> -> vector<1x128xf32>
    %204 = arith.addf %199, %203 : vector<1x128xf32>
    %205 = vector.extract_strided_slice %188 {offsets = [3, 0], sizes = [1, 320], strides = [1, 1]} : vector<5x320xbf16> to vector<1x320xbf16>
    %c3_156 = arith.constant 3 : index
    %c0_157 = arith.constant 0 : index
    %c0_158 = arith.constant 0 : index
    %206 = vector.load %arg6[%c3_156, %c0_157, %c0_158] : memref<5x320x128xbf16, #tpu.memory_space<vmem>>, vector<1x320x128xbf16>
    %207 = vector.shape_cast %206 : vector<1x320x128xbf16> to vector<320x128xbf16>
    %cst_159 = arith.constant dense<0.000000e+00> : vector<1x128xf32>
    %208 = tpu.matmul %205, %207, %cst_159 {dimension_numbers = #tpu.dot_dimension_numbers<[1], [0], [0], [1], [0, 0, 1, 1], [], []>} : vector<1x320xbf16>, vector<320x128xbf16>, vector<1x128xf32> -> vector<1x128xf32>
    %209 = arith.addf %204, %208 : vector<1x128xf32>
    %210 = vector.extract_strided_slice %188 {offsets = [4, 0], sizes = [1, 320], strides = [1, 1]} : vector<5x320xbf16> to vector<1x320xbf16>
    %c4_160 = arith.constant 4 : index
    %c0_161 = arith.constant 0 : index
    %c0_162 = arith.constant 0 : index
    %211 = vector.load %arg6[%c4_160, %c0_161, %c0_162] : memref<5x320x128xbf16, #tpu.memory_space<vmem>>, vector<1x320x128xbf16>
    %212 = vector.shape_cast %211 : vector<1x320x128xbf16> to vector<320x128xbf16>
    %cst_163 = arith.constant dense<0.000000e+00> : vector<1x128xf32>
    %213 = tpu.matmul %210, %212, %cst_163 {dimension_numbers = #tpu.dot_dimension_numbers<[1], [0], [0], [1], [0, 0, 1, 1], [], []>} : vector<1x320xbf16>, vector<320x128xbf16>, vector<1x128xf32> -> vector<1x128xf32>
    %214 = arith.addf %209, %213 : vector<1x128xf32>
    %c0_164 = arith.constant 0 : index
    %c0_165 = arith.constant 0 : index
    %215 = vector.load %arg8[%c0_164, %c0_165] : memref<2x128xf32, #tpu.memory_space<vmem>>, vector<1x128xf32>
    tpu.vector_store %arg8[%c0_164, %c0_165], %214 {strides = array<i32>} : memref<2x128xf32, #tpu.memory_space<vmem>>, vector<1x128xf32>,
    %c1_166 = arith.constant 1 : index
    %c0_167 = arith.constant 0 : index
    %c0_168 = arith.constant 0 : index
    %216 = vector.load %arg1[%c1_166, %c0_167, %c0_168] : memref<2x28x28xf32, #tpu.memory_space<vmem>>, vector<1x28x28xf32>
    %217 = vector.shape_cast %216 : vector<1x28x28xf32> to vector<28x28xf32>
    %218 = arith.truncf %217 : vector<28x28xf32> to vector<28x28xbf16>
    %219 = vector.extract_strided_slice %218 {offsets = [0, 0], sizes = [26, 28], strides = [1, 1]} : vector<28x28xbf16> to vector<26x28xbf16>
    %c0_169 = arith.constant 0 : index
    %c0_170 = arith.constant 0 : index
    %c0_171 = arith.constant 0 : index
    %220 = vector.load %arg2[%c0_169, %c0_170, %c0_171] : memref<3x28x832xbf16, #tpu.memory_space<vmem>>, vector<1x28x832xbf16>
    %221 = vector.shape_cast %220 : vector<1x28x832xbf16> to vector<28x832xbf16>
    %cst_172 = arith.constant dense<0.000000e+00> : vector<26x832xf32>
    %222 = tpu.matmul %219, %221, %cst_172 {dimension_numbers = #tpu.dot_dimension_numbers<[1], [0], [0], [1], [0, 0, 1, 1], [], []>} : vector<26x28xbf16>, vector<28x832xbf16>, vector<26x832xf32> -> vector<26x832xf32>
    %223 = vector.extract_strided_slice %218 {offsets = [1, 0], sizes = [26, 28], strides = [1, 1]} : vector<28x28xbf16> to vector<26x28xbf16>
    %c1_173 = arith.constant 1 : index
    %c0_174 = arith.constant 0 : index
    %c0_175 = arith.constant 0 : index
    %224 = vector.load %arg2[%c1_173, %c0_174, %c0_175] : memref<3x28x832xbf16, #tpu.memory_space<vmem>>, vector<1x28x832xbf16>
    %225 = vector.shape_cast %224 : vector<1x28x832xbf16> to vector<28x832xbf16>
    %cst_176 = arith.constant dense<0.000000e+00> : vector<26x832xf32>
    %226 = tpu.matmul %223, %225, %cst_176 {dimension_numbers = #tpu.dot_dimension_numbers<[1], [0], [0], [1], [0, 0, 1, 1], [], []>} : vector<26x28xbf16>, vector<28x832xbf16>, vector<26x832xf32> -> vector<26x832xf32>
    %227 = arith.addf %222, %226 : vector<26x832xf32>
    %228 = vector.extract_strided_slice %218 {offsets = [2, 0], sizes = [26, 28], strides = [1, 1]} : vector<28x28xbf16> to vector<26x28xbf16>
    %c2_177 = arith.constant 2 : index
    %c0_178 = arith.constant 0 : index
    %c0_179 = arith.constant 0 : index
    %229 = vector.load %arg2[%c2_177, %c0_178, %c0_179] : memref<3x28x832xbf16, #tpu.memory_space<vmem>>, vector<1x28x832xbf16>
    %230 = vector.shape_cast %229 : vector<1x28x832xbf16> to vector<28x832xbf16>
    %cst_180 = arith.constant dense<0.000000e+00> : vector<26x832xf32>
    %231 = tpu.matmul %228, %230, %cst_180 {dimension_numbers = #tpu.dot_dimension_numbers<[1], [0], [0], [1], [0, 0, 1, 1], [], []>} : vector<26x28xbf16>, vector<28x832xbf16>, vector<26x832xf32> -> vector<26x832xf32>
    %232 = arith.addf %227, %231 : vector<26x832xf32>
    %c0_181 = arith.constant 0 : index
    %c0_182 = arith.constant 0 : index
    %233 = vector.load %arg3[%c0_181, %c0_182] : memref<1x832xf32, #tpu.memory_space<vmem>>, vector<1x832xf32>
    %234 = vector.broadcast %233 : vector<1x832xf32> to vector<26x832xf32>
    %235 = arith.addf %232, %234 : vector<26x832xf32>
    %cst_183 = arith.constant 0.000000e+00 : f32
    %236 = vector.broadcast %cst_183 : f32 to vector<26x832xf32>
    %237 = arith.maximumf %235, %236 : vector<26x832xf32>
    %238 = vector.extract_strided_slice %237 {offsets = [0, 0], sizes = [26, 32], strides = [1, 1]} : vector<26x832xf32> to vector<26x32xf32>
    %239 = vector.extract_strided_slice %237 {offsets = [0, 32], sizes = [26, 32], strides = [1, 1]} : vector<26x832xf32> to vector<26x32xf32>
    %240 = arith.maximumf %238, %239 : vector<26x32xf32>
    %c0_184 = arith.constant 0 : index
    %c0_185 = arith.constant 0 : index
    %241 = vector.load %arg9[%c0_184, %c0_185] : memref<26x416xf32, #tpu.memory_space<vmem>>, vector<26x32xf32>
    tpu.vector_store %arg9[%c0_184, %c0_185], %240 {strides = array<i32>} : memref<26x416xf32, #tpu.memory_space<vmem>>, vector<26x32xf32>,
    %242 = vector.extract_strided_slice %237 {offsets = [0, 64], sizes = [26, 32], strides = [1, 1]} : vector<26x832xf32> to vector<26x32xf32>
    %243 = vector.extract_strided_slice %237 {offsets = [0, 96], sizes = [26, 32], strides = [1, 1]} : vector<26x832xf32> to vector<26x32xf32>
    %244 = arith.maximumf %242, %243 : vector<26x32xf32>
    %c0_186 = arith.constant 0 : index
    %c32_187 = arith.constant 32 : index
    %245 = vector.load %arg9[%c0_186, %c32_187] : memref<26x416xf32, #tpu.memory_space<vmem>>, vector<26x32xf32>
    tpu.vector_store %arg9[%c0_186, %c32_187], %244 {strides = array<i32>} : memref<26x416xf32, #tpu.memory_space<vmem>>, vector<26x32xf32>,
    %246 = vector.extract_strided_slice %237 {offsets = [0, 128], sizes = [26, 32], strides = [1, 1]} : vector<26x832xf32> to vector<26x32xf32>
    %247 = vector.extract_strided_slice %237 {offsets = [0, 160], sizes = [26, 32], strides = [1, 1]} : vector<26x832xf32> to vector<26x32xf32>
    %248 = arith.maximumf %246, %247 : vector<26x32xf32>
    %c0_188 = arith.constant 0 : index
    %c64_189 = arith.constant 64 : index
    %249 = vector.load %arg9[%c0_188, %c64_189] : memref<26x416xf32, #tpu.memory_space<vmem>>, vector<26x32xf32>
    tpu.vector_store %arg9[%c0_188, %c64_189], %248 {strides = array<i32>} : memref<26x416xf32, #tpu.memory_space<vmem>>, vector<26x32xf32>,
    %250 = vector.extract_strided_slice %237 {offsets = [0, 192], sizes = [26, 32], strides = [1, 1]} : vector<26x832xf32> to vector<26x32xf32>
    %251 = vector.extract_strided_slice %237 {offsets = [0, 224], sizes = [26, 32], strides = [1, 1]} : vector<26x832xf32> to vector<26x32xf32>
    %252 = arith.maximumf %250, %251 : vector<26x32xf32>
    %c0_190 = arith.constant 0 : index
    %c96_191 = arith.constant 96 : index
    %253 = vector.load %arg9[%c0_190, %c96_191] : memref<26x416xf32, #tpu.memory_space<vmem>>, vector<26x32xf32>
    tpu.vector_store %arg9[%c0_190, %c96_191], %252 {strides = array<i32>} : memref<26x416xf32, #tpu.memory_space<vmem>>, vector<26x32xf32>,
    %254 = vector.extract_strided_slice %237 {offsets = [0, 256], sizes = [26, 32], strides = [1, 1]} : vector<26x832xf32> to vector<26x32xf32>
    %255 = vector.extract_strided_slice %237 {offsets = [0, 288], sizes = [26, 32], strides = [1, 1]} : vector<26x832xf32> to vector<26x32xf32>
    %256 = arith.maximumf %254, %255 : vector<26x32xf32>
    %c0_192 = arith.constant 0 : index
    %c128_193 = arith.constant 128 : index
    %257 = vector.load %arg9[%c0_192, %c128_193] : memref<26x416xf32, #tpu.memory_space<vmem>>, vector<26x32xf32>
    tpu.vector_store %arg9[%c0_192, %c128_193], %256 {strides = array<i32>} : memref<26x416xf32, #tpu.memory_space<vmem>>, vector<26x32xf32>,
    %258 = vector.extract_strided_slice %237 {offsets = [0, 320], sizes = [26, 32], strides = [1, 1]} : vector<26x832xf32> to vector<26x32xf32>
    %259 = vector.extract_strided_slice %237 {offsets = [0, 352], sizes = [26, 32], strides = [1, 1]} : vector<26x832xf32> to vector<26x32xf32>
    %260 = arith.maximumf %258, %259 : vector<26x32xf32>
    %c0_194 = arith.constant 0 : index
    %c160_195 = arith.constant 160 : index
    %261 = vector.load %arg9[%c0_194, %c160_195] : memref<26x416xf32, #tpu.memory_space<vmem>>, vector<26x32xf32>
    tpu.vector_store %arg9[%c0_194, %c160_195], %260 {strides = array<i32>} : memref<26x416xf32, #tpu.memory_space<vmem>>, vector<26x32xf32>,
    %262 = vector.extract_strided_slice %237 {offsets = [0, 384], sizes = [26, 32], strides = [1, 1]} : vector<26x832xf32> to vector<26x32xf32>
    %263 = vector.extract_strided_slice %237 {offsets = [0, 416], sizes = [26, 32], strides = [1, 1]} : vector<26x832xf32> to vector<26x32xf32>
    %264 = arith.maximumf %262, %263 : vector<26x32xf32>
    %c0_196 = arith.constant 0 : index
    %c192_197 = arith.constant 192 : index
    %265 = vector.load %arg9[%c0_196, %c192_197] : memref<26x416xf32, #tpu.memory_space<vmem>>, vector<26x32xf32>
    tpu.vector_store %arg9[%c0_196, %c192_197], %264 {strides = array<i32>} : memref<26x416xf32, #tpu.memory_space<vmem>>, vector<26x32xf32>,
    %266 = vector.extract_strided_slice %237 {offsets = [0, 448], sizes = [26, 32], strides = [1, 1]} : vector<26x832xf32> to vector<26x32xf32>
    %267 = vector.extract_strided_slice %237 {offsets = [0, 480], sizes = [26, 32], strides = [1, 1]} : vector<26x832xf32> to vector<26x32xf32>
    %268 = arith.maximumf %266, %267 : vector<26x32xf32>
    %c0_198 = arith.constant 0 : index
    %c224_199 = arith.constant 224 : index
    %269 = vector.load %arg9[%c0_198, %c224_199] : memref<26x416xf32, #tpu.memory_space<vmem>>, vector<26x32xf32>
    tpu.vector_store %arg9[%c0_198, %c224_199], %268 {strides = array<i32>} : memref<26x416xf32, #tpu.memory_space<vmem>>, vector<26x32xf32>,
    %270 = vector.extract_strided_slice %237 {offsets = [0, 512], sizes = [26, 32], strides = [1, 1]} : vector<26x832xf32> to vector<26x32xf32>
    %271 = vector.extract_strided_slice %237 {offsets = [0, 544], sizes = [26, 32], strides = [1, 1]} : vector<26x832xf32> to vector<26x32xf32>
    %272 = arith.maximumf %270, %271 : vector<26x32xf32>
    %c0_200 = arith.constant 0 : index
    %c256_201 = arith.constant 256 : index
    %273 = vector.load %arg9[%c0_200, %c256_201] : memref<26x416xf32, #tpu.memory_space<vmem>>, vector<26x32xf32>
    tpu.vector_store %arg9[%c0_200, %c256_201], %272 {strides = array<i32>} : memref<26x416xf32, #tpu.memory_space<vmem>>, vector<26x32xf32>,
    %274 = vector.extract_strided_slice %237 {offsets = [0, 576], sizes = [26, 32], strides = [1, 1]} : vector<26x832xf32> to vector<26x32xf32>
    %275 = vector.extract_strided_slice %237 {offsets = [0, 608], sizes = [26, 32], strides = [1, 1]} : vector<26x832xf32> to vector<26x32xf32>
    %276 = arith.maximumf %274, %275 : vector<26x32xf32>
    %c0_202 = arith.constant 0 : index
    %c288_203 = arith.constant 288 : index
    %277 = vector.load %arg9[%c0_202, %c288_203] : memref<26x416xf32, #tpu.memory_space<vmem>>, vector<26x32xf32>
    tpu.vector_store %arg9[%c0_202, %c288_203], %276 {strides = array<i32>} : memref<26x416xf32, #tpu.memory_space<vmem>>, vector<26x32xf32>,
    %278 = vector.extract_strided_slice %237 {offsets = [0, 640], sizes = [26, 32], strides = [1, 1]} : vector<26x832xf32> to vector<26x32xf32>
    %279 = vector.extract_strided_slice %237 {offsets = [0, 672], sizes = [26, 32], strides = [1, 1]} : vector<26x832xf32> to vector<26x32xf32>
    %280 = arith.maximumf %278, %279 : vector<26x32xf32>
    %c0_204 = arith.constant 0 : index
    %c320_205 = arith.constant 320 : index
    %281 = vector.load %arg9[%c0_204, %c320_205] : memref<26x416xf32, #tpu.memory_space<vmem>>, vector<26x32xf32>
    tpu.vector_store %arg9[%c0_204, %c320_205], %280 {strides = array<i32>} : memref<26x416xf32, #tpu.memory_space<vmem>>, vector<26x32xf32>,
    %282 = vector.extract_strided_slice %237 {offsets = [0, 704], sizes = [26, 32], strides = [1, 1]} : vector<26x832xf32> to vector<26x32xf32>
    %283 = vector.extract_strided_slice %237 {offsets = [0, 736], sizes = [26, 32], strides = [1, 1]} : vector<26x832xf32> to vector<26x32xf32>
    %284 = arith.maximumf %282, %283 : vector<26x32xf32>
    %c0_206 = arith.constant 0 : index
    %c352_207 = arith.constant 352 : index
    %285 = vector.load %arg9[%c0_206, %c352_207] : memref<26x416xf32, #tpu.memory_space<vmem>>, vector<26x32xf32>
    tpu.vector_store %arg9[%c0_206, %c352_207], %284 {strides = array<i32>} : memref<26x416xf32, #tpu.memory_space<vmem>>, vector<26x32xf32>,
    %286 = vector.extract_strided_slice %237 {offsets = [0, 768], sizes = [26, 32], strides = [1, 1]} : vector<26x832xf32> to vector<26x32xf32>
    %287 = vector.extract_strided_slice %237 {offsets = [0, 800], sizes = [26, 32], strides = [1, 1]} : vector<26x832xf32> to vector<26x32xf32>
    %288 = arith.maximumf %286, %287 : vector<26x32xf32>
    %c0_208 = arith.constant 0 : index
    %c384_209 = arith.constant 384 : index
    %289 = vector.load %arg9[%c0_208, %c384_209] : memref<26x416xf32, #tpu.memory_space<vmem>>, vector<26x32xf32>
    tpu.vector_store %arg9[%c0_208, %c384_209], %288 {strides = array<i32>} : memref<26x416xf32, #tpu.memory_space<vmem>>, vector<26x32xf32>,
    %c0_210 = arith.constant 0 : index
    %c0_211 = arith.constant 0 : index
    %290 = vector.load %arg9[%c0_210, %c0_211] : memref<26x416xf32, #tpu.memory_space<vmem>>, vector<1x416xf32>
    %c1_212 = arith.constant 1 : index
    %c0_213 = arith.constant 0 : index
    %291 = vector.load %arg9[%c1_212, %c0_213] : memref<26x416xf32, #tpu.memory_space<vmem>>, vector<1x416xf32>
    %292 = arith.maximumf %290, %291 : vector<1x416xf32>
    %c0_214 = arith.constant 0 : index
    %c0_215 = arith.constant 0 : index
    %293 = vector.load %arg10[%c0_214, %c0_215] : memref<13x416xf32, #tpu.memory_space<vmem>>, vector<1x416xf32>
    tpu.vector_store %arg10[%c0_214, %c0_215], %292 {strides = array<i32>} : memref<13x416xf32, #tpu.memory_space<vmem>>, vector<1x416xf32>,
    %c2_216 = arith.constant 2 : index
    %c0_217 = arith.constant 0 : index
    %294 = vector.load %arg9[%c2_216, %c0_217] : memref<26x416xf32, #tpu.memory_space<vmem>>, vector<1x416xf32>
    %c3_218 = arith.constant 3 : index
    %c0_219 = arith.constant 0 : index
    %295 = vector.load %arg9[%c3_218, %c0_219] : memref<26x416xf32, #tpu.memory_space<vmem>>, vector<1x416xf32>
    %296 = arith.maximumf %294, %295 : vector<1x416xf32>
    %c1_220 = arith.constant 1 : index
    %c0_221 = arith.constant 0 : index
    %297 = vector.load %arg10[%c1_220, %c0_221] : memref<13x416xf32, #tpu.memory_space<vmem>>, vector<1x416xf32>
    tpu.vector_store %arg10[%c1_220, %c0_221], %296 {strides = array<i32>} : memref<13x416xf32, #tpu.memory_space<vmem>>, vector<1x416xf32>,
    %c4_222 = arith.constant 4 : index
    %c0_223 = arith.constant 0 : index
    %298 = vector.load %arg9[%c4_222, %c0_223] : memref<26x416xf32, #tpu.memory_space<vmem>>, vector<1x416xf32>
    %c5_224 = arith.constant 5 : index
    %c0_225 = arith.constant 0 : index
    %299 = vector.load %arg9[%c5_224, %c0_225] : memref<26x416xf32, #tpu.memory_space<vmem>>, vector<1x416xf32>
    %300 = arith.maximumf %298, %299 : vector<1x416xf32>
    %c2_226 = arith.constant 2 : index
    %c0_227 = arith.constant 0 : index
    %301 = vector.load %arg10[%c2_226, %c0_227] : memref<13x416xf32, #tpu.memory_space<vmem>>, vector<1x416xf32>
    tpu.vector_store %arg10[%c2_226, %c0_227], %300 {strides = array<i32>} : memref<13x416xf32, #tpu.memory_space<vmem>>, vector<1x416xf32>,
    %c6_228 = arith.constant 6 : index
    %c0_229 = arith.constant 0 : index
    %302 = vector.load %arg9[%c6_228, %c0_229] : memref<26x416xf32, #tpu.memory_space<vmem>>, vector<1x416xf32>
    %c7_230 = arith.constant 7 : index
    %c0_231 = arith.constant 0 : index
    %303 = vector.load %arg9[%c7_230, %c0_231] : memref<26x416xf32, #tpu.memory_space<vmem>>, vector<1x416xf32>
    %304 = arith.maximumf %302, %303 : vector<1x416xf32>
    %c3_232 = arith.constant 3 : index
    %c0_233 = arith.constant 0 : index
    %305 = vector.load %arg10[%c3_232, %c0_233] : memref<13x416xf32, #tpu.memory_space<vmem>>, vector<1x416xf32>
    tpu.vector_store %arg10[%c3_232, %c0_233], %304 {strides = array<i32>} : memref<13x416xf32, #tpu.memory_space<vmem>>, vector<1x416xf32>,
    %c8_234 = arith.constant 8 : index
    %c0_235 = arith.constant 0 : index
    %306 = vector.load %arg9[%c8_234, %c0_235] : memref<26x416xf32, #tpu.memory_space<vmem>>, vector<1x416xf32>
    %c9_236 = arith.constant 9 : index
    %c0_237 = arith.constant 0 : index
    %307 = vector.load %arg9[%c9_236, %c0_237] : memref<26x416xf32, #tpu.memory_space<vmem>>, vector<1x416xf32>
    %308 = arith.maximumf %306, %307 : vector<1x416xf32>
    %c4_238 = arith.constant 4 : index
    %c0_239 = arith.constant 0 : index
    %309 = vector.load %arg10[%c4_238, %c0_239] : memref<13x416xf32, #tpu.memory_space<vmem>>, vector<1x416xf32>
    tpu.vector_store %arg10[%c4_238, %c0_239], %308 {strides = array<i32>} : memref<13x416xf32, #tpu.memory_space<vmem>>, vector<1x416xf32>,
    %c10_240 = arith.constant 10 : index
    %c0_241 = arith.constant 0 : index
    %310 = vector.load %arg9[%c10_240, %c0_241] : memref<26x416xf32, #tpu.memory_space<vmem>>, vector<1x416xf32>
    %c11_242 = arith.constant 11 : index
    %c0_243 = arith.constant 0 : index
    %311 = vector.load %arg9[%c11_242, %c0_243] : memref<26x416xf32, #tpu.memory_space<vmem>>, vector<1x416xf32>
    %312 = arith.maximumf %310, %311 : vector<1x416xf32>
    %c5_244 = arith.constant 5 : index
    %c0_245 = arith.constant 0 : index
    %313 = vector.load %arg10[%c5_244, %c0_245] : memref<13x416xf32, #tpu.memory_space<vmem>>, vector<1x416xf32>
    tpu.vector_store %arg10[%c5_244, %c0_245], %312 {strides = array<i32>} : memref<13x416xf32, #tpu.memory_space<vmem>>, vector<1x416xf32>,
    %c12_246 = arith.constant 12 : index
    %c0_247 = arith.constant 0 : index
    %314 = vector.load %arg9[%c12_246, %c0_247] : memref<26x416xf32, #tpu.memory_space<vmem>>, vector<1x416xf32>
    %c13_248 = arith.constant 13 : index
    %c0_249 = arith.constant 0 : index
    %315 = vector.load %arg9[%c13_248, %c0_249] : memref<26x416xf32, #tpu.memory_space<vmem>>, vector<1x416xf32>
    %316 = arith.maximumf %314, %315 : vector<1x416xf32>
    %c6_250 = arith.constant 6 : index
    %c0_251 = arith.constant 0 : index
    %317 = vector.load %arg10[%c6_250, %c0_251] : memref<13x416xf32, #tpu.memory_space<vmem>>, vector<1x416xf32>
    tpu.vector_store %arg10[%c6_250, %c0_251], %316 {strides = array<i32>} : memref<13x416xf32, #tpu.memory_space<vmem>>, vector<1x416xf32>,
    %c14_252 = arith.constant 14 : index
    %c0_253 = arith.constant 0 : index
    %318 = vector.load %arg9[%c14_252, %c0_253] : memref<26x416xf32, #tpu.memory_space<vmem>>, vector<1x416xf32>
    %c15_254 = arith.constant 15 : index
    %c0_255 = arith.constant 0 : index
    %319 = vector.load %arg9[%c15_254, %c0_255] : memref<26x416xf32, #tpu.memory_space<vmem>>, vector<1x416xf32>
    %320 = arith.maximumf %318, %319 : vector<1x416xf32>
    %c7_256 = arith.constant 7 : index
    %c0_257 = arith.constant 0 : index
    %321 = vector.load %arg10[%c7_256, %c0_257] : memref<13x416xf32, #tpu.memory_space<vmem>>, vector<1x416xf32>
    tpu.vector_store %arg10[%c7_256, %c0_257], %320 {strides = array<i32>} : memref<13x416xf32, #tpu.memory_space<vmem>>, vector<1x416xf32>,
    %c16_258 = arith.constant 16 : index
    %c0_259 = arith.constant 0 : index
    %322 = vector.load %arg9[%c16_258, %c0_259] : memref<26x416xf32, #tpu.memory_space<vmem>>, vector<1x416xf32>
    %c17_260 = arith.constant 17 : index
    %c0_261 = arith.constant 0 : index
    %323 = vector.load %arg9[%c17_260, %c0_261] : memref<26x416xf32, #tpu.memory_space<vmem>>, vector<1x416xf32>
    %324 = arith.maximumf %322, %323 : vector<1x416xf32>
    %c8_262 = arith.constant 8 : index
    %c0_263 = arith.constant 0 : index
    %325 = vector.load %arg10[%c8_262, %c0_263] : memref<13x416xf32, #tpu.memory_space<vmem>>, vector<1x416xf32>
    tpu.vector_store %arg10[%c8_262, %c0_263], %324 {strides = array<i32>} : memref<13x416xf32, #tpu.memory_space<vmem>>, vector<1x416xf32>,
    %c18_264 = arith.constant 18 : index
    %c0_265 = arith.constant 0 : index
    %326 = vector.load %arg9[%c18_264, %c0_265] : memref<26x416xf32, #tpu.memory_space<vmem>>, vector<1x416xf32>
    %c19_266 = arith.constant 19 : index
    %c0_267 = arith.constant 0 : index
    %327 = vector.load %arg9[%c19_266, %c0_267] : memref<26x416xf32, #tpu.memory_space<vmem>>, vector<1x416xf32>
    %328 = arith.maximumf %326, %327 : vector<1x416xf32>
    %c9_268 = arith.constant 9 : index
    %c0_269 = arith.constant 0 : index
    %329 = vector.load %arg10[%c9_268, %c0_269] : memref<13x416xf32, #tpu.memory_space<vmem>>, vector<1x416xf32>
    tpu.vector_store %arg10[%c9_268, %c0_269], %328 {strides = array<i32>} : memref<13x416xf32, #tpu.memory_space<vmem>>, vector<1x416xf32>,
    %c20_270 = arith.constant 20 : index
    %c0_271 = arith.constant 0 : index
    %330 = vector.load %arg9[%c20_270, %c0_271] : memref<26x416xf32, #tpu.memory_space<vmem>>, vector<1x416xf32>
    %c21_272 = arith.constant 21 : index
    %c0_273 = arith.constant 0 : index
    %331 = vector.load %arg9[%c21_272, %c0_273] : memref<26x416xf32, #tpu.memory_space<vmem>>, vector<1x416xf32>
    %332 = arith.maximumf %330, %331 : vector<1x416xf32>
    %c10_274 = arith.constant 10 : index
    %c0_275 = arith.constant 0 : index
    %333 = vector.load %arg10[%c10_274, %c0_275] : memref<13x416xf32, #tpu.memory_space<vmem>>, vector<1x416xf32>
    tpu.vector_store %arg10[%c10_274, %c0_275], %332 {strides = array<i32>} : memref<13x416xf32, #tpu.memory_space<vmem>>, vector<1x416xf32>,
    %c22_276 = arith.constant 22 : index
    %c0_277 = arith.constant 0 : index
    %334 = vector.load %arg9[%c22_276, %c0_277] : memref<26x416xf32, #tpu.memory_space<vmem>>, vector<1x416xf32>
    %c23_278 = arith.constant 23 : index
    %c0_279 = arith.constant 0 : index
    %335 = vector.load %arg9[%c23_278, %c0_279] : memref<26x416xf32, #tpu.memory_space<vmem>>, vector<1x416xf32>
    %336 = arith.maximumf %334, %335 : vector<1x416xf32>
    %c11_280 = arith.constant 11 : index
    %c0_281 = arith.constant 0 : index
    %337 = vector.load %arg10[%c11_280, %c0_281] : memref<13x416xf32, #tpu.memory_space<vmem>>, vector<1x416xf32>
    tpu.vector_store %arg10[%c11_280, %c0_281], %336 {strides = array<i32>} : memref<13x416xf32, #tpu.memory_space<vmem>>, vector<1x416xf32>,
    %c24_282 = arith.constant 24 : index
    %c0_283 = arith.constant 0 : index
    %338 = vector.load %arg9[%c24_282, %c0_283] : memref<26x416xf32, #tpu.memory_space<vmem>>, vector<1x416xf32>
    %c25_284 = arith.constant 25 : index
    %c0_285 = arith.constant 0 : index
    %339 = vector.load %arg9[%c25_284, %c0_285] : memref<26x416xf32, #tpu.memory_space<vmem>>, vector<1x416xf32>
    %340 = arith.maximumf %338, %339 : vector<1x416xf32>
    %c12_286 = arith.constant 12 : index
    %c0_287 = arith.constant 0 : index
    %341 = vector.load %arg10[%c12_286, %c0_287] : memref<13x416xf32, #tpu.memory_space<vmem>>, vector<1x416xf32>
    tpu.vector_store %arg10[%c12_286, %c0_287], %340 {strides = array<i32>} : memref<13x416xf32, #tpu.memory_space<vmem>>, vector<1x416xf32>,
    %c0_288 = arith.constant 0 : index
    %c0_289 = arith.constant 0 : index
    %342 = vector.load %arg10[%c0_288, %c0_289] : memref<13x416xf32, #tpu.memory_space<vmem>>, vector<13x416xf32>
    %343 = arith.truncf %342 : vector<13x416xf32> to vector<13x416xbf16>
    %344 = vector.extract_strided_slice %343 {offsets = [0, 0], sizes = [11, 416], strides = [1, 1]} : vector<13x416xbf16> to vector<11x416xbf16>
    %c0_290 = arith.constant 0 : index
    %c0_291 = arith.constant 0 : index
    %c0_292 = arith.constant 0 : index
    %345 = vector.load %arg4[%c0_290, %c0_291, %c0_292] : memref<3x416x704xbf16, #tpu.memory_space<vmem>>, vector<1x416x704xbf16>
    %346 = vector.shape_cast %345 : vector<1x416x704xbf16> to vector<416x704xbf16>
    %cst_293 = arith.constant dense<0.000000e+00> : vector<11x704xf32>
    %347 = tpu.matmul %344, %346, %cst_293 {dimension_numbers = #tpu.dot_dimension_numbers<[1], [0], [0], [1], [0, 0, 1, 1], [], []>} : vector<11x416xbf16>, vector<416x704xbf16>, vector<11x704xf32> -> vector<11x704xf32>
    %348 = vector.extract_strided_slice %343 {offsets = [1, 0], sizes = [11, 416], strides = [1, 1]} : vector<13x416xbf16> to vector<11x416xbf16>
    %c1_294 = arith.constant 1 : index
    %c0_295 = arith.constant 0 : index
    %c0_296 = arith.constant 0 : index
    %349 = vector.load %arg4[%c1_294, %c0_295, %c0_296] : memref<3x416x704xbf16, #tpu.memory_space<vmem>>, vector<1x416x704xbf16>
    %350 = vector.shape_cast %349 : vector<1x416x704xbf16> to vector<416x704xbf16>
    %cst_297 = arith.constant dense<0.000000e+00> : vector<11x704xf32>
    %351 = tpu.matmul %348, %350, %cst_297 {dimension_numbers = #tpu.dot_dimension_numbers<[1], [0], [0], [1], [0, 0, 1, 1], [], []>} : vector<11x416xbf16>, vector<416x704xbf16>, vector<11x704xf32> -> vector<11x704xf32>
    %352 = arith.addf %347, %351 : vector<11x704xf32>
    %353 = vector.extract_strided_slice %343 {offsets = [2, 0], sizes = [11, 416], strides = [1, 1]} : vector<13x416xbf16> to vector<11x416xbf16>
    %c2_298 = arith.constant 2 : index
    %c0_299 = arith.constant 0 : index
    %c0_300 = arith.constant 0 : index
    %354 = vector.load %arg4[%c2_298, %c0_299, %c0_300] : memref<3x416x704xbf16, #tpu.memory_space<vmem>>, vector<1x416x704xbf16>
    %355 = vector.shape_cast %354 : vector<1x416x704xbf16> to vector<416x704xbf16>
    %cst_301 = arith.constant dense<0.000000e+00> : vector<11x704xf32>
    %356 = tpu.matmul %353, %355, %cst_301 {dimension_numbers = #tpu.dot_dimension_numbers<[1], [0], [0], [1], [0, 0, 1, 1], [], []>} : vector<11x416xbf16>, vector<416x704xbf16>, vector<11x704xf32> -> vector<11x704xf32>
    %357 = arith.addf %352, %356 : vector<11x704xf32>
    %c0_302 = arith.constant 0 : index
    %c0_303 = arith.constant 0 : index
    %358 = vector.load %arg5[%c0_302, %c0_303] : memref<1x704xf32, #tpu.memory_space<vmem>>, vector<1x704xf32>
    %359 = vector.broadcast %358 : vector<1x704xf32> to vector<11x704xf32>
    %360 = arith.addf %357, %359 : vector<11x704xf32>
    %cst_304 = arith.constant 0.000000e+00 : f32
    %361 = vector.broadcast %cst_304 : f32 to vector<11x704xf32>
    %362 = arith.maximumf %360, %361 : vector<11x704xf32>
    %363 = vector.extract_strided_slice %362 {offsets = [0, 0], sizes = [11, 64], strides = [1, 1]} : vector<11x704xf32> to vector<11x64xf32>
    %364 = vector.extract_strided_slice %362 {offsets = [0, 64], sizes = [11, 64], strides = [1, 1]} : vector<11x704xf32> to vector<11x64xf32>
    %365 = arith.maximumf %363, %364 : vector<11x64xf32>
    %c0_305 = arith.constant 0 : index
    %c0_306 = arith.constant 0 : index
    %366 = vector.load %arg11[%c0_305, %c0_306] : memref<11x320xf32, #tpu.memory_space<vmem>>, vector<11x64xf32>
    tpu.vector_store %arg11[%c0_305, %c0_306], %365 {strides = array<i32>} : memref<11x320xf32, #tpu.memory_space<vmem>>, vector<11x64xf32>,
    %367 = vector.extract_strided_slice %362 {offsets = [0, 128], sizes = [11, 64], strides = [1, 1]} : vector<11x704xf32> to vector<11x64xf32>
    %368 = vector.extract_strided_slice %362 {offsets = [0, 192], sizes = [11, 64], strides = [1, 1]} : vector<11x704xf32> to vector<11x64xf32>
    %369 = arith.maximumf %367, %368 : vector<11x64xf32>
    %c0_307 = arith.constant 0 : index
    %c64_308 = arith.constant 64 : index
    %370 = vector.load %arg11[%c0_307, %c64_308] : memref<11x320xf32, #tpu.memory_space<vmem>>, vector<11x64xf32>
    tpu.vector_store %arg11[%c0_307, %c64_308], %369 {strides = array<i32>} : memref<11x320xf32, #tpu.memory_space<vmem>>, vector<11x64xf32>,
    %371 = vector.extract_strided_slice %362 {offsets = [0, 256], sizes = [11, 64], strides = [1, 1]} : vector<11x704xf32> to vector<11x64xf32>
    %372 = vector.extract_strided_slice %362 {offsets = [0, 320], sizes = [11, 64], strides = [1, 1]} : vector<11x704xf32> to vector<11x64xf32>
    %373 = arith.maximumf %371, %372 : vector<11x64xf32>
    %c0_309 = arith.constant 0 : index
    %c128_310 = arith.constant 128 : index
    %374 = vector.load %arg11[%c0_309, %c128_310] : memref<11x320xf32, #tpu.memory_space<vmem>>, vector<11x64xf32>
    tpu.vector_store %arg11[%c0_309, %c128_310], %373 {strides = array<i32>} : memref<11x320xf32, #tpu.memory_space<vmem>>, vector<11x64xf32>,
    %375 = vector.extract_strided_slice %362 {offsets = [0, 384], sizes = [11, 64], strides = [1, 1]} : vector<11x704xf32> to vector<11x64xf32>
    %376 = vector.extract_strided_slice %362 {offsets = [0, 448], sizes = [11, 64], strides = [1, 1]} : vector<11x704xf32> to vector<11x64xf32>
    %377 = arith.maximumf %375, %376 : vector<11x64xf32>
    %c0_311 = arith.constant 0 : index
    %c192_312 = arith.constant 192 : index
    %378 = vector.load %arg11[%c0_311, %c192_312] : memref<11x320xf32, #tpu.memory_space<vmem>>, vector<11x64xf32>
    tpu.vector_store %arg11[%c0_311, %c192_312], %377 {strides = array<i32>} : memref<11x320xf32, #tpu.memory_space<vmem>>, vector<11x64xf32>,
    %379 = vector.extract_strided_slice %362 {offsets = [0, 512], sizes = [11, 64], strides = [1, 1]} : vector<11x704xf32> to vector<11x64xf32>
    %380 = vector.extract_strided_slice %362 {offsets = [0, 576], sizes = [11, 64], strides = [1, 1]} : vector<11x704xf32> to vector<11x64xf32>
    %381 = arith.maximumf %379, %380 : vector<11x64xf32>
    %c0_313 = arith.constant 0 : index
    %c256_314 = arith.constant 256 : index
    %382 = vector.load %arg11[%c0_313, %c256_314] : memref<11x320xf32, #tpu.memory_space<vmem>>, vector<11x64xf32>
    tpu.vector_store %arg11[%c0_313, %c256_314], %381 {strides = array<i32>} : memref<11x320xf32, #tpu.memory_space<vmem>>, vector<11x64xf32>,
    %c0_315 = arith.constant 0 : index
    %c0_316 = arith.constant 0 : index
    %383 = vector.load %arg11[%c0_315, %c0_316] : memref<11x320xf32, #tpu.memory_space<vmem>>, vector<1x320xf32>
    %c1_317 = arith.constant 1 : index
    %c0_318 = arith.constant 0 : index
    %384 = vector.load %arg11[%c1_317, %c0_318] : memref<11x320xf32, #tpu.memory_space<vmem>>, vector<1x320xf32>
    %385 = arith.maximumf %383, %384 : vector<1x320xf32>
    %c0_319 = arith.constant 0 : index
    %c0_320 = arith.constant 0 : index
    %386 = vector.load %arg12[%c0_319, %c0_320] : memref<5x320xf32, #tpu.memory_space<vmem>>, vector<1x320xf32>
    tpu.vector_store %arg12[%c0_319, %c0_320], %385 {strides = array<i32>} : memref<5x320xf32, #tpu.memory_space<vmem>>, vector<1x320xf32>,
    %c2_321 = arith.constant 2 : index
    %c0_322 = arith.constant 0 : index
    %387 = vector.load %arg11[%c2_321, %c0_322] : memref<11x320xf32, #tpu.memory_space<vmem>>, vector<1x320xf32>
    %c3_323 = arith.constant 3 : index
    %c0_324 = arith.constant 0 : index
    %388 = vector.load %arg11[%c3_323, %c0_324] : memref<11x320xf32, #tpu.memory_space<vmem>>, vector<1x320xf32>
    %389 = arith.maximumf %387, %388 : vector<1x320xf32>
    %c1_325 = arith.constant 1 : index
    %c0_326 = arith.constant 0 : index
    %390 = vector.load %arg12[%c1_325, %c0_326] : memref<5x320xf32, #tpu.memory_space<vmem>>, vector<1x320xf32>
    tpu.vector_store %arg12[%c1_325, %c0_326], %389 {strides = array<i32>} : memref<5x320xf32, #tpu.memory_space<vmem>>, vector<1x320xf32>,
    %c4_327 = arith.constant 4 : index
    %c0_328 = arith.constant 0 : index
    %391 = vector.load %arg11[%c4_327, %c0_328] : memref<11x320xf32, #tpu.memory_space<vmem>>, vector<1x320xf32>
    %c5_329 = arith.constant 5 : index
    %c0_330 = arith.constant 0 : index
    %392 = vector.load %arg11[%c5_329, %c0_330] : memref<11x320xf32, #tpu.memory_space<vmem>>, vector<1x320xf32>
    %393 = arith.maximumf %391, %392 : vector<1x320xf32>
    %c2_331 = arith.constant 2 : index
    %c0_332 = arith.constant 0 : index
    %394 = vector.load %arg12[%c2_331, %c0_332] : memref<5x320xf32, #tpu.memory_space<vmem>>, vector<1x320xf32>
    tpu.vector_store %arg12[%c2_331, %c0_332], %393 {strides = array<i32>} : memref<5x320xf32, #tpu.memory_space<vmem>>, vector<1x320xf32>,
    %c6_333 = arith.constant 6 : index
    %c0_334 = arith.constant 0 : index
    %395 = vector.load %arg11[%c6_333, %c0_334] : memref<11x320xf32, #tpu.memory_space<vmem>>, vector<1x320xf32>
    %c7_335 = arith.constant 7 : index
    %c0_336 = arith.constant 0 : index
    %396 = vector.load %arg11[%c7_335, %c0_336] : memref<11x320xf32, #tpu.memory_space<vmem>>, vector<1x320xf32>
    %397 = arith.maximumf %395, %396 : vector<1x320xf32>
    %c3_337 = arith.constant 3 : index
    %c0_338 = arith.constant 0 : index
    %398 = vector.load %arg12[%c3_337, %c0_338] : memref<5x320xf32, #tpu.memory_space<vmem>>, vector<1x320xf32>
    tpu.vector_store %arg12[%c3_337, %c0_338], %397 {strides = array<i32>} : memref<5x320xf32, #tpu.memory_space<vmem>>, vector<1x320xf32>,
    %c8_339 = arith.constant 8 : index
    %c0_340 = arith.constant 0 : index
    %399 = vector.load %arg11[%c8_339, %c0_340] : memref<11x320xf32, #tpu.memory_space<vmem>>, vector<1x320xf32>
    %c9_341 = arith.constant 9 : index
    %c0_342 = arith.constant 0 : index
    %400 = vector.load %arg11[%c9_341, %c0_342] : memref<11x320xf32, #tpu.memory_space<vmem>>, vector<1x320xf32>
    %401 = arith.maximumf %399, %400 : vector<1x320xf32>
    %c4_343 = arith.constant 4 : index
    %c0_344 = arith.constant 0 : index
    %402 = vector.load %arg12[%c4_343, %c0_344] : memref<5x320xf32, #tpu.memory_space<vmem>>, vector<1x320xf32>
    tpu.vector_store %arg12[%c4_343, %c0_344], %401 {strides = array<i32>} : memref<5x320xf32, #tpu.memory_space<vmem>>, vector<1x320xf32>,
    %c0_345 = arith.constant 0 : index
    %c0_346 = arith.constant 0 : index
    %403 = vector.load %arg12[%c0_345, %c0_346] : memref<5x320xf32, #tpu.memory_space<vmem>>, vector<5x320xf32>
    %404 = arith.truncf %403 : vector<5x320xf32> to vector<5x320xbf16>
    %c0_347 = arith.constant 0 : index
    %c0_348 = arith.constant 0 : index
    %405 = vector.load %arg7[%c0_347, %c0_348] : memref<1x128xf32, #tpu.memory_space<vmem>>, vector<1x128xf32>
    %406 = vector.extract_strided_slice %404 {offsets = [0, 0], sizes = [1, 320], strides = [1, 1]} : vector<5x320xbf16> to vector<1x320xbf16>
    %c0_349 = arith.constant 0 : index
    %c0_350 = arith.constant 0 : index
    %c0_351 = arith.constant 0 : index
    %407 = vector.load %arg6[%c0_349, %c0_350, %c0_351] : memref<5x320x128xbf16, #tpu.memory_space<vmem>>, vector<1x320x128xbf16>
    %408 = vector.shape_cast %407 : vector<1x320x128xbf16> to vector<320x128xbf16>
    %cst_352 = arith.constant dense<0.000000e+00> : vector<1x128xf32>
    %409 = tpu.matmul %406, %408, %cst_352 {dimension_numbers = #tpu.dot_dimension_numbers<[1], [0], [0], [1], [0, 0, 1, 1], [], []>} : vector<1x320xbf16>, vector<320x128xbf16>, vector<1x128xf32> -> vector<1x128xf32>
    %410 = arith.addf %405, %409 : vector<1x128xf32>
    %411 = vector.extract_strided_slice %404 {offsets = [1, 0], sizes = [1, 320], strides = [1, 1]} : vector<5x320xbf16> to vector<1x320xbf16>
    %c1_353 = arith.constant 1 : index
    %c0_354 = arith.constant 0 : index
    %c0_355 = arith.constant 0 : index
    %412 = vector.load %arg6[%c1_353, %c0_354, %c0_355] : memref<5x320x128xbf16, #tpu.memory_space<vmem>>, vector<1x320x128xbf16>
    %413 = vector.shape_cast %412 : vector<1x320x128xbf16> to vector<320x128xbf16>
    %cst_356 = arith.constant dense<0.000000e+00> : vector<1x128xf32>
    %414 = tpu.matmul %411, %413, %cst_356 {dimension_numbers = #tpu.dot_dimension_numbers<[1], [0], [0], [1], [0, 0, 1, 1], [], []>} : vector<1x320xbf16>, vector<320x128xbf16>, vector<1x128xf32> -> vector<1x128xf32>
    %415 = arith.addf %410, %414 : vector<1x128xf32>
    %416 = vector.extract_strided_slice %404 {offsets = [2, 0], sizes = [1, 320], strides = [1, 1]} : vector<5x320xbf16> to vector<1x320xbf16>
    %c2_357 = arith.constant 2 : index
    %c0_358 = arith.constant 0 : index
    %c0_359 = arith.constant 0 : index
    %417 = vector.load %arg6[%c2_357, %c0_358, %c0_359] : memref<5x320x128xbf16, #tpu.memory_space<vmem>>, vector<1x320x128xbf16>
    %418 = vector.shape_cast %417 : vector<1x320x128xbf16> to vector<320x128xbf16>
    %cst_360 = arith.constant dense<0.000000e+00> : vector<1x128xf32>
    %419 = tpu.matmul %416, %418, %cst_360 {dimension_numbers = #tpu.dot_dimension_numbers<[1], [0], [0], [1], [0, 0, 1, 1], [], []>} : vector<1x320xbf16>, vector<320x128xbf16>, vector<1x128xf32> -> vector<1x128xf32>
    %420 = arith.addf %415, %419 : vector<1x128xf32>
    %421 = vector.extract_strided_slice %404 {offsets = [3, 0], sizes = [1, 320], strides = [1, 1]} : vector<5x320xbf16> to vector<1x320xbf16>
    %c3_361 = arith.constant 3 : index
    %c0_362 = arith.constant 0 : index
    %c0_363 = arith.constant 0 : index
    %422 = vector.load %arg6[%c3_361, %c0_362, %c0_363] : memref<5x320x128xbf16, #tpu.memory_space<vmem>>, vector<1x320x128xbf16>
    %423 = vector.shape_cast %422 : vector<1x320x128xbf16> to vector<320x128xbf16>
    %cst_364 = arith.constant dense<0.000000e+00> : vector<1x128xf32>
    %424 = tpu.matmul %421, %423, %cst_364 {dimension_numbers = #tpu.dot_dimension_numbers<[1], [0], [0], [1], [0, 0, 1, 1], [], []>} : vector<1x320xbf16>, vector<320x128xbf16>, vector<1x128xf32> -> vector<1x128xf32>
    %425 = arith.addf %420, %424 : vector<1x128xf32>
    %426 = vector.extract_strided_slice %404 {offsets = [4, 0], sizes = [1, 320], strides = [1, 1]} : vector<5x320xbf16> to vector<1x320xbf16>
    %c4_365 = arith.constant 4 : index
    %c0_366 = arith.constant 0 : index
    %c0_367 = arith.constant 0 : index
    %427 = vector.load %arg6[%c4_365, %c0_366, %c0_367] : memref<5x320x128xbf16, #tpu.memory_space<vmem>>, vector<1x320x128xbf16>
    %428 = vector.shape_cast %427 : vector<1x320x128xbf16> to vector<320x128xbf16>
    %cst_368 = arith.constant dense<0.000000e+00> : vector<1x128xf32>
    %429 = tpu.matmul %426, %428, %cst_368 {dimension_numbers = #tpu.dot_dimension_numbers<[1], [0], [0], [1], [0, 0, 1, 1], [], []>} : vector<1x320xbf16>, vector<320x128xbf16>, vector<1x128xf32> -> vector<1x128xf32>
    %430 = arith.addf %425, %429 : vector<1x128xf32>
    %c1_369 = arith.constant 1 : index
    %c0_370 = arith.constant 0 : index
    %431 = vector.load %arg8[%c1_369, %c0_370] : memref<2x128xf32, #tpu.memory_space<vmem>>, vector<1x128xf32>
    tpu.vector_store %arg8[%c1_369, %c0_370], %430 {strides = array<i32>} : memref<2x128xf32, #tpu.memory_space<vmem>>, vector<1x128xf32>,
    return
  }
  func.func @transform_0(%arg0: i32) -> (i32, i32, i32) {
    %c0_i32 = arith.constant 0 : i32
    %c0_i32_0 = arith.constant 0 : i32
    %c0_i32_1 = arith.constant 0 : i32
    return %arg0, %c0_i32, %c0_i32_0 : i32, i32, i32
  }
  func.func @transform_1(%arg0: i32) -> (i32, i32, i32) {
    %c0_i32 = arith.constant 0 : i32
    %c0_i32_0 = arith.constant 0 : i32
    %c0_i32_1 = arith.constant 0 : i32
    %c0_i32_2 = arith.constant 0 : i32
    return %c0_i32, %c0_i32_0, %c0_i32_1 : i32, i32, i32
  }
  func.func @transform_2(%arg0: i32) -> (i32, i32) {
    %c0_i32 = arith.constant 0 : i32
    %c0_i32_0 = arith.constant 0 : i32
    %c0_i32_1 = arith.constant 0 : i32
    return %c0_i32, %c0_i32_0 : i32, i32
  }
  func.func @transform_3(%arg0: i32) -> (i32, i32, i32) {
    %c0_i32 = arith.constant 0 : i32
    %c0_i32_0 = arith.constant 0 : i32
    %c0_i32_1 = arith.constant 0 : i32
    %c0_i32_2 = arith.constant 0 : i32
    return %c0_i32, %c0_i32_0, %c0_i32_1 : i32, i32, i32
  }
  func.func @transform_4(%arg0: i32) -> (i32, i32) {
    %c0_i32 = arith.constant 0 : i32
    %c0_i32_0 = arith.constant 0 : i32
    %c0_i32_1 = arith.constant 0 : i32
    return %c0_i32, %c0_i32_0 : i32, i32
  }
  func.func @transform_5(%arg0: i32) -> (i32, i32, i32) {
    %c0_i32 = arith.constant 0 : i32
    %c0_i32_0 = arith.constant 0 : i32
    %c0_i32_1 = arith.constant 0 : i32
    %c0_i32_2 = arith.constant 0 : i32
    return %c0_i32, %c0_i32_0, %c0_i32_1 : i32, i32, i32
  }
  func.func @transform_6(%arg0: i32) -> (i32, i32) {
    %c0_i32 = arith.constant 0 : i32
    %c0_i32_0 = arith.constant 0 : i32
    %c0_i32_1 = arith.constant 0 : i32
    return %c0_i32, %c0_i32_0 : i32, i32
  }
  func.func @transform_7(%arg0: i32) -> (i32, i32) {
    %c0_i32 = arith.constant 0 : i32
    %c0_i32_0 = arith.constant 0 : i32
    return %arg0, %c0_i32 : i32, i32
  }
}

</mosaic_0001>

<bundles_post_ra>
// kernel: forward.1
= control target key start
LH: loop header
LB: loop body
LE: loop exit
PB: predicated region body
PF: predicated region fallthrough
CT: control target
= control target key end

     0   :  { %12 = vsyncpa [#allocation7], 0  ;;  %s19770_s0 = inlined_call_operand.vmem [shape: f32[2,28,28], index: 0, kind: input, shape index: {}]   ;;  %s19771_s1 = inlined_call_operand.hbm [shape: bf16[3,28,832], index: 1, kind: input, shape index: {}]   ;;  %s19772_s2 = inlined_call_operand.hbm [shape: f32[1,832], index: 2, kind: input, shape index: {}]   ;;  %s19773_s3 = inlined_call_operand.hbm [shape: bf16[3,416,704], index: 3, kind: input, shape index: {}]   ;;  %s19774_s4 = inlined_call_operand.hbm [shape: f32[1,704], index: 4, kind: input, shape index: {}]   ;;  %s19775_s5 = inlined_call_operand.hbm [shape: bf16[5,320,128], index: 5, kind: input, shape index: {}]   ;;  %s19776_s6 = inlined_call_operand.hbm [shape: f32[1,128], index: 6, kind: input, shape index: {}]   ;;  %s19777_s7 = inlined_call_operand.hbm [shape: f32[2,128], index: 7, kind: output, shape index: {}]  }
   0x1   :  { %13 = vsyncpa [#allocation10], 0 }
   0x2   :  { %14 = vsyncpa [#allocation13], 0 }
   0x3   :  { %15 = vsyncpa [#allocation16], 0  ;;  %s37_s26 = sshll.u32 %s19772_s2, 4  ;;  %s38_s26 = int_to_ptr.hbm [resolvable:$true] %s37_s26 }
   0x4   :  { %16 = vsyncpa [#allocation8], 0  ;;  %s17578_s27 = smov [#allocation9]   ;;  %s61_s8 = sshll.u32 %s19774_s4, 4  ;;  %s62_s8 = int_to_ptr.hbm [resolvable:$true] %s61_s8 }
   0x5   :  { %s39_s28 = sshll.u32 %s17578_s27, 4  ;;  %s17579_s9 = smov [#allocation12]   ;;  %s40_s28 = int_to_ptr.vmem [resolvable:$true] %s39_s28 }
   0x6   :  { %42 = dma.hbm_to_vmem [thread:$0]  %s38_s26, 112, %s40_s28, [#allocation10]  }
   0x7   :  { %s63_s10 = sshll.u32 %s17579_s9, 4  ;;  %s23_s13 = sshll.u32 %s19771_s1, 4  ;;  %s64_s10 = int_to_ptr.vmem [resolvable:$true] %s63_s10  ;;  %s24_s13 = int_to_ptr.hbm [resolvable:$true] %s23_s13 }
   0x8   :  { %66 = dma.hbm_to_vmem [thread:$0]  %s62_s8, 96, %s64_s10, [#allocation13]  }
   0x9   :  { %s17580_s2 = smov [#allocation6]   ;;  %s47_s17 = sshll.u32 %s19773_s3, 4  ;;  %s48_s17 = int_to_ptr.hbm [resolvable:$true] %s47_s17 }
   0xa   :  { %s25_s14 = sshll.u32 %s17580_s2, 4  ;;  %s17581_s18 = smov 448   ;;  %s26_s14 = int_to_ptr.vmem [resolvable:$true] %s25_s14 }
   0xb   :  { %s17582_s4 = smov 28   ;;  %s17583_s19 = smov [#allocation11]  }
   0xc   :  { %31 = dma.hbm_to_vmem [thread:$0]  %s24_s13, 5376, %s26_s14, [#allocation7], %s17581_s18, %s17581_s18, %s17582_s4  }
   0xd   :  { %s49_s20 = sshll.u32 %s17583_s19, 4  ;;  %s17584_s21 = smov 384   ;;  %s50_s20 = int_to_ptr.vmem [resolvable:$true] %s49_s20 }
   0xe   :  { %s17585_s22 = smov 24   ;;  %s71_s24 = sshll.u32 %s19775_s5, 4  ;;  %s72_s24 = int_to_ptr.hbm [resolvable:$true] %s71_s24 }
   0xf   :  { %55 = dma.hbm_to_vmem [thread:$0]  %s48_s17, 59904, %s50_s20, [#allocation10], %s17584_s21, %s17584_s21, %s17585_s22  }
  0x10   :  { %s17586_s25 = smov [#allocation14]   ;;  %s85_s28 = sshll.u32 %s19776_s6, 4  ;;  %s86_s28 = int_to_ptr.hbm [resolvable:$true] %s85_s28 }
  0x11   :  { %s73_s26 = sshll.u32 %s17586_s25, 4  ;;  %s17587_s29 = smov 64   ;;  %s74_s26 = int_to_ptr.vmem [resolvable:$true] %s73_s26 }
  0x12   :  { %s17588_s30 = smov 4   ;;  %s17589_s8 = smov [#allocation15]  }
  0x13   :  { %79 = dma.hbm_to_vmem [thread:$0]  %s72_s24, 12800, %s74_s26, [#allocation13], %s17587_s29, %s17587_s29, %s17588_s30  }
  0x14   :  { %s87_s9 = sshll.u32 %s17589_s8, 4  ;;  %s88_s9 = int_to_ptr.vmem [resolvable:$true] %s87_s9 }
  0x15   :  { %90 = dma.hbm_to_vmem [thread:$0]  %s86_s28, 16, %s88_s9, [#allocation16]  }
  0x16   :  { %17568 = dma.done.wait [#allocation7], 5376  }
  0x17   :  { %17569 = vsyncadd [#allocation7], 4294961920 }
  0x18   :  { %17570 = dma.done.wait [#allocation10], 60016  }
  0x19   :  { %17571 = vsyncadd [#allocation10], 4294907280 }
  0x1a   :  { %17572 = dma.done.wait [#allocation13], 12896  }
  0x1b   :  { %17573 = vsyncadd [#allocation13], 4294954400 }
  0x1c   :  { %17574 = dma.done.wait [#allocation16], 16  }
  0x1d   :  { %17575 = vsyncadd [#allocation16], 4294967280  ;;  %vm255_vm0 = vcmask 1045504   ;;  %v11965_v0 = vld [vmem:[#allocation6 + $0xa8] sm:$0xf]  ;;  %v116_v25 = vld [vmem:[%s19770_s0] sm:$0xff] }
  0x1e   :  { %v16343_v1 = vld [vmem:[#allocation6 + $0xc0] sm:$0x30]  ;;  %v16340_v2 = vld [vmem:[#allocation6 + $0xac] sm:$0xf]  ;;  %v11967_v4 = vld [vmem:[#allocation6 + $0xc4] sm:$0x30]  ;;  %v120_v29 = vpack.c.bf16 %v116_v25, %v116_v25 }
  0x1f   :  { %v11966_v3 = vor.u32 %v16343_v1, %v11965_v0  ;;  %v11973_v5 = vld [vmem:[#allocation6 + $0xb0] sm:$0xf]  ;;  %v16344_v6 = vld [vmem:[#allocation6 + $0xc8] sm:$0x30]  ;;  %v11970_v7 = vor.u32 %v16340_v2, %v11967_v4  ;;  %v16333_v11 = vld [vmem:[#allocation6 + $0x74] sm:$0xf] }
  0x20   :  { %v11974_v8 = vor.u32 %v16344_v6, %v11973_v5  ;;  %v11937_v9 = vld [vmem:[#allocation6 + $0x70] sm:$0xf]  ;;  %v16336_v10 = vld [vmem:[#allocation6 + $0x88] sm:$0xf0]  ;;  %v11945_v14 = vld [vmem:[#allocation6 + $0x78] sm:$0xf]  ;;  %v161_v40 = vunpack.c.l.b16 %v120_v29 }
  0x21   :  { %v257_v12 = vsel %vm255_vm0, %v11966_v3, 0  ;;  %v11939_v13 = vld [vmem:[#allocation6 + $0x8c] sm:$0xf0]  ;;  %v118_v15 = vld [vmem:[%s19770_s0 + $0x10] sm:$0xff]  ;;  %v260_v16 = vsel %vm255_vm0, %v11970_v7, 0  ;;  %v11938_v18 = vor.u32 %v16336_v10, %v11937_v9  ;;  %v117_v26 = vld [vmem:[%s19770_s0 + $0x8] sm:$0xff] }
  0x22   :  { %17383 = vmatpush.bf16.msra.mxu3 %v257_v12  ;;  %283 = vmatpush.bf16.msra.mxu0 %v257_v12  ;;  %v263_v17 = vsel %vm255_vm0, %v11974_v8, 0  ;;  %v16337_v19 = vld [vmem:[#allocation6 + $0x90] sm:$0xf0]  ;;  %v119_v20 = vld [vmem:[%s19770_s0 + $0x18] sm:$0xf]  ;;  %v122_v21 = vpack.c.bf16 %v118_v15, %v118_v15  ;;  %v11942_v22 = vor.u32 %v16333_v11, %v11939_v13  ;;  %v121_v30 = vpack.c.bf16 %v117_v26, %v117_v26  ;;  %s17590_s15 = smov 96  }
  0x23   :  { %302 = vmatpush.bf16.msra.mxu1 %v260_v16  ;;  %321 = vmatpush.bf16.msra.mxu2 %v263_v17  ;;  %v11946_v23 = vor.u32 %v16337_v19, %v11945_v14  ;;  %v123_v24 = vpack.c.bf16 %v119_v20, %v119_v20  ;;  %v16341_v27 = vld [vmem:[#allocation6 + $0xb4] sm:$0xf]  ;;  %v11975_v31 = vld [vmem:[#allocation6 + $0xcc] sm:$0x30]  ;;  %v11981_v32 = vld [vmem:[#allocation6 + $0xb8] sm:$0xf] }
  0x24   :  { %v163_v28 = vunpack.c.l.b16 %v122_v21  ;;  %v16345_v33 = vld [vmem:[#allocation6 + $0xd0] sm:$0x30]  ;;  %v11978_v35 = vor.u32 %v16341_v27, %v11975_v31  ;;  %v16334_v37 = vld [vmem:[#allocation6 + $0x7c] sm:$0xf]  ;;  %v11947_v38 = vld [vmem:[#allocation6 + $0x94] sm:$0xf0]  ;;  %v162_v41 = vunpack.c.l.b16 %v121_v30 }
  0x25   :  { %v164_v34 = vunpack.c.l.b16 %v123_v24  ;;  %v11982_v36 = vor.u32 %v16345_v33, %v11981_v32  ;;  %v11953_v39 = vld [vmem:[#allocation6 + $0x80] sm:$0xf]  ;;  %v11950_v42 = vor.u32 %v16334_v37, %v11947_v38  ;;  %v16338_v43 = vld [vmem:[#allocation6 + $0x98] sm:$0xf0]  ;;  %v11983_v45 = vld [vmem:[#allocation6 + $0xd4] sm:$0x30] }
  0x26   :  { %17384 = vmatpush.bf16.msra.mxu3 %v11938_v18  ;;  %284 = vmatpush.bf16.msra.mxu0 %v11938_v18  ;;  %v16342_v44 = vld [vmem:[#allocation6 + $0xbc] sm:$0xf]  ;;  %v266_v47 = vsel %vm255_vm0, %v11978_v35, 0  ;;  %v11954_v49 = vor.u32 %v16338_v43, %v11953_v39  ;;  %v11989_v50 = vld [vmem:[#allocation6 + $0xc0] sm:$0xf]  ;;  %v17672_v52 = vpack.c.b16 %v162_v41, %v161_v40  ;;  %vm248_vm1 = vcmask 228352  }
  0x27   :  { %303 = vmatpush.bf16.msra.mxu1 %v11942_v22  ;;  %322 = vmatpush.bf16.msra.mxu2 %v11946_v23  ;;  %v17668_v46 = vpack.c.b16 %v164_v34, %v163_v28  ;;  %v269_v48 = vsel %vm255_vm0, %v11982_v36, 0  ;;  %v16346_v51 = vld [vmem:[#allocation6 + $0xd8] sm:$0x30]  ;;  %v11986_v53 = vor.u32 %v16342_v44, %v11983_v45  ;;  %v16335_v55 = vld [vmem:[#allocation6 + $0x84] sm:$0xf]  ;;  %vm650_vm3 = vcmask 1046528  }
  0x28   :  { %v11990_v54 = vor.u32 %v16346_v51, %v11989_v50  ;;  %v11955_v56 = vld [vmem:[#allocation6 + $0x9c] sm:$0xf0]  ;;  %v11961_v59 = vld [vmem:[#allocation6 + $0x88] sm:$0xf]  ;;  %v16339_v60 = vld [vmem:[#allocation6 + $0xa0] sm:$0xf0] }
  0x29   :  { %v176_v57 = vshll.u32 %v17668_v46, 16  ;;  %v180_v58 = vshrl.u32 %v17668_v46, 16  ;;  %v169_v61 = vshrl.u32 %v17672_v52, 16  ;;  %v171_v62 = vshll.u32 %v17672_v52, 16  ;;  %v12035_v8 = vld [vmem:[#allocation6 + $0x38] sm:$0xf] }
  0x2a   :  { %340 = vmatpush.bf16.msrb.mxu3 %v266_v47  ;;  %359 = vmatpush.bf16.msrb.mxu0 %v269_v48  ;;  %v272_v63 = vsel %vm255_vm0, %v11986_v53, 0  ;;  %v275_v0 = vsel %vm255_vm0, %v11990_v54, 0  ;;  %v11958_v2 = vor.u32 %v16335_v55, %v11955_v56  ;;  %v11962_v4 = vor.u32 %v16339_v60, %v11961_v59  ;;  %v16329_v9 = vld [vmem:[#allocation6 + $0x50] sm:$0x30]  ;;  %v16326_v10 = vld [vmem:[#allocation6 + $0x3c] sm:$0xf] }
  0x2b   :  { %v178_v1 = vrot.slane %v176_v57, 1  ;;  %378 = vmatpush.bf16.msrb.mxu1 %v272_v63  ;;  %397 = vmatpush.bf16.msrb.mxu2 %v275_v0  ;;  %v173_v3 = vrot.slane %v171_v62, 1  ;;  %vm167_vm2 = vsmask.f32 7424  ;;  %v12036_v11 = vor.u32 %v16329_v9, %v12035_v8  ;;  %v12037_v12 = vld [vmem:[#allocation6 + $0x54] sm:$0x30] }
  0x2c   :  { %v12007_v13 = vld [vmem:[#allocation6] sm:$0xf]  ;;  %v16322_v14 = vld [vmem:[#allocation6 + $0x18] sm:$0xf0]  ;;  %v12040_v15 = vor.u32 %v16326_v10, %v12037_v12  ;;  %v16319_v16 = vld [vmem:[#allocation6 + $0x4] sm:$0xf] }
  0x2d   :  { %v17680_v5 = vor.u32 %v180_v58, %v178_v1  ;;  %v174_v6 = vor.u32 %v173_v3, %v169_v61  ;;  %v12009_v17 = vld [vmem:[#allocation6 + $0x1c] sm:$0xf0]  ;;  %v480_v18 = vsel %vm255_vm0, %v12036_v11, 0  ;;  %v12008_v20 = vor.u32 %v16322_v14, %v12007_v13  ;;  %v16330_v23 = vld [vmem:[#allocation6 + $0x58] sm:$0x30]  ;;  %s17591_s16 = smov 32  }
  0x2e   :  { %341 = vmatpush.bf16.msrb.mxu3 %v11950_v42  ;;  %360 = vmatpush.bf16.msrb.mxu0 %v11954_v49  ;;  %v483_v19 = vsel %vm255_vm0, %v12040_v15, 0  ;;  %v12012_v21 = vor.u32 %v16319_v16, %v12009_v17  ;;  %v12043_v22 = vld [vmem:[#allocation6 + $0x40] sm:$0xf]  ;;  %v16327_v24 = vld [vmem:[#allocation6 + $0x44] sm:$0xf]  ;;  %vm999_vm4 = vcmask 261120  }
  0x2f   :  { %11992 = vmatmul.msk.bf16.vlgmr.msra.gmra.mxu3 %vm248_vm1, %v17680_v5  ;;  %379 = vmatpush.bf16.msrb.mxu1 %v11958_v2  ;;  %v179_v7 = vsel %vm167_vm2, %v174_v6, %v178_v1  ;;  %v12044_v25 = vor.u32 %v16330_v23, %v12043_v22  ;;  %v12045_v26 = vld [vmem:[#allocation6 + $0x5c] sm:$0x30]  ;;  %v12015_v27 = vld [vmem:[#allocation6 + $0x8] sm:$0xf]  ;;  %v16323_v28 = vld [vmem:[#allocation6 + $0x20] sm:$0xf0] }
  0x30   :  { %398 = vmatpush.bf16.msrb.mxu2 %v11962_v4  ;;  %11991 = vmatmul.msk.bf16.vlgmr.msra.gmra.mxu0 %vm248_vm1, %v179_v7  ;;  %v12048_v29 = vor.u32 %v16327_v24, %v12045_v26  ;;  %v16320_v30 = vld [vmem:[#allocation6 + $0xc] sm:$0xf]  ;;  %v12017_v31 = vld [vmem:[#allocation6 + $0x24] sm:$0xf0]  ;;  %v12016_v34 = vor.u32 %v16323_v28, %v12015_v27  ;;  %v16331_v37 = vld [vmem:[#allocation6 + $0x60] sm:$0x30] }
  0x31   :  { %11993 = vmatmul.msk.bf16.vlgmr.msra.gmra.mxu1 %vm248_vm1, %v179_v7  ;;  %11995 = vmatmul.msk.bf16.vlgmr.msra.gmra.mxu2 %vm248_vm1, %v179_v7  ;;  %v486_v32 = vsel %vm255_vm0, %v12044_v25, 0  ;;  %v12020_v35 = vor.u32 %v16320_v30, %v12017_v31  ;;  %v12051_v36 = vld [vmem:[#allocation6 + $0x48] sm:$0xf]  ;;  %v16328_v38 = vld [vmem:[#allocation6 + $0x4c] sm:$0xf]  ;;  %v651_v24 = vrot.slane %v17672_v52, 1 }
  0x32   :  { %506 = vmatpush.bf16.msra.mxu3 %v480_v18  ;;  %525 = vmatpush.bf16.msra.mxu0 %v483_v19  ;;  %v489_v33 = vsel %vm255_vm0, %v12048_v29, 0  ;;  %v12052_v39 = vor.u32 %v16331_v37, %v12051_v36  ;;  %v12053_v40 = vld [vmem:[#allocation6 + $0x64] sm:$0x30]  ;;  %v12023_v41 = vld [vmem:[#allocation6 + $0x10] sm:$0xf]  ;;  %v17738_v25 = vrot.slane %v17668_v46, 1 }
  0x33   :  { %544 = vmatpush.bf16.msra.mxu1 %v486_v32  ;;  %v16324_v42 = vld [vmem:[#allocation6 + $0x28] sm:$0xf0]  ;;  %v12056_v43 = vor.u32 %v16328_v38, %v12053_v40  ;;  %v16321_v44 = vld [vmem:[#allocation6 + $0x14] sm:$0xf]  ;;  %v12025_v45 = vld [vmem:[#allocation6 + $0x2c] sm:$0xf0] }
  0x34   :  { %563 = vmatpush.bf16.msra.mxu2 %v489_v33  ;;  %v492_v47 = vsel %vm255_vm0, %v12052_v39, 0  ;;  %v12024_v49 = vor.u32 %v16324_v42, %v12023_v41  ;;  %v12028_v50 = vor.u32 %v16321_v44, %v12025_v45  ;;  %v12059_v51 = vld [vmem:[#allocation6 + $0x50] sm:$0xf]  ;;  %v16332_v53 = vld [vmem:[#allocation6 + $0x68] sm:$0x30]  ;;  %v653_v32 = vsel %vm650_vm3, %v651_v24, %v17738_v25  ;;  %s11922_s26 = sshll.u32 %s19777_s7, 4  ;;  %s11923_s26 = int_to_ptr.hbm [resolvable:$true] %s11922_s26 }
  0x35   :  { %v495_v48 = vsel %vm255_vm0, %v12056_v43, 0  ;;  %v12105_v54 = vld [vmem:[#allocation6 + $0x118] sm:$0xf]  ;;  %v12060_v55 = vor.u32 %v16332_v53, %v12059_v51  ;;  %v16357_v56 = vld [vmem:[#allocation6 + $0x130] sm:$0x30]  ;;  %vm1003_vm5 = vcmask 254976  }
  0x36   :  { %507 = vmatpush.bf16.msra.mxu3 %v12008_v20  ;;  %526 = vmatpush.bf16.msra.mxu0 %v12012_v21  ;;  %v12031_v57 = vld [vmem:[#allocation6 + $0x18] sm:$0xf]  ;;  %v16325_v58 = vld [vmem:[#allocation6 + $0x30] sm:$0xf0]  ;;  %v12106_v59 = vor.u32 %v16357_v56, %v12105_v54  ;;  %v12077_v60 = vld [vmem:[#allocation6 + $0xe0] sm:$0xf] }
  0x37   :  { %545 = vmatpush.bf16.msra.mxu1 %v12016_v34  ;;  %v16350_v61 = vld [vmem:[#allocation6 + $0xf8] sm:$0xf0]  ;;  %v498_v62 = vsel %vm255_vm0, %v12060_v55, 0  ;;  %v12032_v0 = vor.u32 %v16325_v58, %v12031_v57  ;;  %v12107_v3 = vld [vmem:[#allocation6 + $0x134] sm:$0x30]  ;;  %vm1021_vm6 = vcmask 523520  }
  0x38   :  { %564 = vmatpush.bf16.msra.mxu2 %v12020_v35  ;;  %v726_v63 = vsel %vm255_vm0, %v12106_v59, 0  ;;  %v12078_v1 = vor.u32 %v16350_v61, %v12077_v60  ;;  %v16354_v2 = vld [vmem:[#allocation6 + $0x11c] sm:$0xf]  ;;  %v12113_v4 = vld [vmem:[#allocation6 + $0x120] sm:$0xf]  ;;  %vm1063_vm7 = vcmask 785920  }
  0x39   :  { %v16358_v6 = vld [vmem:[#allocation6 + $0x138] sm:$0x30]  ;;  %v12079_v8 = vld [vmem:[#allocation6 + $0xfc] sm:$0xf0]  ;;  %v12085_v10 = vld [vmem:[#allocation6 + $0xe8] sm:$0xf] }
  0x3a   :  { %v12114_v9 = vor.u32 %v16358_v6, %v12113_v4  ;;  %v16351_v11 = vld [vmem:[#allocation6 + $0x100] sm:$0xf0]  ;;  %v12115_v17 = vld [vmem:[#allocation6 + $0x13c] sm:$0x30]  ;;  %v12121_v18 = vld [vmem:[#allocation6 + $0x128] sm:$0xf] }
  0x3b   :  { %v12086_v15 = vor.u32 %v16351_v11, %v12085_v10  ;;  %v16355_v16 = vld [vmem:[#allocation6 + $0x124] sm:$0xf]  ;;  %v16348_v26 = vld [vmem:[#allocation6 + $0xec] sm:$0xf]  ;;  %v12087_v27 = vld [vmem:[#allocation6 + $0x104] sm:$0xf0] }
  0x3c   :  { %v732_v13 = vsel %vm255_vm0, %v12114_v9, 0  ;;  %v12118_v19 = vor.u32 %v16355_v16, %v12115_v17  ;;  %v16359_v20 = vld [vmem:[#allocation6 + $0x140] sm:$0x30]  ;;  %v12093_v28 = vld [vmem:[#allocation6 + $0xf0] sm:$0xf]  ;;  %v12090_v29 = vor.u32 %v16348_v26, %v12087_v27  ;;  %vm1081_vm8 = vcmask 1048320  }
  0x3d   :  { %v12122_v21 = vor.u32 %v16359_v20, %v12121_v18  ;;  %v16352_v30 = vld [vmem:[#allocation6 + $0x108] sm:$0xf0]  ;;  %v12123_v34 = vld [vmem:[#allocation6 + $0x144] sm:$0x30]  ;;  %v12129_v35 = vld [vmem:[#allocation6 + $0x130] sm:$0xf] }
  0x3e   :  { %v735_v22 = vsel %vm255_vm0, %v12118_v19, 0  ;;  %v12094_v31 = vor.u32 %v16352_v30, %v12093_v28  ;;  %v16356_v33 = vld [vmem:[#allocation6 + $0x12c] sm:$0xf]  ;;  %v16349_v41 = vld [vmem:[#allocation6 + $0xf4] sm:$0xf]  ;;  %vm1025_vm9 = vcmask 517376  }
  0x3f   :  { %11997 = vmatmul.msk.bf16.vlgmr.msrb.gmra.mxu3 %vm248_vm1, %v179_v7  ;;  %v738_v23 = vsel %vm255_vm0, %v12122_v21, 0  ;;  %v12126_v36 = vor.u32 %v16356_v33, %v12123_v34  ;;  %v16360_v37 = vld [vmem:[#allocation6 + $0x148] sm:$0x30]  ;;  %v12095_v42 = vld [vmem:[#allocation6 + $0x10c] sm:$0xf0]  ;;  %vm1067_vm10 = vcmask 779776  }
  0x40   :  { %11999 = vmatmul.msk.bf16.vlgmr.msrb.gmra.mxu0 %vm248_vm1, %v179_v7  ;;  %582 = vmatpush.bf16.msrb.mxu3 %v492_v47  ;;  %v12130_v38 = vor.u32 %v16360_v37, %v12129_v35  ;;  %v12098_v43 = vor.u32 %v16349_v41, %v12095_v42  ;;  %v12101_v44 = vld [vmem:[#allocation6 + $0xf8] sm:$0xf]  ;;  %v16353_v45 = vld [vmem:[#allocation6 + $0x110] sm:$0xf0]  ;;  %vm19787_vm11 = vcmask 1042176   ;;  %vm4884_vm13 = vcmask 523264  }
  0x41   :  { %11994 = vmatmul.msk.bf16.gmra.mxu1 %vm248_vm1, %v17680_v5  ;;  %11996 = vmatmul.msk.bf16.gmra.mxu2 %vm248_vm1, %v17680_v5  ;;  %v741_v39 = vsel %vm255_vm0, %v12126_v36, 0  ;;  %vm19788_vm14 = vcmask 518144   ;;  %vm4906_vm15 = vcmask 1048064  }
  0x42   :  { %601 = vmatpush.bf16.msrb.mxu0 %v495_v48  ;;  %v744_v40 = vsel %vm255_vm0, %v12130_v38, 0 }
  0x44   :  { %583 = vmatpush.bf16.msrb.mxu3 %v12024_v49 }
  0x46   :  { %602 = vmatpush.bf16.msrb.mxu0 %v12028_v50 }
  0x4f   :  { %11998 = vmatmul.msk.bf16.gmra.mxu3 %vm248_vm1, %v17680_v5 }
  0x50   :  { %12000 = vmatmul.msk.bf16.gmra.mxu0 %vm248_vm1, %v17680_v5 }
  0x51   :  { %12001 = vmatmul.msk.bf16.vlgmr.msrb.gmra.mxu1 %vm248_vm1, %v179_v7  ;;  %12003 = vmatmul.msk.bf16.vlgmr.msrb.gmra.mxu2 %vm248_vm1, %v179_v7  ;;  %v16347_v7 = vld [vmem:[#allocation6 + $0xe4] sm:$0xf] }
  0x52   :  { %620 = vmatpush.bf16.msrb.mxu1 %v498_v62  ;;  %752 = vmatpush.bf16.msrb.mxu2 %v726_v63  ;;  %v12082_v14 = vor.u32 %v16347_v7, %v12079_v8 }
  0x56   :  { %621 = vmatpush.bf16.msrb.mxu1 %v12032_v0  ;;  %753 = vmatpush.bf16.msrb.mxu2 %v12078_v1 }
  0x5f   :  { %12061 = vmatmul.msk.bf16.vlgmr.msra.gmra.mxu3 %vm248_vm1, %v17672_v52 }
  0x60   :  { %12063 = vmatmul.msk.bf16.vlgmr.msra.gmra.mxu0 %vm248_vm1, %v17672_v52 }
  0x61   :  { %12002 = vmatmul.msk.bf16.gmra.mxu1 %vm248_vm1, %v17680_v5  ;;  %12004 = vmatmul.msk.bf16.gmra.mxu2 %vm248_vm1, %v17680_v5  ;;  %v12110_v5 = vor.u32 %v16354_v2, %v12107_v3 }
  0x62   :  { %790 = vmatpush.bf16.msra.mxu0 %v732_v13 }
  0x63   :  { %v729_v12 = vsel %vm255_vm0, %v12110_v5, 0 }
  0x64   :  { %771 = vmatpush.bf16.msra.mxu3 %v729_v12 }
  0x66   :  { %791 = vmatpush.bf16.msra.mxu0 %v12086_v15 }
  0x68   :  { %772 = vmatpush.bf16.msra.mxu3 %v12082_v14 }
  0x6f   :  { %12062 = vmatmul.msk.bf16.gmra.mxu3 %vm248_vm1, %v17668_v46 }
  0x70   :  { %12064 = vmatmul.msk.bf16.gmra.mxu0 %vm248_vm1, %v17668_v46 }
  0x71   :  { %12065 = vmatmul.msk.bf16.vlgmr.msra.gmra.mxu1 %vm248_vm1, %v17672_v52  ;;  %12067 = vmatmul.msk.bf16.vlgmr.msra.gmra.mxu2 %vm248_vm1, %v17672_v52 }
  0x72   :  { %809 = vmatpush.bf16.msra.mxu1 %v735_v22  ;;  %828 = vmatpush.bf16.msra.mxu2 %v738_v23 }
  0x76   :  { %810 = vmatpush.bf16.msra.mxu1 %v12090_v29  ;;  %829 = vmatpush.bf16.msra.mxu2 %v12094_v31 }
  0x7f   :  { %12069 = vmatmul.msk.bf16.vlgmr.msrb.gmra.mxu3 %vm248_vm1, %v17672_v52 }
  0x80   :  { %12071 = vmatmul.msk.bf16.vlgmr.msrb.gmra.mxu0 %vm248_vm1, %v17672_v52  ;;  %847 = vmatpush.bf16.msrb.mxu3 %v741_v39  ;;  %v17847_v39 = vld [vmem:[#allocation9] sm:$0x7f] }
  0x81   :  { %12066 = vmatmul.msk.bf16.gmra.mxu1 %vm248_vm1, %v17668_v46  ;;  %12068 = vmatmul.msk.bf16.gmra.mxu2 %vm248_vm1, %v17668_v46  ;;  %v17853_v42 = vperm.slane %v17847_v39, 0 }
  0x82   :  { %866 = vmatpush.bf16.msrb.mxu0 %v744_v40 }
  0x84   :  { %848 = vmatpush.bf16.msrb.mxu3 %v12098_v43 }
  0x8f   :  { %12070 = vmatmul.msk.bf16.gmra.mxu3 %vm248_vm1, %v17668_v46 }
  0x90   :  { %12072 = vmatmul.msk.bf16.gmra.mxu0 %vm248_vm1, %v17668_v46 }
  0x91   :  { %12073 = vmatmul.msk.bf16.vlgmr.msrb.gmra.mxu1 %vm248_vm1, %v17672_v52  ;;  %12131 = vmatmul.msk.bf16.vlgmr.msrb.gmra.mxu2 %vm248_vm1, %v653_v32  ;;  %v12102_v52 = vor.u32 %v16353_v45, %v12101_v44 }
  0x93   :  { %867 = vmatpush.bf16.msrb.mxu0 %v12102_v52 }
  0x9f   :  { %12133 = vmatmul.msk.bf16.vlgmr.msra.gmra.mxu3 %vm248_vm1, %v653_v32 }
  0xa0   :  { %12135 = vmatmul.msk.bf16.vlgmr.msra.gmra.mxu0 %vm248_vm1, %v653_v32 }
  0xa1   :  { %12074 = vmatmul.msk.bf16.gmra.mxu1 %vm248_vm1, %v17668_v46  ;;  %12132 = vmatmul.msk.bf16.gmra.mxu2 %vm248_vm1, %v17738_v25 }
  0xad   :  { %v17757_v47 = vpop.f32.mrf.mxu0 }
  0xae   :  { %v305_v48 = vpop.f32.mrf.mxu1 }
  0xaf   :  { %12134 = vmatmul.msk.bf16.gmra.mxu3 %vm248_vm1, %v17738_v25 }
  0xb0   :  { %12136 = vmatmul.msk.bf16.gmra.mxu0 %vm248_vm1, %v17738_v25 }
  0xb1   :  { %12137 = vmatmul.msk.bf16.vlgmr.msra.gmra.mxu1 %vm248_vm1, %v653_v32  ;;  %12139 = vmatmul.msk.bf16.vlgmr.msra.gmra.mxu2 %vm248_vm1, %v653_v32 }
  0xb2   :  { %v17765_v49 = vpop.f32.mrf.mxu3 }
  0xb4   :  { %v17767_v46 = vpop.f32.mrf.mxu2 }
  0xb5   :  { %v17769_v50 = vpop.f32.mrf.mxu0 }
  0xb6   :  { %v17771_v51 = vpop.f32.mrf.mxu1 }
  0xba   :  { %v17773_v53 = vpop.f32.mrf.mxu3 }
  0xbc   :  { %v17775_v54 = vpop.f32.mrf.mxu2 }
  0xbd   :  { %v17777_v56 = vpop.f32.mrf.mxu0 }
  0xbe   :  { %v310_v55 = vpop.f32.mrf.mxu1 }
  0xbf   :  { %12141 = vmatmul.msk.bf16.vlgmr.msrb.gmra.mxu3 %vm248_vm1, %v653_v32 }
  0xc0   :  { %12143 = vmatmul.msk.bf16.vlgmr.msrb.gmra.mxu0 %vm248_vm1, %v653_v32 }
  0xc1   :  { %12138 = vmatmul.msk.bf16.gmra.mxu1 %vm248_vm1, %v17738_v25  ;;  %12140 = vmatmul.msk.bf16.gmra.mxu2 %vm248_vm1, %v17738_v25 }
  0xc2   :  { %v343_v57 = vpop.f32.mrf.mxu3 }
  0xc4   :  { %v17785_v58 = vpop.f32.mrf.mxu2 }
  0xc5   :  { %v17789_v60 = vpop.f32.mrf.mxu0 }
  0xc6   :  { %v17787_v59 = vpop.f32.mrf.mxu1 }
  0xca   :  { %v17791_v61 = vpop.f32.mrf.mxu3 }
  0xcc   :  { %v17793_v62 = vpop.f32.mrf.mxu2 }
  0xcd   :  { %v17795_v63 = vpop.f32.mrf.mxu0 }
  0xce   :  { %v381_v0 = vpop.f32.mrf.mxu1 }
  0xcf   :  { %12142 = vmatmul.msk.bf16.gmra.mxu3 %vm248_vm1, %v17738_v25 }
  0xd0   :  { %12144 = vmatmul.msk.bf16.gmra.mxu0 %vm248_vm1, %v17738_v25 }
  0xd2   :  { %v348_v1 = vpop.f32.mrf.mxu3 }
  0xd4   :  { %v17801_v2 = vpop.f32.mrf.mxu2 }
  0xd5   :  { %v17803_v3 = vpop.f32.mrf.mxu0 }
  0xd6   :  { %v17805_v4 = vpop.f32.mrf.mxu1 }
  0xda   :  { %v17807_v5 = vpop.f32.mrf.mxu3 }
  0xdc   :  { %v17809_v6 = vpop.f32.mrf.mxu2 }
  0xdd   :  { %v528_v8 = vpop.f32.mrf.mxu0 }
  0xde   :  { %v386_v7 = vpop.f32.mrf.mxu1  ;;  %v529_v9 = vadd.f32 %v528_v8, %v305_v48 }
  0xe2   :  { %v509_v10 = vpop.f32.mrf.mxu3 }
  0xe3   :  { %v510_v41 = vadd.f32 %v509_v10, %v17757_v47 }
  0xe4   :  { %v17811_v11 = vpop.f32.mrf.mxu2 }
  0xe5   :  { %v17815_v13 = vpop.f32.mrf.mxu0 }
  0xe6   :  { %v17813_v12 = vpop.f32.mrf.mxu1 }
  0xea   :  { %v511_v14 = vpop.f32.mrf.mxu3 }
  0xec   :  { %v17817_v15 = vpop.f32.mrf.mxu2 }
  0xed   :  { %v533_v16 = vpop.f32.mrf.mxu0 }
  0xee   :  { %v547_v17 = vpop.f32.mrf.mxu1  ;;  %v17819_v18 = vadd.f32 %v533_v16, %v310_v55 }
  0xef   :  { %v548_v47 = vadd.f32 %v547_v17, %v17767_v46 }
  0xf2   :  { %v514_v19 = vpop.f32.mrf.mxu3 }
  0xf4   :  { %v566_v20 = vpop.f32.mrf.mxu2 }
  0xf5   :  { %v17821_v21 = vadd.f32 %v566_v20, %v343_v57  ;;  %v17823_v22 = vpop.f32.mrf.mxu0 }
  0xf6   :  { %v549_v23 = vpop.f32.mrf.mxu1 }
  0xfa   :  { %v17825_v24 = vpop.f32.mrf.mxu3 }
  0xfc   :  { %v17827_v25 = vpop.f32.mrf.mxu2 }
  0xfd   :  { %v604_v27 = vpop.f32.mrf.mxu0 }
  0xfe   :  { %v552_v26 = vpop.f32.mrf.mxu1  ;;  %v17829_v28 = vadd.f32 %v604_v27, %v381_v0  ;;  %v512_v0 = vadd.f32 %v511_v14, %v17769_v50  ;;  %v910_v50 = vperm.slane %v17847_v39, 1 }
 0x102   :  { %v17831_v29 = vpop.f32.mrf.mxu3 }
 0x104   :  { %v571_v30 = vpop.f32.mrf.mxu2 }
 0x105   :  { %v17833_v31 = vadd.f32 %v571_v30, %v348_v1  ;;  %v17837_v33 = vpop.f32.mrf.mxu0 }
 0x106   :  { %v17835_v32 = vpop.f32.mrf.mxu1 }
 0x10a   :  { %v17839_v34 = vpop.f32.mrf.mxu3 }
 0x10c   :  { %v17841_v35 = vpop.f32.mrf.mxu2 }
 0x10d   :  { %v609_v36 = vpop.f32.mrf.mxu0 }
 0x10e   :  { %v17843_v37 = vpop.f32.mrf.mxu1  ;;  %v17845_v38 = vadd.f32 %v609_v36, %v386_v7  ;;  %v17871_v7 = vperm.slane %v17847_v39, 2 }
 0x112   :  { %v17849_v40 = vpop.f32.mrf.mxu3 }
 0x114   :  { %v755_v43 = vpop.f32.mrf.mxu2 }
 0x115   :  { %v879_v44 = vadd.f32 %v755_v43, %v510_v41  ;;  %v17855_v45 = vpop.f32.mrf.mxu0  ;;  %v515_v41 = vadd.f32 %v514_v19, %v17765_v49  ;;  %v550_v43 = vadd.f32 %v549_v23, %v17775_v54  ;;  %v531_v54 = vadd.f32 %v17815_v13, %v17771_v51 }
 0x116   :  { %v17857_v52 = vpop.f32.mrf.mxu1 }
 0x117   :  { %v17860_v48 = vadd.f32 %v17853_v42, %v879_v44 }
 0x119   :  { %v951_v57 = vmax.f32 %v17860_v48, 0.0 }
 0x11a   :  { %v17862_v55 = vpop.f32.mrf.mxu3 }
 0x11b   :  { %983 = vrot.lane.b32.xlu0 %v951_v57, %s17590_s15 }
 0x11c   :  { %v757_v1 = vpop.f32.mrf.mxu2 }
 0x11d   :  { %v886_v8 = vadd.f32 %v757_v1, %v512_v0  ;;  %v793_v16 = vpop.f32.mrf.mxu0 }
 0x11e   :  { %v17873_v10 = vpop.f32.mrf.mxu1  ;;  %v881_v20 = vadd.f32 %v793_v16, %v548_v47 }
 0x11f   :  { %v17876_v27 = vadd.f32 %v17853_v42, %v886_v8 }
 0x120   :  { %v17880_v14 = vadd.f32 %v17871_v7, %v881_v20 }
 0x121   :  { %v958_v46 = vmax.f32 %v17876_v27, 0.0 }
 0x122   :  { %v774_v30 = vpop.f32.mrf.mxu3  ;;  %v953_v36 = vmax.f32 %v17880_v14, 0.0 }
 0x123   :  { %v880_v17 = vadd.f32 %v774_v30, %v529_v9  ;;  %985 = vrot.lane.b32.xlu0 %v958_v46, %s17590_s15 }
 0x124   :  { %v760_v0 = vpop.f32.mrf.mxu2  ;;  %1091 = vrot.lane.b32.xlu2 %v953_v36, %s17590_s15 }
 0x125   :  { %v17889_v44 = vadd.f32 %v910_v50, %v880_v17  ;;  %v893_v47 = vadd.f32 %v760_v0, %v515_v41  ;;  %v795_v9 = vpop.f32.mrf.mxu0  ;;  %v553_v41 = vadd.f32 %v552_v26, %v17785_v58 }
 0x126   :  { %v17894_v1 = vpop.f32.mrf.mxu1  ;;  %v888_v8 = vadd.f32 %v795_v9, %v550_v43 }
 0x127   :  { %v952_v49 = vmax.f32 %v17889_v44, 0.0  ;;  %v17898_v19 = vadd.f32 %v17853_v42, %v893_v47  ;;  %v517_v47 = vadd.f32 %v17825_v24, %v17773_v53 }
 0x128   :  { %v17903_v23 = vadd.f32 %v17871_v7, %v888_v8 }
 0x129   :  { %v965_v20 = vmax.f32 %v17898_v19, 0.0 }
 0x12a   :  { %v776_v16 = vpop.f32.mrf.mxu3  ;;  %v960_v17 = vmax.f32 %v17903_v23, 0.0 }
 0x12b   :  { %v887_v30 = vadd.f32 %v776_v16, %v531_v54  ;;  %987 = vrot.lane.b32.xlu1 %v965_v20, %s17590_s15  ;;  %1031 = vrot.lane.b32.xlu0 %v952_v49, %s17590_s15 }
 0x12c   :  { %v762_v13 = vpop.f32.mrf.mxu2  ;;  %1093 = vrot.lane.b32.xlu2 %v960_v17, %s17590_s15 }
 0x12d   :  { %v17914_v51 = vadd.f32 %v910_v50, %v887_v30  ;;  %v798_v43 = vpop.f32.mrf.mxu0  ;;  %v900_v16 = vadd.f32 %v762_v13, %v517_v47  ;;  %v17942_v47 = vperm.slane %v17847_v39, 4 }
 0x12e   :  { %v895_v0 = vadd.f32 %v798_v43, %v553_v41  ;;  %v812_v9 = vpop.f32.mrf.mxu1  ;;  %v586_v41 = vadd.f32 %v17831_v29, %v17777_v56  ;;  %v536_v56 = vadd.f32 %v17823_v22, %v17787_v59  ;;  %v569_v59 = vadd.f32 %v17827_v25, %v17791_v61 }
 0x12f   :  { %v19779_v8 = vmax.f32 %v17914_v51, 0.0  ;;  %v17938_v13 = vadd.f32 %v17853_v42, %v900_v16  ;;  %v882_v29 = vadd.f32 %v812_v9, %v17821_v21  ;;  %v588_v21 = vadd.f32 %v17839_v34, %v17789_v60 }
 0x130   :  { %v17923_v54 = vadd.f32 %v17871_v7, %v895_v0 }
 0x132   :  { %v779_v58 = vpop.f32.mrf.mxu3  ;;  %v19780_v26 = vmax.f32 %v17923_v54, 0.0 }
 0x133   :  { %v894_v30 = vadd.f32 %v779_v58, %v17819_v18  ;;  %1033 = vrot.lane.b32.xlu1 %v19779_v8, %s17590_s15  ;;  %v17951_v58 = vperm.slane %v17847_v39, 3 }
 0x134   :  { %v831_v24 = vpop.f32.mrf.mxu2  ;;  %1095 = vrot.lane.b32.xlu0 %v19780_v26, %s17590_s15 }
 0x135   :  { %v17932_v53 = vadd.f32 %v910_v50, %v894_v30  ;;  %v800_v43 = vpop.f32.mrf.mxu0  ;;  %v883_v0 = vadd.f32 %v831_v24, %v586_v41  ;;  %v19781_v30 = vmax.f32 %v17938_v13, 0.0 }
 0x136   :  { %v814_v42 = vpop.f32.mrf.mxu1 }
 0x137   :  { %v19778_v18 = vmax.f32 %v17932_v53, 0.0  ;;  %v17955_v41 = vadd.f32 %v17942_v47, %v883_v0 }
 0x139   :  { %1035 = vrot.lane.b32.xlu2 %v19778_v18, %s17590_s15  ;;  %v17967_v18 = vadd.f32 %v17951_v58, %v882_v29  ;;  %v955_v0 = vmax.f32 %v17955_v41, 0.0 }
 0x13a   :  { %v781_v16 = vpop.f32.mrf.mxu3 }
 0x13b   :  { %v901_v24 = vadd.f32 %v781_v16, %v536_v56  ;;  %989 = vrot.lane.b32.xlu1 %v19781_v30, %s17590_s15  ;;  %v889_v56 = vadd.f32 %v814_v42, %v569_v59  ;;  %v555_v30 = vadd.f32 %v17835_v32, %v17793_v62  ;;  %v954_v60 = vmax.f32 %v17967_v18, 0.0 }
 0x13c   :  { %v833_v9 = vpop.f32.mrf.mxu2  ;;  %v17993_v42 = vperm.slane %v17847_v39, 5 }
 0x13d   :  { %v17964_v22 = vadd.f32 %v910_v50, %v901_v24  ;;  %v869_v8 = vpop.f32.mrf.mxu0  ;;  %v890_v16 = vadd.f32 %v833_v9, %v588_v21  ;;  %v902_v61 = vadd.f32 %v800_v43, %v555_v30  ;;  %v17981_v34 = vadd.f32 %v17951_v58, %v889_v56 }
 0x13e   :  { %v817_v29 = vpop.f32.mrf.mxu1  ;;  %v591_v21 = vadd.f32 %v17849_v40, %v17795_v63  ;;  %v624_v63 = vadd.f32 %v17843_v37, %v17801_v2  ;;  %v593_v40 = vadd.f32 %v17862_v55, %v17803_v3 }
 0x13f   :  { %v19783_v26 = vmax.f32 %v17964_v22, 0.0  ;;  %v17984_v50 = vadd.f32 %v17942_v47, %v890_v16  ;;  %v17990_v32 = vadd.f32 %v17871_v7, %v902_v61  ;;  %v896_v43 = vadd.f32 %v817_v29, %v17833_v31 }
 0x140   :  { %v19782_v24 = vmax.f32 %v17981_v34, 0.0  ;;  %v19803_v18 = vmax.f32 %v17964_v22, 0.0  ;;  %v19804_v22 = vmax.f32 %v17981_v34, 0.0 }
 0x141   :  { %1191 = vrot.lane.b32.xlu2 %v955_v0, %s17590_s15  ;;  %1037 = vrot.lane.b32.xlu0 %v19783_v26, %s17590_s15  ;;  %v962_v59 = vmax.f32 %v17984_v50, 0.0  ;;  %v18009_v56 = vadd.f32 %v17951_v58, %v896_v43  ;;  %v885_v43 = vadd.f32 %v869_v8, %v624_v63  ;;  %v574_v26 = vadd.f32 %v17841_v35, %v17807_v5 }
 0x142   :  { %v850_v25 = vpop.f32.mrf.mxu3  ;;  %v607_v5 = vadd.f32 %v17837_v33, %v17805_v4  ;;  %v629_v35 = vadd.f32 %v17873_v10, %v17811_v11 }
 0x143   :  { %1135 = vrot.lane.b32.xlu1 %v954_v60, %s17590_s15  ;;  %v884_v30 = vadd.f32 %v850_v25, %v17829_v28  ;;  %v974_v28 = vmax.f32 %v17990_v32, 0.0  ;;  %v915_v25 = vperm.slane %v17847_v39, 6 }
 0x144   :  { %v836_v62 = vpop.f32.mrf.mxu2 }
 0x145   :  { %v871_v9 = vpop.f32.mrf.mxu0  ;;  %v897_v7 = vadd.f32 %v836_v62, %v591_v21  ;;  %v18012_v16 = vadd.f32 %v17993_v42, %v884_v30  ;;  %v968_v62 = vmax.f32 %v18009_v56, 0.0  ;;  %v18036_v55 = vadd.f32 %v915_v25, %v885_v43 }
 0x146   :  { %v819_v21 = vpop.f32.mrf.mxu1 }
 0x147   :  { %v18023_v29 = vadd.f32 %v17942_v47, %v897_v7  ;;  %v956_v30 = vmax.f32 %v18012_v16, 0.0  ;;  %v903_v3 = vadd.f32 %v819_v21, %v574_v26  ;;  %v957_v26 = vmax.f32 %v18036_v55, 0.0 }
 0x149   :  { %1137 = vrot.lane.b32.xlu2 %v19782_v24, %s17590_s15  ;;  %1193 = vrot.lane.b32.xlu0 %v962_v59, %s17590_s15  ;;  %v969_v2 = vmax.f32 %v18023_v29, 0.0  ;;  %v18049_v7 = vadd.f32 %v17951_v58, %v903_v3 }
 0x14a   :  { %v852_v31 = vpop.f32.mrf.mxu3 }
 0x14b   :  { %1097 = vrot.lane.b32.xlu1 %v974_v28, %s17590_s15  ;;  %v891_v63 = vadd.f32 %v852_v31, %v607_v5  ;;  %v975_v11 = vmax.f32 %v18049_v7, 0.0 }
 0x14c   :  { %v838_v61 = vpop.f32.mrf.mxu2 }
 0x14d   :  { %v904_v24 = vadd.f32 %v838_v61, %v593_v40  ;;  %v874_v37 = vpop.f32.mrf.mxu0  ;;  %v18063_v33 = vadd.f32 %v17993_v42, %v891_v63 }
 0x14e   :  { %v899_v40 = vadd.f32 %v874_v37, %v629_v35 }
 0x14f   :  { %v18039_v8 = vadd.f32 %v17942_v47, %v904_v24  ;;  %v626_v24 = vadd.f32 %v17857_v52, %v17809_v6  ;;  %v612_v6 = vadd.f32 %v17855_v45, %v17813_v12  ;;  %v631_v52 = vadd.f32 %v17894_v1, %v17817_v15 }
 0x150   :  { %v18065_v10 = vadd.f32 %v915_v25, %v899_v40  ;;  %v963_v3 = vmax.f32 %v18063_v33, 0.0 }
 0x151   :  { %1235 = vrot.lane.b32.xlu2 %v956_v30, %s17590_s15  ;;  %1139 = vrot.lane.b32.xlu0 %v968_v62, %s17590_s15  ;;  %v976_v47 = vmax.f32 %v18039_v8, 0.0  ;;  %v892_v4 = vadd.f32 %v871_v9, %v626_v24 }
 0x152   :  { %v855_v39 = vpop.f32.mrf.mxu3  ;;  %v971_v61 = vmax.f32 %v18065_v10, 0.0 }
 0x153   :  { %1195 = vrot.lane.b32.xlu1 %v969_v2, %s17590_s15  ;;  %v18074_v9 = vadd.f32 %v915_v25, %v892_v4  ;;  %v898_v12 = vadd.f32 %v855_v39, %v17845_v38 }
 0x155   :  { %v876_v58 = vpop.f32.mrf.mxu0  ;;  %v964_v15 = vmax.f32 %v18074_v9, 0.0  ;;  %v18095_v37 = vadd.f32 %v17993_v42, %v898_v12 }
 0x156   :  { %v906_v43 = vadd.f32 %v876_v58, %v631_v52  ;;  %v19800_v52 = vmax.f32 %v17938_v13, 0.0 }
 0x157   :  { %v970_v38 = vmax.f32 %v18095_v37, 0.0 }
 0x158   :  { %v18086_v45 = vadd.f32 %v915_v25, %v906_v43 }
 0x159   :  { %1197 = vrot.lane.b32.xlu2 %v976_v47, %s17590_s15  ;;  %1291 = vrot.lane.b32.xlu0 %v957_v26, %s17590_s15 }
 0x15a   :  { %v857_v31 = vpop.f32.mrf.mxu3  ;;  %v978_v35 = vmax.f32 %v18086_v45, 0.0 }
 0x15b   :  { %1141 = vrot.lane.b32.xlu1 %v975_v11, %s17590_s15  ;;  %v905_v21 = vadd.f32 %v857_v31, %v612_v6 }
 0x15d   :  { %v18089_v1 = vadd.f32 %v17993_v42, %v905_v21  ;;  %v19801_v21 = vmax.f32 %v17914_v51, 0.0 }
 0x15f   :  { %v977_v5 = vmax.f32 %v18089_v1, 0.0 }
 0x161   :  { %1295 = vrot.lane.b32.xlu2 %v971_v61, %s17590_s15  ;;  %1237 = vrot.lane.b32.xlu0 %v963_v3, %s17590_s15 }
 0x163   :  { %1293 = vrot.lane.b32.xlu1 %v964_v15, %s17590_s15 }
 0x169   :  { %1241 = vrot.lane.b32.xlu2 %v977_v5, %s17590_s15  ;;  %1297 = vrot.lane.b32.xlu0 %v978_v35, %s17590_s15 }
 0x16b   :  { %1239 = vrot.lane.b32.xlu1 %v970_v38, %s17590_s15 }
 0x17e   :  { %v1092_v42 = vpop.permute.xlu2 %1091 }
 0x17f   :  { %v1103_v25 = vmax.f32 %v953_v36, %v1092_v42 }
 0x181   :  { %1107 = vst.msk [vmem:[#allocation2 + $0x8] sm:$0xff] %vm999_vm4, %v1103_v25 }
 0x186   :  { %v1094_v39 = vpop.permute.xlu2 %1093 }
 0x187   :  { %v1104_v63 = vmax.f32 %v960_v17, %v1094_v39 }
 0x189   :  { %1108 = vst.msk [vmem:[#allocation2 + $0x28] sm:$0xff] %vm999_vm4, %v1104_v63 }
 0x18d   :  { %v984_v40 = vpop.permute.xlu0 %983 }
 0x18e   :  { %v995_v24 = vmax.f32 %v951_v57, %v984_v40  ;;  %v19802_v40 = vmax.f32 %v17932_v53, 0.0 }
 0x190   :  { %1000 = vst.msk [vmem:[#allocation2] sm:$0xff] %vm999_vm4, %v995_v24  ;;  %1009 = vrot.lane.b32.xlu0 %v995_v24, %s17590_s15 }
 0x193   :  { %v1036_v4 = vpop.permute.xlu2 %1035 }
 0x194   :  { %v1045_v24 = vmax.f32 %v19802_v40, %v1036_v4 }
 0x195   :  { %v986_v58 = vpop.permute.xlu0 %985 }
 0x196   :  { %v996_v14 = vmax.f32 %v958_v46, %v986_v58 }
 0x198   :  { %1001 = vst.msk [vmem:[#allocation2 + $0x20] sm:$0xff] %vm999_vm4, %v996_v14  ;;  %1011 = vrot.lane.b32.xlu1 %v996_v14, %s17590_s15 }
 0x19b   :  { %v1192_v36 = vpop.permute.xlu2 %1191 }
 0x19c   :  { %v1203_v23 = vmax.f32 %v955_v0, %v1192_v36  ;;  %v19799_v0 = vmax.f32 %v17923_v54, 0.0 }
 0x19d   :  { %v988_v48 = vpop.permute.xlu1 %987  ;;  %v1032_v17 = vpop.permute.xlu0 %1031 }
 0x19e   :  { %1207 = vst.msk [vmem:[#allocation2 + $0x10] sm:$0xff] %vm999_vm4, %v1203_v23  ;;  %v997_v57 = vmax.f32 %v965_v20, %v988_v48  ;;  %v1043_v41 = vmax.f32 %v952_v49, %v1032_v17 }
 0x1a0   :  { %1002 = vst.msk [vmem:[#allocation2 + $0x40] sm:$0xff] %vm999_vm4, %v997_v57  ;;  %1013 = vrot.lane.b32.xlu2 %v997_v57, %s17590_s15  ;;  %1115 = vrot.lane.b32.xlu1 %v1103_v25, %s17590_s15 }
 0x1a3   :  { %v1138_v27 = vpop.permute.xlu2 %1137 }
 0x1a5   :  { %v1034_v46 = vpop.permute.xlu1 %1033 }
 0x1a6   :  { %v1096_v31 = vpop.permute.xlu0 %1095  ;;  %v1044_v12 = vmax.f32 %v19801_v21, %v1034_v46  ;;  %v12447_v46 = vld [vmem:[#allocation11 + $0x7b0] sm:$0xf]  ;;  %v12427_v21 = vld [vmem:[#allocation11 + $0x780] sm:$0xf] }
 0x1a7   :  { %v1105_v6 = vmax.f32 %v19799_v0, %v1096_v31  ;;  %v16568_v31 = vld [vmem:[#allocation11 + $0x7c4] sm:$0xf0]  ;;  %v16526_v0 = vld [vmem:[#allocation11 + $0x634] sm:$0xf] }
 0x1a8   :  { %1117 = vrot.lane.b32.xlu2 %v1104_v63, %s17590_s15  ;;  %1051 = vrot.lane.b32.xlu1 %v1043_v41, %s17587_s29 }
 0x1a9   :  { %1109 = vst.msk [vmem:[#allocation2 + $0x48] sm:$0xff] %vm999_vm4, %v1105_v6 }
 0x1ab   :  { %v1236_v19 = vpop.permute.xlu2 %1235 }
 0x1ac   :  { %v1247_v56 = vmax.f32 %v956_v30, %v1236_v19 }
 0x1ad   :  { %v990_v20 = vpop.permute.xlu1 %989 }
 0x1ae   :  { %v998_v43 = vmax.f32 %v19800_v52, %v990_v20 }
 0x1b0   :  { %1004 = vst.msk [vmem:[#allocation2 + $0x60] sm:$0x3] %vm1003_vm5, %v998_v43  ;;  %1053 = vrot.lane.b32.xlu2 %v1044_v12, %s17587_s29  ;;  %1015 = vrot.lane.b32.xlu0 %v998_v43, %s17590_s15 }
 0x1b1   :  { %1069 = vrot.lane.b32.xlu1 %v1043_v41, %s17591_s16  ;;  %v12448_v41 = vor.u32 %v16568_v31, %v12447_v46 }
 0x1b3   :  { %v1198_v44 = vpop.permute.xlu2 %1197  ;;  %v1038_v49 = vpop.permute.xlu0 %1037  ;;  %2482 = vmatpush.bf16.msrb.mxu2 %v12448_v41  ;;  %v12287_v41 = vld [vmem:[#allocation11 + $0x630] sm:$0xf] }
 0x1b4   :  { %v1206_v54 = vmax.f32 %v976_v47, %v1198_v44 }
 0x1b5   :  { %v1136_v13 = vpop.permute.xlu1 %1135 }
 0x1b6   :  { %1210 = vst.msk [vmem:[#allocation2 + $0x70] sm:$0x3] %vm1003_vm5, %v1206_v54  ;;  %v1147_v8 = vmax.f32 %v954_v60, %v1136_v13  ;;  %v1046_v60 = vmax.f32 %v19803_v18, %v1038_v49  ;;  %v16521_v49 = vld [vmem:[#allocation11 + $0x604] sm:$0xf] }
 0x1b8   :  { %1071 = vrot.lane.b32.xlu2 %v1044_v12, %s17591_s16  ;;  %1119 = vrot.lane.b32.xlu0 %v1105_v6, %s17590_s15  ;;  %v12289_v6 = vld [vmem:[#allocation11 + $0x648] sm:$0xf0]  ;;  %v16563_v12 = vld [vmem:[#allocation11 + $0x794] sm:$0xf0] }
 0x1b9   :  { %v12292_v19 = vor.u32 %v16526_v0, %v12289_v6  ;;  %v12428_v44 = vor.u32 %v16563_v12, %v12427_v21  ;;  %v16528_v0 = vld [vmem:[#allocation11 + $0x644] sm:$0xf0]  ;;  %v12527_v6 = vld [vmem:[#allocation11 + $0x870] sm:$0xf] }
 0x1bb   :  { %v1296_v51 = vpop.permute.xlu2 %1295  ;;  %v1194_v42 = vpop.permute.xlu0 %1193  ;;  %2524 = vmatpush.bf16.msra.mxu0 %v12292_v19  ;;  %2483 = vmatpush.bf16.msrb.mxu2 %v12428_v44  ;;  %v16533_v44 = vld [vmem:[#allocation11 + $0x674] sm:$0xf0] }
 0x1bc   :  { %v1305_v25 = vmax.f32 %v971_v61, %v1296_v51  ;;  %v1204_v39 = vmax.f32 %v962_v59, %v1194_v42  ;;  %v1148_v61 = vmax.f32 %v19804_v22, %v1138_v27  ;;  %v12407_v51 = vld [vmem:[#allocation11 + $0x750] sm:$0xf]  ;;  %v16558_v42 = vld [vmem:[#allocation11 + $0x764] sm:$0xf0]  ;;  %v16511_v22 = vld [vmem:[#allocation11 + $0x5a4] sm:$0xf] }
 0x1bd   :  { %v1098_v63 = vpop.permute.xlu1 %1097 }
 0x1be   :  { %1309 = vst.msk [vmem:[#allocation2 + $0x58] sm:$0xff] %vm999_vm4, %v1305_v25  ;;  %v1106_v47 = vmax.f32 %v974_v28, %v1098_v63  ;;  %v16516_v25 = vld [vmem:[#allocation11 + $0x5d4] sm:$0xf]  ;;  %v12249_v63 = vld [vmem:[#allocation11 + $0x5e8] sm:$0xf0] }
 0x1bf   :  { %1208 = vst.msk [vmem:[#allocation2 + $0x30] sm:$0xff] %vm999_vm4, %v1204_v39  ;;  %v12252_v40 = vor.u32 %v16516_v25, %v12249_v63  ;;  %v12449_v25 = vld [vmem:[#allocation11 + $0x7c8] sm:$0xf0]  ;;  %v19784_v63 = vlaneseq }
 0x1c0   :  { %1110 = vst.msk [vmem:[#allocation2 + $0x68] sm:$0x3] %vm1003_vm5, %v1106_v47  ;;  %1155 = vrot.lane.b32.xlu2 %v1147_v8, %s17587_s29  ;;  %1121 = vrot.lane.b32.xlu1 %v1106_v47, %s17590_s15 }
 0x1c1   :  { %1055 = vrot.lane.b32.xlu0 %v1045_v24, %s17587_s29  ;;  %vm18249_vm12 = vcmp.lt.s32.totalorder %v19784_v63, 416  ;;  %v13347_v63 = vld [vmem:[#allocation11 + $0xb30] sm:$0xf0] }
 0x1c3   :  { %v1140_v50 = vpop.permute.xlu0 %1139  ;;  %v1242_v16 = vpop.permute.xlu2 %1241 }
 0x1c4   :  { %v1149_v4 = vmax.f32 %v968_v62, %v1140_v50  ;;  %v1250_v30 = vmax.f32 %v977_v5, %v1242_v16  ;;  %v12607_v50 = vld [vmem:[#allocation11 + $0x930] sm:$0xf] }
 0x1c5   :  { %v1196_v59 = vpop.permute.xlu1 %1195 }
 0x1c6   :  { %v1205_v32 = vmax.f32 %v969_v2, %v1196_v59  ;;  %v16608_v59 = vld [vmem:[#allocation11 + $0x944] sm:$0xf0] }
 0x1c7   :  { %v12608_v18 = vor.u32 %v16608_v59, %v12607_v50 }
 0x1c8   :  { %1209 = vst.msk [vmem:[#allocation2 + $0x50] sm:$0xff] %vm999_vm4, %v1205_v32  ;;  %1171 = vrot.lane.b32.xlu2 %v1147_v8, %s17591_s16  ;;  %1057 = vrot.lane.b32.xlu1 %v1046_v60, %s17587_s29 }
 0x1c9   :  { %1073 = vrot.lane.b32.xlu0 %v1045_v24, %s17591_s16  ;;  %2496 = vmatpush.bf16.msra.mxu3 %v12608_v18  ;;  %v12507_v18 = vld [vmem:[#allocation11 + $0x840] sm:$0xf] }
 0x1cb   :  { %v1292_v53 = vpop.permute.xlu0 %1291 }
 0x1cc   :  { %v1303_v28 = vmax.f32 %v957_v26, %v1292_v53  ;;  %v12387_v53 = vld [vmem:[#allocation11 + $0x720] sm:$0xf] }
 0x1cd   :  { %v1142_v10 = vpop.permute.xlu1 %1141 }
 0x1ce   :  { %1307 = vst.msk [vmem:[#allocation2 + $0x18] sm:$0xff] %vm999_vm4, %v1303_v28  ;;  %v1150_v55 = vmax.f32 %v975_v11, %v1142_v10  ;;  %v16553_v28 = vld [vmem:[#allocation11 + $0x734] sm:$0xf0] }
 0x1cf   :  { %v12388_v10 = vor.u32 %v16553_v28, %v12387_v53  ;;  %v12429_v28 = vld [vmem:[#allocation11 + $0x798] sm:$0xf0] }
 0x1d0   :  { %1215 = vrot.lane.b32.xlu2 %v1203_v23, %s17590_s15  ;;  %1075 = vrot.lane.b32.xlu1 %v1046_v60, %s17591_s16 }
 0x1d1   :  { %1157 = vrot.lane.b32.xlu0 %v1148_v61, %s17587_s29 }
 0x1d3   :  { %v1238_v29 = vpop.permute.xlu0 %1237 }
 0x1d4   :  { %v1248_v7 = vmax.f32 %v963_v3, %v1238_v29 }
 0x1d5   :  { %v1294_v2 = vpop.permute.xlu1 %1293 }
 0x1d6   :  { %v1304_v26 = vmax.f32 %v964_v15, %v1294_v2  ;;  %v12587_v2 = vld [vmem:[#allocation11 + $0x900] sm:$0xf] }
 0x1d8   :  { %1308 = vst.msk [vmem:[#allocation2 + $0x38] sm:$0xff] %vm999_vm4, %v1304_v26  ;;  %1161 = vrot.lane.b32.xlu2 %v1150_v55, %s17587_s29  ;;  %1159 = vrot.lane.b32.xlu1 %v1149_v4, %s17587_s29  ;;  %v12367_v26 = vld [vmem:[#allocation11 + $0x6f0] sm:$0xf] }
 0x1d9   :  { %1173 = vrot.lane.b32.xlu0 %v1148_v61, %s17591_s16  ;;  %v12229_v61 = vld [vmem:[#allocation11 + $0x5b8] sm:$0xf0] }
 0x1da   :  { %v12232_v29 = vor.u32 %v16511_v22, %v12229_v61  ;;  %v16524_v22 = vld [vmem:[#allocation11 + $0x61c] sm:$0xf0] }
 0x1db   :  { %v1298_v34 = vpop.permute.xlu0 %1297 }
 0x1dc   :  { %v1306_v58 = vmax.f32 %v978_v35, %v1298_v34  ;;  %v16548_v34 = vld [vmem:[#allocation11 + $0x704] sm:$0xf0] }
 0x1dd   :  { %v1240_v62 = vpop.permute.xlu1 %1239 }
 0x1de   :  { %1310 = vst.msk [vmem:[#allocation2 + $0x78] sm:$0x3] %vm1003_vm5, %v1306_v58  ;;  %v1249_v11 = vmax.f32 %v970_v38, %v1240_v62  ;;  %v16506_v58 = vld [vmem:[#allocation11 + $0x574] sm:$0xf]  ;;  %v12209_v62 = vld [vmem:[#allocation11 + $0x588] sm:$0xf0] }
 0x1e0   :  { %1177 = vrot.lane.b32.xlu2 %v1150_v55, %s17591_s16  ;;  %1175 = vrot.lane.b32.xlu1 %v1149_v4, %s17591_s16  ;;  %v16603_v4 = vld [vmem:[#allocation11 + $0x914] sm:$0xf0] }
 0x1e1   :  { %1217 = vrot.lane.b32.xlu0 %v1204_v39, %s17590_s15  ;;  %v12408_v39 = vor.u32 %v16558_v42, %v12407_v51  ;;  %v12588_v55 = vor.u32 %v16603_v4, %v12587_v2  ;;  %v16566_v51 = vld [vmem:[#allocation11 + $0x7b4] sm:$0xf]  ;;  %v12247_v4 = vld [vmem:[#allocation11 + $0x5d0] sm:$0xf] }
 0x1e3   :  { %2484 = vmatpush.bf16.msrb.mxu2 %v12408_v39  ;;  %2497 = vmatpush.bf16.msra.mxu3 %v12588_v55  ;;  %v12295_v39 = vld [vmem:[#allocation11 + $0x638] sm:$0xf]  ;;  %v16518_v55 = vld [vmem:[#allocation11 + $0x5e4] sm:$0xf0] }
 0x1e7   :  { %2485 = vmatpush.bf16.msrb.mxu2 %v12388_v10  ;;  %v12275_v10 = vld [vmem:[#allocation11 + $0x608] sm:$0xf] }
 0x1e8   :  { %1221 = vrot.lane.b32.xlu2 %v1206_v54, %s17590_s15  ;;  %1219 = vrot.lane.b32.xlu1 %v1205_v32, %s17590_s15  ;;  %v12269_v54 = vld [vmem:[#allocation11 + $0x618] sm:$0xf0]  ;;  %v12276_v2 = vor.u32 %v16524_v22, %v12275_v10 }
 0x1e9   :  { %1255 = vrot.lane.b32.xlu0 %v1247_v56, %s17587_s29  ;;  %v12272_v13 = vor.u32 %v16521_v49, %v12269_v54  ;;  %v16491_v49 = vld [vmem:[#allocation11 + $0x4e4] sm:$0xf] }
 0x1eb   :  { %2525 = vmatpush.bf16.msra.mxu0 %v12272_v13  ;;  %v12149_v13 = vld [vmem:[#allocation11 + $0x4f8] sm:$0xf0] }
 0x1ec   :  { %v12152_v42 = vor.u32 %v16491_v49, %v12149_v13  ;;  %v16514_v49 = vld [vmem:[#allocation11 + $0x5bc] sm:$0xf0] }
 0x1ef   :  { %2526 = vmatpush.bf16.msra.mxu0 %v12252_v40  ;;  %v12267_v40 = vld [vmem:[#allocation11 + $0x600] sm:$0xf] }
 0x1f0   :  { %1259 = vrot.lane.b32.xlu2 %v1249_v11, %s17587_s29  ;;  %1257 = vrot.lane.b32.xlu1 %v1248_v7, %s17587_s29 }
 0x1f1   :  { %1271 = vrot.lane.b32.xlu0 %v1247_v56, %s17591_s16  ;;  %v12368_v56 = vor.u32 %v16548_v34, %v12367_v26  ;;  %v12487_v26 = vld [vmem:[#allocation11 + $0x810] sm:$0xf]  ;;  %v19805_v34 = vmov 0 }
 0x1f2   :  { %v19806_v34 = vsel %vm18249_vm12, 4294967295, %v19805_v34 }
 0x1f3   :  { %2527 = vmatpush.bf16.msra.mxu0 %v12232_v29  ;;  %2486 = vmatpush.bf16.msrb.mxu2 %v12368_v56  ;;  %19807 = vst [vmem:[#allocation23_spill] sm:$0xff] %v19806_v34  ;;  %v12248_v56 = vor.u32 %v16518_v55, %v12247_v4  ;;  %v16601_v4 = vld [vmem:[#allocation11 + $0x904] sm:$0xf] }
 0x1f8   :  { %1275 = vrot.lane.b32.xlu2 %v1249_v11, %s17591_s16  ;;  %1273 = vrot.lane.b32.xlu1 %v1248_v7, %s17591_s16  ;;  %v12212_v7 = vor.u32 %v16506_v58, %v12209_v62  ;;  %v16578_v62 = vld [vmem:[#allocation11 + $0x824] sm:$0xf0] }
 0x1f9   :  { %1261 = vrot.lane.b32.xlu0 %v1250_v30, %s17587_s29 }
 0x1fa   :  { %v1014_v33 = vpop.permute.xlu2 %1013  ;;  %2528 = vmatpush.bf16.msra.mxu0 %v12212_v7 }
 0x1fb   :  { %1024 = vst.msk [vmem:[#allocation2 + $0x40] sm:$0xff] %vm1021_vm6, %v1014_v33  ;;  %v16598_v33 = vld [vmem:[#allocation11 + $0x8e4] sm:$0xf0] }
 0x201   :  { %1277 = vrot.lane.b32.xlu0 %v1250_v30, %s17591_s16  ;;  %v12567_v30 = vld [vmem:[#allocation11 + $0x8d0] sm:$0xf] }
 0x202   :  { %v1118_v9 = vpop.permute.xlu2 %1117  ;;  %v1010_v3 = vpop.permute.xlu0 %1009 }
 0x203   :  { %1128 = vst.msk [vmem:[#allocation2 + $0x28] sm:$0xff] %vm1021_vm6, %v1118_v9 }
 0x204   :  { %1022 = vst.msk [vmem:[#allocation2] sm:$0xff] %vm1021_vm6, %v1010_v3  ;;  %v12568_v3 = vor.u32 %v16598_v33, %v12567_v30 }
 0x206   :  { %2498 = vmatpush.bf16.msra.mxu3 %v12568_v3 }
 0x20a   :  { %v1054_v15 = vpop.permute.xlu2 %1053  ;;  %v1012_v45 = vpop.permute.xlu1 %1011 }
 0x20b   :  { %1023 = vst.msk [vmem:[#allocation2 + $0x20] sm:$0xff] %vm1021_vm6, %v1012_v45  ;;  %v16543_v45 = vld [vmem:[#allocation11 + $0x6d4] sm:$0xf0] }
 0x20c   :  { %1065 = vst.msk [vmem:[#allocation2 + $0x20] sm:$0xff] %vm1063_vm7, %v1054_v15  ;;  %v12347_v15 = vld [vmem:[#allocation11 + $0x6c0] sm:$0xf] }
 0x212   :  { %v1072_v1 = vpop.permute.xlu2 %1071  ;;  %v1116_v37 = vpop.permute.xlu1 %1115 }
 0x213   :  { %1083 = vst.msk [vmem:[#allocation2 + $0x20] sm:$0xff] %vm1081_vm8, %v1072_v1  ;;  %v12348_v1 = vor.u32 %v16543_v45, %v12347_v15 }
 0x214   :  { %1127 = vst.msk [vmem:[#allocation2 + $0x8] sm:$0xff] %vm1021_vm6, %v1116_v37  ;;  %v16501_v37 = vld [vmem:[#allocation11 + $0x544] sm:$0xf] }
 0x215   :  { %2487 = vmatpush.bf16.msrb.mxu2 %v12348_v1 }
 0x21a   :  { %v1156_v5 = vpop.permute.xlu2 %1155  ;;  %v1052_v35 = vpop.permute.xlu1 %1051 }
 0x21b   :  { %1167 = vst.msk [vmem:[#allocation2 + $0x8] sm:$0xff] %vm1063_vm7, %v1156_v5  ;;  %v12189_v5 = vld [vmem:[#allocation11 + $0x558] sm:$0xf0] }
 0x21c   :  { %1064 = vst.msk [vmem:[#allocation2] sm:$0xff] %vm1063_vm7, %v1052_v35  ;;  %v12192_v35 = vor.u32 %v16501_v37, %v12189_v5 }
 0x21e   :  { %2529 = vmatpush.bf16.msra.mxu0 %v12192_v35 }
 0x222   :  { %v1172_v38 = vpop.permute.xlu2 %1171  ;;  %v1016_v14 = vpop.permute.xlu0 %1015 }
 0x223   :  { %1183 = vst.msk [vmem:[#allocation2 + $0x8] sm:$0xff] %vm1081_vm8, %v1172_v38  ;;  %v1070_v36 = vpop.permute.xlu1 %1069  ;;  %v12547_v38 = vld [vmem:[#allocation11 + $0x8a0] sm:$0xf] }
 0x224   :  { %1082 = vst.msk [vmem:[#allocation2] sm:$0xff] %vm1081_vm8, %v1070_v36 }
 0x225   :  { %1026 = vst.msk [vmem:[#allocation2 + $0x60] sm:$0x3] %vm1025_vm9, %v1016_v14  ;;  %v16593_v14 = vld [vmem:[#allocation11 + $0x8b4] sm:$0xf0] }
 0x226   :  { %v12548_v36 = vor.u32 %v16593_v14, %v12547_v38  ;;  %v16556_v38 = vld [vmem:[#allocation11 + $0x754] sm:$0xf] }
 0x228   :  { %2499 = vmatpush.bf16.msra.mxu3 %v12548_v36  ;;  %v12409_v36 = vld [vmem:[#allocation11 + $0x768] sm:$0xf0] }
 0x22a   :  { %v1216_v23 = vpop.permute.xlu2 %1215  ;;  %v1120_v48 = vpop.permute.xlu0 %1119 }
 0x22b   :  { %1227 = vst.msk [vmem:[#allocation2 + $0x10] sm:$0xff] %vm1021_vm6, %v1216_v23  ;;  %v12327_v23 = vld [vmem:[#allocation11 + $0x690] sm:$0xf] }
 0x22c   :  { %1129 = vst.msk [vmem:[#allocation2 + $0x48] sm:$0xff] %vm1021_vm6, %v1120_v48  ;;  %v16538_v48 = vld [vmem:[#allocation11 + $0x6a4] sm:$0xf0] }
 0x232   :  { %v1162_v57 = vpop.permute.xlu2 %1161  ;;  %v1122_v17 = vpop.permute.xlu1 %1121 }
 0x233   :  { %1130 = vst.msk [vmem:[#allocation2 + $0x68] sm:$0x3] %vm1025_vm9, %v1122_v17  ;;  %v1056_v27 = vpop.permute.xlu0 %1055  ;;  %v12328_v17 = vor.u32 %v16538_v48, %v12327_v23  ;;  %v12255_v23 = vld [vmem:[#allocation11 + $0x5d8] sm:$0xf] }
 0x234   :  { %1066 = vst.msk [vmem:[#allocation2 + $0x40] sm:$0xff] %vm1063_vm7, %v1056_v27  ;;  %v12169_v27 = vld [vmem:[#allocation11 + $0x528] sm:$0xf0] }
 0x235   :  { %1170 = vst.msk [vmem:[#allocation2 + $0x68] sm:$0x3] %vm1067_vm10, %v1162_v57  ;;  %v16496_v57 = vld [vmem:[#allocation11 + $0x514] sm:$0xf]  ;;  %2488 = vmatpush.bf16.msrb.mxu2 %v12328_v17  ;;  %v16519_v17 = vld [vmem:[#allocation11 + $0x5ec] sm:$0xf0] }
 0x236   :  { %v12172_v46 = vor.u32 %v16496_v57, %v12169_v27  ;;  %v12412_v57 = vor.u32 %v16556_v38, %v12409_v36  ;;  %v12256_v27 = vor.u32 %v16519_v17, %v12255_v23  ;;  %v12569_v36 = vld [vmem:[#allocation11 + $0x8e8] sm:$0xf0]  ;;  %v16541_v23 = vld [vmem:[#allocation11 + $0x6c4] sm:$0xf]  ;;  %v12195_v17 = vld [vmem:[#allocation11 + $0x548] sm:$0xf] }
 0x238   :  { %2530 = vmatpush.bf16.msra.mxu0 %v12172_v46  ;;  %v12227_v46 = vld [vmem:[#allocation11 + $0x5a0] sm:$0xf] }
 0x23a   :  { %v1178_v20 = vpop.permute.xlu2 %1177  ;;  %v1058_v52 = vpop.permute.xlu1 %1057 }
 0x23b   :  { %1186 = vst.msk [vmem:[#allocation2 + $0x68] sm:$0x3] %vm19787_vm11, %v1178_v20  ;;  %v1074_v43 = vpop.permute.xlu0 %1073  ;;  %v12288_v20 = vor.u32 %v16528_v0, %v12287_v41  ;;  %v12467_v0 = vld [vmem:[#allocation11 + $0x7e0] sm:$0xf] }
 0x23c   :  { %1068 = vst.msk [vmem:[#allocation2 + $0x60] sm:$0x3] %vm1067_vm10, %v1058_v52  ;;  %v16588_v52 = vld [vmem:[#allocation11 + $0x884] sm:$0xf0]  ;;  %2531 = vmatpush.bf16.msra.mxu0 %v12152_v42 }
 0x23d   :  { %1084 = vst.msk [vmem:[#allocation2 + $0x40] sm:$0xff] %vm1081_vm8, %v1074_v43  ;;  %v12307_v43 = vld [vmem:[#allocation11 + $0x660] sm:$0xf]  ;;  %v12528_v12 = vor.u32 %v16588_v52, %v12527_v6  ;;  %2468 = vmatpush.bf16.msrb.mxu1 %v12288_v20  ;;  %v16573_v6 = vld [vmem:[#allocation11 + $0x7f4] sm:$0xf0] }
 0x23e   :  { %v12308_v54 = vor.u32 %v16533_v44, %v12307_v43  ;;  %v16606_v20 = vld [vmem:[#allocation11 + $0x934] sm:$0xf]  ;;  %v12609_v52 = vld [vmem:[#allocation11 + $0x948] sm:$0xf0]  ;;  %v16551_v43 = vld [vmem:[#allocation11 + $0x724] sm:$0xf] }
 0x23f   :  { %2500 = vmatpush.bf16.msra.mxu3 %v12528_v12  ;;  %v12389_v12 = vld [vmem:[#allocation11 + $0x738] sm:$0xf0]  ;;  %v12235_v44 = vld [vmem:[#allocation11 + $0x5a8] sm:$0xf] }
 0x240   :  { %2489 = vmatpush.bf16.msrb.mxu2 %v12308_v54  ;;  %v12392_v54 = vor.u32 %v16551_v43, %v12389_v12  ;;  %v12236_v13 = vor.u32 %v16514_v49, %v12235_v44  ;;  %v16508_v42 = vld [vmem:[#allocation11 + $0x584] sm:$0xf0]  ;;  %v12329_v43 = vld [vmem:[#allocation11 + $0x6a8] sm:$0xf0] }
 0x242   :  { %v1222_v8 = vpop.permute.xlu2 %1221  ;;  %v1076_v47 = vpop.permute.xlu1 %1075 }
 0x243   :  { %1230 = vst.msk [vmem:[#allocation2 + $0x70] sm:$0x3] %vm1025_vm9, %v1222_v8  ;;  %v1158_v24 = vpop.permute.xlu0 %1157  ;;  %v12452_v8 = vor.u32 %v16566_v51, %v12449_v25  ;;  %v12207_v51 = vld [vmem:[#allocation11 + $0x570] sm:$0xf] }
 0x244   :  { %1086 = vst.msk [vmem:[#allocation2 + $0x60] sm:$0x3] %vm19787_vm11, %v1076_v47  ;;  %v16529_v47 = vld [vmem:[#allocation11 + $0x64c] sm:$0xf0] }
 0x245   :  { %1168 = vst.msk [vmem:[#allocation2 + $0x28] sm:$0xff] %vm1063_vm7, %v1158_v24  ;;  %v16523_v24 = vld [vmem:[#allocation11 + $0x614] sm:$0xf0]  ;;  %v12296_v50 = vor.u32 %v16529_v47, %v12295_v39  ;;  %2538 = vmatpush.bf16.msra.mxu2 %v12452_v8  ;;  %v12208_v8 = vor.u32 %v16508_v42, %v12207_v51  ;;  %v16499_v51 = vld [vmem:[#allocation11 + $0x52c] sm:$0xf0] }
 0x246   :  { %v12268_v59 = vor.u32 %v16523_v24, %v12267_v40  ;;  %v12147_v42 = vld [vmem:[#allocation11 + $0x4e0] sm:$0xf] }
 0x247   :  { %2580 = vmatpush.bf16.msrb.mxu0 %v12296_v50 }
 0x248   :  { %2469 = vmatpush.bf16.msrb.mxu1 %v12268_v59 }
 0x24a   :  { %v1160_v60 = vpop.permute.xlu1 %1159  ;;  %v1260_v11 = vpop.permute.xlu2 %1259 }
 0x24b   :  { %1169 = vst.msk [vmem:[#allocation2 + $0x48] sm:$0xff] %vm1063_vm7, %v1160_v60  ;;  %v1174_v32 = vpop.permute.xlu0 %1173  ;;  %v16583_v60 = vld [vmem:[#allocation11 + $0x854] sm:$0xf0]  ;;  %2581 = vmatpush.bf16.msrb.mxu0 %v12276_v2 }
 0x24c   :  { %1184 = vst.msk [vmem:[#allocation2 + $0x28] sm:$0xff] %vm1081_vm8, %v1174_v32  ;;  %v16561_v32 = vld [vmem:[#allocation11 + $0x784] sm:$0xf]  ;;  %v12508_v53 = vor.u32 %v16583_v60, %v12507_v18  ;;  %2470 = vmatpush.bf16.msrb.mxu1 %v12248_v56 }
 0x24d   :  { %v12432_v29 = vor.u32 %v16561_v32, %v12429_v28 }
 0x24e   :  { %2501 = vmatpush.bf16.msra.mxu3 %v12508_v53 }
 0x24f   :  { %2539 = vmatpush.bf16.msra.mxu2 %v12432_v29  ;;  %2582 = vmatpush.bf16.msrb.mxu0 %v12256_v27  ;;  %v16504_v27 = vld [vmem:[#allocation11 + $0x55c] sm:$0xf0] }
 0x252   :  { %v1176_v16 = vpop.permute.xlu1 %1175  ;;  %v1276_v21 = vpop.permute.xlu2 %1275 }
 0x253   :  { %1185 = vst.msk [vmem:[#allocation2 + $0x48] sm:$0xff] %vm1081_vm8, %v1176_v16  ;;  %v1218_v9 = vpop.permute.xlu0 %1217  ;;  %v12488_v16 = vor.u32 %v16578_v62, %v12487_v26  ;;  %2540 = vmatpush.bf16.msra.mxu2 %v12412_v57  ;;  %2583 = vmatpush.bf16.msrb.mxu0 %v12236_v13  ;;  %v12349_v57 = vld [vmem:[#allocation11 + $0x6d8] sm:$0xf0]  ;;  %v12175_v13 = vld [vmem:[#allocation11 + $0x518] sm:$0xf] }
 0x254   :  { %1228 = vst.msk [vmem:[#allocation2 + $0x30] sm:$0xff] %vm1021_vm6, %v1218_v9 }
 0x255   :  { %2502 = vmatpush.bf16.msra.mxu3 %v12488_v16 }
 0x257   :  { %2541 = vmatpush.bf16.msra.mxu2 %v12392_v54 }
 0x25a   :  { %v1220_v31 = vpop.permute.xlu1 %1219 }
 0x25b   :  { %1229 = vst.msk [vmem:[#allocation2 + $0x50] sm:$0xff] %vm1021_vm6, %v1220_v31  ;;  %v1256_v19 = vpop.permute.xlu0 %1255  ;;  %v16513_v31 = vld [vmem:[#allocation11 + $0x5b4] sm:$0xf0] }
 0x25c   :  { %1269 = vst.msk [vmem:[#allocation2 + $0x50] sm:$0xff] %vm1063_vm7, %v1260_v11  ;;  %v12228_v41 = vor.u32 %v16513_v31, %v12227_v46  ;;  %v12352_v46 = vor.u32 %v16541_v23, %v12349_v57  ;;  %v12196_v31 = vor.u32 %v16504_v27, %v12195_v17  ;;  %v16571_v57 = vld [vmem:[#allocation11 + $0x7e4] sm:$0xf]  ;;  %v12469_v17 = vld [vmem:[#allocation11 + $0x7f8] sm:$0xf0] }
 0x25d   :  { %1285 = vst.msk [vmem:[#allocation2 + $0x50] sm:$0xff] %vm1081_vm8, %v1276_v21  ;;  %v12612_v21 = vor.u32 %v16606_v20, %v12609_v52  ;;  %v12549_v20 = vld [vmem:[#allocation11 + $0x8b8] sm:$0xf0]  ;;  %v16536_v52 = vld [vmem:[#allocation11 + $0x694] sm:$0xf] }
 0x25e   :  { %1267 = vst.msk [vmem:[#allocation2 + $0x10] sm:$0xff] %vm1063_vm7, %v1256_v19  ;;  %v12468_v19 = vor.u32 %v16573_v6, %v12467_v0  ;;  %2471 = vmatpush.bf16.msrb.mxu1 %v12228_v41  ;;  %v12167_v41 = vld [vmem:[#allocation11 + $0x510] sm:$0xf]  ;;  %v16498_v0 = vld [vmem:[#allocation11 + $0x524] sm:$0xf0]  ;;  %v12332_v49 = vor.u32 %v16536_v52, %v12329_v43 }
 0x25f   :  { %v16591_v6 = vld [vmem:[#allocation11 + $0x8a4] sm:$0xf]  ;;  %v12457_v43 = vld [vmem:[#allocation11 + $0x7d0] sm:$0xf0] }
 0x260   :  { %2503 = vmatpush.bf16.msra.mxu3 %v12468_v19  ;;  %v12168_v19 = vor.u32 %v16498_v0, %v12167_v41  ;;  %v12552_v44 = vor.u32 %v16591_v6, %v12549_v20  ;;  %v12615_v0 = vld [vmem:[#allocation11 + $0x938] sm:$0xf]  ;;  %v16609_v6 = vld [vmem:[#allocation11 + $0x94c] sm:$0xf0] }
 0x262   :  { %v1258_v61 = vpop.permute.xlu1 %1257  ;;  %2472 = vmatpush.bf16.msrb.mxu1 %v12208_v8  ;;  %v16586_v8 = vld [vmem:[#allocation11 + $0x874] sm:$0xf] }
 0x263   :  { %1268 = vst.msk [vmem:[#allocation2 + $0x30] sm:$0xff] %vm1063_vm7, %v1258_v61  ;;  %v1272_v58 = vpop.permute.xlu0 %1271 }
 0x264   :  { %v1378_v7 = vld [vmem:[#allocation2 + $0x40] ss:$8 sm:$0xf]  ;;  %v1380_v11 = vld [vmem:[#allocation2 + $0x41] ss:$8 sm:$0xf]  ;;  %2552 = vmatpush.bf16.msrb.mxu3 %v12612_v21 }
 0x265   :  { %v1381_v30 = vmax.f32 %v1378_v7, %v1380_v11  ;;  %v1386_v33 = vld [vmem:[#allocation2 + $0x42] ss:$8 sm:$0xf]  ;;  %v1388_v9 = vld [vmem:[#allocation2 + $0x43] ss:$8 sm:$0xf] }
 0x266   :  { %v1389_v3 = vmax.f32 %v1386_v33, %v1388_v9  ;;  %v1394_v15 = vld [vmem:[#allocation2 + $0x44] ss:$8 sm:$0xf]  ;;  %v1396_v45 = vld [vmem:[#allocation2 + $0x45] ss:$8 sm:$0xf] }
 0x267   :  { %1383 = vst.msk [vmem:[#allocation3 + $0x20] ss:$8 sm:$0xf] %vm18249_vm12, %v1381_v30  ;;  %v1397_v1 = vmax.f32 %v1394_v15, %v1396_v45  ;;  %v1402_v37 = vld [vmem:[#allocation2 + $0x46] ss:$8 sm:$0xf] }
 0x268   :  { %v1404_v5 = vld [vmem:[#allocation2 + $0x47] ss:$8 sm:$0xf]  ;;  %1391 = vst.msk [vmem:[#allocation3 + $0x21] ss:$8 sm:$0xf] %vm18249_vm12, %v1389_v3 }
 0x269   :  { %v1405_v35 = vmax.f32 %v1402_v37, %v1404_v5  ;;  %1399 = vst.msk [vmem:[#allocation3 + $0x22] ss:$8 sm:$0xf] %vm18249_vm12, %v1397_v1  ;;  %v12589_v30 = vld [vmem:[#allocation11 + $0x918] sm:$0xf0] }
 0x26a   :  { %1283 = vst.msk [vmem:[#allocation2 + $0x10] sm:$0xff] %vm1081_vm8, %v1272_v58  ;;  %v1274_v14 = vpop.permute.xlu1 %1273  ;;  %v12592_v33 = vor.u32 %v16601_v4, %v12589_v30  ;;  %v16546_v9 = vld [vmem:[#allocation11 + $0x6f4] sm:$0xf]  ;;  %v12369_v3 = vld [vmem:[#allocation11 + $0x708] sm:$0xf0] }
 0x26b   :  { %1407 = vst.msk [vmem:[#allocation3 + $0x23] ss:$8 sm:$0xf] %vm18249_vm12, %v1405_v35  ;;  %v1262_v48 = vpop.permute.xlu0 %1261  ;;  %v12372_v15 = vor.u32 %v16546_v9, %v12369_v3  ;;  %v12215_v45 = vld [vmem:[#allocation11 + $0x578] sm:$0xf] }
 0x26c   :  { %1284 = vst.msk [vmem:[#allocation2 + $0x30] sm:$0xff] %vm1081_vm8, %v1274_v14  ;;  %2553 = vmatpush.bf16.msrb.mxu3 %v12592_v33  ;;  %v16509_v1 = vld [vmem:[#allocation11 + $0x58c] sm:$0xf0]  ;;  %v12187_v37 = vld [vmem:[#allocation11 + $0x540] sm:$0xf] }
 0x26d   :  { %1270 = vst.msk [vmem:[#allocation2 + $0x70] sm:$0x3] %vm1067_vm10, %v1262_v48  ;;  %v16503_v5 = vld [vmem:[#allocation11 + $0x554] sm:$0xf0]  ;;  %2542 = vmatpush.bf16.msra.mxu2 %v12372_v15  ;;  %v12216_v35 = vor.u32 %v16509_v1, %v12215_v45  ;;  %v16596_v14 = vld [vmem:[#allocation11 + $0x8d4] sm:$0xf] }
 0x26e   :  { %v12188_v38 = vor.u32 %v16503_v5, %v12187_v37  ;;  %v12572_v48 = vor.u32 %v16596_v14, %v12569_v36  ;;  %v16576_v9 = vld [vmem:[#allocation11 + $0x814] sm:$0xf]  ;;  %v12489_v3 = vld [vmem:[#allocation11 + $0x828] sm:$0xf0]  ;;  %v16613_v14 = vld [vmem:[#allocation11 + $0x974] sm:$0xf0] }
 0x26f   :  { %2584 = vmatpush.bf16.msrb.mxu0 %v12216_v35  ;;  %v12492_v45 = vor.u32 %v16576_v9, %v12489_v3 }
 0x270   :  { %2473 = vmatpush.bf16.msrb.mxu1 %v12188_v38  ;;  %2554 = vmatpush.bf16.msrb.mxu3 %v12572_v48  ;;  %v12627_v38 = vld [vmem:[#allocation11 + $0x960] sm:$0xf] }
 0x271   :  { %v1311_v25 = vld [vmem:[#allocation2] ss:$8 sm:$0xf]  ;;  %v1313_v39 = vld [vmem:[#allocation2 + $0x1] ss:$8 sm:$0xf]  ;;  %2543 = vmatpush.bf16.msra.mxu2 %v12352_v46  ;;  %v12628_v48 = vor.u32 %v16613_v14, %v12627_v38 }
 0x272   :  { %v1314_v47 = vmax.f32 %v1311_v25, %v1313_v39  ;;  %v1322_v40 = vld [vmem:[#allocation2 + $0x2] ss:$8 sm:$0xf]  ;;  %v1324_v24 = vld [vmem:[#allocation2 + $0x3] ss:$8 sm:$0xf]  ;;  %v12176_v25 = vor.u32 %v16499_v51, %v12175_v13 }
 0x273   :  { %v1325_v50 = vmax.f32 %v1322_v40, %v1324_v24  ;;  %v1330_v59 = vld [vmem:[#allocation2 + $0x4] ss:$8 sm:$0xf]  ;;  %v1332_v18 = vld [vmem:[#allocation2 + $0x5] ss:$8 sm:$0xf]  ;;  %v1278_v7 = vpop.permute.xlu0 %1277  ;;  %2585 = vmatpush.bf16.msrb.mxu0 %v12196_v31  ;;  %v12472_v31 = vor.u32 %v16571_v57, %v12469_v17 }
 0x274   :  { %1319 = vst.msk [vmem:[#allocation3] ss:$8 sm:$0xf] %vm18249_vm12, %v1314_v47  ;;  %v1333_v60 = vmax.f32 %v1330_v59, %v1332_v18  ;;  %v1338_v32 = vld [vmem:[#allocation2 + $0x6] ss:$8 sm:$0xf]  ;;  %2474 = vmatpush.bf16.msrb.mxu1 %v12168_v19  ;;  %2555 = vmatpush.bf16.msrb.mxu3 %v12552_v44 }
 0x275   :  { %1327 = vst.msk [vmem:[#allocation3 + $0x1] ss:$8 sm:$0xf] %vm18249_vm12, %v1325_v50  ;;  %v1340_v53 = vld [vmem:[#allocation2 + $0x7] ss:$8 sm:$0xf]  ;;  %2544 = vmatpush.bf16.msra.mxu2 %v12332_v49 }
 0x276   :  { %1335 = vst.msk [vmem:[#allocation3 + $0x2] ss:$8 sm:$0xf] %vm18249_vm12, %v1333_v60  ;;  %v1341_v28 = vmax.f32 %v1338_v32, %v1340_v53  ;;  %v1346_v10 = vld [vmem:[#allocation2 + $0x20] ss:$8 sm:$0xf] }
 0x277   :  { %v1348_v22 = vld [vmem:[#allocation2 + $0x21] ss:$8 sm:$0xf]  ;;  %v1354_v61 = vld [vmem:[#allocation2 + $0x22] ss:$8 sm:$0xf]  ;;  %2586 = vmatpush.bf16.msrb.mxu0 %v12176_v25 }
 0x278   :  { %1343 = vst.msk [vmem:[#allocation3 + $0x3] ss:$8 sm:$0xf] %vm18249_vm12, %v1341_v28  ;;  %v1349_v29 = vmax.f32 %v1346_v10, %v1348_v22  ;;  %v1356_v2 = vld [vmem:[#allocation2 + $0x23] ss:$8 sm:$0xf] }
 0x279   :  { %v1357_v55 = vmax.f32 %v1354_v61, %v1356_v2  ;;  %v1362_v26 = vld [vmem:[#allocation2 + $0x24] ss:$8 sm:$0xf]  ;;  %v1364_v58 = vld [vmem:[#allocation2 + $0x25] ss:$8 sm:$0xf] }
 0x27a   :  { %1351 = vst.msk [vmem:[#allocation3 + $0x4] ss:$8 sm:$0xf] %vm18249_vm12, %v1349_v29  ;;  %v1365_v56 = vmax.f32 %v1362_v26, %v1364_v58  ;;  %v1370_v62 = vld [vmem:[#allocation2 + $0x26] ss:$8 sm:$0xf] }
 0x27b   :  { %1359 = vst.msk [vmem:[#allocation3 + $0x5] ss:$8 sm:$0xf] %vm18249_vm12, %v1357_v55  ;;  %v1372_v11 = vld [vmem:[#allocation2 + $0x27] ss:$8 sm:$0xf] }
 0x27c   :  { %1367 = vst.msk [vmem:[#allocation3 + $0x6] ss:$8 sm:$0xf] %vm18249_vm12, %v1365_v56  ;;  %v1373_v16 = vmax.f32 %v1370_v62, %v1372_v11  ;;  %v16493_v39 = vld [vmem:[#allocation11 + $0x4f4] sm:$0xf0] }
 0x27d   :  { %1286 = vst.msk [vmem:[#allocation2 + $0x70] sm:$0x3] %vm19787_vm11, %v1278_v7  ;;  %v12529_v47 = vld [vmem:[#allocation11 + $0x888] sm:$0xf0]  ;;  %v12148_v40 = vor.u32 %v16493_v39, %v12147_v42  ;;  %v16531_v50 = vld [vmem:[#allocation11 + $0x664] sm:$0xf] }
 0x27e   :  { %1375 = vst.msk [vmem:[#allocation3 + $0x7] ss:$8 sm:$0xf] %vm18249_vm12, %v1373_v16  ;;  %v12532_v24 = vor.u32 %v16586_v8, %v12529_v47  ;;  %v12309_v59 = vld [vmem:[#allocation11 + $0x678] sm:$0xf0]  ;;  %v12616_v47 = vor.u32 %v16609_v6, %v12615_v0  ;;  %vm4908_vm11 = vcmask 1042944  }
 0x27f   :  { %v12155_v18 = vld [vmem:[#allocation11 + $0x4e8] sm:$0xf]  ;;  %v16494_v60 = vld [vmem:[#allocation11 + $0x4fc] sm:$0xf0]  ;;  %v12312_v32 = vor.u32 %v16531_v50, %v12309_v59  ;;  %2475 = vmatpush.bf16.msrb.mxu1 %v12148_v40  ;;  %v16581_v29 = vld [vmem:[#allocation11 + $0x844] sm:$0xf] }
 0x280   :  { %v12156_v53 = vor.u32 %v16494_v60, %v12155_v18  ;;  %2556 = vmatpush.bf16.msrb.mxu3 %v12532_v24  ;;  %v12509_v2 = vld [vmem:[#allocation11 + $0x858] sm:$0xf0]  ;;  %v12647_v26 = vld [vmem:[#allocation11 + $0x990] sm:$0xf]  ;;  %v16618_v58 = vld [vmem:[#allocation11 + $0x9a4] sm:$0xf0] }
 0x281   :  { %2545 = vmatpush.bf16.msra.mxu2 %v12312_v32  ;;  %v12512_v55 = vor.u32 %v16581_v29, %v12509_v2  ;;  %v12648_v16 = vor.u32 %v16618_v58, %v12647_v26  ;;  %v16567_v19 = vld [vmem:[#allocation11 + $0x7bc] sm:$0xf]  ;;  %v12649_v44 = vld [vmem:[#allocation11 + $0x9a8] sm:$0xf0]  ;;  %v12655_v49 = vld [vmem:[#allocation11 + $0x998] sm:$0xf] }
 0x282   :  { %2587 = vmatpush.bf16.msrb.mxu0 %v12156_v53  ;;  %v16619_v25 = vld [vmem:[#allocation11 + $0x9ac] sm:$0xf0]  ;;  %v12460_v50 = vor.u32 %v16567_v19, %v12457_v43  ;;  %v12595_v59 = vld [vmem:[#allocation11 + $0x908] sm:$0xf]  ;;  %v16604_v18 = vld [vmem:[#allocation11 + $0x91c] sm:$0xf0] }
 0x283   :  { %2516 = vmatpush.bf16.msra.mxu1 %v12648_v16  ;;  %v16562_v53 = vld [vmem:[#allocation11 + $0x78c] sm:$0xf]  ;;  %v12629_v29 = vld [vmem:[#allocation11 + $0x978] sm:$0xf0]  ;;  %v12635_v2 = vld [vmem:[#allocation11 + $0x968] sm:$0xf]  ;;  %v12596_v26 = vor.u32 %v16604_v18, %v12595_v59 }
 0x284   :  { %v1410_v21 = vld [vmem:[#allocation2 + $0x60] ss:$8 sm:$0xf]  ;;  %v1412_v12 = vld [vmem:[#allocation2 + $0x61] ss:$8 sm:$0xf]  ;;  %2557 = vmatpush.bf16.msrb.mxu3 %v12512_v55 }
 0x285   :  { %v1413_v54 = vmax.f32 %v1410_v21, %v1412_v12  ;;  %v1417_v28 = vld [vmem:[#allocation3] sm:$0xff]  ;;  %v1418_v10 = vld [vmem:[#allocation3 + $0x8] sm:$0xff]  ;;  %v1419_v22 = vld [vmem:[#allocation3 + $0x10] sm:$0xff] }
 0x286   :  { %v1420_v61 = vld [vmem:[#allocation3 + $0x18] sm:$0xff]  ;;  %v1425_v4 = vpack.c.bf16 %v1418_v10, %v1417_v28  ;;  %v16616_v21 = vld [vmem:[#allocation11 + $0x994] sm:$0xf]  ;;  %v12437_v28 = vld [vmem:[#allocation11 + $0x7a0] sm:$0xf0] }
 0x287   :  { %1415 = vst.msk [vmem:[#allocation3 + $0x24] ss:$8 sm:$0xf] %vm18249_vm12, %v1413_v54  ;;  %v18284_v11 = vpack.c.bf16 %v1420_v61, %v1419_v22  ;;  %2517 = vmatpush.bf16.msra.mxu1 %v12628_v48  ;;  %v12652_v10 = vor.u32 %v16616_v21, %v12649_v44  ;;  %v12656_v22 = vor.u32 %v16619_v25, %v12655_v49  ;;  %v16611_v61 = vld [vmem:[#allocation11 + $0x964] sm:$0xf] }
 0x288   :  { %v1746_v1 = vunpack.c.l.b16 %v1425_v4  ;;  %v1747_v5 = vunpack.c.h.b16 %v1425_v4  ;;  %2558 = vmatpush.bf16.msrb.mxu3 %v12492_v45  ;;  %v16614_v4 = vld [vmem:[#allocation11 + $0x97c] sm:$0xf0]  ;;  %v12440_v58 = vor.u32 %v16562_v53, %v12437_v28  ;;  %v16557_v16 = vld [vmem:[#allocation11 + $0x75c] sm:$0xf]  ;;  %v16569_v48 = vld [vmem:[#allocation11 + $0x7cc] sm:$0xf0] }
 0x289   :  { %v1748_v36 = vunpack.c.l.b16 %v18284_v11  ;;  %v1749_v55 = vunpack.c.h.b16 %v18284_v11  ;;  %v12636_v9 = vor.u32 %v16614_v4, %v12635_v2  ;;  %v12535_v57 = vld [vmem:[#allocation11 + $0x878] sm:$0xf]  ;;  %v16589_v17 = vld [vmem:[#allocation11 + $0x88c] sm:$0xf0]  ;;  %v12297_v0 = vld [vmem:[#allocation11 + $0x650] sm:$0xf0] }
 0x28a   :  { %v16547_v6 = vld [vmem:[#allocation11 + $0x6fc] sm:$0xf]  ;;  %v12377_v19 = vld [vmem:[#allocation11 + $0x710] sm:$0xf0]  ;;  %v12536_v43 = vor.u32 %v16589_v17, %v12535_v57  ;;  %v12435_v21 = vld [vmem:[#allocation11 + $0x788] sm:$0xf] }
 0x28b   :  { %v12380_v49 = vor.u32 %v16547_v6, %v12377_v19  ;;  %v16542_v25 = vld [vmem:[#allocation11 + $0x6cc] sm:$0xf]  ;;  %v16559_v59 = vld [vmem:[#allocation11 + $0x76c] sm:$0xf0]  ;;  %v12495_v53 = vld [vmem:[#allocation11 + $0x818] sm:$0xf] }
 0x28c   :  { %2559 = vmatpush.bf16.msrb.mxu3 %v12472_v31  ;;  %v16527_v31 = vld [vmem:[#allocation11 + $0x63c] sm:$0xf]  ;;  %v16579_v28 = vld [vmem:[#allocation11 + $0x82c] sm:$0xf0]  ;;  %v12217_v17 = vld [vmem:[#allocation11 + $0x590] sm:$0xf0] }
 0x28d   :  { %v12300_v44 = vor.u32 %v16527_v31, %v12297_v0  ;;  %v12496_v4 = vor.u32 %v16579_v28, %v12495_v53  ;;  %v16507_v57 = vld [vmem:[#allocation11 + $0x57c] sm:$0xf]  ;;  %v16612_v31 = vld [vmem:[#allocation11 + $0x96c] sm:$0xf]  ;;  %v12637_v0 = vld [vmem:[#allocation11 + $0x980] sm:$0xf0] }
 0x28e   :  { %v1421_v56 = vld [vmem:[#allocation3 + $0x20] sm:$0x1f]  ;;  %v1422_v62 = vld [vmem:[#allocation3 + $0x28] sm:$0x1f]  ;;  %v1423_v7 = vld [vmem:[#allocation3 + $0x30] sm:$0x1f] }
 0x28f   :  { %v1427_v30 = vpack.c.bf16 %v1422_v62, %v1421_v56  ;;  %v1424_v33 = vld [vmem:[#allocation3 + $0x38] sm:$0x1f]  ;;  %v12603_v6 = vld [vmem:[#allocation11 + $0x910] sm:$0xf]  ;;  %v16605_v19 = vld [vmem:[#allocation11 + $0x924] sm:$0xf0] }
 0x290   :  { %v18286_v15 = vpack.c.bf16 %v1424_v33, %v1423_v7  ;;  %v12575_v56 = vld [vmem:[#allocation11 + $0x8d8] sm:$0xf]  ;;  %v16599_v7 = vld [vmem:[#allocation11 + $0x8ec] sm:$0xf0]  ;;  %v12632_v33 = vor.u32 %v16611_v61, %v12629_v29  ;;  %v16537_v61 = vld [vmem:[#allocation11 + $0x69c] sm:$0xf] }
 0x291   :  { %v1750_v37 = vunpack.c.l.b16 %v1427_v30  ;;  %v1751_v35 = vunpack.c.h.b16 %v1427_v30  ;;  %v12417_v30 = vld [vmem:[#allocation11 + $0x770] sm:$0xf0]  ;;  %v12576_v11 = vor.u32 %v16599_v7, %v12575_v56  ;;  %v16539_v53 = vld [vmem:[#allocation11 + $0x6ac] sm:$0xf0] }
 0x292   :  { %v1752_v23 = vunpack.c.l.b16 %v18286_v15  ;;  %v1753_v60 = vunpack.c.h.b16 %v18286_v15  ;;  %v12420_v3 = vor.u32 %v16557_v16, %v12417_v30  ;;  %v12555_v15 = vld [vmem:[#allocation11 + $0x8a8] sm:$0xf]  ;;  %v12337_v29 = vld [vmem:[#allocation11 + $0x6b0] sm:$0xf0]  ;;  %v16574_v16 = vld [vmem:[#allocation11 + $0x7fc] sm:$0xf0] }
 0x293   :  { %v18290_v27 = vpack.c.b16 %v1750_v37, %v1746_v1  ;;  %v18292_v46 = vpack.c.b16 %v1751_v35, %v1747_v5  ;;  %v16594_v1 = vld [vmem:[#allocation11 + $0x8bc] sm:$0xf0]  ;;  %v16552_v37 = vld [vmem:[#allocation11 + $0x72c] sm:$0xf]  ;;  %v12397_v5 = vld [vmem:[#allocation11 + $0x740] sm:$0xf0]  ;;  %v12340_v7 = vor.u32 %v16537_v61, %v12337_v29 }
 0x294   :  { %v18294_v41 = vpack.c.b16 %v1752_v23, %v1748_v36  ;;  %v18314_v62 = vpack.c.b16 %v1753_v60, %v1749_v55  ;;  %v12556_v35 = vor.u32 %v16594_v1, %v12555_v15  ;;  %v12400_v38 = vor.u32 %v16552_v37, %v12397_v5  ;;  %v12455_v23 = vld [vmem:[#allocation11 + $0x7b8] sm:$0xf]  ;;  %v12395_v55 = vld [vmem:[#allocation11 + $0x728] sm:$0xf]  ;;  %v16512_v30 = vld [vmem:[#allocation11 + $0x5ac] sm:$0xf] }
 0x295   :  { %v1761_v20 = vshll.u32 %v18290_v27, 16  ;;  %v1768_v52 = vshll.u32 %v18292_v46, 16  ;;  %v1759_v54 = vshrl.u32 %v18290_v27, 16  ;;  %v1766_v51 = vshrl.u32 %v18292_v46, 16  ;;  %v12657_v15 = vld [vmem:[#allocation11 + $0x9b0] sm:$0xf0] }
 0x296   :  { %v1775_v12 = vshll.u32 %v18294_v41, 16  ;;  %v1773_v39 = vshrl.u32 %v18294_v41, 16  ;;  %v1782_v45 = vshll.u32 %v18314_v62, 16  ;;  %v1780_v14 = vshrl.u32 %v18314_v62, 16  ;;  %v16610_v1 = vld [vmem:[#allocation11 + $0x954] sm:$0xf0] }
 0x297   :  { %v1763_v13 = vrot.slane %v1761_v20, 1  ;;  %v1770_v42 = vrot.slane %v1768_v52, 1  ;;  %v12456_v52 = vor.u32 %v16569_v48, %v12455_v23  ;;  %v12563_v29 = vld [vmem:[#allocation11 + $0x8b0] sm:$0xf] }
 0x298   :  { %v1777_v8 = vrot.slane %v1775_v12, 1  ;;  %v1784_v36 = vrot.slane %v1782_v45, 1  ;;  %v16564_v12 = vld [vmem:[#allocation11 + $0x79c] sm:$0xf0] }
 0x299   :  { %v18302_v40 = vor.u32 %v1763_v13, %v1759_v54  ;;  %v18304_v24 = vor.u32 %v1770_v42, %v1766_v51  ;;  %v12515_v54 = vld [vmem:[#allocation11 + $0x848] sm:$0xf]  ;;  %v16584_v13 = vld [vmem:[#allocation11 + $0x85c] sm:$0xf0]  ;;  %v16522_v51 = vld [vmem:[#allocation11 + $0x60c] sm:$0xf] }
 0x29a   :  { %v18307_v32 = vor.u32 %v1777_v8, %v1773_v39  ;;  %v18318_v20 = vor.u32 %v1784_v36, %v1780_v14  ;;  %v12277_v42 = vld [vmem:[#allocation11 + $0x620] sm:$0xf0]  ;;  %v12436_v8 = vor.u32 %v16564_v12, %v12435_v21  ;;  %v12623_v45 = vld [vmem:[#allocation11 + $0x940] sm:$0xf]  ;;  %v12375_v14 = vld [vmem:[#allocation11 + $0x6f8] sm:$0xf]  ;;  %v12220_v12 = vor.u32 %v16507_v57, %v12217_v17 }
 0x29b   :  { %2476 = vmatmul.bf16.vlgmr.msrb.gmra.mxu1 %v18302_v40  ;;  %2490 = vmatmul.bf16.vlgmr.msrb.gmra.mxu2 %v18304_v24  ;;  %v12357_v39 = vld [vmem:[#allocation11 + $0x6e0] sm:$0xf0]  ;;  %v12280_v18 = vor.u32 %v16522_v51, %v12277_v42  ;;  %v16549_v36 = vld [vmem:[#allocation11 + $0x70c] sm:$0xf0]  ;;  %v12624_v48 = vor.u32 %v16610_v1, %v12623_v45  ;;  %v16530_v21 = vld [vmem:[#allocation11 + $0x654] sm:$0xf0] }
 0x29c   :  { %2504 = vmatmul.bf16.vlgmr.msra.gmra.mxu3 %v18307_v32  ;;  %2532 = vmatmul.bf16.vlgmr.msra.gmra.mxu0 %v18302_v40  ;;  %v12360_v60 = vor.u32 %v16542_v25, %v12357_v39  ;;  %v16502_v51 = vld [vmem:[#allocation11 + $0x54c] sm:$0xf]  ;;  %v12197_v42 = vld [vmem:[#allocation11 + $0x560] sm:$0xf0]  ;;  %v12583_v39 = vld [vmem:[#allocation11 + $0x8e0] sm:$0xf] }
 0x29d   :  { %2608 = vmatpush.bf16.msrb.mxu2 %v12616_v47  ;;  %2650 = vmatpush.bf16.msra.mxu0 %v12460_v50  ;;  %v12516_v47 = vor.u32 %v16584_v13, %v12515_v54  ;;  %v12415_v50 = vld [vmem:[#allocation11 + $0x758] sm:$0xf]  ;;  %v12640_v54 = vor.u32 %v16612_v31, %v12637_v0  ;;  %v12604_v13 = vor.u32 %v16605_v19, %v12603_v6  ;;  %v12543_v1 = vld [vmem:[#allocation11 + $0x880] sm:$0xf]  ;;  %v16602_v57 = vld [vmem:[#allocation11 + $0x90c] sm:$0xf] }
 0x29e   :  { %2572 = vmatpush.bf16.msrb.mxu1 %v12652_v10  ;;  %2628 = vmatpush.bf16.msra.mxu3 %v12656_v22  ;;  %v16517_v10 = vld [vmem:[#allocation11 + $0x5dc] sm:$0xf]  ;;  %v12257_v22 = vld [vmem:[#allocation11 + $0x5f0] sm:$0xf0]  ;;  %v12416_v2 = vor.u32 %v16559_v59, %v12415_v50  ;;  %v12283_v50 = vld [vmem:[#allocation11 + $0x610] sm:$0xf] }
 0x29f   :  { %v12260_v56 = vor.u32 %v16517_v10, %v12257_v22  ;;  %v16525_v59 = vld [vmem:[#allocation11 + $0x624] sm:$0xf0]  ;;  %v16497_v10 = vld [vmem:[#allocation11 + $0x51c] sm:$0xf]  ;;  %v12177_v22 = vld [vmem:[#allocation11 + $0x530] sm:$0xf0] }
 0x2a0   :  { %v12284_v61 = vor.u32 %v16525_v59, %v12283_v50  ;;  %v16570_v45 = vld [vmem:[#allocation11 + $0x7d4] sm:$0xf0]  ;;  %v12597_v17 = vld [vmem:[#allocation11 + $0x920] sm:$0xf0]  ;;  %v12443_v31 = vld [vmem:[#allocation11 + $0x790] sm:$0xf] }
 0x2a1   :  { %2609 = vmatpush.bf16.msrb.mxu2 %v12596_v26  ;;  %2651 = vmatpush.bf16.msra.mxu0 %v12440_v58  ;;  %v16554_v26 = vld [vmem:[#allocation11 + $0x73c] sm:$0xf0]  ;;  %v12475_v58 = vld [vmem:[#allocation11 + $0x7e8] sm:$0xf]  ;;  %v12523_v19 = vld [vmem:[#allocation11 + $0x850] sm:$0xf] }
 0x2a2   :  { %2573 = vmatpush.bf16.msrb.mxu1 %v12632_v33  ;;  %2629 = vmatpush.bf16.msra.mxu3 %v12636_v9  ;;  %v12237_v33 = vld [vmem:[#allocation11 + $0x5c0] sm:$0xf0]  ;;  %v16532_v9 = vld [vmem:[#allocation11 + $0x66c] sm:$0xf]  ;;  %v12396_v37 = vor.u32 %v16554_v26, %v12395_v55  ;;  %v12476_v5 = vor.u32 %v16574_v16, %v12475_v58  ;;  %v12263_v55 = vld [vmem:[#allocation11 + $0x5e0] sm:$0xf] }
 0x2a3   :  { %v16520_v26 = vld [vmem:[#allocation11 + $0x5f4] sm:$0xf0]  ;;  %v12315_v58 = vld [vmem:[#allocation11 + $0x668] sm:$0xf]  ;;  %v16492_v16 = vld [vmem:[#allocation11 + $0x4ec] sm:$0xf] }
 0x2a4   :  { %v16565_v6 = vld [vmem:[#allocation11 + $0x7a4] sm:$0xf0] }
 0x2a5   :  { %2610 = vmatpush.bf16.msrb.mxu2 %v12576_v11  ;;  %2652 = vmatpush.bf16.msra.mxu0 %v12420_v3  ;;  %v12317_v11 = vld [vmem:[#allocation11 + $0x680] sm:$0xf0]  ;;  %v16617_v3 = vld [vmem:[#allocation11 + $0x99c] sm:$0xf]  ;;  %v16505_v50 = vld [vmem:[#allocation11 + $0x564] sm:$0xf0] }
 0x2a6   :  { %v12660_v23 = vor.u32 %v16617_v3, %v12657_v15  ;;  %v12463_v3 = vld [vmem:[#allocation11 + $0x7c0] sm:$0xf]  ;;  %v12264_v15 = vor.u32 %v16520_v26, %v12263_v55  ;;  %v16500_v55 = vld [vmem:[#allocation11 + $0x534] sm:$0xf0]  ;;  %v13172_v26 = vld [vmem:[#allocation11 + $0x4b0] sm:$0xf] }
 0x2a9   :  { %2611 = vmatpush.bf16.msrb.mxu2 %v12556_v35  ;;  %2653 = vmatpush.bf16.msra.mxu0 %v12400_v38  ;;  %v12240_v35 = vor.u32 %v16512_v30, %v12237_v33  ;;  %v12320_v38 = vor.u32 %v16532_v9, %v12317_v11  ;;  %v12157_v30 = vld [vmem:[#allocation11 + $0x500] sm:$0xf0]  ;;  %v16607_v9 = vld [vmem:[#allocation11 + $0x93c] sm:$0xf]  ;;  %v12617_v11 = vld [vmem:[#allocation11 + $0x950] sm:$0xf0] }
 0x2ab   :  { %12665 = vmatmul.msk.bf16.vlgmr.msra.gmra.mxu1 %vm999_vm4, %v18318_v20  ;;  %2546 = vmatmul.bf16.vlgmr.msra.gmra.mxu2 %v18304_v24 }
 0x2ac   :  { %2560 = vmatmul.bf16.vlgmr.msrb.gmra.mxu3 %v18307_v32  ;;  %2588 = vmatmul.bf16.vlgmr.msrb.gmra.mxu0 %v18302_v40 }
 0x2ad   :  { %2594 = vmatpush.bf16.msra.mxu1 %v12456_v52  ;;  %2612 = vmatpush.bf16.msrb.mxu2 %v12536_v43  ;;  %v12376_v52 = vor.u32 %v16549_v36, %v12375_v14  ;;  %v12303_v43 = vld [vmem:[#allocation11 + $0x640] sm:$0xf]  ;;  %v12160_v14 = vor.u32 %v16492_v16, %v12157_v30  ;;  %v12620_v36 = vor.u32 %v16607_v9, %v12617_v11  ;;  %v16587_v30 = vld [vmem:[#allocation11 + $0x87c] sm:$0xf] }
 0x2ae   :  { %2636 = vmatpush.bf16.msrb.mxu3 %v12300_v44  ;;  %2654 = vmatpush.bf16.msra.mxu0 %v12380_v49  ;;  %v12355_v44 = vld [vmem:[#allocation11 + $0x6c8] sm:$0xf]  ;;  %v16544_v49 = vld [vmem:[#allocation11 + $0x6dc] sm:$0xf0]  ;;  %v12304_v25 = vor.u32 %v16530_v21, %v12303_v43  ;;  %v16510_v21 = vld [vmem:[#allocation11 + $0x594] sm:$0xf0] }
 0x2af   :  { %v12223_v43 = vld [vmem:[#allocation11 + $0x580] sm:$0xf] }
 0x2b0   :  { %v12383_v9 = vld [vmem:[#allocation11 + $0x700] sm:$0xf] }
 0x2b1   :  { %2595 = vmatpush.bf16.msra.mxu1 %v12436_v8  ;;  %2613 = vmatpush.bf16.msrb.mxu2 %v12516_v47  ;;  %v16600_v8 = vld [vmem:[#allocation11 + $0x8f4] sm:$0xf0]  ;;  %v12356_v47 = vor.u32 %v16544_v49, %v12355_v44  ;;  %v12444_v44 = vor.u32 %v16565_v6, %v12443_v31  ;;  %v12363_v6 = vld [vmem:[#allocation11 + $0x6d0] sm:$0xf] }
 0x2b2   :  { %2637 = vmatpush.bf16.msrb.mxu3 %v12280_v18  ;;  %2655 = vmatpush.bf16.msra.mxu0 %v12360_v60  ;;  %v12200_v18 = vor.u32 %v16502_v51, %v12197_v42  ;;  %v12335_v60 = vld [vmem:[#allocation11 + $0x698] sm:$0xf]  ;;  %v12584_v28 = vor.u32 %v16600_v8, %v12583_v39  ;;  %v12423_v51 = vld [vmem:[#allocation11 + $0x760] sm:$0xf]  ;;  %v12224_v42 = vor.u32 %v16510_v21, %v12223_v43 }
 0x2b3   :  { %v12503_v39 = vld [vmem:[#allocation11 + $0x820] sm:$0xf]  ;;  %v16580_v8 = vld [vmem:[#allocation11 + $0x834] sm:$0xf0] }
 0x2b4   :  { %v12952_v21 = vld [vmem:[#allocation11 + $0x2a0] sm:$0xf] }
 0x2b5   :  { %2596 = vmatpush.bf16.msra.mxu1 %v12416_v2  ;;  %2614 = vmatpush.bf16.msrb.mxu2 %v12496_v4  ;;  %v16595_v2 = vld [vmem:[#allocation11 + $0x8c4] sm:$0xf0]  ;;  %v12336_v4 = vor.u32 %v16539_v53, %v12335_v60  ;;  %v12504_v53 = vor.u32 %v16580_v8, %v12503_v39  ;;  %v16540_v39 = vld [vmem:[#allocation11 + $0x6b4] sm:$0xf0] }
 0x2b6   :  { %2638 = vmatpush.bf16.msrb.mxu3 %v12260_v56  ;;  %2656 = vmatpush.bf16.msra.mxu0 %v12340_v7  ;;  %v12180_v56 = vor.u32 %v16497_v10, %v12177_v22  ;;  %v16534_v7 = vld [vmem:[#allocation11 + $0x67c] sm:$0xf0]  ;;  %v12564_v33 = vor.u32 %v16595_v2, %v12563_v29  ;;  %v12403_v10 = vld [vmem:[#allocation11 + $0x730] sm:$0xf]  ;;  %v16555_v22 = vld [vmem:[#allocation11 + $0x744] sm:$0xf0] }
 0x2b7   :  { %v12483_v29 = vld [vmem:[#allocation11 + $0x7f0] sm:$0xf]  ;;  %v16575_v2 = vld [vmem:[#allocation11 + $0x804] sm:$0xf0] }
 0x2b8   :  { %v12484_v16 = vor.u32 %v16575_v2, %v12483_v29  ;;  %v16535_v29 = vld [vmem:[#allocation11 + $0x684] sm:$0xf0]  ;;  %v12663_v2 = vld [vmem:[#allocation11 + $0x9a0] sm:$0xf] }
 0x2b9   :  { %2597 = vmatpush.bf16.msra.mxu1 %v12396_v37  ;;  %2615 = vmatpush.bf16.msrb.mxu2 %v12476_v5  ;;  %v16590_v37 = vld [vmem:[#allocation11 + $0x894] sm:$0xf0]  ;;  %v12316_v5 = vor.u32 %v16534_v7, %v12315_v58  ;;  %v16488_v58 = vld [vmem:[#allocation11 + $0x4c4] sm:$0xf0]  ;;  %v12404_v7 = vor.u32 %v16555_v22, %v12403_v10  ;;  %v16572_v10 = vld [vmem:[#allocation11 + $0x7ec] sm:$0xf] }
 0x2ba   :  { %2639 = vmatpush.bf16.msrb.mxu3 %v12240_v35  ;;  %2657 = vmatpush.bf16.msra.mxu0 %v12320_v38  ;;  %v12243_v35 = vld [vmem:[#allocation11 + $0x5b0] sm:$0xf]  ;;  %v16515_v38 = vld [vmem:[#allocation11 + $0x5c4] sm:$0xf0]  ;;  %v12477_v22 = vld [vmem:[#allocation11 + $0x800] sm:$0xf0] }
 0x2bb   :  { %12666 = vmatmul.msk.bf16.vlgmr.msrb.gmra.mxu1 %vm999_vm4, %v18318_v20  ;;  %v12244_v0 = vor.u32 %v16515_v38, %v12243_v35  ;;  %v12972_v35 = vld [vmem:[#allocation11 + $0x2d0] sm:$0xf] }
 0x2bc   :  { %2616 = vmatmul.bf16.vlgmr.msrb.gmra.mxu2 %v18307_v32  ;;  %12667 = vmatmul.msk.bf16.vlgmr.msra.gmra.mxu3 %vm999_vm4, %v18318_v20 }
 0x2bd   :  { %2684 = vmatpush.bf16.msra.mxu2 %v12660_v23  ;;  %2598 = vmatpush.bf16.msra.mxu1 %v12376_v52  ;;  %v12464_v23 = vor.u32 %v16570_v45, %v12463_v3  ;;  %v16585_v52 = vld [vmem:[#allocation11 + $0x864] sm:$0xf0]  ;;  %v13173_v3 = vor.u32 %v16488_v58, %v13172_v26  ;;  %v12163_v45 = vld [vmem:[#allocation11 + $0x4f0] sm:$0xf] }
 0x2be   :  { %2720 = vmatpush.bf16.msrb.mxu0 %v12624_v48  ;;  %2640 = vmatpush.bf16.msrb.mxu3 %v12220_v12  ;;  %v12544_v48 = vor.u32 %v16590_v37, %v12543_v1  ;;  %v12600_v12 = vor.u32 %v16602_v57, %v12597_v17  ;;  %v12524_v49 = vor.u32 %v16585_v52, %v12523_v19  ;;  %v16495_v1 = vld [vmem:[#allocation11 + $0x504] sm:$0xf0]  ;;  %v13152_v37 = vld [vmem:[#allocation11 + $0x480] sm:$0xf]  ;;  %v16582_v57 = vld [vmem:[#allocation11 + $0x84c] sm:$0xf] }
 0x2bf   :  { %2658 = vmatmul.bf16.vlgmr.msra.gmra.mxu0 %v18304_v24  ;;  %v12517_v17 = vld [vmem:[#allocation11 + $0x860] sm:$0xf0]  ;;  %v12164_v31 = vor.u32 %v16495_v1, %v12163_v45  ;;  %v16545_v19 = vld [vmem:[#allocation11 + $0x6e4] sm:$0xf0]  ;;  %v13132_v58 = vld [vmem:[#allocation11 + $0x450] sm:$0xf] }
 0x2c0   :  { %v16615_v45 = vld [vmem:[#allocation11 + $0x984] sm:$0xf0]  ;;  %v13112_v1 = vld [vmem:[#allocation11 + $0x420] sm:$0xf] }
 0x2c1   :  { %2685 = vmatpush.bf16.msra.mxu2 %v12640_v54  ;;  %2599 = vmatpush.bf16.msra.mxu1 %v12356_v47  ;;  %v16597_v54 = vld [vmem:[#allocation11 + $0x8dc] sm:$0xf]  ;;  %v12203_v47 = vld [vmem:[#allocation11 + $0x550] sm:$0xf] }
 0x2c2   :  { %2721 = vmatpush.bf16.msrb.mxu0 %v12604_v13  ;;  %2641 = vmatpush.bf16.msrb.mxu3 %v12200_v18  ;;  %v12577_v13 = vld [vmem:[#allocation11 + $0x8f0] sm:$0xf0]  ;;  %v16592_v18 = vld [vmem:[#allocation11 + $0x8ac] sm:$0xf] }
 0x2c3   :  { %v12580_v59 = vor.u32 %v16597_v54, %v12577_v13  ;;  %v12794_v54 = vld [vmem:[#allocation11 + $0x138] sm:$0xf0]  ;;  %v12364_v13 = vor.u32 %v16545_v19, %v12363_v6  ;;  %v13092_v6 = vld [vmem:[#allocation11 + $0x3f0] sm:$0xf]  ;;  %v16468_v19 = vld [vmem:[#allocation11 + $0x404] sm:$0xf0] }
 0x2c5   :  { %2692 = vmatpush.bf16.msrb.mxu2 %v12304_v25  ;;  %2600 = vmatpush.bf16.msra.mxu1 %v12336_v4  ;;  %v16560_v25 = vld [vmem:[#allocation11 + $0x774] sm:$0xf0]  ;;  %v12183_v4 = vld [vmem:[#allocation11 + $0x520] sm:$0xf] }
 0x2c6   :  { %2722 = vmatpush.bf16.msrb.mxu0 %v12584_v28  ;;  %2642 = vmatpush.bf16.msrb.mxu3 %v12180_v56  ;;  %v12424_v60 = vor.u32 %v16560_v25, %v12423_v51  ;;  %v12557_v28 = vld [vmem:[#allocation11 + $0x8c0] sm:$0xf0]  ;;  %v12184_v11 = vor.u32 %v16500_v55, %v12183_v4  ;;  %v16577_v51 = vld [vmem:[#allocation11 + $0x81c] sm:$0xf]  ;;  %v12343_v25 = vld [vmem:[#allocation11 + $0x6a0] sm:$0xf] }
 0x2c7   :  { %v12560_v56 = vor.u32 %v16592_v18, %v12557_v28  ;;  %v16428_v18 = vld [vmem:[#allocation11 + $0x284] sm:$0xf0]  ;;  %v12344_v28 = vor.u32 %v16540_v39, %v12343_v25  ;;  %v16620_v4 = vld [vmem:[#allocation11 + $0x9b4] sm:$0xf0]  ;;  %v13072_v25 = vld [vmem:[#allocation11 + $0x3c0] sm:$0xf] }
 0x2c8   :  { %v16463_v39 = vld [vmem:[#allocation11 + $0x3d4] sm:$0xf0] }
 0x2c9   :  { %2693 = vmatpush.bf16.msrb.mxu2 %v12284_v61  ;;  %2601 = vmatpush.bf16.msra.mxu1 %v12316_v5  ;;  %v12204_v61 = vor.u32 %v16505_v50, %v12203_v47  ;;  %v16483_v5 = vld [vmem:[#allocation11 + $0x494] sm:$0xf0]  ;;  %v12932_v50 = vld [vmem:[#allocation11 + $0x270] sm:$0xf] }
 0x2ca   :  { %2723 = vmatpush.bf16.msrb.mxu0 %v12564_v33  ;;  %2643 = vmatpush.bf16.msrb.mxu3 %v12160_v14  ;;  %v12537_v33 = vld [vmem:[#allocation11 + $0x890] sm:$0xf0]  ;;  %v16438_v14 = vld [vmem:[#allocation11 + $0x2e4] sm:$0xf0]  ;;  %v12933_v55 = vor.u32 %v16428_v18, %v12932_v50 }
 0x2cb   :  { %v12540_v38 = vor.u32 %v16587_v30, %v12537_v33  ;;  %v12973_v52 = vor.u32 %v16438_v14, %v12972_v35  ;;  %v16423_v30 = vld [vmem:[#allocation11 + $0x254] sm:$0xf0]  ;;  %v16381_v33 = vld [vmem:[#allocation11 + $0xc4] sm:$0xf]  ;;  %v16398_v14 = vld [vmem:[#allocation11 + $0x164] sm:$0xf0] }
 0x2cc   :  { %2602 = vmatmul.bf16.vlgmr.msra.gmra.mxu1 %v18304_v24  ;;  %12668 = vmatmul.msk.bf16.vlgmr.msra.gmra.mxu2 %vm999_vm4, %v18318_v20  ;;  %v16388_v50 = vld [vmem:[#allocation11 + $0x104] sm:$0xf0]  ;;  %v16366_v18 = vld [vmem:[#allocation11 + $0x34] sm:$0xf] }
 0x2cd   :  { %2694 = vmatpush.bf16.msrb.mxu2 %v12264_v15  ;;  %2664 = vmatpush.bf16.msrb.mxu1 %v12620_v36  ;;  %v16550_v15 = vld [vmem:[#allocation11 + $0x714] sm:$0xf0]  ;;  %v16396_v36 = vld [vmem:[#allocation11 + $0x154] sm:$0xf] }
 0x2ce   :  { %2706 = vmatpush.bf16.msra.mxu3 %v12464_v23  ;;  %2724 = vmatpush.bf16.msrb.mxu0 %v12544_v48  ;;  %v12814_v23 = vld [vmem:[#allocation11 + $0x168] sm:$0xf0]  ;;  %v12384_v48 = vor.u32 %v16550_v15, %v12383_v9 }
 0x2cf   :  { %2644 = vmatmul.bf16.vlgmr.msrb.gmra.mxu3 %v18302_v40  ;;  %v12817_v43 = vor.u32 %v16396_v36, %v12814_v23  ;;  %v12892_v36 = vld [vmem:[#allocation11 + $0x210] sm:$0xf]  ;;  %v16418_v23 = vld [vmem:[#allocation11 + $0x224] sm:$0xf0] }
 0x2d1   :  { %2695 = vmatpush.bf16.msrb.mxu2 %v12244_v0  ;;  %2665 = vmatpush.bf16.msrb.mxu1 %v12600_v12  ;;  %v13153_v0 = vor.u32 %v16483_v5, %v13152_v37  ;;  %v12520_v12 = vor.u32 %v16582_v57, %v12517_v17  ;;  %v16473_v37 = vld [vmem:[#allocation11 + $0x434] sm:$0xf0]  ;;  %v12734_v57 = vld [vmem:[#allocation11 + $0xa8] sm:$0xf0] }
 0x2d2   :  { %2707 = vmatpush.bf16.msra.mxu3 %v12444_v44  ;;  %2725 = vmatpush.bf16.msrb.mxu0 %v12524_v49  ;;  %v16433_v44 = vld [vmem:[#allocation11 + $0x2b4] sm:$0xf0]  ;;  %v16391_v49 = vld [vmem:[#allocation11 + $0x124] sm:$0xf] }
 0x2d3   :  { %v12953_v8 = vor.u32 %v16433_v44, %v12952_v21  ;;  %v12797_v47 = vor.u32 %v16391_v49, %v12794_v54  ;;  %v12792_v21 = vld [vmem:[#allocation11 + $0x120] sm:$0xf]  ;;  %v16413_v49 = vld [vmem:[#allocation11 + $0x1f4] sm:$0xf0]  ;;  %v16371_v54 = vld [vmem:[#allocation11 + $0x64] sm:$0xf] }
 0x2d4   :  { %v12872_v44 = vld [vmem:[#allocation11 + $0x1e0] sm:$0xf] }
 0x2d5   :  { %2696 = vmatpush.bf16.msrb.mxu2 %v12224_v42  ;;  %2666 = vmatpush.bf16.msrb.mxu1 %v12580_v59  ;;  %v12497_v42 = vld [vmem:[#allocation11 + $0x830] sm:$0xf0] }
 0x2d6   :  { %2708 = vmatpush.bf16.msra.mxu3 %v12424_v60  ;;  %2726 = vmatpush.bf16.msrb.mxu0 %v12504_v53  ;;  %v12500_v59 = vor.u32 %v16577_v51, %v12497_v42  ;;  %v16386_v60 = vld [vmem:[#allocation11 + $0xf4] sm:$0xf]  ;;  %v12774_v53 = vld [vmem:[#allocation11 + $0x108] sm:$0xf0]  ;;  %v13093_v51 = vor.u32 %v16468_v19, %v13092_v6  ;;  %v12712_v6 = vld [vmem:[#allocation11 + $0x60] sm:$0xf] }
 0x2d7   :  { %v12777_v26 = vor.u32 %v16386_v60, %v12774_v53  ;;  %v12694_v60 = vld [vmem:[#allocation11 + $0x48] sm:$0xf0]  ;;  %v13073_v53 = vor.u32 %v16463_v39, %v13072_v25  ;;  %v16373_v19 = vld [vmem:[#allocation11 + $0x74] sm:$0xf0]  ;;  %v16368_v25 = vld [vmem:[#allocation11 + $0x44] sm:$0xf0] }
 0x2d8   :  { %v16486_v39 = vld [vmem:[#allocation11 + $0x4b4] sm:$0xf] }
 0x2d9   :  { %2697 = vmatpush.bf16.msrb.mxu2 %v12204_v61  ;;  %2667 = vmatpush.bf16.msrb.mxu1 %v12560_v56  ;;  %v12323_v61 = vld [vmem:[#allocation11 + $0x670] sm:$0xf]  ;;  %v16478_v56 = vld [vmem:[#allocation11 + $0x464] sm:$0xf0] }
 0x2da   :  { %2709 = vmatpush.bf16.msra.mxu3 %v12404_v7  ;;  %2727 = vmatpush.bf16.msrb.mxu0 %v12484_v16  ;;  %v12912_v7 = vld [vmem:[#allocation11 + $0x240] sm:$0xf]  ;;  %v12480_v16 = vor.u32 %v16572_v10, %v12477_v22  ;;  %v12324_v9 = vor.u32 %v16535_v29, %v12323_v61  ;;  %v13133_v15 = vor.u32 %v16478_v56, %v13132_v58  ;;  %v13052_v10 = vld [vmem:[#allocation11 + $0x390] sm:$0xf]  ;;  %v16458_v22 = vld [vmem:[#allocation11 + $0x3a4] sm:$0xf0] }
 0x2db   :  { %v12913_v5 = vor.u32 %v16423_v30, %v12912_v7  ;;  %v12697_v29 = vor.u32 %v16366_v18, %v12694_v60  ;;  %v16361_v58 = vld [vmem:[#allocation11 + $0x4] sm:$0xf]  ;;  %v12674_v56 = vld [vmem:[#allocation11 + $0x18] sm:$0xf0]  ;;  %v16476_v7 = vld [vmem:[#allocation11 + $0x454] sm:$0xf]  ;;  %v13053_v30 = vor.u32 %v16458_v22, %v13052_v10 }
 0x2dc   :  { %v16424_v18 = vld [vmem:[#allocation11 + $0x25c] sm:$0xf0]  ;;  %v16363_v10 = vld [vmem:[#allocation11 + $0x14] sm:$0xf0]  ;;  %v16481_v22 = vld [vmem:[#allocation11 + $0x484] sm:$0xf] }
 0x2dd   :  { %2698 = vmatpush.bf16.msrb.mxu2 %v12184_v11  ;;  %2728 = vmatmul.bf16.vlgmr.msrb.gmra.mxu0 %v18307_v32  ;;  %v12664_v11 = vor.u32 %v16620_v4, %v12663_v2  ;;  %v12752_v2 = vld [vmem:[#allocation11 + $0xc0] sm:$0xf]  ;;  %v16383_v4 = vld [vmem:[#allocation11 + $0xd4] sm:$0xf0] }
 0x2de   :  { %3477 = vmatpush.bf16.msra.mxu0 %v13173_v3  ;;  %2668 = vmatpush.bf16.msrb.mxu1 %v12540_v38  ;;  %v12643_v3 = vld [vmem:[#allocation11 + $0x970] sm:$0xf] }
 0x2df   :  { %2710 = vmatpush.bf16.msra.mxu3 %v12384_v48  ;;  %v12812_v38 = vld [vmem:[#allocation11 + $0x150] sm:$0xf]  ;;  %v16376_v48 = vld [vmem:[#allocation11 + $0x94] sm:$0xf]  ;;  %v12644_v17 = vor.u32 %v16615_v45, %v12643_v3  ;;  %v12677_v3 = vor.u32 %v16361_v58, %v12674_v56  ;;  %v16453_v45 = vld [vmem:[#allocation11 + $0x374] sm:$0xf0] }
 0x2e0   :  { %v13054_v58 = vld [vmem:[#allocation11 + $0x3a8] sm:$0xf0]  ;;  %v12820_v56 = vld [vmem:[#allocation11 + $0x158] sm:$0xf] }
 0x2e1   :  { %2699 = vmatpush.bf16.msrb.mxu2 %v12164_v31  ;;  %v13113_v31 = vor.u32 %v16473_v37, %v13112_v1  ;;  %v12732_v37 = vld [vmem:[#allocation11 + $0x90] sm:$0xf] }
 0x2e2   :  { %3478 = vmatpush.bf16.msra.mxu0 %v13153_v0  ;;  %2669 = vmatpush.bf16.msrb.mxu1 %v12520_v12  ;;  %v12813_v0 = vor.u32 %v16398_v14, %v12812_v38  ;;  %v16393_v12 = vld [vmem:[#allocation11 + $0x134] sm:$0xf0]  ;;  %v16471_v38 = vld [vmem:[#allocation11 + $0x424] sm:$0xf]  ;;  %v13114_v14 = vld [vmem:[#allocation11 + $0x438] sm:$0xf0] }
 0x2e3   :  { %2711 = vmatpush.bf16.msra.mxu3 %v12364_v13  ;;  %v12714_v13 = vld [vmem:[#allocation11 + $0x78] sm:$0xf0]  ;;  %v12793_v42 = vor.u32 %v16393_v12, %v12792_v21  ;;  %v13094_v21 = vld [vmem:[#allocation11 + $0x408] sm:$0xf0] }
 0x2e4   :  { %2700 = vmatmul.bf16.vlgmr.msrb.gmra.mxu2 %v18302_v40  ;;  %v12754_v40 = vld [vmem:[#allocation11 + $0xd8] sm:$0xf0] }
 0x2e5   :  { %3443 = vmatpush.bf16.msra.mxu2 %v12973_v52  ;;  %v12757_v35 = vor.u32 %v16381_v33, %v12754_v40  ;;  %v12893_v52 = vor.u32 %v16418_v23, %v12892_v36  ;;  %v12753_v33 = vor.u32 %v16383_v4, %v12752_v2  ;;  %v12980_v40 = vld [vmem:[#allocation11 + $0x2d8] sm:$0xf]  ;;  %v12960_v23 = vld [vmem:[#allocation11 + $0x2a8] sm:$0xf]  ;;  %v16436_v2 = vld [vmem:[#allocation11 + $0x2d4] sm:$0xf] }
 0x2e6   :  { %3485 = vmatpush.bf16.msrb.mxu0 %v12817_v43  ;;  %2670 = vmatpush.bf16.msrb.mxu1 %v12500_v59  ;;  %v12737_v43 = vor.u32 %v16376_v48, %v12734_v57  ;;  %v16408_v59 = vld [vmem:[#allocation11 + $0x1c4] sm:$0xf0]  ;;  %v16434_v48 = vld [vmem:[#allocation11 + $0x2bc] sm:$0xf0]  ;;  %v12974_v4 = vld [vmem:[#allocation11 + $0x2e8] sm:$0xf0] }
 0x2e7   :  { %2712 = vmatpush.bf16.msra.mxu3 %v12344_v28 }
 0x2e9   :  { %3444 = vmatpush.bf16.msra.mxu2 %v12953_v8  ;;  %v12873_v8 = vor.u32 %v16413_v49, %v12872_v44  ;;  %v12940_v44 = vld [vmem:[#allocation11 + $0x278] sm:$0xf]  ;;  %v16429_v49 = vld [vmem:[#allocation11 + $0x28c] sm:$0xf0] }
 0x2ea   :  { %3486 = vmatpush.bf16.msrb.mxu0 %v12797_v47  ;;  %2671 = vmatpush.bf16.msrb.mxu1 %v12480_v16  ;;  %v12717_v47 = vor.u32 %v16371_v54, %v12714_v13  ;;  %v13134_v16 = vld [vmem:[#allocation11 + $0x468] sm:$0xf0]  ;;  %v12713_v54 = vor.u32 %v16373_v19, %v12712_v6  ;;  %v12992_v13 = vld [vmem:[#allocation11 + $0x300] sm:$0xf]  ;;  %v16446_v6 = vld [vmem:[#allocation11 + $0x334] sm:$0xf] }
 0x2eb   :  { %2713 = vmatpush.bf16.msra.mxu3 %v12324_v9  ;;  %v16439_v9 = vld [vmem:[#allocation11 + $0x2ec] sm:$0xf0]  ;;  %v13137_v1 = vor.u32 %v16476_v7, %v13134_v16  ;;  %v12900_v16 = vld [vmem:[#allocation11 + $0x218] sm:$0xf]  ;;  %v13014_v19 = vld [vmem:[#allocation11 + $0x348] sm:$0xf0] }
 0x2ec   :  { %v16399_v7 = vld [vmem:[#allocation11 + $0x16c] sm:$0xf0] }
 0x2ed   :  { %3445 = vmatpush.bf16.msra.mxu2 %v12933_v55  ;;  %2672 = vmatmul.bf16.vlgmr.msrb.gmra.mxu1 %v18307_v32  ;;  %v12772_v32 = vld [vmem:[#allocation11 + $0xf0] sm:$0xf]  ;;  %v12832_v55 = vld [vmem:[#allocation11 + $0x180] sm:$0xf] }
 0x2ee   :  { %3487 = vmatpush.bf16.msrb.mxu0 %v12777_v26  ;;  %2740 = vmatpush.bf16.msra.mxu1 %v12664_v11  ;;  %v12773_v28 = vor.u32 %v16388_v50, %v12772_v32  ;;  %v16403_v26 = vld [vmem:[#allocation11 + $0x194] sm:$0xf0]  ;;  %v16461_v32 = vld [vmem:[#allocation11 + $0x3c4] sm:$0xf]  ;;  %v13074_v50 = vld [vmem:[#allocation11 + $0x3d8] sm:$0xf0] }
 0x2ef   :  { %3457 = vmatpush.bf16.msrb.mxu3 %v13133_v15  ;;  %13190 = vmatmul.msk.bf16.vlgmr.msra.gmra.mxu0 %vm999_vm4, %v18314_v62  ;;  %v12833_v11 = vor.u32 %v16403_v26, %v12832_v55  ;;  %v13032_v15 = vld [vmem:[#allocation11 + $0x360] sm:$0xf]  ;;  %v16456_v26 = vld [vmem:[#allocation11 + $0x394] sm:$0xf] }
 0x2f0   :  { %2714 = vmatmul.bf16.vlgmr.msra.gmra.mxu3 %v18304_v24  ;;  %v12852_v24 = vld [vmem:[#allocation11 + $0x1b0] sm:$0xf]  ;;  %v13033_v36 = vor.u32 %v16453_v45, %v13032_v15  ;;  %v12954_v15 = vld [vmem:[#allocation11 + $0x2b8] sm:$0xf0]  ;;  %v12821_v45 = vor.u32 %v16399_v7, %v12820_v56  ;;  %v16472_v56 = vld [vmem:[#allocation11 + $0x42c] sm:$0xf] }
 0x2f1   :  { %3446 = vmatpush.bf16.msra.mxu2 %v12913_v5  ;;  %v12853_v61 = vor.u32 %v16408_v59, %v12852_v24  ;;  %v16378_v5 = vld [vmem:[#allocation11 + $0xa4] sm:$0xf0] }
 0x2f2   :  { %3488 = vmatpush.bf16.msrb.mxu0 %v12757_v35  ;;  %2741 = vmatpush.bf16.msra.mxu1 %v12644_v17  ;;  %v12981_v35 = vor.u32 %v16439_v9, %v12980_v40  ;;  %v12733_v57 = vor.u32 %v16378_v5, %v12732_v37  ;;  %v13012_v17 = vld [vmem:[#allocation11 + $0x330] sm:$0xf]  ;;  %v12920_v59 = vld [vmem:[#allocation11 + $0x248] sm:$0xf]  ;;  %v12977_v9 = vor.u32 %v16436_v2, %v12974_v4  ;;  %v16451_v37 = vld [vmem:[#allocation11 + $0x364] sm:$0xf] }
 0x2f3   :  { %3458 = vmatpush.bf16.msrb.mxu3 %v13113_v31  ;;  %v16448_v31 = vld [vmem:[#allocation11 + $0x344] sm:$0xf0]  ;;  %v12921_v55 = vor.u32 %v16424_v18, %v12920_v59  ;;  %v13034_v5 = vld [vmem:[#allocation11 + $0x378] sm:$0xf0]  ;;  %v12740_v2 = vld [vmem:[#allocation11 + $0x98] sm:$0xf] }
 0x2f4   :  { %v13013_v12 = vor.u32 %v16448_v31, %v13012_v17  ;;  %v12934_v17 = vld [vmem:[#allocation11 + $0x288] sm:$0xf0]  ;;  %v16379_v4 = vld [vmem:[#allocation11 + $0xac] sm:$0xf0] }
 0x2f5   :  { %3447 = vmatpush.bf16.msra.mxu2 %v12893_v52  ;;  %v12961_v52 = vor.u32 %v16434_v48, %v12960_v23  ;;  %v13037_v48 = vor.u32 %v16451_v37, %v13034_v5 }
 0x2f6   :  { %3429 = vmatpush.bf16.msrb.mxu1 %v12813_v0  ;;  %3489 = vmatpush.bf16.msrb.mxu0 %v12737_v43  ;;  %v13117_v0 = vor.u32 %v16471_v38, %v13114_v14  ;;  %v16466_v43 = vld [vmem:[#allocation11 + $0x3f4] sm:$0xf]  ;;  %v16394_v38 = vld [vmem:[#allocation11 + $0x13c] sm:$0xf0]  ;;  %v12880_v14 = vld [vmem:[#allocation11 + $0x1e8] sm:$0xf] }
 0x2f7   :  { %3459 = vmatpush.bf16.msrb.mxu3 %v13093_v51  ;;  %v12692_v51 = vld [vmem:[#allocation11 + $0x30] sm:$0xf] }
 0x2f8   :  { %v12693_v60 = vor.u32 %v16368_v25, %v12692_v51  ;;  %v12994_v25 = vld [vmem:[#allocation11 + $0x318] sm:$0xf0] }
 0x2f9   :  { %3448 = vmatpush.bf16.msra.mxu2 %v12873_v8  ;;  %v13174_v8 = vld [vmem:[#allocation11 + $0x4c8] sm:$0xf0] }
 0x2fa   :  { %3430 = vmatpush.bf16.msrb.mxu1 %v12793_v42  ;;  %3490 = vmatpush.bf16.msrb.mxu0 %v12717_v47  ;;  %v13097_v42 = vor.u32 %v16466_v43, %v13094_v21  ;;  %v12941_v47 = vor.u32 %v16429_v49, %v12940_v44  ;;  %v16389_v43 = vld [vmem:[#allocation11 + $0x10c] sm:$0xf0]  ;;  %v12860_v21 = vld [vmem:[#allocation11 + $0x1b8] sm:$0xf]  ;;  %v13017_v49 = vor.u32 %v16446_v6, %v13014_v19 }
 0x2fb   :  { %3460 = vmatpush.bf16.msrb.mxu3 %v13073_v53  ;;  %v13177_v53 = vor.u32 %v16486_v39, %v13174_v8  ;;  %v12760_v39 = vld [vmem:[#allocation11 + $0xc8] sm:$0xf]  ;;  %v16384_v8 = vld [vmem:[#allocation11 + $0xdc] sm:$0xf0] }
 0x2fd   :  { %3449 = vmatpush.bf16.msra.mxu2 %v12853_v61  ;;  %12669 = vmatmul.msk.bf16.vlgmr.msra.gmra.mxu1 %vm999_vm4, %v18318_v20  ;;  %v16443_v20 = vld [vmem:[#allocation11 + $0x314] sm:$0xf0]  ;;  %v13077_v61 = vor.u32 %v16461_v32, %v13074_v50  ;;  %v16404_v32 = vld [vmem:[#allocation11 + $0x19c] sm:$0xf0] }
 0x2fe   :  { %3431 = vmatpush.bf16.msrb.mxu1 %v12773_v28  ;;  %3491 = vmatpush.bf16.msrb.mxu0 %v12697_v29  ;;  %v12993_v24 = vor.u32 %v16443_v20, %v12992_v13  ;;  %v12672_v28 = vld [vmem:[#allocation11] sm:$0xf]  ;;  %v13154_v29 = vld [vmem:[#allocation11 + $0x498] sm:$0xf0]  ;;  %v13180_v50 = vld [vmem:[#allocation11 + $0x4b8] sm:$0xf] }
 0x2ff   :  { %3461 = vmatpush.bf16.msrb.mxu3 %v13053_v30  ;;  %v16419_v30 = vld [vmem:[#allocation11 + $0x22c] sm:$0xf0]  ;;  %v13157_v40 = vor.u32 %v16481_v22, %v13154_v29  ;;  %v12914_v13 = vld [vmem:[#allocation11 + $0x258] sm:$0xf0]  ;;  %v16416_v22 = vld [vmem:[#allocation11 + $0x214] sm:$0xf] }
 0x301   :  { %3450 = vmatpush.bf16.msra.mxu2 %v12833_v11  ;;  %v13057_v11 = vor.u32 %v16456_v26, %v13054_v58  ;;  %v13160_v26 = vld [vmem:[#allocation11 + $0x488] sm:$0xf]  ;;  %v16484_v58 = vld [vmem:[#allocation11 + $0x49c] sm:$0xf0] }
 0x302   :  { %3432 = vmatpush.bf16.msrb.mxu1 %v12753_v33  ;;  %3492 = vmatpush.bf16.msrb.mxu0 %v12677_v3  ;;  %v12673_v33 = vor.u32 %v16363_v10, %v12672_v28  ;;  %v16431_v3 = vld [vmem:[#allocation11 + $0x2a4] sm:$0xf]  ;;  %v12761_v28 = vor.u32 %v16384_v8, %v12760_v39  ;;  %v12680_v39 = vld [vmem:[#allocation11 + $0x8] sm:$0xf] }
 0x303   :  { %3462 = vmatpush.bf16.msrb.mxu3 %v13033_v36  ;;  %v16414_v36 = vld [vmem:[#allocation11 + $0x1fc] sm:$0xf0]  ;;  %v12957_v23 = vor.u32 %v16431_v3, %v12954_v15  ;;  %v13161_v15 = vor.u32 %v16484_v58, %v13160_v26  ;;  %v13120_v26 = vld [vmem:[#allocation11 + $0x428] sm:$0xf] }
 0x304   :  { %3451 = vmatmul.bf16.vlgmr.msra.gmra.mxu2 %v18292_v46  ;;  %v16474_v58 = vld [vmem:[#allocation11 + $0x43c] sm:$0xf0] }
 0x305   :  { %3513 = vmatpush.bf16.msrb.mxu2 %v13137_v1  ;;  %3493 = vmatmul.bf16.vlgmr.msrb.gmra.mxu0 %v18290_v27  ;;  %v12901_v1 = vor.u32 %v16419_v30, %v12900_v16  ;;  %v13122_v16 = vld [vmem:[#allocation11 + $0x440] sm:$0xf0]  ;;  %v16397_v30 = vld [vmem:[#allocation11 + $0x15c] sm:$0xf] }
 0x306   :  { %3555 = vmatpush.bf16.msra.mxu0 %v12981_v35  ;;  %3433 = vmatpush.bf16.msrb.mxu1 %v12733_v57  ;;  %v12800_v35 = vld [vmem:[#allocation11 + $0x128] sm:$0xf]  ;;  %v16426_v57 = vld [vmem:[#allocation11 + $0x274] sm:$0xf]  ;;  %v13125_v37 = vor.u32 %v16472_v56, %v13122_v16  ;;  %v16432_v16 = vld [vmem:[#allocation11 + $0x2ac] sm:$0xf] }
 0x307   :  { %3463 = vmatpush.bf16.msrb.mxu3 %v13013_v12  ;;  %v12801_v31 = vor.u32 %v16394_v38, %v12800_v35  ;;  %v16409_v12 = vld [vmem:[#allocation11 + $0x1cc] sm:$0xf0]  ;;  %v12937_v44 = vor.u32 %v16426_v57, %v12934_v17  ;;  %v16467_v35 = vld [vmem:[#allocation11 + $0x3fc] sm:$0xf]  ;;  %v16406_v57 = vld [vmem:[#allocation11 + $0x1b4] sm:$0xf] }
 0x308   :  { %v12861_v51 = vor.u32 %v16409_v12, %v12860_v21  ;;  %v12854_v17 = vld [vmem:[#allocation11 + $0x1c8] sm:$0xf0] }
 0x309   :  { %3514 = vmatpush.bf16.msrb.mxu2 %v13117_v0  ;;  %v12881_v0 = vor.u32 %v16414_v36, %v12880_v14  ;;  %v13102_v14 = vld [vmem:[#allocation11 + $0x410] sm:$0xf0]  ;;  %v16392_v36 = vld [vmem:[#allocation11 + $0x12c] sm:$0xf]  ;;  %v12857_v12 = vor.u32 %v16406_v57, %v12854_v17  ;;  %v16447_v17 = vld [vmem:[#allocation11 + $0x33c] sm:$0xf] }
 0x30a   :  { %3556 = vmatpush.bf16.msra.mxu0 %v12961_v52  ;;  %3434 = vmatpush.bf16.msrb.mxu1 %v12713_v54  ;;  %v12780_v52 = vld [vmem:[#allocation11 + $0xf8] sm:$0xf]  ;;  %v16421_v54 = vld [vmem:[#allocation11 + $0x244] sm:$0xf]  ;;  %v13105_v19 = vor.u32 %v16467_v35, %v13102_v14  ;;  %v12942_v57 = vld [vmem:[#allocation11 + $0x290] sm:$0xf0] }
 0x30b   :  { %3464 = vmatpush.bf16.msrb.mxu3 %v12993_v24  ;;  %v12781_v20 = vor.u32 %v16389_v43, %v12780_v52  ;;  %v16489_v24 = vld [vmem:[#allocation11 + $0x4cc] sm:$0xf0]  ;;  %v12917_v59 = vor.u32 %v16421_v54, %v12914_v13  ;;  %v16462_v43 = vld [vmem:[#allocation11 + $0x3cc] sm:$0xf]  ;;  %v12782_v54 = vld [vmem:[#allocation11 + $0x110] sm:$0xf0] }
 0x30c   :  { %v13181_v29 = vor.u32 %v16489_v24, %v13180_v50  ;;  %v16479_v50 = vld [vmem:[#allocation11 + $0x46c] sm:$0xf0]  ;;  %v13100_v35 = vld [vmem:[#allocation11 + $0x3f8] sm:$0xf] }
 0x30d   :  { %3515 = vmatpush.bf16.msrb.mxu2 %v13097_v42  ;;  %v16441_v42 = vld [vmem:[#allocation11 + $0x304] sm:$0xf] }
 0x30e   :  { %3557 = vmatpush.bf16.msra.mxu0 %v12941_v47  ;;  %3435 = vmatpush.bf16.msrb.mxu1 %v12693_v60  ;;  %v12840_v47 = vld [vmem:[#allocation11 + $0x188] sm:$0xf]  ;;  %v12997_v18 = vor.u32 %v16441_v42, %v12994_v25  ;;  %v16477_v60 = vld [vmem:[#allocation11 + $0x45c] sm:$0xf]  ;;  %v16401_v42 = vld [vmem:[#allocation11 + $0x184] sm:$0xf] }
 0x30f   :  { %3533 = vmatpush.bf16.msra.mxu3 %v13177_v53  ;;  %v13142_v53 = vld [vmem:[#allocation11 + $0x470] sm:$0xf0]  ;;  %v12841_v10 = vor.u32 %v16404_v32, %v12840_v47  ;;  %v12834_v25 = vld [vmem:[#allocation11 + $0x198] sm:$0xf0]  ;;  %v16364_v47 = vld [vmem:[#allocation11 + $0x1c] sm:$0xf0] }
 0x310   :  { %3465 = vmatmul.bf16.vlgmr.msrb.gmra.mxu3 %v18294_v41  ;;  %v13140_v32 = vld [vmem:[#allocation11 + $0x458] sm:$0xf] }
 0x311   :  { %3516 = vmatpush.bf16.msrb.mxu2 %v13077_v61  ;;  %v12894_v61 = vld [vmem:[#allocation11 + $0x228] sm:$0xf0] }
 0x312   :  { %3558 = vmatpush.bf16.msra.mxu0 %v12921_v55  ;;  %3436 = vmatpush.bf16.msrb.mxu1 %v12673_v33  ;;  %v13145_v55 = vor.u32 %v16477_v60, %v13142_v53  ;;  %v12897_v7 = vor.u32 %v16416_v22, %v12894_v61  ;;  %v12822_v33 = vld [vmem:[#allocation11 + $0x170] sm:$0xf0]  ;;  %v16437_v60 = vld [vmem:[#allocation11 + $0x2dc] sm:$0xf]  ;;  %v16382_v61 = vld [vmem:[#allocation11 + $0xcc] sm:$0xf] }
 0x313   :  { %3534 = vmatpush.bf16.msra.mxu3 %v13157_v40  ;;  %v12741_v40 = vor.u32 %v16379_v4, %v12740_v2  ;;  %v12825_v5 = vor.u32 %v16397_v30, %v12822_v33  ;;  %v12982_v53 = vld [vmem:[#allocation11 + $0x2f0] sm:$0xf0]  ;;  %v12681_v2 = vor.u32 %v16364_v47, %v12680_v39  ;;  %v13141_v4 = vor.u32 %v16479_v50, %v13140_v32  ;;  %v12962_v30 = vld [vmem:[#allocation11 + $0x2c0] sm:$0xf0]  ;;  %v16452_v33 = vld [vmem:[#allocation11 + $0x36c] sm:$0xf] }
 0x314   :  { %v13062_v22 = vld [vmem:[#allocation11 + $0x3b0] sm:$0xf0] }
 0x315   :  { %3517 = vmatpush.bf16.msrb.mxu2 %v13057_v11  ;;  %3437 = vmatmul.bf16.vlgmr.msrb.gmra.mxu1 %v18290_v27  ;;  %v12874_v11 = vld [vmem:[#allocation11 + $0x1f8] sm:$0xf0]  ;;  %v12702_v39 = vld [vmem:[#allocation11 + $0x50] sm:$0xf0] }
 0x316   :  { %3499 = vmatpush.bf16.msra.mxu1 %v12977_v9  ;;  %3559 = vmatpush.bf16.msra.mxu0 %v12901_v1  ;;  %v16411_v9 = vld [vmem:[#allocation11 + $0x1e4] sm:$0xf]  ;;  %v16374_v1 = vld [vmem:[#allocation11 + $0x7c] sm:$0xf0] }
 0x317   :  { %3541 = vmatpush.bf16.msrb.mxu3 %v12821_v45  ;;  %v12720_v45 = vld [vmem:[#allocation11 + $0x68] sm:$0xf]  ;;  %v12877_v38 = vor.u32 %v16411_v9, %v12874_v11  ;;  %v13042_v9 = vld [vmem:[#allocation11 + $0x380] sm:$0xf0]  ;;  %v16377_v11 = vld [vmem:[#allocation11 + $0x9c] sm:$0xf] }
 0x318   :  { %v2477_v3 = vpop.f32.mrf.mxu1 }
 0x319   :  { %3518 = vmatpush.bf16.msrb.mxu2 %v13037_v48  ;;  %v12721_v48 = vor.u32 %v16374_v1, %v12720_v45  ;;  %v18351_v6 = vpop.f32.mrf.mxu0  ;;  %v13121_v1 = vor.u32 %v16474_v58, %v13120_v26  ;;  %v12682_v26 = vld [vmem:[#allocation11 + $0x20] sm:$0xf0]  ;;  %v13168_v58 = vld [vmem:[#allocation11 + $0x490] sm:$0xf] }
 0x31a   :  { %3500 = vmatpush.bf16.msra.mxu1 %v12957_v23  ;;  %3560 = vmatpush.bf16.msra.mxu0 %v12881_v0  ;;  %v12802_v23 = vld [vmem:[#allocation11 + $0x140] sm:$0xf0]  ;;  %v16369_v0 = vld [vmem:[#allocation11 + $0x4c] sm:$0xf0] }
 0x31b   :  { %3542 = vmatpush.bf16.msrb.mxu3 %v12801_v31  ;;  %v12700_v31 = vld [vmem:[#allocation11 + $0x38] sm:$0xf]  ;;  %v12805_v52 = vor.u32 %v16392_v36, %v12802_v23  ;;  %v13045_v36 = vor.u32 %v16452_v33, %v13042_v9  ;;  %v13337_v33 = vld [vmem:[#allocation11 + $0xb10] sm:$0xf] }
 0x31d   :  { %3519 = vmatpush.bf16.msrb.mxu2 %v13017_v49  ;;  %v16387_v49 = vld [vmem:[#allocation11 + $0xfc] sm:$0xf] }
 0x31e   :  { %3501 = vmatpush.bf16.msra.mxu1 %v12937_v44  ;;  %3561 = vmatpush.bf16.msra.mxu0 %v12861_v51  ;;  %v2491_v21 = vpop.f32.mrf.mxu2  ;;  %v13082_v44 = vld [vmem:[#allocation11 + $0x3e0] sm:$0xf0]  ;;  %v12701_v51 = vor.u32 %v16369_v0, %v12700_v31  ;;  %v13022_v31 = vld [vmem:[#allocation11 + $0x350] sm:$0xf0]  ;;  %v16372_v0 = vld [vmem:[#allocation11 + $0x6c] sm:$0xf] }
 0x31f   :  { %3543 = vmatpush.bf16.msrb.mxu3 %v12781_v20  ;;  %v2492_v13 = vadd.f32 %v2491_v21, %v2477_v3  ;;  %v2505_v20 = vpop.f32.mrf.mxu3  ;;  %v12742_v3 = vld [vmem:[#allocation11 + $0xb0] sm:$0xf0]  ;;  %v13080_v21 = vld [vmem:[#allocation11 + $0x3c8] sm:$0xf] }
 0x320   :  { %13191 = vmatmul.msk.bf16.vlgmr.msra.gmra.mxu3 %vm999_vm4, %v18314_v62  ;;  %v18353_v8 = vpop.f32.mrf.mxu1  ;;  %v12745_v23 = vor.u32 %v16377_v11, %v12742_v3  ;;  %v16658_v11 = vld [vmem:[#allocation11 + $0xb24] sm:$0xf0] }
 0x321   :  { %3520 = vmatpush.bf16.msrb.mxu2 %v12997_v18  ;;  %v2506_v24 = vadd.f32 %v2505_v20, %v2492_v13  ;;  %v12785_v18 = vor.u32 %v16387_v49, %v12782_v54  ;;  %v16422_v54 = vld [vmem:[#allocation11 + $0x24c] sm:$0xf]  ;;  %v12922_v13 = vld [vmem:[#allocation11 + $0x260] sm:$0xf0]  ;;  %v13040_v3 = vld [vmem:[#allocation11 + $0x368] sm:$0xf] }
 0x322   :  { %3502 = vmatpush.bf16.msra.mxu1 %v12917_v59  ;;  %3562 = vmatpush.bf16.msra.mxu0 %v12841_v10  ;;  %v13085_v59 = vor.u32 %v16462_v43, %v13082_v44  ;;  %v12837_v10 = vor.u32 %v16401_v42, %v12834_v25  ;;  %v13025_v44 = vor.u32 %v16447_v17, %v13022_v31  ;;  %v16442_v20 = vld [vmem:[#allocation11 + $0x30c] sm:$0xf]  ;;  %v13002_v42 = vld [vmem:[#allocation11 + $0x320] sm:$0xf0]  ;;  %v16367_v25 = vld [vmem:[#allocation11 + $0x3c] sm:$0xf] }
 0x323   :  { %3544 = vmatpush.bf16.msrb.mxu3 %v12761_v28  ;;  %v16457_v28 = vld [vmem:[#allocation11 + $0x39c] sm:$0xf]  ;;  %v12968_v17 = vld [vmem:[#allocation11 + $0x2b0] sm:$0xf]  ;;  %v16435_v31 = vld [vmem:[#allocation11 + $0x2c4] sm:$0xf0] }
 0x324   :  { %3521 = vmatmul.bf16.vlgmr.msrb.gmra.mxu2 %v18294_v41  ;;  %v13065_v56 = vor.u32 %v16457_v28, %v13062_v22  ;;  %v16459_v28 = vld [vmem:[#allocation11 + $0x3ac] sm:$0xf0] }
 0x325   :  { %3589 = vmatpush.bf16.msra.mxu2 %v13181_v29  ;;  %3563 = vmatmul.bf16.vlgmr.msra.gmra.mxu0 %v18292_v46  ;;  %v12762_v29 = vld [vmem:[#allocation11 + $0xe0] sm:$0xf0] }
 0x326   :  { %3625 = vmatpush.bf16.msrb.mxu0 %v13145_v55  ;;  %3503 = vmatpush.bf16.msra.mxu1 %v12897_v7  ;;  %v12985_v55 = vor.u32 %v16437_v60, %v12982_v53  ;;  %v12765_v7 = vor.u32 %v16382_v61, %v12762_v29  ;;  %v12925_v60 = vor.u32 %v16422_v54, %v12922_v13  ;;  %v13060_v53 = vld [vmem:[#allocation11 + $0x398] sm:$0xf] }
 0x327   :  { %3545 = vmatpush.bf16.msrb.mxu3 %v12741_v40  ;;  %v18355_v40 = vpop.f32.mrf.mxu2  ;;  %v18359_v45 = vpop.f32.mrf.mxu3  ;;  %v13005_v61 = vor.u32 %v16442_v20, %v13002_v42  ;;  %v12705_v29 = vor.u32 %v16367_v25, %v12702_v39  ;;  %v12969_v13 = vor.u32 %v16435_v31, %v12968_v17  ;;  %v12948_v20 = vld [vmem:[#allocation11 + $0x280] sm:$0xf]  ;;  %v16420_v17 = vld [vmem:[#allocation11 + $0x234] sm:$0xf0] }
 0x329   :  { %3590 = vmatpush.bf16.msra.mxu2 %v13161_v15  ;;  %v18357_v15 = vpop.f32.mrf.mxu0 }
 0x32a   :  { %3626 = vmatpush.bf16.msrb.mxu0 %v13125_v37  ;;  %3504 = vmatpush.bf16.msra.mxu1 %v12877_v38  ;;  %v2519_v37 = vpop.f32.mrf.mxu1  ;;  %v16469_v38 = vld [vmem:[#allocation11 + $0x40c] sm:$0xf0] }
 0x32b   :  { %3546 = vmatpush.bf16.msrb.mxu3 %v12721_v48  ;;  %v18361_v14 = vadd.f32 %v2519_v37, %v2506_v24  ;;  %v16427_v48 = vld [vmem:[#allocation11 + $0x27c] sm:$0xf]  ;;  %v13188_v24 = vld [vmem:[#allocation11 + $0x4c0] sm:$0xf] }
 0x32c   :  { %v12945_v43 = vor.u32 %v16427_v48, %v12942_v57  ;;  %v13338_v48 = vor.u32 %v16658_v11, %v13337_v33  ;;  %v16643_v33 = vld [vmem:[#allocation11 + $0xa94] sm:$0xf0] }
 0x32d   :  { %3597 = vmatpush.bf16.msrb.mxu2 %v12825_v5  ;;  %v12965_v5 = vor.u32 %v16432_v16, %v12962_v30  ;;  %v12988_v16 = vld [vmem:[#allocation11 + $0x2e0] sm:$0xf]  ;;  %v16440_v30 = vld [vmem:[#allocation11 + $0x2f4] sm:$0xf0] }
 0x32e   :  { %3627 = vmatpush.bf16.msrb.mxu0 %v13105_v19  ;;  %3505 = vmatpush.bf16.msra.mxu1 %v12857_v12  ;;  %v12722_v19 = vld [vmem:[#allocation11 + $0x80] sm:$0xf0]  ;;  %v16464_v12 = vld [vmem:[#allocation11 + $0x3dc] sm:$0xf0] }
 0x32f   :  { %3547 = vmatpush.bf16.msrb.mxu3 %v12701_v51  ;;  %v12725_v49 = vor.u32 %v16372_v0, %v12722_v19  ;;  %v2547_v51 = vpop.f32.mrf.mxu2  ;;  %v2561_v32 = vpop.f32.mrf.mxu3  ;;  %v13081_v50 = vor.u32 %v16464_v12, %v13080_v21  ;;  %v13317_v0 = vld [vmem:[#allocation11 + $0xae0] sm:$0xf]  ;;  %v16449_v21 = vld [vmem:[#allocation11 + $0x34c] sm:$0xf0] }
 0x330   :  { %v2548_v47 = vadd.f32 %v2547_v51, %v18351_v6  ;;  %v16362_v6 = vld [vmem:[#allocation11 + $0xc] sm:$0xf] }
 0x331   :  { %3598 = vmatpush.bf16.msrb.mxu2 %v12805_v52  ;;  %v13101_v52 = vor.u32 %v16469_v38, %v13100_v35  ;;  %v12685_v37 = vor.u32 %v16362_v6, %v12682_v26  ;;  %v12882_v35 = vld [vmem:[#allocation11 + $0x200] sm:$0xf0]  ;;  %v12928_v26 = vld [vmem:[#allocation11 + $0x250] sm:$0xf] }
 0x332   :  { %3628 = vmatpush.bf16.msrb.mxu0 %v13085_v59  ;;  %3506 = vmatpush.bf16.msra.mxu1 %v12837_v10  ;;  %v16490_v59 = vld [vmem:[#allocation11 + $0x4d4] sm:$0xf0]  ;;  %v18370_v10 = vpop.f32.mrf.mxu0  ;;  %v2562_v22 = vadd.f32 %v2561_v32, %v2548_v47  ;;  %v13297_v32 = vld [vmem:[#allocation11 + $0xab0] sm:$0xf] }
 0x333   :  { %3548 = vmatpush.bf16.msrb.mxu3 %v12681_v2  ;;  %v16417_v2 = vld [vmem:[#allocation11 + $0x21c] sm:$0xf]  ;;  %v16430_v47 = vld [vmem:[#allocation11 + $0x294] sm:$0xf0] }
 0x334   :  { %13192 = vmatmul.msk.bf16.vlgmr.msra.gmra.mxu2 %vm999_vm4, %v18314_v62 }
 0x335   :  { %3599 = vmatpush.bf16.msrb.mxu2 %v12785_v18  ;;  %3507 = vmatmul.bf16.vlgmr.msra.gmra.mxu1 %v18292_v46  ;;  %v18368_v18 = vpop.f32.mrf.mxu1 }
 0x336   :  { %3569 = vmatpush.bf16.msrb.mxu1 %v13141_v4  ;;  %3629 = vmatpush.bf16.msrb.mxu0 %v13065_v56  ;;  %v12902_v4 = vld [vmem:[#allocation11 + $0x230] sm:$0xf0]  ;;  %v16485_v56 = vld [vmem:[#allocation11 + $0x4a4] sm:$0xf0] }
 0x337   :  { %3611 = vmatpush.bf16.msra.mxu3 %v12985_v55  ;;  %v13189_v55 = vor.u32 %v16490_v59, %v13188_v24  ;;  %v12905_v9 = vor.u32 %v16417_v2, %v12902_v4  ;;  %v13169_v38 = vor.u32 %v16485_v56, %v13168_v58  ;;  %v18379_v42 = vpop.f32.mrf.mxu2  ;;  %v13000_v59 = vld [vmem:[#allocation11 + $0x308] sm:$0xf]  ;;  %v13148_v2 = vld [vmem:[#allocation11 + $0x460] sm:$0xf]  ;;  %v16480_v4 = vld [vmem:[#allocation11 + $0x474] sm:$0xf0] }
 0x338   :  { %3549 = vmatmul.bf16.vlgmr.msrb.gmra.mxu3 %v18290_v27  ;;  %v16425_v58 = vld [vmem:[#allocation11 + $0x264] sm:$0xf0]  ;;  %v13149_v11 = vor.u32 %v16480_v4, %v13148_v2  ;;  %v12788_v4 = vld [vmem:[#allocation11 + $0x100] sm:$0xf] }
 0x339   :  { %3600 = vmatpush.bf16.msrb.mxu2 %v12765_v7  ;;  %v13061_v7 = vor.u32 %v16459_v28, %v13060_v53  ;;  %v16402_v53 = vld [vmem:[#allocation11 + $0x18c] sm:$0xf]  ;;  %v12842_v28 = vld [vmem:[#allocation11 + $0x1a0] sm:$0xf0]  ;;  %v16465_v2 = vld [vmem:[#allocation11 + $0x3e4] sm:$0xf0] }
 0x33a   :  { %3570 = vmatpush.bf16.msrb.mxu1 %v13121_v1  ;;  %3630 = vmatpush.bf16.msrb.mxu0 %v13045_v36  ;;  %v16454_v1 = vld [vmem:[#allocation11 + $0x37c] sm:$0xf0]  ;;  %v12989_v36 = vor.u32 %v16440_v30, %v12988_v16  ;;  %v18377_v51 = vpop.f32.mrf.mxu0 }
 0x33b   :  { %3612 = vmatpush.bf16.msra.mxu3 %v12965_v5  ;;  %v16412_v5 = vld [vmem:[#allocation11 + $0x1ec] sm:$0xf]  ;;  %v13041_v57 = vor.u32 %v16454_v1, %v13040_v3  ;;  %v13277_v30 = vld [vmem:[#allocation11 + $0xa80] sm:$0xf]  ;;  %v13162_v1 = vld [vmem:[#allocation11 + $0x4a0] sm:$0xf0] }
 0x33c   :  { %v12885_v19 = vor.u32 %v16412_v5, %v12882_v35  ;;  %v16482_v3 = vld [vmem:[#allocation11 + $0x48c] sm:$0xf]  ;;  %v12929_v5 = vor.u32 %v16425_v58, %v12928_v26  ;;  %v16475_v35 = vld [vmem:[#allocation11 + $0x444] sm:$0xf0]  ;;  %v12868_v26 = vld [vmem:[#allocation11 + $0x1c0] sm:$0xf] }
 0x33d   :  { %3601 = vmatpush.bf16.msrb.mxu2 %v12745_v23  ;;  %v18372_v23 = vpop.f32.mrf.mxu3  ;;  %v2575_v12 = vpop.f32.mrf.mxu1  ;;  %v13165_v31 = vor.u32 %v16482_v3, %v13162_v1  ;;  %v16410_v58 = vld [vmem:[#allocation11 + $0x1d4] sm:$0xf0]  ;;  %v13068_v3 = vld [vmem:[#allocation11 + $0x3a0] sm:$0xf] }
 0x33e   :  { %3571 = vmatpush.bf16.msrb.mxu1 %v13101_v52  ;;  %3631 = vmatpush.bf16.msrb.mxu0 %v13025_v44  ;;  %v16653_v52 = vld [vmem:[#allocation11 + $0xaf4] sm:$0xf0]  ;;  %v16407_v44 = vld [vmem:[#allocation11 + $0x1bc] sm:$0xf]  ;;  %v18375_v54 = vadd.f32 %v2575_v12, %v2562_v22  ;;  %v12869_v1 = vor.u32 %v16410_v58, %v12868_v26  ;;  %v12728_v26 = vld [vmem:[#allocation11 + $0x70] sm:$0xf] }
 0x33f   :  { %3613 = vmatpush.bf16.msra.mxu3 %v12945_v43  ;;  %v13020_v43 = vld [vmem:[#allocation11 + $0x338] sm:$0xf]  ;;  %v13318_v25 = vor.u32 %v16653_v52, %v13317_v0  ;;  %v16487_v22 = vld [vmem:[#allocation11 + $0x4bc] sm:$0xf]  ;;  %v13257_v0 = vld [vmem:[#allocation11 + $0xa50] sm:$0xf] }
 0x340   :  { %v13021_v39 = vor.u32 %v16449_v21, %v13020_v43  ;;  %v2617_v43 = vpop.f32.mrf.mxu2  ;;  %v16375_v58 = vld [vmem:[#allocation11 + $0x84] sm:$0xf0] }
 0x341   :  { %3602 = vmatpush.bf16.msrb.mxu2 %v12725_v49  ;;  %v12862_v49 = vld [vmem:[#allocation11 + $0x1d0] sm:$0xf0] }
 0x342   :  { %3572 = vmatpush.bf16.msrb.mxu1 %v13081_v50  ;;  %3632 = vmatpush.bf16.msrb.mxu0 %v13005_v61  ;;  %v16648_v50 = vld [vmem:[#allocation11 + $0xac4] sm:$0xf0]  ;;  %v12865_v24 = vor.u32 %v16407_v44, %v12862_v49  ;;  %v13182_v61 = vld [vmem:[#allocation11 + $0x4d0] sm:$0xf0]  ;;  %v18386_v52 = vpop.f32.mrf.mxu0  ;;  %v13108_v44 = vld [vmem:[#allocation11 + $0x400] sm:$0xf] }
 0x343   :  { %3614 = vmatpush.bf16.msra.mxu3 %v12925_v60  ;;  %v16444_v60 = vld [vmem:[#allocation11 + $0x31c] sm:$0xf0]  ;;  %v13298_v6 = vor.u32 %v16648_v50, %v13297_v32  ;;  %v13185_v16 = vor.u32 %v16487_v22, %v13182_v61  ;;  %v16415_v32 = vld [vmem:[#allocation11 + $0x204] sm:$0xf0]  ;;  %v13088_v22 = vld [vmem:[#allocation11 + $0x3d0] sm:$0xf] }
 0x345   :  { %3603 = vmatpush.bf16.msrb.mxu2 %v12705_v29  ;;  %3633 = vmatmul.bf16.vlgmr.msrb.gmra.mxu0 %v18294_v41  ;;  %v12949_v29 = vor.u32 %v16430_v47, %v12948_v20  ;;  %v18382_v56 = vpop.f32.mrf.mxu3  ;;  %v12808_v20 = vld [vmem:[#allocation11 + $0x130] sm:$0xf] }
 0x346   :  { %3701 = vmatpush.bf16.msra.mxu0 %v13189_v55  ;;  %3573 = vmatpush.bf16.msrb.mxu1 %v13061_v7  ;;  %v13001_v55 = vor.u32 %v16444_v60, %v13000_v59  ;;  %v12845_v7 = vor.u32 %v16402_v53, %v12842_v28  ;;  %v12888_v47 = vld [vmem:[#allocation11 + $0x1f0] sm:$0xf]  ;;  %v16633_v59 = vld [vmem:[#allocation11 + $0xa34] sm:$0xf0] }
 0x347   :  { %3615 = vmatpush.bf16.msra.mxu3 %v12905_v9  ;;  %v18384_v9 = vpop.f32.mrf.mxu1 }
 0x349   :  { %3604 = vmatpush.bf16.msrb.mxu2 %v12685_v37  ;;  %v13128_v37 = vld [vmem:[#allocation11 + $0x430] sm:$0xf] }
 0x34a   :  { %3702 = vmatpush.bf16.msra.mxu0 %v13169_v38  ;;  %3574 = vmatpush.bf16.msrb.mxu1 %v13041_v57  ;;  %v12828_v38 = vld [vmem:[#allocation11 + $0x160] sm:$0xf]  ;;  %v13129_v21 = vor.u32 %v16475_v35, %v13128_v37  ;;  %v12768_v37 = vld [vmem:[#allocation11 + $0xd0] sm:$0xf]  ;;  %v18397_v35 = vpop.f32.mrf.mxu0 }
 0x34b   :  { %3616 = vmatpush.bf16.msra.mxu3 %v12885_v19  ;;  %v12908_v57 = vld [vmem:[#allocation11 + $0x220] sm:$0xf]  ;;  %v16638_v19 = vld [vmem:[#allocation11 + $0xa64] sm:$0xf0] }
 0x34c   :  { %3605 = vmatmul.bf16.vlgmr.msrb.gmra.mxu2 %v18290_v27  ;;  %v12909_v49 = vor.u32 %v16420_v17, %v12908_v57  ;;  %v16405_v57 = vld [vmem:[#allocation11 + $0x1a4] sm:$0xf0]  ;;  %v13197_v17 = vld [vmem:[#allocation11 + $0x9c0] sm:$0xf] }
 0x34d   :  { %3667 = vmatpush.bf16.msra.mxu2 %v12989_v36  ;;  %v16400_v36 = vld [vmem:[#allocation11 + $0x174] sm:$0xf0]  ;;  %v18392_v50 = vpop.f32.mrf.mxu3 }
 0x34e   :  { %4552 = vmatpush.bf16.msrb.mxu0 %v13338_v48  ;;  %3575 = vmatpush.bf16.msrb.mxu1 %v13021_v39  ;;  %v13278_v48 = vor.u32 %v16643_v33, %v13277_v30  ;;  %v12829_v12 = vor.u32 %v16400_v36, %v12828_v38  ;;  %v13258_v39 = vor.u32 %v16638_v19, %v13257_v0  ;;  %v16628_v30 = vld [vmem:[#allocation11 + $0xa04] sm:$0xf0]  ;;  %v18399_v38 = vpop.f32.mrf.mxu2  ;;  %v16623_v0 = vld [vmem:[#allocation11 + $0x9d4] sm:$0xf0]  ;;  %v13657_v19 = vld [vmem:[#allocation11 + $0xe10] sm:$0xf] }
 0x34f   :  { %3617 = vmatpush.bf16.msra.mxu3 %v12865_v24  ;;  %v13237_v24 = vld [vmem:[#allocation11 + $0xa20] sm:$0xf]  ;;  %v2603_v60 = vpop.f32.mrf.mxu1  ;;  %v13089_v33 = vor.u32 %v16465_v2, %v13088_v22  ;;  %v16691_v22 = vld [vmem:[#allocation11 + $0xc64] sm:$0xf] }
 0x350   :  { %v2604_v61 = vadd.f32 %v2603_v60, %v18370_v10  ;;  %v16460_v10 = vld [vmem:[#allocation11 + $0x3b4] sm:$0xf0]  ;;  %v13028_v2 = vld [vmem:[#allocation11 + $0x340] sm:$0xf] }
 0x351   :  { %3668 = vmatpush.bf16.msra.mxu2 %v12969_v13  ;;  %v16470_v13 = vld [vmem:[#allocation11 + $0x414] sm:$0xf0] }
 0x352   :  { %4553 = vmatpush.bf16.msrb.mxu0 %v13318_v25  ;;  %3576 = vmatpush.bf16.msrb.mxu1 %v13001_v55  ;;  %v16395_v25 = vld [vmem:[#allocation11 + $0x144] sm:$0xf0]  ;;  %v13109_v53 = vor.u32 %v16470_v13, %v13108_v44  ;;  %v13238_v55 = vor.u32 %v16633_v59, %v13237_v24  ;;  %v13499_v13 = vld [vmem:[#allocation11 + $0xca8] sm:$0xf0]  ;;  %v12748_v24 = vld [vmem:[#allocation11 + $0xa0] sm:$0xf] }
 0x353   :  { %3618 = vmatpush.bf16.msra.mxu3 %v12845_v7  ;;  %v12809_v28 = vor.u32 %v16395_v25, %v12808_v20  ;;  %v18395_v7 = vadd.f32 %v2617_v43, %v2604_v61  ;;  %v16738_v43 = vld [vmem:[#allocation11 + $0xe24] sm:$0xf0]  ;;  %v13048_v25 = vld [vmem:[#allocation11 + $0x370] sm:$0xf]  ;;  %v16380_v59 = vld [vmem:[#allocation11 + $0xb4] sm:$0xf0] }
 0x354   :  { %v13479_v61 = vld [vmem:[#allocation11 + $0xc78] sm:$0xf0] }
 0x355   :  { %3669 = vmatpush.bf16.msra.mxu2 %v12949_v29  ;;  %3577 = vmatmul.bf16.vlgmr.msrb.gmra.mxu1 %v18294_v41  ;;  %v12889_v29 = vor.u32 %v16415_v32, %v12888_v47  ;;  %v13198_v47 = vor.u32 %v16623_v0, %v13197_v17  ;;  %v13658_v32 = vor.u32 %v16738_v43, %v13657_v19  ;;  %v13697_v0 = vld [vmem:[#allocation11 + $0xe70] sm:$0xf]  ;;  %v16748_v19 = vld [vmem:[#allocation11 + $0xe84] sm:$0xf0] }
 0x356   :  { %4554 = vmatpush.bf16.msrb.mxu0 %v13298_v6  ;;  %3645 = vmatpush.bf16.msra.mxu1 %v13185_v16  ;;  %v16390_v6 = vld [vmem:[#allocation11 + $0x114] sm:$0xf0]  ;;  %v13217_v16 = vld [vmem:[#allocation11 + $0x9f0] sm:$0xf] }
 0x357   :  { %3681 = vmatpush.bf16.msrb.mxu3 %v13149_v11  ;;  %13194 = vmatmul.msk.bf16.vlgmr.msra.gmra.mxu0 %vm999_vm4, %v18314_v62  ;;  %v12789_v11 = vor.u32 %v16390_v6, %v12788_v4  ;;  %v13218_v36 = vor.u32 %v16628_v30, %v13217_v16  ;;  %v16450_v4 = vld [vmem:[#allocation11 + $0x354] sm:$0xf0]  ;;  %v18409_v16 = vrot.slane %v18290_v27, 1  ;;  %v13482_v30 = vor.u32 %v16691_v22, %v13479_v61  ;;  %v13497_v22 = vld [vmem:[#allocation11 + $0xc90] sm:$0xf] }
 0x358   :  { %3619 = vmatmul.bf16.vlgmr.msra.gmra.mxu3 %v18292_v46  ;;  %v13577_v61 = vld [vmem:[#allocation11 + $0xd50] sm:$0xf] }
 0x359   :  { %3670 = vmatpush.bf16.msra.mxu2 %v12929_v5  ;;  %v16385_v5 = vld [vmem:[#allocation11 + $0xe4] sm:$0xf0] }
 0x35a   :  { %4555 = vmatpush.bf16.msrb.mxu0 %v13278_v48  ;;  %3646 = vmatpush.bf16.msra.mxu1 %v13165_v31  ;;  %v12848_v48 = vld [vmem:[#allocation11 + $0x190] sm:$0xf]  ;;  %v2645_v31 = vpop.f32.mrf.mxu3  ;;  %v12769_v44 = vor.u32 %v16385_v5, %v12768_v37  ;;  %v18406_v6 = vpop.f32.mrf.mxu0  ;;  %v13459_v37 = vld [vmem:[#allocation11 + $0xc48] sm:$0xf0]  ;;  %v12729_v5 = vor.u32 %v16375_v58, %v12728_v26 }
 0x35b   :  { %3682 = vmatpush.bf16.msrb.mxu3 %v13129_v21  ;;  %v18402_v21 = vadd.f32 %v18386_v52, %v2645_v31  ;;  %v12849_v20 = vor.u32 %v16405_v57, %v12848_v48  ;;  %v16445_v48 = vld [vmem:[#allocation11 + $0x324] sm:$0xf0]  ;;  %v12708_v57 = vld [vmem:[#allocation11 + $0x40] sm:$0xf]  ;;  %v16370_v31 = vld [vmem:[#allocation11 + $0x54] sm:$0xf0] }
 0x35c   :  { %v13419_v26 = vld [vmem:[#allocation11 + $0xbe8] sm:$0xf0] }
 0x35d   :  { %3671 = vmatpush.bf16.msra.mxu2 %v12909_v49  ;;  %v16696_v49 = vld [vmem:[#allocation11 + $0xc94] sm:$0xf] }
 0x35e   :  { %3653 = vmatpush.bf16.msrb.mxu1 %v12829_v12  ;;  %4556 = vmatpush.bf16.msrb.mxu0 %v13258_v39  ;;  %v13069_v12 = vor.u32 %v16460_v10, %v13068_v3  ;;  %v16455_v39 = vld [vmem:[#allocation11 + $0x384] sm:$0xf0]  ;;  %v13502_v60 = vor.u32 %v16696_v49, %v13499_v13  ;;  %v18411_v3 = vpop.f32.mrf.mxu2  ;;  %v16686_v10 = vld [vmem:[#allocation11 + $0xc34] sm:$0xf]  ;;  %v18417_v49 = vadd.f32 %v18382_v56, %v18395_v7 }
 0x35f   :  { %3683 = vmatpush.bf16.msrb.mxu3 %v13109_v53  ;;  %v13637_v53 = vld [vmem:[#allocation11 + $0xde0] sm:$0xf]  ;;  %v13049_v52 = vor.u32 %v16455_v39, %v13048_v25  ;;  %v13462_v43 = vor.u32 %v16686_v10, %v13459_v37  ;;  %v13439_v25 = vld [vmem:[#allocation11 + $0xc18] sm:$0xf0]  ;;  %v12709_v39 = vor.u32 %v16370_v31, %v12708_v57  ;;  %v16698_v56 = vld [vmem:[#allocation11 + $0xca4] sm:$0xf0] }
 0x360   :  { %v13477_v10 = vld [vmem:[#allocation11 + $0xc60] sm:$0xf]  ;;  %v16693_v37 = vld [vmem:[#allocation11 + $0xc74] sm:$0xf0] }
 0x361   :  { %3672 = vmatpush.bf16.msra.mxu2 %v12889_v29  ;;  %v12749_v29 = vor.u32 %v16380_v59, %v12748_v24  ;;  %v16365_v24 = vld [vmem:[#allocation11 + $0x24] sm:$0xf0]  ;;  %v13677_v59 = vld [vmem:[#allocation11 + $0xe40] sm:$0xf]  ;;  %v16713_v57 = vld [vmem:[#allocation11 + $0xd34] sm:$0xf0] }
 0x362   :  { %3654 = vmatpush.bf16.msrb.mxu1 %v12809_v28  ;;  %4557 = vmatpush.bf16.msrb.mxu0 %v13238_v55  ;;  %v16733_v28 = vld [vmem:[#allocation11 + $0xdf4] sm:$0xf0]  ;;  %v18426_v31 = vpop.f32.mrf.mxu3 }
 0x363   :  { %3684 = vmatpush.bf16.msrb.mxu3 %v13089_v33  ;;  %v13638_v55 = vor.u32 %v16733_v28, %v13637_v53  ;;  %v13617_v33 = vld [vmem:[#allocation11 + $0xdb0] sm:$0xf]  ;;  %v18421_v53 = vpop.f32.mrf.mxu0 }
 0x365   :  { %3673 = vmatpush.bf16.msra.mxu2 %v12869_v1  ;;  %13193 = vmatmul.msk.bf16.vlgmr.msra.gmra.mxu1 %vm999_vm4, %v18314_v62  ;;  %v13029_v1 = vor.u32 %v16450_v4, %v13028_v2  ;;  %v16656_v2 = vld [vmem:[#allocation11 + $0xb14] sm:$0xf]  ;;  %v13339_v4 = vld [vmem:[#allocation11 + $0xb28] sm:$0xf0] }
 0x366   :  { %3655 = vmatpush.bf16.msrb.mxu1 %v12789_v11  ;;  %4558 = vmatpush.bf16.msrb.mxu0 %v13218_v36  ;;  %v16728_v11 = vld [vmem:[#allocation11 + $0xdc4] sm:$0xf0]  ;;  %v13008_v36 = vld [vmem:[#allocation11 + $0x310] sm:$0xf] }
 0x367   :  { %3685 = vmatpush.bf16.msrb.mxu3 %v13069_v12  ;;  %v13618_v17 = vor.u32 %v16728_v11, %v13617_v33  ;;  %v13597_v12 = vld [vmem:[#allocation11 + $0xd80] sm:$0xf]  ;;  %v13009_v13 = vor.u32 %v16445_v48, %v13008_v36  ;;  %v18423_v33 = vpop.f32.mrf.mxu2  ;;  %v13498_v11 = vor.u32 %v16698_v56, %v13497_v22  ;;  %v13299_v22 = vld [vmem:[#allocation11 + $0xac8] sm:$0xf0]  ;;  %v16666_v56 = vld [vmem:[#allocation11 + $0xb74] sm:$0xf] }
 0x368   :  { %v13557_v48 = vld [vmem:[#allocation11 + $0xd20] sm:$0xf] }
 0x369   :  { %3674 = vmatpush.bf16.msra.mxu2 %v12849_v20  ;;  %v16681_v20 = vld [vmem:[#allocation11 + $0xc04] sm:$0xf] }
 0x36a   :  { %3656 = vmatpush.bf16.msrb.mxu1 %v12769_v44  ;;  %4559 = vmatpush.bf16.msrb.mxu0 %v13198_v47  ;;  %v16723_v44 = vld [vmem:[#allocation11 + $0xd94] sm:$0xf0]  ;;  %v13698_v47 = vor.u32 %v16748_v19, %v13697_v0  ;;  %v13442_v7 = vor.u32 %v16681_v20, %v13439_v25  ;;  %v13319_v0 = vld [vmem:[#allocation11 + $0xaf8] sm:$0xf0]  ;;  %v16671_v19 = vld [vmem:[#allocation11 + $0xba4] sm:$0xf] }
 0x36b   :  { %3686 = vmatpush.bf16.msrb.mxu3 %v13049_v52  ;;  %v13598_v28 = vor.u32 %v16723_v44, %v13597_v12  ;;  %v16743_v52 = vld [vmem:[#allocation11 + $0xe54] sm:$0xf0]  ;;  %v13478_v44 = vor.u32 %v16693_v37, %v13477_v10  ;;  %v13457_v20 = vld [vmem:[#allocation11 + $0xc30] sm:$0xf]  ;;  %v16688_v25 = vld [vmem:[#allocation11 + $0xc44] sm:$0xf0] }
 0x36c   :  { %3675 = vmatmul.bf16.vlgmr.msra.gmra.mxu2 %v18292_v46  ;;  %v13279_v10 = vld [vmem:[#allocation11 + $0xa98] sm:$0xf0] }
 0x36d   :  { %4580 = vmatpush.bf16.msrb.mxu2 %v13658_v32  ;;  %4560 = vmatmul.bf16.vlgmr.msrb.gmra.mxu0 %v18409_v16  ;;  %v12688_v32 = vld [vmem:[#allocation11 + $0x10] sm:$0xf]  ;;  %v13359_v37 = vld [vmem:[#allocation11 + $0xb58] sm:$0xf0] }
 0x36e   :  { %4622 = vmatpush.bf16.msra.mxu0 %v13502_v60  ;;  %3657 = vmatpush.bf16.msrb.mxu1 %v12749_v29  ;;  %v18419_v60 = vpop.f32.mrf.mxu1  ;;  %v16718_v29 = vld [vmem:[#allocation11 + $0xd64] sm:$0xf0]  ;;  %v12689_v58 = vor.u32 %v16365_v24, %v12688_v32 }
 0x36f   :  { %3687 = vmatpush.bf16.msrb.mxu3 %v13029_v1  ;;  %v13578_v1 = vor.u32 %v16718_v29, %v13577_v61  ;;  %v13458_v61 = vor.u32 %v16688_v25, %v13457_v20  ;;  %v16678_v20 = vld [vmem:[#allocation11 + $0xbe4] sm:$0xf0] }
 0x371   :  { %4581 = vmatpush.bf16.msrb.mxu2 %v13638_v55  ;;  %v16676_v55 = vld [vmem:[#allocation11 + $0xbd4] sm:$0xf] }
 0x372   :  { %4623 = vmatpush.bf16.msra.mxu0 %v13482_v30  ;;  %3658 = vmatpush.bf16.msrb.mxu1 %v12729_v5  ;;  %v13678_v30 = vor.u32 %v16743_v52, %v13677_v59  ;;  %v13342_v5 = vor.u32 %v16656_v2, %v13339_v4  ;;  %v13422_v36 = vor.u32 %v16676_v55, %v13419_v26  ;;  %v13537_v59 = vld [vmem:[#allocation11 + $0xcf0] sm:$0xf]  ;;  %v16646_v52 = vld [vmem:[#allocation11 + $0xab4] sm:$0xf]  ;;  %v13437_v2 = vld [vmem:[#allocation11 + $0xc00] sm:$0xf] }
 0x373   :  { %3688 = vmatpush.bf16.msrb.mxu3 %v13009_v13  ;;  %v13558_v13 = vor.u32 %v16713_v57, %v13557_v48  ;;  %v16683_v4 = vld [vmem:[#allocation11 + $0xc14] sm:$0xf0]  ;;  %v13517_v26 = vld [vmem:[#allocation11 + $0xcc0] sm:$0xf]  ;;  %v13699_v48 = vld [vmem:[#allocation11 + $0xe88] sm:$0xf0] }
 0x375   :  { %4582 = vmatpush.bf16.msrb.mxu2 %v13618_v17  ;;  %v16651_v17 = vld [vmem:[#allocation11 + $0xae4] sm:$0xf] }
 0x376   :  { %4624 = vmatpush.bf16.msra.mxu0 %v13462_v43  ;;  %3659 = vmatpush.bf16.msrb.mxu1 %v12709_v39  ;;  %v13399_v43 = vld [vmem:[#allocation11 + $0xbb8] sm:$0xf0]  ;;  %v2673_v12 = vpop.f32.mrf.mxu1  ;;  %v13322_v32 = vor.u32 %v16651_v17, %v13319_v0  ;;  %v13438_v17 = vor.u32 %v16683_v4, %v13437_v2  ;;  %v16734_v2 = vld [vmem:[#allocation11 + $0xdfc] sm:$0xf0]  ;;  %v13345_v4 = vld [vmem:[#allocation11 + $0xb18] sm:$0xf] }
 0x377   :  { %4600 = vmatpush.bf16.msra.mxu3 %v13698_v47  ;;  %v18429_v39 = vadd.f32 %v2673_v12, %v18402_v21  ;;  %v18431_v47 = vpop.f32.mrf.mxu0  ;;  %v13402_v24 = vor.u32 %v16671_v19, %v13399_v43  ;;  %v13302_v21 = vor.u32 %v16646_v52, %v13299_v22  ;;  %v13665_v19 = vld [vmem:[#allocation11 + $0xe18] sm:$0xf]  ;;  %v16739_v43 = vld [vmem:[#allocation11 + $0xe2c] sm:$0xf0] }
 0x378   :  { %3689 = vmatmul.bf16.vlgmr.msrb.gmra.mxu3 %v18294_v41  ;;  %v13666_v22 = vor.u32 %v16739_v43, %v13665_v19  ;;  %v13377_v43 = vld [vmem:[#allocation11 + $0xb70] sm:$0xf] }
 0x379   :  { %4583 = vmatpush.bf16.msrb.mxu2 %v13598_v28  ;;  %v16708_v28 = vld [vmem:[#allocation11 + $0xd04] sm:$0xf0] }
 0x37a   :  { %4625 = vmatpush.bf16.msra.mxu0 %v13442_v7  ;;  %3660 = vmatpush.bf16.msrb.mxu1 %v12689_v58  ;;  %v13379_v7 = vld [vmem:[#allocation11 + $0xb88] sm:$0xf0]  ;;  %v13538_v29 = vor.u32 %v16708_v28, %v13537_v59  ;;  %v16703_v58 = vld [vmem:[#allocation11 + $0xcd4] sm:$0xf0]  ;;  %v16636_v59 = vld [vmem:[#allocation11 + $0xa54] sm:$0xf] }
 0x37b   :  { %4601 = vmatpush.bf16.msra.mxu3 %v13678_v30  ;;  %v13382_v55 = vor.u32 %v16666_v56, %v13379_v7  ;;  %v16641_v30 = vld [vmem:[#allocation11 + $0xa84] sm:$0xf]  ;;  %v13518_v0 = vor.u32 %v16703_v58, %v13517_v26  ;;  %v13259_v28 = vld [vmem:[#allocation11 + $0xa68] sm:$0xf0]  ;;  %v13679_v7 = vld [vmem:[#allocation11 + $0xe58] sm:$0xf0] }
 0x37c   :  { %v13282_v12 = vor.u32 %v16641_v30, %v13279_v10  ;;  %v16741_v56 = vld [vmem:[#allocation11 + $0xe44] sm:$0xf]  ;;  %v16673_v26 = vld [vmem:[#allocation11 + $0xbb4] sm:$0xf0]  ;;  %v18448_v58 = vrot.slane %v18292_v46, 1  ;;  %v18454_v46 = vadd.f32 %v18411_v3, %v18429_v39 }
 0x37d   :  { %4584 = vmatpush.bf16.msrb.mxu2 %v13578_v1  ;;  %3661 = vmatmul.bf16.vlgmr.msrb.gmra.mxu1 %v18290_v27  ;;  %v2715_v1 = vpop.f32.mrf.mxu3  ;;  %v16661_v27 = vld [vmem:[#allocation11 + $0xb44] sm:$0xf]  ;;  %v13682_v30 = vor.u32 %v16741_v56, %v13679_v7  ;;  %v16724_v39 = vld [vmem:[#allocation11 + $0xd9c] sm:$0xf0]  ;;  %v16649_v56 = vld [vmem:[#allocation11 + $0xacc] sm:$0xf0] }
 0x37e   :  { %4566 = vmatpush.bf16.msra.mxu1 %v13498_v11  ;;  %4626 = vmatpush.bf16.msra.mxu0 %v13422_v36  ;;  %v2701_v11 = vpop.f32.mrf.mxu2  ;;  %v16746_v36 = vld [vmem:[#allocation11 + $0xe74] sm:$0xf]  ;;  %v18434_v57 = vpop.f32.mrf.mxu1 }
 0x37f   :  { %4608 = vmatpush.bf16.msrb.mxu3 %v13342_v5  ;;  %v2716_v5 = vadd.f32 %v2715_v1, %v2701_v11  ;;  %v18440_v52 = vpop.f32.mrf.mxu0  ;;  %v16631_v11 = vld [vmem:[#allocation11 + $0xa24] sm:$0xf]  ;;  %v13239_v1 = vld [vmem:[#allocation11 + $0xa38] sm:$0xf0] }
 0x380   :  { %v13242_v19 = vor.u32 %v16631_v11, %v13239_v1  ;;  %v13585_v11 = vld [vmem:[#allocation11 + $0xd58] sm:$0xf] }
 0x381   :  { %4585 = vmatpush.bf16.msrb.mxu2 %v13558_v13  ;;  %v13417_v13 = vld [vmem:[#allocation11 + $0xbd0] sm:$0xf]  ;;  %v2730_v25 = vadd.f32 %v18406_v6, %v2716_v5  ;;  %v13262_v6 = vor.u32 %v16636_v59, %v13259_v28  ;;  %v13605_v28 = vld [vmem:[#allocation11 + $0xd88] sm:$0xf] }
 0x382   :  { %4567 = vmatpush.bf16.msra.mxu1 %v13478_v44  ;;  %4627 = vmatpush.bf16.msra.mxu0 %v13402_v24  ;;  %v13362_v44 = vor.u32 %v16661_v27, %v13359_v37  ;;  %v13702_v24 = vor.u32 %v16746_v36, %v13699_v48  ;;  %v16729_v36 = vld [vmem:[#allocation11 + $0xdcc] sm:$0xf0]  ;;  %v13325_v48 = vld [vmem:[#allocation11 + $0xae8] sm:$0xf] }
 0x383   :  { %4609 = vmatpush.bf16.msrb.mxu3 %v13322_v32  ;;  %v18438_v32 = vrot.slane %v18314_v62, 1  ;;  %v18443_v62 = vrot.slane %v18294_v41, 1  ;;  %v13625_v41 = vld [vmem:[#allocation11 + $0xdb8] sm:$0xf] }
 0x385   :  { %4586 = vmatpush.bf16.msrb.mxu2 %v13538_v29  ;;  %v13418_v29 = vor.u32 %v16678_v20, %v13417_v13  ;;  %v13219_v13 = vld [vmem:[#allocation11 + $0xa08] sm:$0xf0] }
 0x386   :  { %4568 = vmatpush.bf16.msra.mxu1 %v13458_v61  ;;  %4628 = vmatpush.bf16.msra.mxu0 %v13382_v55  ;;  %v13645_v61 = vld [vmem:[#allocation11 + $0xde8] sm:$0xf]  ;;  %v13397_v55 = vld [vmem:[#allocation11 + $0xba0] sm:$0xf]  ;;  %v2743_v37 = vpop.f32.mrf.mxu1 }
 0x387   :  { %4610 = vmatpush.bf16.msrb.mxu3 %v13302_v21  ;;  %v16659_v21 = vld [vmem:[#allocation11 + $0xb2c] sm:$0xf0]  ;;  %v13646_v10 = vor.u32 %v16734_v2, %v13645_v61  ;;  %v13398_v5 = vor.u32 %v16673_v26, %v13397_v55  ;;  %v3494_v20 = vpop.f32.mrf.mxu0  ;;  %v13357_v61 = vld [vmem:[#allocation11 + $0xb40] sm:$0xf]  ;;  %v16621_v2 = vld [vmem:[#allocation11 + $0x9c4] sm:$0xf]  ;;  %v13606_v55 = vor.u32 %v16724_v39, %v13605_v28 }
 0x388   :  { %13715 = vmatmul.msk.bf16.vlgmr.msra.gmra.mxu3 %vm999_vm4, %v18438_v32  ;;  %v13346_v27 = vor.u32 %v16659_v21, %v13345_v4  ;;  %v13199_v4 = vld [vmem:[#allocation11 + $0x9d8] sm:$0xf0]  ;;  %v16736_v21 = vld [vmem:[#allocation11 + $0xe14] sm:$0xf]  ;;  %v16714_v28 = vld [vmem:[#allocation11 + $0xd3c] sm:$0xf0] }
 0x389   :  { %4587 = vmatpush.bf16.msrb.mxu2 %v13518_v0  ;;  %v18456_v0 = vadd.f32 %v2743_v37, %v2730_v25  ;;  %v13305_v25 = vld [vmem:[#allocation11 + $0xab8] sm:$0xf]  ;;  %v13202_v37 = vor.u32 %v16621_v2, %v13199_v4  ;;  %v16639_v39 = vld [vmem:[#allocation11 + $0xa6c] sm:$0xf0] }
 0x38a   :  { %4569 = vmatpush.bf16.msra.mxu1 %v13438_v17  ;;  %4629 = vmatpush.bf16.msra.mxu0 %v13362_v44  ;;  %v16654_v17 = vld [vmem:[#allocation11 + $0xafc] sm:$0xf0]  ;;  %v16626_v44 = vld [vmem:[#allocation11 + $0x9f4] sm:$0xf]  ;;  %v13306_v26 = vor.u32 %v16649_v56, %v13305_v25  ;;  %v13465_v4 = vld [vmem:[#allocation11 + $0xc38] sm:$0xf] }
 0x38b   :  { %4611 = vmatpush.bf16.msrb.mxu3 %v13282_v12  ;;  %v16668_v12 = vld [vmem:[#allocation11 + $0xb84] sm:$0xf0]  ;;  %v13326_v59 = vor.u32 %v16654_v17, %v13325_v48  ;;  %v13222_v7 = vor.u32 %v16626_v44, %v13219_v13  ;;  %v16731_v17 = vld [vmem:[#allocation11 + $0xde4] sm:$0xf] }
 0x38c   :  { %4588 = vmatmul.bf16.vlgmr.msrb.gmra.mxu2 %v18443_v62  ;;  %v13378_v3 = vor.u32 %v16668_v12, %v13377_v43  ;;  %v18463_v43 = vpop.f32.mrf.mxu2  ;;  %v18465_v12 = vpop.f32.mrf.mxu3 }
 0x38d   :  { %4656 = vmatpush.bf16.msra.mxu2 %v13702_v24  ;;  %4630 = vmatmul.bf16.vlgmr.msra.gmra.mxu0 %v18448_v58  ;;  %v13626_v24 = vor.u32 %v16729_v36, %v13625_v41  ;;  %v16644_v41 = vld [vmem:[#allocation11 + $0xa9c] sm:$0xf0] }
 0x38e   :  { %4692 = vmatpush.bf16.msrb.mxu0 %v13666_v22  ;;  %4570 = vmatpush.bf16.msra.mxu1 %v13418_v29  ;;  %v18459_v22 = vadd.f32 %v3494_v20, %v18375_v54  ;;  %v16663_v29 = vld [vmem:[#allocation11 + $0xb54] sm:$0xf0]  ;;  %v16699_v54 = vld [vmem:[#allocation11 + $0xcac] sm:$0xf0]  ;;  %v18461_v36 = vpop.f32.mrf.mxu1  ;;  %v13485_v20 = vld [vmem:[#allocation11 + $0xc68] sm:$0xf] }
 0x38f   :  { %4612 = vmatpush.bf16.msrb.mxu3 %v13262_v6  ;;  %v13659_v6 = vld [vmem:[#allocation11 + $0xe28] sm:$0xf0]  ;;  %v13358_v1 = vor.u32 %v16663_v29, %v13357_v61  ;;  %19808 = vst [vmem:[#allocation24_spill] sm:$0xff] %v18461_v36  ;;  %v13653_v36 = vld [vmem:[#allocation11 + $0xdf0] sm:$0xf] }
 0x390   :  { %v13619_v61 = vld [vmem:[#allocation11 + $0xdc8] sm:$0xf0] }
 0x391   :  { %4657 = vmatpush.bf16.msra.mxu2 %v13682_v30  ;;  %v13505_v30 = vld [vmem:[#allocation11 + $0xc98] sm:$0xf] }
 0x392   :  { %4693 = vmatpush.bf16.msrb.mxu0 %v13646_v10  ;;  %4571 = vmatpush.bf16.msra.mxu1 %v13398_v5  ;;  %v16719_v10 = vld [vmem:[#allocation11 + $0xd6c] sm:$0xf0]  ;;  %v13662_v5 = vor.u32 %v16736_v21, %v13659_v6  ;;  %v13506_v48 = vor.u32 %v16699_v54, %v13505_v30  ;;  %v13545_v6 = vld [vmem:[#allocation11 + $0xcf8] sm:$0xf]  ;;  %v16634_v30 = vld [vmem:[#allocation11 + $0xa3c] sm:$0xf0] }
 0x393   :  { %4613 = vmatpush.bf16.msrb.mxu3 %v13242_v19  ;;  %v13639_v19 = vld [vmem:[#allocation11 + $0xdf8] sm:$0xf0]  ;;  %v13586_v44 = vor.u32 %v16719_v10, %v13585_v11  ;;  %v16689_v21 = vld [vmem:[#allocation11 + $0xc4c] sm:$0xf0]  ;;  %v16721_v10 = vld [vmem:[#allocation11 + $0xd84] sm:$0xf] }
 0x394   :  { %v13642_v25 = vor.u32 %v16731_v17, %v13639_v19  ;;  %v13445_v19 = vld [vmem:[#allocation11 + $0xc08] sm:$0xf] }
 0x395   :  { %4664 = vmatpush.bf16.msrb.mxu2 %v13346_v27  ;;  %v13285_v27 = vld [vmem:[#allocation11 + $0xa88] sm:$0xf] }
 0x396   :  { %4694 = vmatpush.bf16.msrb.mxu0 %v13626_v24  ;;  %4572 = vmatpush.bf16.msra.mxu1 %v13378_v3  ;;  %v13286_v13 = vor.u32 %v16644_v41, %v13285_v27  ;;  %v16694_v24 = vld [vmem:[#allocation11 + $0xc7c] sm:$0xf0]  ;;  %v13265_v3 = vld [vmem:[#allocation11 + $0xa58] sm:$0xf]  ;;  %v3438_v11 = vpop.f32.mrf.mxu1  ;;  %v13599_v27 = vld [vmem:[#allocation11 + $0xd98] sm:$0xf0]  ;;  %v3452_v41 = vpop.f32.mrf.mxu2 }
 0x397   :  { %4614 = vmatpush.bf16.msrb.mxu3 %v13222_v7  ;;  %v13486_v56 = vor.u32 %v16694_v24, %v13485_v20  ;;  %v16726_v7 = vld [vmem:[#allocation11 + $0xdb4] sm:$0xf]  ;;  %v13266_v2 = vor.u32 %v16639_v39, %v13265_v3  ;;  %v16704_v20 = vld [vmem:[#allocation11 + $0xcdc] sm:$0xf0]  ;;  %v13225_v24 = vld [vmem:[#allocation11 + $0x9f8] sm:$0xf]  ;;  %v13602_v3 = vor.u32 %v16721_v10, %v13599_v27 }
 0x398   :  { %v13622_v54 = vor.u32 %v16726_v7, %v13619_v61  ;;  %v16747_v39 = vld [vmem:[#allocation11 + $0xe7c] sm:$0xf]  ;;  %v16716_v7 = vld [vmem:[#allocation11 + $0xd54] sm:$0xf]  ;;  %v13579_v61 = vld [vmem:[#allocation11 + $0xd68] sm:$0xf0] }
 0x399   :  { %4665 = vmatpush.bf16.msrb.mxu2 %v13326_v59  ;;  %v13565_v59 = vld [vmem:[#allocation11 + $0xd28] sm:$0xf]  ;;  %v16697_v10 = vld [vmem:[#allocation11 + $0xc9c] sm:$0xf]  ;;  %v13507_v27 = vld [vmem:[#allocation11 + $0xcb0] sm:$0xf0] }
 0x39a   :  { %4695 = vmatpush.bf16.msrb.mxu0 %v13606_v55  ;;  %4573 = vmatpush.bf16.msra.mxu1 %v13358_v1  ;;  %v13566_v29 = vor.u32 %v16714_v28, %v13565_v59  ;;  %v16709_v55 = vld [vmem:[#allocation11 + $0xd0c] sm:$0xf0]  ;;  %v13466_v1 = vor.u32 %v16689_v21, %v13465_v4  ;;  %v13425_v4 = vld [vmem:[#allocation11 + $0xbd8] sm:$0xf] }
 0x39b   :  { %4615 = vmatpush.bf16.msrb.mxu3 %v13202_v37  ;;  %v3439_v37 = vadd.f32 %v3438_v11, %v18361_v14  ;;  %v16629_v59 = vld [vmem:[#allocation11 + $0xa0c] sm:$0xf0]  ;;  %v13687_v11 = vld [vmem:[#allocation11 + $0xe60] sm:$0xf0] }
 0x39c   :  { %13716 = vmatmul.msk.bf16.vlgmr.msra.gmra.mxu2 %vm999_vm4, %v18438_v32  ;;  %v16679_v21 = vld [vmem:[#allocation11 + $0xbec] sm:$0xf0] }
 0x39d   :  { %4666 = vmatpush.bf16.msrb.mxu2 %v13306_v26  ;;  %4574 = vmatmul.bf16.vlgmr.msra.gmra.mxu1 %v18448_v58  ;;  %v13245_v26 = vld [vmem:[#allocation11 + $0xa28] sm:$0xf]  ;;  %v3453_v28 = vadd.f32 %v3452_v41, %v3439_v37  ;;  %v13353_v41 = vld [vmem:[#allocation11 + $0xb20] sm:$0xf]  ;;  %v13426_v37 = vor.u32 %v16679_v21, %v13425_v4  ;;  %v16669_v4 = vld [vmem:[#allocation11 + $0xb8c] sm:$0xf0] }
 0x39e   :  { %4636 = vmatpush.bf16.msrb.mxu1 %v13662_v5  ;;  %4696 = vmatpush.bf16.msrb.mxu0 %v13586_v44  ;;  %v3466_v5 = vpop.f32.mrf.mxu3  ;;  %v13246_v17 = vor.u32 %v16634_v30, %v13245_v26  ;;  %v16684_v44 = vld [vmem:[#allocation11 + $0xc1c] sm:$0xf0]  ;;  %v16742_v30 = vld [vmem:[#allocation11 + $0xe4c] sm:$0xf] }
 0x39f   :  { %4678 = vmatpush.bf16.msra.mxu3 %v13506_v48  ;;  %v13546_v48 = vor.u32 %v16709_v55, %v13545_v6  ;;  %v13205_v6 = vld [vmem:[#allocation11 + $0x9c8] sm:$0xf]  ;;  %v16624_v26 = vld [vmem:[#allocation11 + $0x9dc] sm:$0xf0] }
 0x3a0   :  { %4616 = vmatmul.bf16.vlgmr.msrb.gmra.mxu3 %v18409_v16 }
 0x3a1   :  { %4667 = vmatpush.bf16.msrb.mxu2 %v13286_v13  ;;  %v13525_v13 = vld [vmem:[#allocation11 + $0xcc8] sm:$0xf] }
 0x3a2   :  { %4637 = vmatpush.bf16.msrb.mxu1 %v13642_v25  ;;  %4697 = vmatpush.bf16.msrb.mxu0 %v13566_v29  ;;  %v13707_v25 = vld [vmem:[#allocation11 + $0xe90] sm:$0xf0]  ;;  %v3467_v29 = vadd.f32 %v3466_v5, %v3453_v28  ;;  %v13526_v14 = vor.u32 %v16704_v20, %v13525_v13  ;;  %v16660_v5 = vld [vmem:[#allocation11 + $0xb34] sm:$0xf0]  ;;  %v13405_v13 = vld [vmem:[#allocation11 + $0xba8] sm:$0xf] }
 0x3a3   :  { %4679 = vmatpush.bf16.msra.mxu3 %v13486_v56  ;;  %v13446_v56 = vor.u32 %v16684_v44, %v13445_v19  ;;  %v13710_v55 = vor.u32 %v16747_v39, %v13707_v25  ;;  %v13206_v44 = vor.u32 %v16624_v26, %v13205_v6  ;;  %v16674_v20 = vld [vmem:[#allocation11 + $0xbbc] sm:$0xf0]  ;;  %v13354_v28 = vor.u32 %v16660_v5, %v13353_v41  ;;  %v16692_v39 = vld [vmem:[#allocation11 + $0xc6c] sm:$0xf]  ;;  %v13487_v25 = vld [vmem:[#allocation11 + $0xc80] sm:$0xf0] }
 0x3a4   :  { %v13490_v21 = vor.u32 %v16692_v39, %v13487_v25  ;;  %v16687_v6 = vld [vmem:[#allocation11 + $0xc3c] sm:$0xf]  ;;  %v16664_v5 = vld [vmem:[#allocation11 + $0xb5c] sm:$0xf0]  ;;  %v16682_v39 = vld [vmem:[#allocation11 + $0xc0c] sm:$0xf] }
 0x3a5   :  { %4668 = vmatpush.bf16.msrb.mxu2 %v13266_v2  ;;  %v13226_v2 = vor.u32 %v16629_v59, %v13225_v24  ;;  %v13510_v24 = vor.u32 %v16697_v10, %v13507_v27  ;;  %v18477_v59 = vpop.f32.mrf.mxu2  ;;  %v16701_v27 = vld [vmem:[#allocation11 + $0xcc4] sm:$0xf]  ;;  %v13519_v41 = vld [vmem:[#allocation11 + $0xcd8] sm:$0xf0] }
 0x3a6   :  { %4638 = vmatpush.bf16.msrb.mxu1 %v13622_v54  ;;  %4698 = vmatpush.bf16.msrb.mxu0 %v13546_v48  ;;  %v18473_v54 = vadd.f32 %v18431_v47, %v3467_v29  ;;  %v16711_v48 = vld [vmem:[#allocation11 + $0xd24] sm:$0xf]  ;;  %v18475_v19 = vpop.f32.mrf.mxu3  ;;  %v13690_v47 = vor.u32 %v16742_v30, %v13687_v11  ;;  %v16706_v29 = vld [vmem:[#allocation11 + $0xcf4] sm:$0xf]  ;;  %v13313_v11 = vld [vmem:[#allocation11 + $0xac0] sm:$0xf] }
 0x3a7   :  { %4680 = vmatpush.bf16.msra.mxu3 %v13466_v1  ;;  %v13582_v1 = vor.u32 %v16716_v7, %v13579_v61  ;;  %v13406_v7 = vor.u32 %v16674_v20, %v13405_v13  ;;  %v16655_v61 = vld [vmem:[#allocation11 + $0xb04] sm:$0xf0]  ;;  %v13467_v30 = vld [vmem:[#allocation11 + $0xc50] sm:$0xf0]  ;;  %v16737_v20 = vld [vmem:[#allocation11 + $0xe1c] sm:$0xf] }
 0x3a8   :  { %v13470_v13 = vor.u32 %v16687_v6, %v13467_v30  ;;  %v13447_v25 = vld [vmem:[#allocation11 + $0xc20] sm:$0xf0]  ;;  %v18485_v6 = vpop.f32.mrf.mxu1  ;;  %v16657_v30 = vld [vmem:[#allocation11 + $0xb1c] sm:$0xf] }
 0x3a9   :  { %4669 = vmatpush.bf16.msrb.mxu2 %v13246_v17  ;;  %v13559_v17 = vld [vmem:[#allocation11 + $0xd38] sm:$0xf0] }
 0x3aa   :  { %4639 = vmatpush.bf16.msrb.mxu1 %v13602_v3  ;;  %4699 = vmatpush.bf16.msrb.mxu0 %v13526_v14  ;;  %v13562_v3 = vor.u32 %v16711_v48, %v13559_v17  ;;  %v13539_v14 = vld [vmem:[#allocation11 + $0xd08] sm:$0xf0]  ;;  %v13705_v48 = vld [vmem:[#allocation11 + $0xe78] sm:$0xf]  ;;  %v16749_v17 = vld [vmem:[#allocation11 + $0xe8c] sm:$0xf0] }
 0x3ab   :  { %4681 = vmatpush.bf16.msra.mxu3 %v13446_v56  ;;  %v13333_v56 = vld [vmem:[#allocation11 + $0xaf0] sm:$0xf]  ;;  %v13542_v26 = vor.u32 %v16706_v29, %v13539_v14  ;;  %v16645_v29 = vld [vmem:[#allocation11 + $0xaa4] sm:$0xf0] }
 0x3ad   :  { %4670 = vmatpush.bf16.msrb.mxu2 %v13226_v2  ;;  %4700 = vmatmul.bf16.vlgmr.msrb.gmra.mxu0 %v18443_v62  ;;  %v13385_v2 = vld [vmem:[#allocation11 + $0xb78] sm:$0xf] }
 0x3ae   :  { %4768 = vmatpush.bf16.msra.mxu0 %v13710_v55  ;;  %4640 = vmatpush.bf16.msrb.mxu1 %v13582_v1  ;;  %v13334_v55 = vor.u32 %v16655_v61, %v13333_v56  ;;  %v16650_v1 = vld [vmem:[#allocation11 + $0xad4] sm:$0xf0]  ;;  %v13386_v10 = vor.u32 %v16669_v4, %v13385_v2  ;;  %v13293_v61 = vld [vmem:[#allocation11 + $0xa90] sm:$0xf]  ;;  %v13685_v2 = vld [vmem:[#allocation11 + $0xe48] sm:$0xf] }
 0x3af   :  { %4682 = vmatpush.bf16.msra.mxu3 %v13426_v37  ;;  %v13365_v37 = vld [vmem:[#allocation11 + $0xb48] sm:$0xf]  ;;  %v16744_v4 = vld [vmem:[#allocation11 + $0xe5c] sm:$0xf0] }
 0x3b0   :  { %v13366_v56 = vor.u32 %v16664_v5, %v13365_v37  ;;  %v16640_v37 = vld [vmem:[#allocation11 + $0xa74] sm:$0xf0] }
 0x3b1   :  { %4671 = vmatpush.bf16.msrb.mxu2 %v13206_v44  ;;  %v18481_v44 = vpop.f32.mrf.mxu3 }
 0x3b2   :  { %4769 = vmatpush.bf16.msra.mxu0 %v13690_v47  ;;  %4641 = vmatpush.bf16.msrb.mxu1 %v13562_v3  ;;  %v13667_v47 = vld [vmem:[#allocation11 + $0xe30] sm:$0xf0]  ;;  %v13522_v3 = vor.u32 %v16701_v27, %v13519_v41  ;;  %v13686_v27 = vor.u32 %v16744_v4, %v13685_v2  ;;  %v13273_v41 = vld [vmem:[#allocation11 + $0xa60] sm:$0xf]  ;;  %v16722_v2 = vld [vmem:[#allocation11 + $0xd8c] sm:$0xf]  ;;  %v18495_v4 = vpop.f32.mrf.mxu0 }
 0x3b3   :  { %4683 = vmatpush.bf16.msra.mxu3 %v13406_v7  ;;  %v13706_v7 = vor.u32 %v16749_v17, %v13705_v48  ;;  %v13670_v14 = vor.u32 %v16737_v20, %v13667_v47  ;;  %v13350_v48 = vor.u32 %v16657_v30, %v13347_v63  ;;  %v16727_v17 = vld [vmem:[#allocation11 + $0xdbc] sm:$0xf]  ;;  %v13627_v20 = vld [vmem:[#allocation11 + $0xdd0] sm:$0xf0]  ;;  %v16652_v47 = vld [vmem:[#allocation11 + $0xaec] sm:$0xf] }
 0x3b4   :  { %4672 = vmatmul.bf16.vlgmr.msrb.gmra.mxu2 %v18409_v16  ;;  %v13253_v63 = vld [vmem:[#allocation11 + $0xa30] sm:$0xf]  ;;  %v16647_v30 = vld [vmem:[#allocation11 + $0xabc] sm:$0xf] }
 0x3b5   :  { %4734 = vmatpush.bf16.msra.mxu2 %v13510_v24  ;;  %v18483_v24 = vpop.f32.mrf.mxu2 }
 0x3b6   :  { %4776 = vmatpush.bf16.msrb.mxu0 %v13354_v28  ;;  %4642 = vmatpush.bf16.msrb.mxu1 %v13542_v26  ;;  %v13314_v28 = vor.u32 %v16650_v1, %v13313_v11  ;;  %v13647_v26 = vld [vmem:[#allocation11 + $0xe00] sm:$0xf0]  ;;  %v13294_v11 = vor.u32 %v16645_v29, %v13293_v61  ;;  %v16677_v1 = vld [vmem:[#allocation11 + $0xbdc] sm:$0xf]  ;;  %v16635_v61 = vld [vmem:[#allocation11 + $0xa44] sm:$0xf0]  ;;  %v13630_v29 = vor.u32 %v16727_v17, %v13627_v20 }
 0x3b7   :  { %4684 = vmatpush.bf16.msra.mxu3 %v13386_v10  ;;  %v13427_v10 = vld [vmem:[#allocation11 + $0xbf0] sm:$0xf0] }
 0x3b9   :  { %4735 = vmatpush.bf16.msra.mxu2 %v13490_v21  ;;  %v16732_v21 = vld [vmem:[#allocation11 + $0xdec] sm:$0xf] }
 0x3ba   :  { %4777 = vmatpush.bf16.msrb.mxu0 %v13334_v55  ;;  %v13450_v55 = vor.u32 %v16682_v39, %v13447_v25  ;;  %4643 = vmatpush.bf16.msrb.mxu1 %v13522_v3  ;;  %v13650_v5 = vor.u32 %v16732_v21, %v13647_v26  ;;  %v13274_v39 = vor.u32 %v16640_v37, %v13273_v41  ;;  %v16672_v25 = vld [vmem:[#allocation11 + $0xbac] sm:$0xf]  ;;  %v3508_v21 = vpop.f32.mrf.mxu1  ;;  %v13607_v26 = vld [vmem:[#allocation11 + $0xda0] sm:$0xf0]  ;;  %v13387_v41 = vld [vmem:[#allocation11 + $0xb90] sm:$0xf0] }
 0x3bb   :  { %4685 = vmatpush.bf16.msra.mxu3 %v13366_v56  ;;  %v13407_v56 = vld [vmem:[#allocation11 + $0xbc0] sm:$0xf0]  ;;  %v13233_v37 = vld [vmem:[#allocation11 + $0xa00] sm:$0xf]  ;;  %v13610_v17 = vor.u32 %v16722_v2, %v13607_v26 }
 0x3bd   :  { %4736 = vmatpush.bf16.msra.mxu2 %v13470_v13  ;;  %4644 = vmatmul.bf16.vlgmr.msrb.gmra.mxu1 %v18443_v62  ;;  %v13430_v13 = vor.u32 %v16677_v1, %v13427_v10  ;;  %v18489_v3 = vpop.f32.mrf.mxu2  ;;  %v3509_v1 = vadd.f32 %v3508_v21, %v18459_v22  ;;  %v13254_v10 = vor.u32 %v16635_v61, %v13253_v63  ;;  %v16662_v63 = vld [vmem:[#allocation11 + $0xb4c] sm:$0xf]  ;;  %v13367_v61 = vld [vmem:[#allocation11 + $0xb60] sm:$0xf0]  ;;  %v13213_v21 = vld [vmem:[#allocation11 + $0x9d0] sm:$0xf] }
 0x3be   :  { %4778 = vmatpush.bf16.msrb.mxu0 %v13314_v28  ;;  %4712 = vmatpush.bf16.msra.mxu1 %v13706_v7  ;;  %v13327_v28 = vld [vmem:[#allocation11 + $0xb00] sm:$0xf0]  ;;  %v18491_v7 = vpop.f32.mrf.mxu3 }
 0x3bf   :  { %4748 = vmatpush.bf16.msrb.mxu3 %v13670_v14  ;;  %13718 = vmatmul.msk.bf16.vlgmr.msra.gmra.mxu0 %vm999_vm4, %v18438_v32  ;;  %v13330_v14 = vor.u32 %v16652_v47, %v13327_v28  ;;  %v13587_v28 = vld [vmem:[#allocation11 + $0xd70] sm:$0xf0] }
 0x3c0   :  { %4686 = vmatmul.bf16.vlgmr.msra.gmra.mxu3 %v18448_v58 }
 0x3c1   :  { %4737 = vmatpush.bf16.msra.mxu2 %v13450_v55  ;;  %v13410_v55 = vor.u32 %v16672_v25, %v13407_v56  ;;  %v16642_v25 = vld [vmem:[#allocation11 + $0xa8c] sm:$0xf]  ;;  %v13287_v56 = vld [vmem:[#allocation11 + $0xaa0] sm:$0xf0] }
 0x3c2   :  { %4779 = vmatpush.bf16.msrb.mxu0 %v13294_v11  ;;  %4713 = vmatpush.bf16.msra.mxu1 %v13686_v27  ;;  %v13307_v11 = vld [vmem:[#allocation11 + $0xad0] sm:$0xf0]  ;;  %v16667_v27 = vld [vmem:[#allocation11 + $0xb7c] sm:$0xf] }
 0x3c3   :  { %4749 = vmatpush.bf16.msrb.mxu3 %v13650_v5  ;;  %v16630_v5 = vld [vmem:[#allocation11 + $0xa14] sm:$0xf0]  ;;  %v13310_v20 = vor.u32 %v16647_v30, %v13307_v11  ;;  %v13390_v47 = vor.u32 %v16667_v27, %v13387_v41  ;;  %v13290_v30 = vor.u32 %v16642_v25, %v13287_v56  ;;  %v3564_v11 = vpop.f32.mrf.mxu0  ;;  %v13247_v25 = vld [vmem:[#allocation11 + $0xa40] sm:$0xf0]  ;;  %v13633_v56 = vld [vmem:[#allocation11 + $0xdc0] sm:$0xf] }
 0x3c4   :  { %v13234_v22 = vor.u32 %v16630_v5, %v13233_v37  ;;  %v16637_v37 = vld [vmem:[#allocation11 + $0xa5c] sm:$0xf]  ;;  %v13267_v5 = vld [vmem:[#allocation11 + $0xa70] sm:$0xf0] }
 0x3c5   :  { %4738 = vmatpush.bf16.msra.mxu2 %v13430_v13  ;;  %v16717_v13 = vld [vmem:[#allocation11 + $0xd5c] sm:$0xf]  ;;  %v18503_v26 = vpop.f32.mrf.mxu2 }
 0x3c6   :  { %4720 = vmatpush.bf16.msrb.mxu1 %v13350_v48  ;;  %4780 = vmatpush.bf16.msrb.mxu0 %v13274_v39  ;;  %v3523_v48 = vadd.f32 %v18483_v24, %v3509_v1  ;;  %v3550_v34 = vpop.f32.mrf.mxu3  ;;  %v16625_v24 = vld [vmem:[#allocation11 + $0x9e4] sm:$0xf0]  ;;  %v16712_v1 = vld [vmem:[#allocation11 + $0xd2c] sm:$0xf] }
 0x3c7   :  { %4750 = vmatpush.bf16.msrb.mxu3 %v13630_v29  ;;  %v13673_v29 = vld [vmem:[#allocation11 + $0xe20] sm:$0xf]  ;;  %v3551_v2 = vadd.f32 %v3550_v34, %v18417_v49  ;;  %v13214_v27 = vor.u32 %v16625_v24, %v13213_v21  ;;  %v16735_v34 = vld [vmem:[#allocation11 + $0xe04] sm:$0xf0]  ;;  %v16702_v24 = vld [vmem:[#allocation11 + $0xccc] sm:$0xf] }
 0x3c8   :  { %v18500_v39 = vadd.f32 %v18481_v44, %v3523_v48  ;;  %v13370_v44 = vor.u32 %v16662_v63, %v13367_v61 }
 0x3c9   :  { %4739 = vmatpush.bf16.msra.mxu2 %v13410_v55  ;;  %v13590_v55 = vor.u32 %v16717_v13, %v13587_v28  ;;  %v18505_v48 = vadd.f32 %v3564_v11, %v3551_v2  ;;  %v13547_v13 = vld [vmem:[#allocation11 + $0xd10] sm:$0xf0]  ;;  %v16632_v28 = vld [vmem:[#allocation11 + $0xa2c] sm:$0xf]  ;;  %v13613_v11 = vld [vmem:[#allocation11 + $0xd90] sm:$0xf] }
 0x3ca   :  { %4721 = vmatpush.bf16.msrb.mxu1 %v13330_v14  ;;  %4781 = vmatpush.bf16.msrb.mxu0 %v13254_v10  ;;  %v16740_v14 = vld [vmem:[#allocation11 + $0xe34] sm:$0xf0]  ;;  %v13567_v10 = vld [vmem:[#allocation11 + $0xd40] sm:$0xf0]  ;;  %v13250_v21 = vor.u32 %v16632_v28, %v13247_v25 }
 0x3cb   :  { %4751 = vmatpush.bf16.msrb.mxu3 %v13610_v17  ;;  %v13674_v41 = vor.u32 %v16740_v14, %v13673_v29  ;;  %v13570_v49 = vor.u32 %v16712_v1, %v13567_v10  ;;  %v13270_v17 = vor.u32 %v16637_v37, %v13267_v5  ;;  %v13527_v29 = vld [vmem:[#allocation11 + $0xce0] sm:$0xf0]  ;;  %v16627_v14 = vld [vmem:[#allocation11 + $0x9fc] sm:$0xf]  ;;  %v18513_v10 = vpop.f32.mrf.mxu1  ;;  %v16720_v28 = vld [vmem:[#allocation11 + $0xd74] sm:$0xf0] }
 0x3cc   :  { %v13530_v1 = vor.u32 %v16702_v24, %v13527_v29  ;;  %v13207_v37 = vld [vmem:[#allocation11 + $0x9e0] sm:$0xf0]  ;;  %v13493_v29 = vld [vmem:[#allocation11 + $0xc70] sm:$0xf] }
 0x3cd   :  { %4740 = vmatpush.bf16.msra.mxu2 %v13390_v47  ;;  %13717 = vmatmul.msk.bf16.vlgmr.msra.gmra.mxu1 %vm999_vm4, %v18438_v32  ;;  %v13654_v47 = vor.u32 %v16735_v34, %v13653_v36  ;;  %v18510_v61 = vpop.f32.mrf.mxu2  ;;  %v13227_v36 = vld [vmem:[#allocation11 + $0xa10] sm:$0xf0] }
 0x3ce   :  { %4722 = vmatpush.bf16.msrb.mxu1 %v13310_v20  ;;  %4782 = vmatpush.bf16.msrb.mxu0 %v13234_v22  ;;  %v16707_v20 = vld [vmem:[#allocation11 + $0xcfc] sm:$0xf]  ;;  %v16730_v22 = vld [vmem:[#allocation11 + $0xdd4] sm:$0xf0] }
 0x3cf   :  { %4752 = vmatpush.bf16.msrb.mxu3 %v13590_v55  ;;  %v13550_v63 = vor.u32 %v16707_v20, %v13547_v13  ;;  %v13634_v2 = vor.u32 %v16730_v22, %v13633_v56  ;;  %v13713_v55 = vld [vmem:[#allocation11 + $0xe80] sm:$0xf]  ;;  %v16745_v20 = vld [vmem:[#allocation11 + $0xe64] sm:$0xf0]  ;;  %v16700_v13 = vld [vmem:[#allocation11 + $0xcb4] sm:$0xf0] }
 0x3d1   :  { %4741 = vmatpush.bf16.msra.mxu2 %v13370_v44  ;;  %v16725_v44 = vld [vmem:[#allocation11 + $0xda4] sm:$0xf0] }
 0x3d2   :  { %4723 = vmatpush.bf16.msrb.mxu1 %v13290_v30  ;;  %4783 = vmatpush.bf16.msrb.mxu0 %v13214_v27  ;;  %v16750_v30 = vld [vmem:[#allocation11 + $0xe94] sm:$0xf0]  ;;  %v13230_v27 = vor.u32 %v16627_v14, %v13227_v36  ;;  %v13614_v34 = vor.u32 %v16725_v44, %v13613_v11  ;;  %v16695_v14 = vld [vmem:[#allocation11 + $0xc84] sm:$0xf0]  ;;  %v18519_v11 = vpop.f32.mrf.mxu0 }
 0x3d3   :  { %4753 = vmatpush.bf16.msrb.mxu3 %v13570_v49  ;;  %v13714_v5 = vor.u32 %v16750_v30, %v13713_v55  ;;  %v13513_v49 = vld [vmem:[#allocation11 + $0xca0] sm:$0xf]  ;;  %v16715_v36 = vld [vmem:[#allocation11 + $0xd44] sm:$0xf0]  ;;  %v18517_v55 = vpop.f32.mrf.mxu3  ;;  %v3578_v30 = vpop.f32.mrf.mxu1  ;;  %v13494_v44 = vor.u32 %v16695_v14, %v13493_v29  ;;  %v16680_v29 = vld [vmem:[#allocation11 + $0xbf4] sm:$0xf0] }
 0x3d4   :  { %4742 = vmatmul.bf16.vlgmr.msra.gmra.mxu2 %v18448_v58 }
 0x3d5   :  { %4804 = vmatpush.bf16.msrb.mxu2 %v13674_v41  ;;  %4784 = vmatmul.bf16.vlgmr.msrb.gmra.mxu0 %v18409_v16  ;;  %v16622_v41 = vld [vmem:[#allocation11 + $0x9cc] sm:$0xf]  ;;  %v3606_v25 = vpop.f32.mrf.mxu2 }
 0x3d6   :  { %4724 = vmatpush.bf16.msrb.mxu1 %v13270_v17  ;;  %v13693_v17 = vld [vmem:[#allocation11 + $0xe50] sm:$0xf]  ;;  %v13210_v56 = vor.u32 %v16622_v41, %v13207_v37  ;;  %v16690_v41 = vld [vmem:[#allocation11 + $0xc54] sm:$0xf0]  ;;  %v13553_v37 = vld [vmem:[#allocation11 + $0xd00] sm:$0xf] }
 0x3d7   :  { %4754 = vmatpush.bf16.msrb.mxu3 %v13550_v63  ;;  %v13694_v22 = vor.u32 %v16745_v20, %v13693_v17  ;;  %v3607_v63 = vadd.f32 %v3606_v25, %v18454_v46  ;;  %v3579_v46 = vadd.f32 %v3578_v30, %v18505_v48  ;;  %v13453_v20 = vld [vmem:[#allocation11 + $0xc10] sm:$0xf] }
 0x3d9   :  { %4805 = vmatpush.bf16.msrb.mxu2 %v13654_v47  ;;  %v13593_v47 = vld [vmem:[#allocation11 + $0xd60] sm:$0xf] }
 0x3da   :  { %4725 = vmatpush.bf16.msrb.mxu1 %v13250_v21  ;;  %v13514_v21 = vor.u32 %v16700_v13, %v13513_v49  ;;  %v13594_v24 = vor.u32 %v16720_v28, %v13593_v47  ;;  %v16685_v13 = vld [vmem:[#allocation11 + $0xc24] sm:$0xf0]  ;;  %v13533_v47 = vld [vmem:[#allocation11 + $0xcd0] sm:$0xf] }
 0x3db   :  { %4755 = vmatpush.bf16.msrb.mxu3 %v13530_v1  ;;  %v16705_v28 = vld [vmem:[#allocation11 + $0xce4] sm:$0xf0]  ;;  %v3620_v48 = vpop.f32.mrf.mxu3 }
 0x3dc   :  { %v3621_v25 = vadd.f32 %v3620_v48, %v3607_v63 }
 0x3dd   :  { %4806 = vmatpush.bf16.msrb.mxu2 %v13634_v2  ;;  %v13573_v2 = vld [vmem:[#allocation11 + $0xd30] sm:$0xf] }
 0x3de   :  { %4726 = vmatpush.bf16.msrb.mxu1 %v13230_v27  ;;  %4756 = vmatmul.bf16.vlgmr.msrb.gmra.mxu3 %v18443_v62  ;;  %v13574_v1 = vor.u32 %v16715_v36, %v13573_v2  ;;  %v13473_v27 = vld [vmem:[#allocation11 + $0xc40] sm:$0xf]  ;;  %v13413_v2 = vld [vmem:[#allocation11 + $0xbb0] sm:$0xf]  ;;  %v16675_v36 = vld [vmem:[#allocation11 + $0xbc4] sm:$0xf0] }
 0x3df   :  { %4824 = vmatpush.bf16.msra.mxu3 %v13714_v5  ;;  %v16710_v5 = vld [vmem:[#allocation11 + $0xd14] sm:$0xf0]  ;;  %v13474_v49 = vor.u32 %v16690_v41, %v13473_v27  ;;  %v13373_v41 = vld [vmem:[#allocation11 + $0xb50] sm:$0xf] }
 0x3e0   :  { %v13554_v17 = vor.u32 %v16710_v5, %v13553_v37  ;;  %v16665_v37 = vld [vmem:[#allocation11 + $0xb64] sm:$0xf0] }
 0x3e1   :  { %4807 = vmatpush.bf16.msrb.mxu2 %v13614_v34  ;;  %v18523_v34 = vadd.f32 %v18503_v26, %v3579_v46  ;;  %v13534_v26 = vor.u32 %v16705_v28, %v13533_v47  ;;  %v13414_v46 = vor.u32 %v16675_v36, %v13413_v2  ;;  %v13374_v5 = vor.u32 %v16665_v37, %v13373_v41 }
 0x3e2   :  { %4727 = vmatpush.bf16.msrb.mxu1 %v13210_v56  ;;  %v18526_v56 = vpop.f32.mrf.mxu1  ;;  %v2550_v41 = vadd.f32 %v18379_v42, %v18357_v15 }
 0x3e3   :  { %4825 = vmatpush.bf16.msra.mxu3 %v13694_v22  ;;  %v3634_v22 = vpop.f32.mrf.mxu0 }
 0x3e5   :  { %4808 = vmatpush.bf16.msrb.mxu2 %v13594_v24  ;;  %4728 = vmatmul.bf16.vlgmr.msrb.gmra.mxu1 %v18409_v16  ;;  %v13433_v24 = vld [vmem:[#allocation11 + $0xbe0] sm:$0xf]  ;;  %v3635_v16 = vadd.f32 %v3634_v22, %v3621_v25 }
 0x3e6   :  { %4790 = vmatpush.bf16.msra.mxu1 %v13514_v21  ;;  %v13454_v21 = vor.u32 %v16685_v13, %v13453_v20  ;;  %v13434_v14 = vor.u32 %v16680_v29, %v13433_v24 }
 0x3e9   :  { %4809 = vmatpush.bf16.msrb.mxu2 %v13574_v1  ;;  %v16670_v1 = vld [vmem:[#allocation11 + $0xb94] sm:$0xf0] }
 0x3ea   :  { %4791 = vmatpush.bf16.msra.mxu1 %v13494_v44  ;;  %v3648_v63 = vpop.f32.mrf.mxu1  ;;  %v13393_v44 = vld [vmem:[#allocation11 + $0xb80] sm:$0xf] }
 0x3eb   :  { %v18531_v30 = vadd.f32 %v3648_v63, %v3635_v16  ;;  %v13394_v27 = vor.u32 %v16670_v1, %v13393_v44 }
 0x3ed   :  { %4810 = vmatpush.bf16.msrb.mxu2 %v13554_v17  ;;  %v18537_v17 = vpop.f32.mrf.mxu0 }
 0x3ee   :  { %4792 = vmatpush.bf16.msra.mxu1 %v13474_v49  ;;  %13719 = vmatmul.msk.bf16.vlgmr.msra.gmra.mxu3 %vm999_vm4, %v18438_v32  ;;  %v18535_v32 = vpop.f32.mrf.mxu2 }
 0x3f1   :  { %4811 = vmatpush.bf16.msrb.mxu2 %v13534_v26 }
 0x3f2   :  { %4793 = vmatpush.bf16.msra.mxu1 %v13454_v21  ;;  %v18533_v49 = vpop.f32.mrf.mxu1 }
 0x3f4   :  { %4812 = vmatmul.bf16.vlgmr.msrb.gmra.mxu2 %v18443_v62  ;;  %v18539_v62 = vpop.f32.mrf.mxu3 }
 0x3f5   :  { %v3704_v22 = vpop.f32.mrf.mxu0 }
 0x3f6   :  { %4794 = vmatpush.bf16.msra.mxu1 %v13434_v14  ;;  %v3676_v47 = vpop.f32.mrf.mxu2 }
 0x3fa   :  { %4795 = vmatpush.bf16.msra.mxu1 %v13414_v46  ;;  %v3662_v20 = vpop.f32.mrf.mxu1 }
 0x3fb   :  { %v3663_v13 = vadd.f32 %v3662_v20, %v18456_v0 }
 0x3fc   :  { %v3690_v48 = vpop.f32.mrf.mxu3 }
 0x3fd   :  { %v3677_v28 = vadd.f32 %v3676_v47, %v3663_v13  ;;  %v18549_v29 = vpop.f32.mrf.mxu0 }
 0x3fe   :  { %4796 = vmatpush.bf16.msra.mxu1 %v13394_v27  ;;  %v18547_v24 = vpop.f32.mrf.mxu2  ;;  %19812 = vst [vmem:[#allocation28_spill] sm:$0xff] %v18549_v29  ;;  %v18566_v29 = vld [vmem:[#allocation12] sm:$0x3f] }
 0x3ff   :  { %v3691_v25 = vadd.f32 %v3690_v48, %v3677_v28  ;;  %19811 = vst [vmem:[#allocation27_spill] sm:$0xff] %v18547_v24  ;;  %v4845_v24 = vperm.slane %v18566_v29, 1 }
 0x401   :  { %v18543_v21 = vadd.f32 %v3704_v22, %v3691_v25 }
 0x402   :  { %4797 = vmatpush.bf16.msra.mxu1 %v13374_v5  ;;  %v18551_v2 = vpop.f32.mrf.mxu1  ;;  %v2564_v5 = vadd.f32 %v18372_v23, %v2550_v41  ;;  %v2606_v23 = vadd.f32 %v18419_v60, %v18377_v51 }
 0x403   :  { %19809 = vst [vmem:[#allocation25_spill] sm:$0xff] %v18543_v21 }
 0x404   :  { %v18545_v26 = vpop.f32.mrf.mxu3  ;;  %v2578_v20 = vadd.f32 %v18384_v9, %v2564_v5 }
 0x405   :  { %4798 = vmatmul.bf16.vlgmr.msra.gmra.mxu1 %v18448_v58  ;;  %19810 = vst [vmem:[#allocation26_spill] sm:$0xff] %v18545_v26  ;;  %v4561_v58 = vpop.f32.mrf.mxu0 }
 0x406   :  { %v3497_v25 = vadd.f32 %v18495_v4, %v2578_v20 }
 0x408   :  { %v3511_v26 = vadd.f32 %v18513_v10, %v3497_v25 }
 0x40c   :  { %v4603_v14 = vpop.f32.mrf.mxu3 }
 0x40d   :  { %v18557_v46 = vpop.f32.mrf.mxu0 }
 0x40f   :  { %v4589_v16 = vpop.f32.mrf.mxu2 }
 0x414   :  { %v18555_v0 = vpop.f32.mrf.mxu3 }
 0x415   :  { %v4631_v37 = vpop.f32.mrf.mxu0 }
 0x417   :  { %v18553_v36 = vpop.f32.mrf.mxu2 }
 0x41a   :  { %v4575_v63 = vpop.f32.mrf.mxu1 }
 0x41b   :  { %v4576_v42 = vadd.f32 %v4575_v63, %v4561_v58 }
 0x41d   :  { %v4633_v15 = vpop.f32.mrf.mxu0  ;;  %v4590_v20 = vadd.f32 %v4589_v16, %v4576_v42 }
 0x41f   :  { %v4659_v1 = vpop.f32.mrf.mxu2 }
 0x422   :  { %v18559_v27 = vpop.f32.mrf.mxu1 }
 0x423   :  { %v4617_v44 = vpop.f32.mrf.mxu3 }
 0x424   :  { %v4632_v13 = vadd.f32 %v4631_v37, %v4617_v44  ;;  %v3525_v44 = vadd.f32 %v18489_v3, %v3511_v26 }
 0x426   :  { %v3539_v51 = vadd.f32 %v18491_v7, %v3525_v44 }
 0x427   :  { %v4661_v28 = vpop.f32.mrf.mxu2 }
 0x42a   :  { %v18586_v3 = vpop.f32.mrf.mxu0 }
 0x42b   :  { %v4619_v47 = vpop.f32.mrf.mxu3 }
 0x42c   :  { %v4634_v41 = vadd.f32 %v4633_v15, %v4619_v47 }
 0x437   :  { %v18578_v5 = vpop.f32.mrf.mxu2 }
 0x43a   :  { %v4645_v48 = vpop.f32.mrf.mxu1 }
 0x43b   :  { %v4646_v22 = vadd.f32 %v4645_v48, %v4632_v13 }
 0x43d   :  { %v4660_v21 = vadd.f32 %v4659_v1, %v4646_v22  ;;  %v2620_v1 = vadd.f32 %v18399_v38, %v2606_v23  ;;  %v2494_v23 = vadd.f32 %v18355_v40, %v18353_v8  ;;  %v2662_v8 = vadd.f32 %v18397_v35, %v18426_v31 }
 0x43f   :  { %v4833_v9 = vadd.f32 %v4660_v21, %v18500_v39  ;;  %v2634_v39 = vadd.f32 %v18392_v50, %v2620_v1  ;;  %v4604_v21 = vadd.f32 %v4603_v14, %v4590_v20  ;;  %v4675_v25 = vpop.f32.mrf.mxu2 }
 0x441   :  { %v18576_v4 = vadd.f32 %v4845_v24, %v4833_v9  ;;  %v3553_v58 = vadd.f32 %v18517_v55, %v2634_v39  ;;  %v4832_v7 = vadd.f32 %v4604_v21, %v18473_v54 }
 0x442   :  { %v4647_v10 = vpop.f32.mrf.mxu1 }
 0x443   :  { %v18574_v37 = vpop.f32.mrf.mxu3  ;;  %v4648_v13 = vadd.f32 %v4647_v10, %v4634_v41  ;;  %v4865_v48 = vmax.f32 %v18576_v4, 0.0  ;;  %v3567_v22 = vadd.f32 %v18519_v11, %v3553_v58  ;;  %v2508_v41 = vadd.f32 %v18359_v45, %v2494_v23 }
 0x445   :  { %v4662_v60 = vadd.f32 %v4661_v28, %v4648_v13  ;;  %4890 = vrot.lane.b32.xlu1 %v4865_v48, %s17587_s29  ;;  %v4844_v28 = vperm.slane %v18566_v29, 0  ;;  %v3581_v50 = vadd.f32 %v18526_v56, %v3567_v22  ;;  %v4846_v56 = vperm.slane %v18566_v29, 2 }
 0x446   :  { %v2522_v1 = vadd.f32 %v18368_v18, %v2508_v41  ;;  %v2676_v13 = vadd.f32 %v18434_v57, %v2662_v8 }
 0x447   :  { %v4838_v26 = vadd.f32 %v4662_v60, %v3539_v51  ;;  %v18600_v55 = vadd.f32 %v4844_v28, %v4832_v7  ;;  %v3595_v42 = vadd.f32 %v18510_v61, %v3581_v50  ;;  %v4578_v51 = vadd.f32 %v18559_v27, %v18557_v46 }
 0x448   :  { %v3441_v40 = vadd.f32 %v18485_v6, %v2522_v1  ;;  %v2690_v31 = vadd.f32 %v18423_v33, %v2676_v13  ;;  %v4847_v27 = vperm.slane %v18566_v29, 3 }
 0x449   :  { %v18590_v38 = vadd.f32 %v4845_v24, %v4838_v26  ;;  %v4703_v24 = vpop.f32.mrf.mxu0  ;;  %v4864_v11 = vmax.f32 %v18600_v55, 0.0  ;;  %v4592_v6 = vadd.f32 %v18553_v36, %v4578_v51  ;;  %v4688_v36 = vadd.f32 %v18574_v37, %v18578_v5 }
 0x44a   :  { %v4715_v63 = vpop.f32.mrf.mxu1  ;;  %v3455_v45 = vadd.f32 %v18477_v59, %v3441_v40  ;;  %v3609_v26 = vadd.f32 %v18535_v32, %v2690_v31 }
 0x44b   :  { %v4689_v16 = vpop.f32.mrf.mxu3  ;;  %v4870_v47 = vmax.f32 %v18590_v38, 0.0 }
 0x44c   :  { %v4690_v15 = vadd.f32 %v4689_v16, %v4675_v25  ;;  %v3469_v57 = vadd.f32 %v18475_v19, %v3455_v45  ;;  %v3623_v58 = vadd.f32 %v18539_v62, %v3609_v26  ;;  %v4606_v16 = vadd.f32 %v18555_v0, %v4592_v6 }
 0x44d   :  { %4892 = vrot.lane.b32.xlu2 %v4870_v47, %s17587_s29 }
 0x44e   :  { %v4704_v14 = vadd.f32 %v4703_v24, %v4690_v15  ;;  %v3483_v33 = vadd.f32 %v18440_v52, %v3469_v57  ;;  %v3637_v32 = vadd.f32 %v18537_v17, %v3623_v58 }
 0x450   :  { %v4837_v24 = vadd.f32 %v4606_v16, %v3483_v33 }
 0x451   :  { %v4771_v35 = vpop.f32.mrf.mxu0 }
 0x452   :  { %v4717_v54 = vpop.f32.mrf.mxu1  ;;  %v4859_v5 = vadd.f32 %v4844_v28, %v4837_v24 }
 0x453   :  { %v4718_v9 = vadd.f32 %v4717_v54, %v4704_v14  ;;  %v4702_v14 = vadd.f32 %v18586_v3, %v4688_v36 }
 0x455   :  { %v4839_v44 = vadd.f32 %v4718_v9, %v3595_v42  ;;  %4876 = vrot.lane.b32.xlu2 %v4864_v11, %s17587_s29  ;;  %v4716_v52 = vadd.f32 %v4715_v63, %v4702_v14  ;;  %v4869_v9 = vmax.f32 %v4859_v5, 0.0  ;;  %v19813_v63 = vld [vmem:[#allocation24_spill] sm:$0xff] }
 0x456   :  { %v16777_v14 = vld [vmem:[#allocation14 + $0xd0] sm:$0xff] }
 0x457   :  { %v18611_v10 = vadd.f32 %v4846_v56, %v4839_v44  ;;  %v4743_v61 = vpop.f32.mrf.mxu2  ;;  %v4834_v17 = vadd.f32 %v4716_v52, %v18523_v34  ;;  %v16770_v52 = vld [vmem:[#allocation14 + $0x98] sm:$0xff] }
 0x458   :  { %5203 = vmatpush.bf16.msrb.mxu1 %v16770_v52 }
 0x459   :  { %v4871_v20 = vmax.f32 %v18611_v10, 0.0  ;;  %v4773_v0 = vpop.f32.mrf.mxu0  ;;  %v4856_v3 = vadd.f32 %v4846_v56, %v4834_v17  ;;  %v16764_v17 = vld [vmem:[#allocation14 + $0x68] sm:$0xff] }
 0x45b   :  { %v4866_v1 = vmax.f32 %v4856_v3, 0.0 }
 0x45d   :  { %4914 = vrot.lane.b32.xlu2 %v4871_v20, %s17587_s29 }
 0x45f   :  { %v4745_v7 = vpop.f32.mrf.mxu2 }
 0x461   :  { %v4757_v39 = vpop.f32.mrf.mxu3  ;;  %v4785_v41 = vpop.f32.mrf.mxu0 }
 0x462   :  { %v4729_v60 = vpop.f32.mrf.mxu1 }
 0x463   :  { %v4744_v18 = vadd.f32 %v4743_v61, %v4729_v60  ;;  %v19814_v60 = vld [vmem:[#allocation27_spill] sm:$0xff] }
 0x465   :  { %v4758_v21 = vadd.f32 %v4757_v39, %v4744_v18 }
 0x467   :  { %v4772_v46 = vadd.f32 %v4771_v35, %v4758_v21  ;;  %v19816_v35 = vld [vmem:[#allocation26_spill] sm:$0xff] }
 0x469   :  { %v4835_v59 = vadd.f32 %v4772_v46, %v18531_v30  ;;  %v4759_v19 = vpop.f32.mrf.mxu3  ;;  %v3651_v30 = vadd.f32 %v18533_v49, %v3637_v32  ;;  %v2718_v49 = vadd.f32 %v18465_v12, %v18463_v43  ;;  %v4848_v43 = vperm.slane %v18566_v29, 4  ;;  %v19815_v12 = vld [vmem:[#allocation25_spill] sm:$0xff]  ;;  %v4787_v56 = vpop.f32.mrf.mxu0 }
 0x46a   :  { %v4731_v25 = vpop.f32.mrf.mxu1 }
 0x46b   :  { %v4746_v22 = vadd.f32 %v4745_v7, %v4731_v25  ;;  %v18636_v15 = vadd.f32 %v4847_v27, %v4835_v59  ;;  %v2732_v44 = vadd.f32 %v18421_v53, %v2718_v49 }
 0x46d   :  { %v4760_v50 = vadd.f32 %v4759_v19, %v4746_v22  ;;  %v4867_v62 = vmax.f32 %v18636_v15, 0.0  ;;  %v2746_v8 = vadd.f32 %v19813_v63, %v2732_v44  ;;  %v16778_v15 = vld [vmem:[#allocation14 + $0xd8] sm:$0xff]  ;;  %v16769_v63 = vld [vmem:[#allocation14 + $0x90] sm:$0xff] }
 0x46e   :  { %5387 = vmatpush.bf16.msra.mxu2 %v16778_v15  ;;  %v16774_v44 = vld [vmem:[#allocation14 + $0xb8] sm:$0xff]  ;;  %5204 = vmatpush.bf16.msrb.mxu1 %v16769_v63  ;;  %v16799_v15 = vld [vmem:[#allocation14 + $0x180] sm:$0xff] }
 0x46f   :  { %v4774_v23 = vadd.f32 %v4773_v0, %v4760_v50  ;;  %4924 = vrot.lane.b32.xlu0 %v4867_v62, %s17587_s29  ;;  %v3665_v34 = vadd.f32 %v18551_v2, %v2746_v8  ;;  %v16773_v8 = vld [vmem:[#allocation14 + $0xb0] sm:$0xff] }
 0x471   :  { %v4840_v37 = vadd.f32 %v4774_v23, %v3651_v30  ;;  %v4827_v13 = vpop.f32.mrf.mxu3  ;;  %v3679_v45 = vadd.f32 %v19814_v60, %v3665_v34  ;;  %v16765_v23 = vld [vmem:[#allocation14 + $0x70] sm:$0xff]  ;;  %v16768_v34 = vld [vmem:[#allocation14 + $0x88] sm:$0xff]  ;;  %v16767_v60 = vld [vmem:[#allocation14 + $0x80] sm:$0xff] }
 0x472   :  { %5388 = vmatpush.bf16.msra.mxu2 %v16777_v14  ;;  %5205 = vmatpush.bf16.msrb.mxu1 %v16768_v34  ;;  %v16791_v14 = vld [vmem:[#allocation14 + $0x140] sm:$0xff] }
 0x473   :  { %v4862_v54 = vadd.f32 %v4847_v27, %v4840_v37  ;;  %v3693_v31 = vadd.f32 %v19816_v35, %v3679_v45  ;;  %v19817_v27 = vld [vmem:[#allocation28_spill] sm:$0xff]  ;;  %v16786_v45 = vld [vmem:[#allocation14 + $0x118] sm:$0xff] }
 0x474   :  { %v16754_v35 = vld [vmem:[#allocation14 + $0x18] sm:$0xff] }
 0x475   :  { %v4872_v42 = vmax.f32 %v4862_v54, 0.0  ;;  %v3707_v58 = vadd.f32 %v19817_v27, %v3693_v31  ;;  %v16776_v54 = vld [vmem:[#allocation14 + $0xc8] sm:$0xff]  ;;  %v16805_v31 = vld [vmem:[#allocation14 + $0x1b0] sm:$0xff]  ;;  %v16783_v27 = vld [vmem:[#allocation14 + $0x100] sm:$0xff] }
 0x476   :  { %5389 = vmatpush.bf16.msra.mxu2 %v16776_v54  ;;  %5206 = vmatpush.bf16.msrb.mxu1 %v16767_v60 }
 0x477   :  { %4926 = vrot.lane.b32.xlu1 %v4872_v42, %s17587_s29  ;;  %4878 = vrot.lane.b32.xlu0 %v4869_v9, %s17587_s29  ;;  %v4813_v28 = vpop.f32.mrf.mxu2 }
 0x479   :  { %v4829_v2 = vpop.f32.mrf.mxu3 }
 0x47a   :  { %5400 = vmatpush.bf16.msra.mxu1 %v16786_v45 }
 0x47f   :  { %4912 = vrot.lane.b32.xlu1 %v4866_v1, %s17587_s29  ;;  %v4815_v57 = vpop.f32.mrf.mxu2 }
 0x482   :  { %v4799_v40 = vpop.f32.mrf.mxu1 }
 0x483   :  { %v4800_v61 = vadd.f32 %v4799_v40, %v4785_v41  ;;  %v16758_v41 = vld [vmem:[#allocation14 + $0x38] sm:$0xff]  ;;  %v16761_v40 = vld [vmem:[#allocation14 + $0x50] sm:$0xff] }
 0x484   :  { %5173 = vmatpush.bf16.msrb.mxu3 %v16758_v41 }
 0x485   :  { %v4814_v51 = vadd.f32 %v4813_v28, %v4800_v61  ;;  %v16757_v28 = vld [vmem:[#allocation14 + $0x30] sm:$0xff]  ;;  %v16772_v61 = vld [vmem:[#allocation14 + $0xa8] sm:$0xff] }
 0x487   :  { %v4828_v18 = vadd.f32 %v4827_v13, %v4814_v51  ;;  %v16756_v13 = vld [vmem:[#allocation14 + $0x28] sm:$0xff] }
 0x488   :  { %5174 = vmatpush.bf16.msrb.mxu3 %v16757_v28  ;;  %v16760_v51 = vld [vmem:[#allocation14 + $0x48] sm:$0xff] }
 0x489   :  { %v4836_v53 = vadd.f32 %v4828_v18, %v19815_v12  ;;  %v16771_v18 = vld [vmem:[#allocation14 + $0xa0] sm:$0xff] }
 0x48a   :  { %v4801_v39 = vpop.f32.mrf.mxu1  ;;  %v16759_v12 = vld [vmem:[#allocation14 + $0x40] sm:$0xff] }
 0x48b   :  { %v4802_v6 = vadd.f32 %v4801_v39, %v4787_v56  ;;  %v4858_v21 = vadd.f32 %v4848_v43, %v4836_v53  ;;  %v16806_v53 = vld [vmem:[#allocation14 + $0x1b8] sm:$0xff]  ;;  %v16785_v39 = vld [vmem:[#allocation14 + $0x110] sm:$0xff] }
 0x48c   :  { %5175 = vmatpush.bf16.msrb.mxu3 %v16756_v13  ;;  %v16798_v56 = vld [vmem:[#allocation14 + $0x178] sm:$0xff]  ;;  %5401 = vmatpush.bf16.msra.mxu1 %v16785_v39  ;;  %v16809_v39 = vld [vmem:[#allocation14 + $0x1d0] sm:$0xff] }
 0x48d   :  { %v4816_v26 = vadd.f32 %v4815_v57, %v4802_v6  ;;  %v4868_v46 = vmax.f32 %v4858_v21, 0.0  ;;  %v16797_v21 = vld [vmem:[#allocation14 + $0x170] sm:$0xff]  ;;  %v16784_v57 = vld [vmem:[#allocation14 + $0x108] sm:$0xff] }
 0x48f   :  { %v4830_v16 = vadd.f32 %v4829_v2, %v4816_v26  ;;  %4944 = vrot.lane.b32.xlu0 %v4868_v46, %s17587_s29  ;;  %v16753_v26 = vld [vmem:[#allocation14 + $0x10] sm:$0xff]  ;;  %v16796_v2 = vld [vmem:[#allocation14 + $0x168] sm:$0xff] }
 0x490   :  { %5402 = vmatpush.bf16.msra.mxu1 %v16784_v57  ;;  %v16816_v57 = vld [vmem:[#allocation14 + $0x208] sm:$0xff] }
 0x491   :  { %v4841_v59 = vadd.f32 %v4830_v16, %v3707_v58  ;;  %v16752_v58 = vld [vmem:[#allocation14 + $0x8] sm:$0xff]  ;;  %v16803_v16 = vld [vmem:[#allocation14 + $0x1a0] sm:$0xff] }
 0x493   :  { %v4863_v7 = vadd.f32 %v4848_v43, %v4841_v59  ;;  %v16755_v43 = vld [vmem:[#allocation14 + $0x20] sm:$0xff] }
 0x494   :  { %5176 = vmatpush.bf16.msrb.mxu3 %v16755_v43  ;;  %v16795_v59 = vld [vmem:[#allocation14 + $0x160] sm:$0xff]  ;;  %5403 = vmatpush.bf16.msra.mxu1 %v16783_v27  ;;  %v16818_v43 = vld [vmem:[#allocation14 + $0x218] sm:$0xff] }
 0x495   :  { %v4873_v29 = vmax.f32 %v4863_v7, 0.0  ;;  %v19818_v7 = vlaneseq  ;;  %v16815_v27 = vld [vmem:[#allocation14 + $0x200] sm:$0xff] }
 0x497   :  { %4946 = vrot.lane.b32.xlu1 %v4873_v29, %s17587_s29 }
 0x498   :  { %5177 = vmatpush.bf16.msrb.mxu3 %v16754_v35  ;;  %v16817_v35 = vld [vmem:[#allocation14 + $0x210] sm:$0xff] }
 0x49c   :  { %5178 = vmatpush.bf16.msrb.mxu3 %v16753_v26  ;;  %v16836_v26 = vld [vmem:[#allocation14 + $0x2a8] sm:$0xff] }
 0x4a0   :  { %5179 = vmatpush.bf16.msrb.mxu3 %v16752_v58  ;;  %v16835_v58 = vld [vmem:[#allocation14 + $0x2a0] sm:$0xff] }
 0x4a7   :  { %v4893_v25 = vpop.permute.xlu2 %4892 }
 0x4a8   :  { %v4897_v33 = vmax.f32 %v4870_v47, %v4893_v25 }
 0x4aa   :  { %4902 = vrot.lane.b32.xlu0 %v4897_v33, %s17587_s29 }
 0x4af   :  { %v4877_v36 = vpop.permute.xlu2 %4876 }
 0x4b0   :  { %v4882_v22 = vmax.f32 %v4864_v11, %v4877_v36 }
 0x4b2   :  { %4885 = vst.msk [vmem:[#allocation4] sm:$0xff] %vm4884_vm13, %v4882_v22  ;;  %v16782_v22 = vld [vmem:[#allocation14 + $0xf8] sm:$0xff] }
 0x4b3   :  { %5404 = vmatpush.bf16.msra.mxu1 %v16782_v22 }
 0x4b7   :  { %v4891_v19 = vpop.permute.xlu1 %4890  ;;  %v4915_v32 = vpop.permute.xlu2 %4914 }
 0x4b8   :  { %v4896_v50 = vmax.f32 %v4865_v48, %v4891_v19  ;;  %v4919_v24 = vmax.f32 %v4871_v20, %v4915_v32  ;;  %v16751_v19 = vld [vmem:[#allocation14] sm:$0xff]  ;;  %v16802_v32 = vld [vmem:[#allocation14 + $0x198] sm:$0xff] }
 0x4b9   :  { %5180 = vmatpush.bf16.msrb.mxu3 %v16751_v19  ;;  %v16834_v19 = vld [vmem:[#allocation14 + $0x298] sm:$0xff] }
 0x4ba   :  { %4921 = vst.msk [vmem:[#allocation4 + $0x20] sm:$0x7] %vm19788_vm14, %v4919_v24  ;;  %4900 = vrot.lane.b32.xlu2 %v4896_v50, %s17587_s29  ;;  %v16790_v50 = vld [vmem:[#allocation14 + $0x138] sm:$0xff] }
 0x4bb   :  { %v16794_v24 = vld [vmem:[#allocation14 + $0x158] sm:$0xff] }
 0x4bd   :  { %5417 = vmatpush.bf16.msra.mxu3 %v16790_v50  ;;  %v16825_v50 = vld [vmem:[#allocation14 + $0x250] sm:$0xff] }
 0x4e1   :  { %v4925_v38 = vpop.permute.xlu0 %4924 }
 0x4e2   :  { %v4930_v47 = vmax.f32 %v4867_v62, %v4925_v38  ;;  %v16766_v62 = vld [vmem:[#allocation14 + $0x78] sm:$0xff]  ;;  %v16781_v38 = vld [vmem:[#allocation14 + $0xf0] sm:$0xff] }
 0x4e3   :  { %5186 = vmatpush.bf16.msra.mxu0 %v16766_v62  ;;  %5405 = vmatpush.bf16.msra.mxu1 %v16781_v38  ;;  %v16787_v62 = vld [vmem:[#allocation14 + $0x120] sm:$0xff]  ;;  %v16845_v38 = vld [vmem:[#allocation14 + $0x2f0] sm:$0xff] }
 0x4e4   :  { %4934 = vrot.lane.b32.xlu1 %v4930_v47, %s17587_s29  ;;  %v16801_v47 = vld [vmem:[#allocation14 + $0x190] sm:$0xff] }
 0x4e7   :  { %5187 = vmatpush.bf16.msra.mxu0 %v16765_v23 }
 0x4e9   :  { %v4927_v55 = vpop.permute.xlu1 %4926  ;;  %v4879_v11 = vpop.permute.xlu0 %4878 }
 0x4ea   :  { %v4931_v0 = vmax.f32 %v4872_v42, %v4927_v55  ;;  %v4883_v30 = vmax.f32 %v4869_v9, %v4879_v11  ;;  %v16775_v42 = vld [vmem:[#allocation14 + $0xc0] sm:$0xff]  ;;  %v16789_v55 = vld [vmem:[#allocation14 + $0x130] sm:$0xff] }
 0x4eb   :  { %5188 = vmatpush.bf16.msra.mxu0 %v16764_v17  ;;  %v16763_v9 = vld [vmem:[#allocation14 + $0x60] sm:$0xff]  ;;  %5390 = vmatpush.bf16.msra.mxu2 %v16775_v42  ;;  %v16793_v11 = vld [vmem:[#allocation14 + $0x150] sm:$0xff] }
 0x4ec   :  { %4887 = vst.msk [vmem:[#allocation4 + $0x18] sm:$0x7] %vm19788_vm14, %v4883_v30  ;;  %4936 = vrot.lane.b32.xlu2 %v4931_v0, %s17587_s29  ;;  %v16780_v30 = vld [vmem:[#allocation14 + $0xe8] sm:$0xff]  ;;  %5418 = vmatpush.bf16.msra.mxu3 %v16789_v55 }
 0x4ed   :  { %5406 = vmatpush.bf16.msra.mxu1 %v16780_v30  ;;  %v16824_v55 = vld [vmem:[#allocation14 + $0x248] sm:$0xff] }
 0x4ee   :  { %v16812_v30 = vld [vmem:[#allocation14 + $0x1e8] sm:$0xff] }
 0x4ef   :  { %5189 = vmatpush.bf16.msra.mxu0 %v16763_v9  ;;  %5391 = vmatpush.bf16.msra.mxu2 %v16774_v44 }
 0x4f1   :  { %v4913_v4 = vpop.permute.xlu1 %4912 }
 0x4f2   :  { %v4918_v48 = vmax.f32 %v4866_v1, %v4913_v4  ;;  %v16762_v1 = vld [vmem:[#allocation14 + $0x58] sm:$0xff]  ;;  %v16800_v4 = vld [vmem:[#allocation14 + $0x188] sm:$0xff] }
 0x4f3   :  { %5190 = vmatpush.bf16.msra.mxu0 %v16762_v1  ;;  %5392 = vmatpush.bf16.msra.mxu2 %v16773_v8 }
 0x4f4   :  { %4920 = vst.msk [vmem:[#allocation4 + $0x8] sm:$0xff] %vm4884_vm13, %v4918_v48  ;;  %v16788_v48 = vld [vmem:[#allocation14 + $0x128] sm:$0xff] }
 0x4f5   :  { %5419 = vmatpush.bf16.msra.mxu3 %v16788_v48  ;;  %v16832_v48 = vld [vmem:[#allocation14 + $0x288] sm:$0xff] }
 0x4f7   :  { %5191 = vmatpush.bf16.msra.mxu0 %v16761_v40  ;;  %5393 = vmatpush.bf16.msra.mxu2 %v16772_v61 }
 0x4f9   :  { %5420 = vmatpush.bf16.msra.mxu3 %v16787_v62  ;;  %v16823_v62 = vld [vmem:[#allocation14 + $0x240] sm:$0xff] }
 0x4fb   :  { %5192 = vmatpush.bf16.msra.mxu0 %v16760_v51  ;;  %5394 = vmatpush.bf16.msra.mxu2 %v16771_v18  ;;  %v16810_v51 = vld [vmem:[#allocation14 + $0x1d8] sm:$0xff] }
 0x4ff   :  { %5193 = vmatpush.bf16.msra.mxu0 %v16759_v12  ;;  %5609 = vmatpush.bf16.msrb.mxu2 %v16806_v53  ;;  %v16838_v12 = vld [vmem:[#allocation14 + $0x2b8] sm:$0xff] }
 0x500   :  { %v16830_v53 = vld [vmem:[#allocation14 + $0x278] sm:$0xff] }
 0x501   :  { %v4945_v10 = vpop.permute.xlu0 %4944 }
 0x502   :  { %v4950_v20 = vmax.f32 %v4868_v46, %v4945_v10  ;;  %v16804_v46 = vld [vmem:[#allocation14 + $0x1a8] sm:$0xff] }
 0x503   :  { %5596 = vmatpush.bf16.msrb.mxu0 %v16798_v56  ;;  %5610 = vmatpush.bf16.msrb.mxu2 %v16805_v31  ;;  %v16792_v10 = vld [vmem:[#allocation14 + $0x148] sm:$0xff]  ;;  %v16837_v31 = vld [vmem:[#allocation14 + $0x2b0] sm:$0xff] }
 0x504   :  { %4952 = vst.msk [vmem:[#allocation4 + $0x10] sm:$0xff] %vm4884_vm13, %v4950_v20  ;;  %v16779_v20 = vld [vmem:[#allocation14 + $0xe0] sm:$0xff] }
 0x505   :  { %5407 = vmatpush.bf16.msra.mxu1 %v16779_v20 }
 0x507   :  { %5597 = vmatpush.bf16.msrb.mxu0 %v16797_v21  ;;  %5611 = vmatpush.bf16.msrb.mxu2 %v16804_v46  ;;  %v16808_v21 = vld [vmem:[#allocation14 + $0x1c8] sm:$0xff] }
 0x508   :  { %v16828_v46 = vld [vmem:[#allocation14 + $0x268] sm:$0xff] }
 0x509   :  { %v4947_v37 = vpop.permute.xlu1 %4946 }
 0x50a   :  { %v4951_v5 = vmax.f32 %v4873_v29, %v4947_v37  ;;  %v19819_v29 = vmov 0 }
 0x50b   :  { %5598 = vmatpush.bf16.msrb.mxu0 %v16796_v2  ;;  %5612 = vmatpush.bf16.msrb.mxu2 %v16803_v16  ;;  %v16807_v2 = vld [vmem:[#allocation14 + $0x1c0] sm:$0xff] }
 0x50c   :  { %4953 = vst.msk [vmem:[#allocation4 + $0x28] sm:$0x7] %vm19788_vm14, %v4951_v5  ;;  %vm18685_vm14 = vcmp.lt.s32.totalorder %v19818_v7, 320  ;;  %v16827_v16 = vld [vmem:[#allocation14 + $0x260] sm:$0xff] }
 0x50d   :  { %v19820_v29 = vsel %vm18685_vm14, 4294967295, %v19819_v29 }
 0x50e   :  { %19821 = vst [vmem:[#allocation24_spill] sm:$0xff] %v19820_v29  ;;  %v15881_v29 = vld [vmem:[#allocation11 + $0xe60] sm:$0xf0] }
 0x50f   :  { %5599 = vmatpush.bf16.msrb.mxu0 %v16795_v59  ;;  %5613 = vmatpush.bf16.msrb.mxu2 %v16802_v32  ;;  %v16826_v59 = vld [vmem:[#allocation14 + $0x258] sm:$0xff] }
 0x513   :  { %5600 = vmatpush.bf16.msrb.mxu0 %v16794_v24  ;;  %5614 = vmatpush.bf16.msrb.mxu2 %v16801_v47  ;;  %v16813_v24 = vld [vmem:[#allocation14 + $0x1f0] sm:$0xff] }
 0x514   :  { %v4901_v49 = vpop.permute.xlu2 %4900  ;;  %v16833_v47 = vld [vmem:[#allocation14 + $0x290] sm:$0xff] }
 0x515   :  { %4907 = vst.msk [vmem:[#allocation4] sm:$0xff] %vm4906_vm15, %v4901_v49 }
 0x517   :  { %5601 = vmatpush.bf16.msrb.mxu0 %v16793_v11  ;;  %5615 = vmatpush.bf16.msrb.mxu2 %v16800_v4  ;;  %v14125_v11 = vld [vmem:[%s19770_s0 + $0x20] sm:$0xff]  ;;  %v16844_v4 = vld [vmem:[#allocation14 + $0x2e8] sm:$0xff] }
 0x518   :  { %v6060_v20 = vpack.c.bf16 %v14125_v11, %v14125_v11 }
 0x51b   :  { %5602 = vmatpush.bf16.msrb.mxu0 %v16792_v10  ;;  %5616 = vmatpush.bf16.msrb.mxu2 %v16799_v15  ;;  %v16811_v10 = vld [vmem:[#allocation14 + $0x1e0] sm:$0xff] }
 0x51c   :  { %v4903_v3 = vpop.permute.xlu0 %4902 }
 0x51d   :  { %4909 = vst.msk [vmem:[#allocation4 + $0x18] sm:$0x7] %vm4908_vm11, %v4903_v3 }
 0x51f   :  { %5603 = vmatpush.bf16.msrb.mxu0 %v16791_v14  ;;  %v14127_v14 = vld [vmem:[%s19770_s0 + $0x30] sm:$0xff] }
 0x546   :  { %v4937_v6 = vpop.permute.xlu2 %4936 }
 0x547   :  { %4941 = vst.msk [vmem:[#allocation4 + $0x20] sm:$0x7] %vm4908_vm11, %v4937_v6  ;;  %v16829_v6 = vld [vmem:[#allocation14 + $0x270] sm:$0xff] }
 0x54e   :  { %v4987_v25 = vld [vmem:[#allocation4 + $0x18] ss:$8 sm:$0x7]  ;;  %v4989_v33 = vld [vmem:[#allocation4 + $0x19] ss:$8 sm:$0x7] }
 0x54f   :  { %v4990_v36 = vmax.f32 %v4987_v25, %v4989_v33  ;;  %v16814_v33 = vld [vmem:[#allocation14 + $0x1f8] sm:$0xff] }
 0x551   :  { %4992 = vst.msk [vmem:[#allocation5 + $0x4] ss:$8 sm:$0x7] %vm18685_vm14, %v4990_v36  ;;  %v16846_v36 = vld [vmem:[#allocation14 + $0x2f8] sm:$0xff] }
 0x556   :  { %v4935_v0 = vpop.permute.xlu1 %4934 }
 0x557   :  { %4940 = vst.msk [vmem:[#allocation4 + $0x8] sm:$0xff] %vm4906_vm15, %v4935_v0  ;;  %v14126_v0 = vld [vmem:[%s19770_s0 + $0x28] sm:$0xff] }
 0x558   :  { %v6061_v15 = vpack.c.bf16 %v14126_v0, %v14126_v0 }
 0x55e   :  { %v4954_v23 = vld [vmem:[#allocation4] ss:$8 sm:$0x7]  ;;  %v4956_v52 = vld [vmem:[#allocation4 + $0x1] ss:$8 sm:$0x7] }
 0x55f   :  { %v4957_v37 = vmax.f32 %v4954_v23, %v4956_v52  ;;  %v4963_v5 = vld [vmem:[#allocation4 + $0x2] ss:$8 sm:$0x7]  ;;  %v4965_v54 = vld [vmem:[#allocation4 + $0x3] ss:$8 sm:$0x7] }
 0x560   :  { %v4966_v17 = vmax.f32 %v4963_v5, %v4965_v54  ;;  %v4971_v42 = vld [vmem:[#allocation4 + $0x4] ss:$8 sm:$0x7]  ;;  %v4973_v9 = vld [vmem:[#allocation4 + $0x5] ss:$8 sm:$0x7] }
 0x561   :  { %4960 = vst.msk [vmem:[#allocation5] ss:$8 sm:$0x7] %vm18685_vm14, %v4957_v37  ;;  %v4974_v49 = vmax.f32 %v4971_v42, %v4973_v9  ;;  %v4979_v3 = vld [vmem:[#allocation4 + $0x6] ss:$8 sm:$0x7]  ;;  %v6062_v42 = vpack.c.bf16 %v14127_v14, %v14127_v14 }
 0x562   :  { %4968 = vst.msk [vmem:[#allocation5 + $0x1] ss:$8 sm:$0x7] %vm18685_vm14, %v4966_v17  ;;  %v4981_v44 = vld [vmem:[#allocation4 + $0x7] ss:$8 sm:$0x7] }
 0x563   :  { %4976 = vst.msk [vmem:[#allocation5 + $0x2] ss:$8 sm:$0x7] %vm18685_vm14, %v4974_v49  ;;  %v4982_v41 = vmax.f32 %v4979_v3, %v4981_v44  ;;  %v14128_v23 = vld [vmem:[%s19770_s0 + $0x38] sm:$0xf]  ;;  %v16843_v52 = vld [vmem:[#allocation14 + $0x2e0] sm:$0xff]  ;;  %v6100_v49 = vunpack.c.l.b16 %v6060_v20  ;;  %v6101_v3 = vunpack.c.l.b16 %v6061_v15 }
 0x564   :  { %v14167_v37 = vld [vmem:[#allocation6 + $0xb0] sm:$0xf]  ;;  %v16876_v5 = vld [vmem:[#allocation6 + $0xc8] sm:$0x30]  ;;  %v16850_v54 = vld [vmem:[#allocation14 + $0x318] sm:$0xff]  ;;  %v6063_v9 = vpack.c.bf16 %v14128_v23, %v14128_v23  ;;  %s17592_s0 = smov [#allocation17]  }
 0x565   :  { %4984 = vst.msk [vmem:[#allocation5 + $0x3] ss:$8 sm:$0x7] %vm18685_vm14, %v4982_v41  ;;  %v16831_v17 = vld [vmem:[#allocation14 + $0x280] sm:$0xff]  ;;  %v14168_v44 = vor.u32 %v16876_v5, %v14167_v37  ;;  %v16868_v37 = vld [vmem:[#allocation6 + $0x88] sm:$0xf0] }
 0x566   :  { %v16839_v20 = vld [vmem:[#allocation14 + $0x2c0] sm:$0xff]  ;;  %s11920_s23 = sshll.u32 %s17592_s0, 4  ;;  %s11921_s23 = int_to_ptr.vmem [resolvable:$true] %s11920_s23 }
 0x56c   :  { %v4994_v1 = vld [vmem:[#allocation5] sm:$0x1f]  ;;  %v4995_v63 = vld [vmem:[#allocation5 + $0x8] sm:$0x1f]  ;;  %v4996_v8 = vld [vmem:[#allocation5 + $0x10] sm:$0x1f] }
 0x56d   :  { %v4997_v28 = vpack.c.bf16 %v4995_v63, %v4994_v1  ;;  %v4998_v40 = vpack.c.bf16 %v4996_v8, %v4996_v8  ;;  %v16822_v1 = vld [vmem:[#allocation14 + $0x238] sm:$0xff] }
 0x56e   :  { %v16842_v63 = vld [vmem:[#allocation14 + $0x2d8] sm:$0xff] }
 0x56f   :  { %v5042_v34 = vunpack.c.l.b16 %v4997_v28  ;;  %v5043_v61 = vunpack.c.h.b16 %v4997_v28  ;;  %v5044_v13 = vunpack.c.l.b16 %v4998_v40  ;;  %v16849_v40 = vld [vmem:[#allocation14 + $0x310] sm:$0xff] }
 0x571   :  { %v18700_v60 = vpack.c.b16 %v5042_v34, %v5042_v34  ;;  %v18702_v45 = vpack.c.b16 %v5043_v61, %v5043_v61  ;;  %v18704_v18 = vpack.c.b16 %v5044_v13, %v5044_v13  ;;  %v6102_v61 = vunpack.c.l.b16 %v6062_v42 }
 0x572   :  { %v6103_v13 = vunpack.c.l.b16 %v6063_v9 }
 0x573   :  { %5181 = vmatmul.bf16.vlgmr.msrb.gmra.mxu3 %v18700_v60  ;;  %5194 = vmatmul.bf16.vlgmr.msra.gmra.mxu0 %v18702_v45  ;;  %v5255_v56 = vshrl.u32 %v18700_v60, 16  ;;  %v5260_v7 = vshrl.u32 %v18704_v18, 16  ;;  %v5468_v25 = vrot.slane %v18700_v60, 1  ;;  %v5258_v22 = vshrl.u32 %v18702_v45, 16 }
 0x574   :  { %13800 = vmatmul.msk.bf16.vlgmr.msrb.gmra.mxu1 %vm4884_vm13, %v18704_v18  ;;  %5626 = vmatpush.bf16.msrb.mxu3 %v16810_v51  ;;  %v5469_v32 = vrot.slane %v18702_v45, 1  ;;  %v5470_v41 = vrot.slane %v18704_v18, 1  ;;  %v5886_v34 = vrot.slane %v18700_v60, 2  ;;  %v18737_v51 = vpack.c.b16 %v6101_v3, %v6100_v49  ;;  %v16848_v60 = vld [vmem:[#allocation14 + $0x308] sm:$0xff] }
 0x575   :  { %5805 = vmatpush.bf16.msrb.mxu1 %v16818_v43  ;;  %5395 = vmatmul.bf16.vlgmr.msra.gmra.mxu2 %v5255_v56  ;;  %v5677_v8 = vrot.slane %v5255_v56, 1  ;;  %v5679_v28 = vrot.slane %v5260_v7, 1  ;;  %v16821_v43 = vld [vmem:[#allocation14 + $0x230] sm:$0xff]  ;;  %v5678_v42 = vrot.slane %v5258_v22, 1  ;;  %v5887_v9 = vrot.slane %v18702_v45, 2 }
 0x576   :  { %6014 = vmatpush.bf16.msra.mxu2 %v16838_v12  ;;  %5835 = vmatpush.bf16.msra.mxu0 %v16830_v53  ;;  %v6199_v12 = vsel %vm255_vm0, %v14168_v44, 0  ;;  %v14139_v53 = vld [vmem:[#allocation6 + $0x78] sm:$0xf]  ;;  %v16869_v56 = vld [vmem:[#allocation6 + $0x90] sm:$0xf0]  ;;  %v5888_v3 = vrot.slane %v18704_v18, 2 }
 0x577   :  { %v16877_v45 = vld [vmem:[#allocation6 + $0xd0] sm:$0x30]  ;;  %v14229_v18 = vld [vmem:[#allocation6 + $0x38] sm:$0xf] }
 0x578   :  { %5627 = vmatpush.bf16.msrb.mxu3 %v16809_v39  ;;  %v16841_v39 = vld [vmem:[#allocation14 + $0x2d0] sm:$0xff] }
 0x579   :  { %5806 = vmatpush.bf16.msrb.mxu1 %v16817_v35  ;;  %v16872_v35 = vld [vmem:[#allocation6 + $0xac] sm:$0xf] }
 0x57a   :  { %6015 = vmatpush.bf16.msra.mxu2 %v16837_v31  ;;  %5836 = vmatpush.bf16.msra.mxu0 %v16829_v6  ;;  %v14161_v31 = vld [vmem:[#allocation6 + $0xc4] sm:$0x30]  ;;  %v14183_v6 = vld [vmem:[#allocation6 + $0xc0] sm:$0xf] }
 0x57c   :  { %5628 = vmatpush.bf16.msrb.mxu3 %v16808_v21  ;;  %v16878_v21 = vld [vmem:[#allocation6 + $0xd8] sm:$0x30] }
 0x57d   :  { %5807 = vmatpush.bf16.msrb.mxu1 %v16816_v57  ;;  %v14140_v57 = vor.u32 %v16869_v56, %v14139_v53  ;;  %v14149_v53 = vld [vmem:[#allocation6 + $0x9c] sm:$0xf0] }
 0x57e   :  { %6016 = vmatpush.bf16.msra.mxu2 %v16836_v26  ;;  %5837 = vmatpush.bf16.msra.mxu0 %v16828_v46  ;;  %v18741_v26 = vpack.c.b16 %v6103_v13, %v6102_v61  ;;  %v6109_v46 = vshll.u32 %v18737_v51, 16  ;;  %v14147_v61 = vld [vmem:[#allocation6 + $0x80] sm:$0xf]  ;;  %v16870_v13 = vld [vmem:[#allocation6 + $0x98] sm:$0xf0] }
 0x57f   :  { %v14201_v56 = vld [vmem:[#allocation6] sm:$0xf] }
 0x580   :  { %5629 = vmatpush.bf16.msrb.mxu3 %v16807_v2  ;;  %v14159_v2 = vld [vmem:[#allocation6 + $0xa8] sm:$0xf] }
 0x581   :  { %5808 = vmatpush.bf16.msrb.mxu1 %v16815_v27  ;;  %v16875_v27 = vld [vmem:[#allocation6 + $0xc0] sm:$0x30] }
 0x582   :  { %6017 = vmatpush.bf16.msra.mxu2 %v16835_v58  ;;  %5838 = vmatpush.bf16.msra.mxu0 %v16827_v16  ;;  %v14184_v58 = vor.u32 %v16878_v21, %v14183_v6  ;;  %v16820_v16 = vld [vmem:[#allocation14 + $0x228] sm:$0xff] }
 0x583   :  { %13881 = vmatmul.msk.bf16.vlgmr.msra.gmra.mxu3 %vm4884_vm13, %v5260_v7  ;;  %5604 = vmatmul.bf16.vlgmr.msrb.gmra.mxu0 %v5468_v25  ;;  %v16873_v7 = vld [vmem:[#allocation6 + $0xb4] sm:$0xf]  ;;  %v14169_v25 = vld [vmem:[#allocation6 + $0xcc] sm:$0x30] }
 0x584   :  { %5408 = vmatmul.bf16.vlgmr.msra.gmra.mxu1 %v5258_v22  ;;  %5818 = vmatpush.bf16.msra.mxu3 %v16826_v59  ;;  %v14164_v59 = vor.u32 %v16872_v35, %v14161_v31  ;;  %v14172_v11 = vor.u32 %v16873_v7, %v14169_v25  ;;  %v14175_v22 = vld [vmem:[#allocation6 + $0xb8] sm:$0xf]  ;;  %v14148_v31 = vor.u32 %v16870_v13, %v14147_v61 }
 0x585   :  { %5809 = vmatpush.bf16.msrb.mxu1 %v16814_v33  ;;  %5617 = vmatmul.bf16.vlgmr.msrb.gmra.mxu2 %v5469_v32  ;;  %v16840_v33 = vld [vmem:[#allocation14 + $0x2c8] sm:$0xff] }
 0x586   :  { %6027 = vmatpush.bf16.msrb.mxu0 %v16846_v36  ;;  %6018 = vmatpush.bf16.msra.mxu2 %v16834_v19  ;;  %v6211_v36 = vsel %vm255_vm0, %v14184_v58, 0  ;;  %v14155_v19 = vld [vmem:[#allocation6 + $0x88] sm:$0xf]  ;;  %v16871_v32 = vld [vmem:[#allocation6 + $0xa0] sm:$0xf0]  ;;  %v6196_v0 = vsel %vm255_vm0, %v14164_v59, 0 }
 0x587   :  { %v6202_v23 = vsel %vm255_vm0, %v14172_v11, 0  ;;  %v14211_v59 = vld [vmem:[#allocation6 + $0x24] sm:$0xf0] }
 0x588   :  { %5819 = vmatpush.bf16.msra.mxu3 %v16825_v50  ;;  %v16847_v50 = vld [vmem:[#allocation14 + $0x300] sm:$0xff] }
 0x589   :  { %5810 = vmatpush.bf16.msrb.mxu1 %v16813_v24  ;;  %v14160_v24 = vor.u32 %v16875_v27, %v14159_v2  ;;  %v16859_v2 = vld [vmem:[#allocation6 + $0x44] sm:$0xf]  ;;  %v14239_v27 = vld [vmem:[#allocation6 + $0x5c] sm:$0x30] }
 0x58a   :  { %6028 = vmatpush.bf16.msrb.mxu0 %v16845_v38  ;;  %6019 = vmatpush.bf16.msra.mxu2 %v16833_v47  ;;  %v6107_v38 = vshrl.u32 %v18737_v51, 16  ;;  %v6111_v47 = vrot.slane %v6109_v46, 1  ;;  %v14242_v58 = vor.u32 %v16859_v2, %v14239_v27 }
 0x58b   :  { %v6193_v15 = vsel %vm255_vm0, %v14160_v24, 0  ;;  %v14245_v24 = vld [vmem:[#allocation6 + $0x48] sm:$0xf] }
 0x58c   :  { %5820 = vmatpush.bf16.msra.mxu3 %v16824_v55  ;;  %v6114_v55 = vshll.u32 %v18741_v26, 16  ;;  %v6425_v7 = vsel %vm255_vm0, %v14242_v58, 0  ;;  %v14315_v58 = vld [vmem:[#allocation6 + $0x128] sm:$0xf] }
 0x58d   :  { %5811 = vmatpush.bf16.msrb.mxu1 %v16812_v30  ;;  %v16865_v30 = vld [vmem:[#allocation6 + $0x74] sm:$0xf] }
 0x58e   :  { %6029 = vmatpush.bf16.msrb.mxu0 %v16844_v4  ;;  %6020 = vmatpush.bf16.msra.mxu2 %v16832_v48  ;;  %v14133_v4 = vld [vmem:[#allocation6 + $0x8c] sm:$0xf0]  ;;  %v14156_v48 = vor.u32 %v16871_v32, %v14155_v19  ;;  %v6116_v14 = vrot.slane %v6114_v55, 1  ;;  %v14237_v19 = vld [vmem:[#allocation6 + $0x40] sm:$0xf] }
 0x58f   :  { %v14136_v5 = vor.u32 %v16865_v30, %v14133_v4  ;;  %v16851_v4 = vld [vmem:[#allocation6 + $0x4] sm:$0xf] }
 0x590   :  { %5821 = vmatpush.bf16.msra.mxu3 %v16823_v62  ;;  %v6112_v62 = vor.u32 %v6111_v47, %v6107_v38  ;;  %v16863_v38 = vld [vmem:[#allocation6 + $0x60] sm:$0x30] }
 0x591   :  { %5812 = vmatpush.bf16.msrb.mxu1 %v16811_v10  ;;  %v16819_v10 = vld [vmem:[#allocation14 + $0x220] sm:$0xff]  ;;  %v14246_v55 = vor.u32 %v16863_v38, %v14245_v24  ;;  %v14287_v24 = vld [vmem:[#allocation6 + $0xf0] sm:$0xf]  ;;  %v16884_v38 = vld [vmem:[#allocation6 + $0x108] sm:$0xf0] }
 0x592   :  { %6030 = vmatpush.bf16.msrb.mxu0 %v16843_v52  ;;  %6021 = vmatpush.bf16.msra.mxu2 %v16831_v17  ;;  %v14131_v52 = vld [vmem:[#allocation6 + $0x70] sm:$0xf]  ;;  %v14141_v17 = vld [vmem:[#allocation6 + $0x94] sm:$0xf0]  ;;  %v18755_v44 = vsel %vm167_vm2, %v6112_v62, %v6116_v14 }
 0x593   :  { %13962 = vmatmul.msk.bf16.vlgmr.msrb.gmra.mxu3 %vm4884_vm13, %v5470_v41  ;;  %14043 = vmatmul.msk.bf16.vlgmr.msra.gmra.mxu0 %vm4884_vm13, %v5679_v28  ;;  %v14132_v49 = vor.u32 %v16868_v37, %v14131_v52  ;;  %v16861_v28 = vld [vmem:[#allocation6 + $0x50] sm:$0x30]  ;;  %v6428_v30 = vsel %vm255_vm0, %v14246_v55, 0  ;;  %v14217_v62 = vld [vmem:[#allocation6 + $0x10] sm:$0xf]  ;;  %v14288_v55 = vor.u32 %v16884_v38, %v14287_v24 }
 0x594   :  { %5813 = vmatmul.bf16.vlgmr.msrb.gmra.mxu1 %v5677_v8  ;;  %5822 = vmatpush.bf16.msra.mxu3 %v16822_v1  ;;  %v16874_v1 = vld [vmem:[#allocation6 + $0xbc] sm:$0xf]  ;;  %v14177_v8 = vld [vmem:[#allocation6 + $0xd4] sm:$0x30] }
 0x595   :  { %6044 = vmatpush.bf16.msra.mxu1 %v16850_v54  ;;  %6022 = vmatmul.bf16.vlgmr.msra.gmra.mxu2 %v5886_v34  ;;  %v16866_v54 = vld [vmem:[#allocation6 + $0x7c] sm:$0xf]  ;;  %v14230_v34 = vor.u32 %v16861_v28, %v14229_v18  ;;  %v14299_v37 = vld [vmem:[#allocation6 + $0x118] sm:$0xf] }
 0x596   :  { %6031 = vmatpush.bf16.msrb.mxu0 %v16842_v63  ;;  %6257 = vmatpush.bf16.msrb.mxu2 %v6199_v12  ;;  %v14144_v41 = vor.u32 %v16866_v54, %v14141_v17  ;;  %v14176_v63 = vor.u32 %v16877_v45, %v14175_v22  ;;  %v16864_v45 = vld [vmem:[#allocation6 + $0x68] sm:$0x30] }
 0x597   :  { %v6416_v35 = vsel %vm255_vm0, %v14230_v34, 0 }
 0x598   :  { %5823 = vmatpush.bf16.msra.mxu3 %v16821_v43  ;;  %v16867_v43 = vld [vmem:[#allocation6 + $0x84] sm:$0xf]  ;;  %v6205_v12 = vsel %vm255_vm0, %v14176_v63, 0  ;;  %v14301_v63 = vld [vmem:[#allocation6 + $0x134] sm:$0x30] }
 0x599   :  { %6045 = vmatpush.bf16.msra.mxu1 %v16849_v40  ;;  %v14180_v40 = vor.u32 %v16874_v1, %v14177_v8  ;;  %v14152_v6 = vor.u32 %v16867_v43, %v14149_v53  ;;  %v16886_v1 = vld [vmem:[#allocation6 + $0x11c] sm:$0xf]  ;;  %v16853_v43 = vld [vmem:[#allocation6 + $0x14] sm:$0xf]  ;;  %v14225_v53 = vld [vmem:[#allocation6 + $0x18] sm:$0xf] }
 0x59a   :  { %6032 = vmatpush.bf16.msrb.mxu0 %v16841_v39  ;;  %6258 = vmatpush.bf16.msrb.mxu2 %v14140_v57  ;;  %v6118_v57 = vshrl.u32 %v18741_v26, 16  ;;  %v14304_v18 = vor.u32 %v16886_v1, %v14301_v63  ;;  %v14289_v1 = vld [vmem:[#allocation6 + $0x10c] sm:$0xf0] }
 0x59b   :  { %v6208_v39 = vsel %vm255_vm0, %v14180_v40, 0 }
 0x59c   :  { %5824 = vmatpush.bf16.msra.mxu3 %v16820_v16  ;;  %v6120_v46 = vor.u32 %v6118_v57, %v6116_v14  ;;  %v16852_v16 = vld [vmem:[#allocation6 + $0xc] sm:$0xf]  ;;  %v6663_v34 = vsel %vm255_vm0, %v14304_v18, 0 }
 0x59d   :  { %6046 = vmatpush.bf16.msra.mxu1 %v16848_v60  ;;  %v16854_v60 = vld [vmem:[#allocation6 + $0x18] sm:$0xf0]  ;;  %v14214_v25 = vor.u32 %v16852_v16, %v14211_v59  ;;  %v16856_v14 = vld [vmem:[#allocation6 + $0x28] sm:$0xf0]  ;;  %v16891_v16 = vld [vmem:[#allocation6 + $0x140] sm:$0x30] }
 0x59e   :  { %6333 = vmatpush.bf16.msra.mxu2 %v6211_v36  ;;  %6033 = vmatpush.bf16.msrb.mxu0 %v16840_v33  ;;  %v14202_v21 = vor.u32 %v16854_v60, %v14201_v56  ;;  %v16858_v33 = vld [vmem:[#allocation6 + $0x3c] sm:$0xf]  ;;  %v14231_v36 = vld [vmem:[#allocation6 + $0x54] sm:$0x30]  ;;  %v14218_v52 = vor.u32 %v16856_v14, %v14217_v62  ;;  %v6585_v59 = vrot.slane %v18737_v51, 1 }
 0x59f   :  { %v14234_v32 = vor.u32 %v16858_v33, %v14231_v36 }
 0x5a0   :  { %5825 = vmatpush.bf16.msra.mxu3 %v16819_v10  ;;  %v14209_v10 = vld [vmem:[#allocation6 + $0x8] sm:$0xf] }
 0x5a1   :  { %6047 = vmatpush.bf16.msra.mxu1 %v16847_v50  ;;  %v16862_v50 = vld [vmem:[#allocation6 + $0x58] sm:$0x30]  ;;  %v6419_v11 = vsel %vm255_vm0, %v14234_v32, 0 }
 0x5a2   :  { %6334 = vmatpush.bf16.msra.mxu2 %v14156_v48  ;;  %6034 = vmatpush.bf16.msrb.mxu0 %v16839_v20  ;;  %v14238_v47 = vor.u32 %v16862_v50, %v14237_v19  ;;  %v14203_v48 = vld [vmem:[#allocation6 + $0x1c] sm:$0xf0] }
 0x5a3   :  { %5826 = vmatmul.bf16.vlgmr.msra.gmra.mxu3 %v5678_v42  ;;  %v14206_v20 = vor.u32 %v16851_v4, %v14203_v48  ;;  %v14271_v42 = vld [vmem:[#allocation6 + $0xe0] sm:$0xf] }
 0x5a4   :  { %6219 = vmatpush.bf16.msrb.mxu3 %v6193_v15  ;;  %14124 = vmatmul.msk.bf16.vlgmr.msra.gmra.mxu1 %vm4884_vm13, %v5888_v3  ;;  %v16855_v15 = vld [vmem:[#allocation6 + $0x20] sm:$0xf0]  ;;  %v16860_v3 = vld [vmem:[#allocation6 + $0x4c] sm:$0xf]  ;;  %v14307_v48 = vld [vmem:[#allocation6 + $0x120] sm:$0xf] }
 0x5a5   :  { %6238 = vmatpush.bf16.msrb.mxu1 %v6196_v0  ;;  %6035 = vmatmul.bf16.vlgmr.msrb.gmra.mxu0 %v5887_v9  ;;  %v6422_v0 = vsel %vm255_vm0, %v14238_v47, 0  ;;  %v16882_v9 = vld [vmem:[#allocation6 + $0xf8] sm:$0xf0] }
 0x5a6   :  { %6276 = vmatpush.bf16.msra.mxu0 %v6202_v23  ;;  %14189 = vmatmul.msk.bf16.vlgmr.msrb.gmra.mxu2 %vm248_vm1, %v18755_v44  ;;  %v14210_v23 = vor.u32 %v16855_v15, %v14209_v10  ;;  %v16890_v10 = vld [vmem:[#allocation6 + $0x138] sm:$0x30] }
 0x5a7   :  { %6499 = vmatpush.bf16.msrb.mxu2 %v6425_v7  ;;  %v18815_v7 = vrot.slane %v18741_v26, 1  ;;  %v14308_v14 = vor.u32 %v16890_v10, %v14307_v48  ;;  %v16885_v48 = vld [vmem:[#allocation6 + $0x110] sm:$0xf0] }
 0x5a8   :  { %6220 = vmatpush.bf16.msrb.mxu3 %v14132_v49  ;;  %v14272_v49 = vor.u32 %v16882_v9, %v14271_v42  ;;  %v14279_v42 = vld [vmem:[#allocation6 + $0xe8] sm:$0xf]  ;;  %v16883_v9 = vld [vmem:[#allocation6 + $0x100] sm:$0xf0] }
 0x5a9   :  { %6239 = vmatpush.bf16.msrb.mxu1 %v14136_v5  ;;  %v16889_v5 = vld [vmem:[#allocation6 + $0x130] sm:$0x30]  ;;  %v18822_v50 = vsel %vm650_vm3, %v6585_v59, %v18815_v7  ;;  %v14280_v63 = vor.u32 %v16883_v9, %v14279_v42  ;;  %vm19838_vm3 = vcmask 518144  }
 0x5aa   :  { %6277 = vmatpush.bf16.msra.mxu0 %v14144_v41  ;;  %v14300_v54 = vor.u32 %v16889_v5, %v14299_v37  ;;  %v14253_v41 = vld [vmem:[#allocation6 + $0x50] sm:$0xf]  ;;  %v14317_v37 = vld [vmem:[#allocation6 + $0x144] sm:$0x30] }
 0x5ab   :  { %6500 = vmatpush.bf16.msrb.mxu2 %v14214_v25  ;;  %v14254_v8 = vor.u32 %v16864_v45, %v14253_v41  ;;  %v14316_v25 = vor.u32 %v16891_v16, %v14315_v58  ;;  %v16881_v45 = vld [vmem:[#allocation6 + $0xf4] sm:$0xf] }
 0x5ac   :  { %6295 = vmatpush.bf16.msra.mxu3 %v6205_v12  ;;  %v6660_v17 = vsel %vm255_vm0, %v14300_v54, 0  ;;  %v14219_v12 = vld [vmem:[#allocation6 + $0x2c] sm:$0xf0] }
 0x5ad   :  { %6314 = vmatpush.bf16.msra.mxu1 %v6208_v39  ;;  %v6434_v40 = vsel %vm255_vm0, %v14254_v8, 0  ;;  %v14222_v56 = vor.u32 %v16853_v43, %v14219_v12  ;;  %v16857_v39 = vld [vmem:[#allocation6 + $0x30] sm:$0xf0]  ;;  %v6672_v32 = vsel %vm255_vm0, %v14316_v25, 0 }
 0x5ae   :  { %6442 = vmatpush.bf16.msrb.mxu0 %v6416_v35  ;;  %v16879_v35 = vld [vmem:[#allocation6 + $0xe4] sm:$0xf]  ;;  %v14226_v60 = vor.u32 %v16857_v39, %v14225_v53 }
 0x5b0   :  { %6296 = vmatpush.bf16.msra.mxu3 %v14148_v31  ;;  %v14273_v31 = vld [vmem:[#allocation6 + $0xfc] sm:$0xf0] }
 0x5b1   :  { %6315 = vmatpush.bf16.msra.mxu1 %v14152_v6  ;;  %v14276_v6 = vor.u32 %v16879_v35, %v14273_v31 }
 0x5b2   :  { %6443 = vmatpush.bf16.msrb.mxu0 %v14202_v21 }
 0x5b3   :  { %14185 = vmatmul.msk.bf16.vlgmr.msrb.gmra.mxu3 %vm248_vm1, %v18755_v44 }
 0x5b4   :  { %14187 = vmatmul.msk.bf16.vlgmr.msrb.gmra.mxu1 %vm248_vm1, %v18755_v44  ;;  %6461 = vmatpush.bf16.msrb.mxu3 %v6419_v11 }
 0x5b5   :  { %14191 = vmatmul.msk.bf16.vlgmr.msra.gmra.mxu0 %vm248_vm1, %v18755_v44  ;;  %6480 = vmatpush.bf16.msrb.mxu1 %v6422_v0 }
 0x5b6   :  { %14190 = vmatmul.msk.bf16.gmra.mxu2 %vm248_vm1, %v6120_v46  ;;  %6518 = vmatpush.bf16.msra.mxu0 %v6428_v30 }
 0x5b8   :  { %6462 = vmatpush.bf16.msrb.mxu3 %v14206_v20  ;;  %v16887_v20 = vld [vmem:[#allocation6 + $0x124] sm:$0xf] }
 0x5b9   :  { %6481 = vmatpush.bf16.msrb.mxu1 %v14210_v23  ;;  %v14309_v23 = vld [vmem:[#allocation6 + $0x13c] sm:$0x30] }
 0x5ba   :  { %6519 = vmatpush.bf16.msra.mxu0 %v14218_v52  ;;  %v16888_v52 = vld [vmem:[#allocation6 + $0x12c] sm:$0xf]  ;;  %v14312_v54 = vor.u32 %v16887_v20, %v14309_v23 }
 0x5bc   :  { %v6669_v41 = vsel %vm255_vm0, %v14312_v54, 0 }
 0x5c3   :  { %14186 = vmatmul.msk.bf16.gmra.mxu3 %vm248_vm1, %v6120_v46 }
 0x5c4   :  { %14188 = vmatmul.msk.bf16.gmra.mxu1 %vm248_vm1, %v6120_v46 }
 0x5c5   :  { %14192 = vmatmul.msk.bf16.gmra.mxu0 %vm248_vm1, %v6120_v46 }
 0x5c6   :  { %14197 = vmatmul.msk.bf16.vlgmr.msra.gmra.mxu2 %vm248_vm1, %v18755_v44 }
 0x5c7   :  { %6686 = vmatpush.bf16.msra.mxu2 %v6660_v17  ;;  %v14320_v17 = vor.u32 %v16888_v52, %v14317_v37 }
 0x5cb   :  { %6687 = vmatpush.bf16.msra.mxu2 %v14272_v49  ;;  %v6666_v49 = vsel %vm255_vm0, %v14308_v14, 0 }
 0x5d3   :  { %14193 = vmatmul.msk.bf16.vlgmr.msra.gmra.mxu3 %vm248_vm1, %v18755_v44 }
 0x5d4   :  { %14195 = vmatmul.msk.bf16.vlgmr.msra.gmra.mxu1 %vm248_vm1, %v18755_v44  ;;  %v14247_v44 = vld [vmem:[#allocation6 + $0x64] sm:$0x30] }
 0x5d5   :  { %14255 = vmatmul.msk.bf16.vlgmr.msrb.gmra.mxu0 %vm248_vm1, %v18737_v51  ;;  %v14250_v22 = vor.u32 %v16860_v3, %v14247_v44  ;;  %6556 = vmatpush.bf16.msra.mxu1 %v6434_v40  ;;  %v16880_v3 = vld [vmem:[#allocation6 + $0xec] sm:$0xf]  ;;  %v14281_v44 = vld [vmem:[#allocation6 + $0x104] sm:$0xf0] }
 0x5d6   :  { %14198 = vmatmul.msk.bf16.gmra.mxu2 %vm248_vm1, %v6120_v46  ;;  %6705 = vmatpush.bf16.msrb.mxu0 %v6663_v34  ;;  %v14284_v18 = vor.u32 %v16880_v3, %v14281_v44 }
 0x5d7   :  { %v6431_v28 = vsel %vm255_vm0, %v14250_v22, 0  ;;  %v6675_v22 = vsel %vm255_vm0, %v14320_v17, 0 }
 0x5d8   :  { %6537 = vmatpush.bf16.msra.mxu3 %v6431_v28  ;;  %v14292_v28 = vor.u32 %v16881_v45, %v14289_v1 }
 0x5d9   :  { %6557 = vmatpush.bf16.msra.mxu1 %v14226_v60  ;;  %v4999_v60 = vld [vmem:[#allocation15] sm:$0x1] }
 0x5da   :  { %6706 = vmatpush.bf16.msrb.mxu0 %v14276_v6 }
 0x5dc   :  { %6538 = vmatpush.bf16.msra.mxu3 %v14222_v56 }
 0x5e3   :  { %14194 = vmatmul.msk.bf16.gmra.mxu3 %vm248_vm1, %v6120_v46 }
 0x5e4   :  { %14196 = vmatmul.msk.bf16.gmra.mxu1 %vm248_vm1, %v6120_v46 }
 0x5e5   :  { %14256 = vmatmul.msk.bf16.gmra.mxu0 %vm248_vm1, %v18741_v26 }
 0x5e6   :  { %14261 = vmatmul.msk.bf16.vlgmr.msrb.gmra.mxu2 %vm248_vm1, %v18737_v51 }
 0x5e7   :  { %6762 = vmatpush.bf16.msrb.mxu2 %v6672_v32 }
 0x5eb   :  { %6763 = vmatpush.bf16.msrb.mxu2 %v14288_v55 }
 0x5f0   :  { %v18797_v61 = vpop.f32.mrf.mxu0 }
 0x5f1   :  { %v18799_v13 = vpop.f32.mrf.mxu1 }
 0x5f3   :  { %14257 = vmatmul.msk.bf16.vlgmr.msrb.gmra.mxu3 %vm248_vm1, %v18737_v51 }
 0x5f4   :  { %14259 = vmatmul.msk.bf16.vlgmr.msrb.gmra.mxu1 %vm248_vm1, %v18737_v51  ;;  %6724 = vmatpush.bf16.msrb.mxu3 %v6666_v49 }
 0x5f5   :  { %14263 = vmatmul.msk.bf16.vlgmr.msra.gmra.mxu0 %vm248_vm1, %v18737_v51  ;;  %6743 = vmatpush.bf16.msrb.mxu1 %v6669_v41 }
 0x5f6   :  { %14262 = vmatmul.msk.bf16.gmra.mxu2 %vm248_vm1, %v18741_v26  ;;  %v18809_v21 = vpop.f32.mrf.mxu3  ;;  %6781 = vmatpush.bf16.msra.mxu0 %v6675_v22 }
 0x5f7   :  { %v5196_v12 = vadd.f32 %v18797_v61, %v18809_v21 }
 0x5f8   :  { %v5197_v57 = vpop.f32.mrf.mxu0  ;;  %v18811_v46 = vpop.f32.mrf.mxu2  ;;  %6725 = vmatpush.bf16.msrb.mxu3 %v14280_v63 }
 0x5f9   :  { %v5210_v2 = vpop.f32.mrf.mxu1  ;;  %6744 = vmatpush.bf16.msrb.mxu1 %v14284_v18  ;;  %v5209_v56 = vadd.f32 %v18799_v13, %v5196_v12 }
 0x5fa   :  { %6782 = vmatpush.bf16.msra.mxu0 %v14292_v28 }
 0x5fb   :  { %v5212_v61 = vadd.f32 %v5209_v56, %v4999_v60 }
 0x5fe   :  { %v5184_v27 = vpop.f32.mrf.mxu3 }
 0x600   :  { %v5398_v33 = vpop.f32.mrf.mxu2  ;;  %v18817_v36 = vpop.f32.mrf.mxu0 }
 0x601   :  { %v5409_v19 = vpop.f32.mrf.mxu1 }
 0x602   :  { %v5410_v39 = vadd.f32 %v5409_v19, %v18811_v46  ;;  %v16892_v19 = vld [vmem:[#allocation6 + $0x148] sm:$0x30] }
 0x603   :  { %14258 = vmatmul.msk.bf16.gmra.mxu3 %vm248_vm1, %v18741_v26 }
 0x604   :  { %14260 = vmatmul.msk.bf16.gmra.mxu1 %vm248_vm1, %v18741_v26 }
 0x605   :  { %14264 = vmatmul.msk.bf16.gmra.mxu0 %vm248_vm1, %v18741_v26 }
 0x606   :  { %14325 = vmatmul.msk.bf16.vlgmr.msra.gmra.mxu2 %vm248_vm1, %v18822_v50  ;;  %v5422_v47 = vpop.f32.mrf.mxu3 }
 0x607   :  { %v5423_v6 = vadd.f32 %v5422_v47, %v5410_v39 }
 0x608   :  { %v5607_v11 = vpop.f32.mrf.mxu0  ;;  %v5618_v30 = vpop.f32.mrf.mxu2 }
 0x609   :  { %v5411_v0 = vpop.f32.mrf.mxu1  ;;  %v5619_v57 = vadd.f32 %v5618_v30, %v18817_v36  ;;  %v5426_v46 = vadd.f32 %v5423_v6, %v5212_v61  ;;  %v14323_v36 = vld [vmem:[#allocation6 + $0x130] sm:$0xf] }
 0x60a   :  { %v14324_v32 = vor.u32 %v16892_v19, %v14323_v36 }
 0x60c   :  { %v6678_v38 = vsel %vm255_vm0, %v14324_v32, 0  ;;  %vm19830_vm0 = vcmask 1042176  }
 0x60d   :  { %vm19833_vm2 = vmmov %vm19830_vm0 }
 0x60e   :  { %v5424_v4 = vpop.f32.mrf.mxu3 }
 0x60f   :  { %v14295_v4 = vld [vmem:[#allocation6 + $0xf8] sm:$0xf] }
 0x610   :  { %v5620_v15 = vpop.f32.mrf.mxu2  ;;  %v5840_v5 = vpop.f32.mrf.mxu0  ;;  %v14296_v10 = vor.u32 %v16885_v48, %v14295_v4 }
 0x611   :  { %v5814_v62 = vpop.f32.mrf.mxu1 }
 0x613   :  { %14265 = vmatmul.msk.bf16.vlgmr.msra.gmra.mxu3 %vm248_vm1, %v18737_v51 }
 0x614   :  { %14267 = vmatmul.msk.bf16.vlgmr.msra.gmra.mxu1 %vm248_vm1, %v18737_v51  ;;  %6800 = vmatpush.bf16.msra.mxu3 %v6678_v38 }
 0x615   :  { %14327 = vmatmul.msk.bf16.vlgmr.msrb.gmra.mxu0 %vm248_vm1, %v18822_v50 }
 0x616   :  { %14326 = vmatmul.msk.bf16.gmra.mxu2 %vm248_vm1, %v18815_v7  ;;  %v5631_v8 = vpop.f32.mrf.mxu3 }
 0x617   :  { %v5632_v21 = vadd.f32 %v5631_v8, %v5619_v57 }
 0x618   :  { %v6023_v34 = vpop.f32.mrf.mxu2  ;;  %v5842_v43 = vpop.f32.mrf.mxu0  ;;  %6801 = vmatpush.bf16.msra.mxu3 %v14296_v10 }
 0x619   :  { %v5816_v40 = vpop.f32.mrf.mxu1  ;;  %v5635_v16 = vadd.f32 %v5632_v21, %v5426_v46 }
 0x61e   :  { %v5633_v51 = vpop.f32.mrf.mxu3 }
 0x620   :  { %v6025_v53 = vpop.f32.mrf.mxu2 }
 0x621   :  { %v6049_v31 = vpop.f32.mrf.mxu1 }
 0x622   :  { %v6036_v35 = vpop.f32.mrf.mxu0 }
 0x623   :  { %14266 = vmatmul.msk.bf16.gmra.mxu3 %vm248_vm1, %v18741_v26  ;;  %v6037_v2 = vadd.f32 %v6036_v35, %v6023_v34 }
 0x624   :  { %14268 = vmatmul.msk.bf16.gmra.mxu1 %vm248_vm1, %v18741_v26 }
 0x625   :  { %14328 = vmatmul.msk.bf16.gmra.mxu0 %vm248_vm1, %v18815_v7  ;;  %v6050_v24 = vadd.f32 %v6049_v31, %v6037_v2  ;;  %v18941_v2 = vld [vmem:[#allocation9] sm:$0x7f] }
 0x626   :  { %14333 = vmatmul.msk.bf16.vlgmr.msrb.gmra.mxu2 %vm248_vm1, %v18822_v50  ;;  %v5827_v13 = vpop.f32.mrf.mxu3 }
 0x627   :  { %v5828_v27 = vadd.f32 %v5827_v13, %v5814_v62 }
 0x629   :  { %v18856_v58 = vpop.f32.mrf.mxu2  ;;  %v5841_v59 = vadd.f32 %v5840_v5, %v5828_v27  ;;  %v6051_v33 = vpop.f32.mrf.mxu1 }
 0x62a   :  { %v6038_v25 = vpop.f32.mrf.mxu0 }
 0x62b   :  { %v5844_v26 = vadd.f32 %v5841_v59, %v5635_v16  ;;  %v6843_v59 = vperm.slane %v18941_v2, 0 }
 0x62d   :  { %v6053_v47 = vadd.f32 %v6050_v24, %v5844_v26 }
 0x62e   :  { %v5829_v55 = vpop.f32.mrf.mxu3 }
 0x62f   :  { %6054 = vst [vmem:[#allocation17] sm:$0x1] %v6053_v47 }
 0x631   :  { %v18859_v11 = vpop.f32.mrf.mxu2  ;;  %v18861_v0 = vpop.f32.mrf.mxu1 }
 0x632   :  { %v6279_v30 = vpop.f32.mrf.mxu0 }
 0x633   :  { %14329 = vmatmul.msk.bf16.vlgmr.msrb.gmra.mxu3 %vm248_vm1, %v18822_v50 }
 0x634   :  { %14331 = vmatmul.msk.bf16.vlgmr.msrb.gmra.mxu1 %vm248_vm1, %v18822_v50 }
 0x635   :  { %14335 = vmatmul.msk.bf16.vlgmr.msra.gmra.mxu0 %vm248_vm1, %v18822_v50 }
 0x636   :  { %14334 = vmatmul.msk.bf16.gmra.mxu2 %vm248_vm1, %v18815_v7  ;;  %v6222_v20 = vpop.f32.mrf.mxu3 }
 0x639   :  { %v18871_v15 = vpop.f32.mrf.mxu2  ;;  %v18873_v62 = vpop.f32.mrf.mxu1 }
 0x63a   :  { %v18875_v14 = vpop.f32.mrf.mxu0 }
 0x63e   :  { %v6224_v23 = vpop.f32.mrf.mxu3 }
 0x641   :  { %v18877_v52 = vpop.f32.mrf.mxu2  ;;  %v18879_v37 = vpop.f32.mrf.mxu1 }
 0x642   :  { %v6284_v5 = vpop.f32.mrf.mxu0 }
 0x643   :  { %14330 = vmatmul.msk.bf16.gmra.mxu3 %vm248_vm1, %v18815_v7 }
 0x644   :  { %14332 = vmatmul.msk.bf16.gmra.mxu1 %vm248_vm1, %v18815_v7 }
 0x645   :  { %14336 = vmatmul.msk.bf16.gmra.mxu0 %vm248_vm1, %v18815_v7 }
 0x646   :  { %v6227_v54 = vpop.f32.mrf.mxu3 }
 0x649   :  { %v18887_v17 = vpop.f32.mrf.mxu2  ;;  %v18889_v42 = vpop.f32.mrf.mxu1 }
 0x64a   :  { %v18891_v9 = vpop.f32.mrf.mxu0 }
 0x64e   :  { %v18893_v49 = vpop.f32.mrf.mxu3 }
 0x651   :  { %v18895_v3 = vpop.f32.mrf.mxu2  ;;  %v18897_v44 = vpop.f32.mrf.mxu1 }
 0x652   :  { %v6445_v41 = vpop.f32.mrf.mxu0 }
 0x653   :  { %14337 = vmatmul.msk.bf16.vlgmr.msra.gmra.mxu3 %vm248_vm1, %v18822_v50  ;;  %v6446_v16 = vadd.f32 %v6445_v41, %v6222_v20 }
 0x656   :  { %v18901_v22 = vpop.f32.mrf.mxu3 }
 0x659   :  { %v18903_v45 = vpop.f32.mrf.mxu2  ;;  %v18905_v1 = vpop.f32.mrf.mxu1 }
 0x65a   :  { %v6447_v63 = vpop.f32.mrf.mxu0 }
 0x65b   :  { %v6448_v38 = vadd.f32 %v6447_v63, %v6224_v23 }
 0x65e   :  { %v18907_v8 = vpop.f32.mrf.mxu3 }
 0x661   :  { %v18909_v18 = vpop.f32.mrf.mxu2  ;;  %v18911_v28 = vpop.f32.mrf.mxu1 }
 0x662   :  { %v6450_v40 = vpop.f32.mrf.mxu0 }
 0x663   :  { %14338 = vmatmul.msk.bf16.gmra.mxu3 %vm248_vm1, %v18815_v7  ;;  %vm19832_vm1 = vmmov %vm19830_vm0 }
 0x666   :  { %v18915_v34 = vpop.f32.mrf.mxu3 }
 0x669   :  { %v6502_v50 = vpop.f32.mrf.mxu2  ;;  %v18917_v43 = vpop.f32.mrf.mxu1 }
 0x66a   :  { %v6452_v12 = vpop.f32.mrf.mxu0  ;;  %v18919_v51 = vadd.f32 %v6502_v50, %v6279_v30  ;;  %v6844_v30 = vperm.slane %v18941_v2, 1 }
 0x66e   :  { %v18921_v53 = vpop.f32.mrf.mxu3 }
 0x671   :  { %v18923_v56 = vpop.f32.mrf.mxu2  ;;  %v18925_v39 = vpop.f32.mrf.mxu1 }
 0x672   :  { %v18927_v35 = vpop.f32.mrf.mxu0 }
 0x676   :  { %v6464_v31 = vpop.f32.mrf.mxu3 }
 0x677   :  { %v6465_v47 = vadd.f32 %v6464_v31, %v18861_v0 }
 0x679   :  { %v6507_v60 = vpop.f32.mrf.mxu2  ;;  %v18929_v6 = vpop.f32.mrf.mxu1 }
 0x67a   :  { %v18931_v7 = vadd.f32 %v6507_v60, %v6284_v5  ;;  %v18933_v57 = vpop.f32.mrf.mxu0  ;;  %v6451_v60 = vadd.f32 %v6450_v40, %v6227_v54 }
 0x67e   :  { %v6466_v61 = vpop.f32.mrf.mxu3 }
 0x67f   :  { %v6467_v0 = vadd.f32 %v6466_v61, %v18873_v62  ;;  %v6453_v62 = vadd.f32 %v6452_v12, %v18893_v49 }
 0x681   :  { %v18935_v21 = vpop.f32.mrf.mxu2  ;;  %v18937_v13 = vpop.f32.mrf.mxu1 }
 0x682   :  { %v18939_v46 = vpop.f32.mrf.mxu0 }
 0x686   :  { %v6469_v27 = vpop.f32.mrf.mxu3 }
 0x687   :  { %v6470_v61 = vadd.f32 %v6469_v27, %v18879_v37  ;;  %v6522_v37 = vadd.f32 %v18927_v35, %v18901_v22  ;;  %v19003_v27 = vperm.slane %v18941_v2, 4 }
 0x689   :  { %v6689_v25 = vpop.f32.mrf.mxu2  ;;  %v18944_v33 = vpop.f32.mrf.mxu1 }
 0x68a   :  { %v18946_v36 = vpop.f32.mrf.mxu0  ;;  %v6813_v19 = vadd.f32 %v6689_v25, %v6446_v16 }
 0x68c   :  { %v18948_v32 = vadd.f32 %v6843_v59, %v6813_v19 }
 0x68e   :  { %v6885_v24 = vmax.f32 %v18948_v32, 0.0  ;;  %v6471_v26 = vpop.f32.mrf.mxu3 }
 0x690   :  { %6917 = vrot.lane.b32.xlu0 %v6885_v24, %s17590_s15 }
 0x691   :  { %v6691_v55 = vpop.f32.mrf.mxu2  ;;  %v18956_v4 = vpop.f32.mrf.mxu1 }
 0x692   :  { %v6820_v48 = vadd.f32 %v6691_v55, %v6448_v38  ;;  %v6708_v10 = vpop.f32.mrf.mxu0 }
 0x693   :  { %v6814_v20 = vadd.f32 %v6708_v10, %v6465_v47 }
 0x694   :  { %v18958_v5 = vadd.f32 %v6843_v59, %v6820_v48 }
 0x695   :  { %v18960_v41 = vadd.f32 %v6844_v30, %v6814_v20 }
 0x696   :  { %v6892_v23 = vmax.f32 %v18958_v5, 0.0  ;;  %v6540_v50 = vpop.f32.mrf.mxu3 }
 0x697   :  { %v6886_v63 = vmax.f32 %v18960_v41, 0.0 }
 0x698   :  { %6919 = vrot.lane.b32.xlu1 %v6892_v23, %s17590_s15 }
 0x699   :  { %6961 = vrot.lane.b32.xlu0 %v6886_v63, %s17590_s15  ;;  %v6694_v31 = vpop.f32.mrf.mxu2  ;;  %v18971_v16 = vpop.f32.mrf.mxu1 }
 0x69a   :  { %v6827_v25 = vadd.f32 %v6694_v31, %v6451_v60  ;;  %v6710_v19 = vpop.f32.mrf.mxu0 }
 0x69b   :  { %v6821_v38 = vadd.f32 %v6710_v19, %v6467_v0 }
 0x69c   :  { %v18973_v47 = vadd.f32 %v6843_v59, %v6827_v25 }
 0x69d   :  { %v18975_v55 = vadd.f32 %v6844_v30, %v6821_v38 }
 0x69e   :  { %v6899_v54 = vmax.f32 %v18973_v47, 0.0  ;;  %v6542_v40 = vpop.f32.mrf.mxu3 }
 0x69f   :  { %v19792_v48 = vmax.f32 %v18975_v55, 0.0 }
 0x6a0   :  { %6921 = vrot.lane.b32.xlu2 %v6899_v54, %s17590_s15 }
 0x6a1   :  { %6963 = vrot.lane.b32.xlu1 %v19792_v48, %s17590_s15  ;;  %v6696_v10 = vpop.f32.mrf.mxu2  ;;  %v18987_v20 = vpop.f32.mrf.mxu1 }
 0x6a2   :  { %v6834_v60 = vadd.f32 %v6696_v10, %v6453_v62  ;;  %v6713_v0 = vpop.f32.mrf.mxu0 }
 0x6a3   :  { %v6828_v31 = vadd.f32 %v6713_v0, %v6470_v61 }
 0x6a4   :  { %v18989_v25 = vadd.f32 %v6843_v59, %v6834_v60  ;;  %v6472_v59 = vadd.f32 %v6471_v26, %v18889_v42  ;;  %v6524_v26 = vadd.f32 %v18933_v57, %v18907_v8 }
 0x6a5   :  { %v18991_v19 = vadd.f32 %v6844_v30, %v6828_v31 }
 0x6a6   :  { %v19789_v49 = vmax.f32 %v18989_v25, 0.0  ;;  %v18995_v38 = vpop.f32.mrf.mxu3 }
 0x6a7   :  { %v19790_v12 = vmax.f32 %v18991_v19, 0.0  ;;  %v19824_v41 = vmax.f32 %v18991_v19, 0.0 }
 0x6a8   :  { %6923 = vrot.lane.b32.xlu0 %v19789_v49, %s17590_s15 }
 0x6a9   :  { %6965 = vrot.lane.b32.xlu2 %v19790_v12, %s17590_s15  ;;  %v6765_v62 = vpop.f32.mrf.mxu2  ;;  %v19009_v61 = vpop.f32.mrf.mxu1  ;;  %v6541_v12 = vadd.f32 %v6540_v50, %v18897_v44 }
 0x6aa   :  { %v6715_v10 = vpop.f32.mrf.mxu0  ;;  %v6817_v60 = vadd.f32 %v6765_v62, %v6522_v37 }
 0x6ab   :  { %v6835_v0 = vadd.f32 %v6715_v10, %v6472_v59  ;;  %v19033_v59 = vperm.slane %v18941_v2, 5 }
 0x6ac   :  { %v19012_v22 = vadd.f32 %v19003_v27, %v6817_v60 }
 0x6ad   :  { %v19014_v35 = vadd.f32 %v6844_v30, %v6835_v0  ;;  %v19030_v30 = vperm.slane %v18941_v2, 3 }
 0x6ae   :  { %v6889_v31 = vmax.f32 %v19012_v22, 0.0  ;;  %v19017_v49 = vpop.f32.mrf.mxu3 }
 0x6af   :  { %v19791_v42 = vmax.f32 %v19014_v35, 0.0 }
 0x6b1   :  { %7117 = vrot.lane.b32.xlu2 %v6889_v31, %s17590_s15  ;;  %6967 = vrot.lane.b32.xlu0 %v19791_v42, %s17590_s15  ;;  %v6767_v37 = vpop.f32.mrf.mxu2  ;;  %v6746_v62 = vpop.f32.mrf.mxu1  ;;  %v6484_v42 = vadd.f32 %v18925_v39, %v18856_v58 }
 0x6b2   :  { %v6824_v10 = vadd.f32 %v6767_v37, %v6524_v26  ;;  %v6784_v8 = vpop.f32.mrf.mxu0  ;;  %v6816_v44 = vadd.f32 %v6746_v62, %v18919_v51 }
 0x6b3   :  { %v6818_v57 = vadd.f32 %v6784_v8, %v6541_v12  ;;  %v19051_v12 = vperm.slane %v18941_v2, 2  ;;  %v6543_v8 = vadd.f32 %v6542_v40, %v18905_v1 }
 0x6b4   :  { %v19037_v50 = vadd.f32 %v19003_v27, %v6824_v10  ;;  %v19040_v60 = vadd.f32 %v19030_v30, %v6816_v44  ;;  %v6505_v10 = vadd.f32 %v18923_v56, %v18875_v14  ;;  %v6527_v56 = vadd.f32 %v18939_v46, %v18915_v34 }
 0x6b5   :  { %v19043_v0 = vadd.f32 %v19033_v59, %v6818_v57 }
 0x6b6   :  { %v19794_v48 = vmax.f32 %v19037_v50, 0.0  ;;  %v19795_v26 = vmax.f32 %v19040_v60, 0.0  ;;  %v6727_v51 = vpop.f32.mrf.mxu3 }
 0x6b7   :  { %v19793_v37 = vmax.f32 %v19043_v0, 0.0  ;;  %v6815_v62 = vadd.f32 %v6727_v51, %v6484_v42  ;;  %v6486_v51 = vadd.f32 %v18929_v6, %v18859_v11 }
 0x6b8   :  { %7061 = vrot.lane.b32.xlu1 %v19795_v26, %s17590_s15 }
 0x6b9   :  { %7161 = vrot.lane.b32.xlu2 %v19793_v37, %s17590_s15  ;;  %v6770_v58 = vpop.f32.mrf.mxu2  ;;  %7119 = vrot.lane.b32.xlu0 %v19794_v48, %s17590_s15  ;;  %v6748_v39 = vpop.f32.mrf.mxu1  ;;  %v19066_v44 = vadd.f32 %v19051_v12, %v6815_v62 }
 0x6ba   :  { %v6786_v42 = vpop.f32.mrf.mxu0  ;;  %v6823_v14 = vadd.f32 %v6748_v39, %v6505_v10  ;;  %v6831_v37 = vadd.f32 %v6770_v58, %v6527_v56  ;;  %v6529_v39 = vadd.f32 %v18946_v36, %v18921_v53 }
 0x6bb   :  { %v6825_v1 = vadd.f32 %v6786_v42, %v6543_v8  ;;  %v6887_v48 = vmax.f32 %v19066_v44, 0.0  ;;  %v6546_v42 = vadd.f32 %v18995_v38, %v18911_v28  ;;  %v6510_v38 = vadd.f32 %v18935_v21, %v18891_v9 }
 0x6bc   :  { %v19071_v40 = vadd.f32 %v19030_v30, %v6823_v14  ;;  %v19088_v34 = vadd.f32 %v19003_v27, %v6831_v37  ;;  %v6489_v14 = vadd.f32 %v18937_v13, %v18871_v15  ;;  %v6491_v21 = vadd.f32 %v18944_v33, %v18877_v52 }
 0x6bd   :  { %v19074_v57 = vadd.f32 %v19033_v59, %v6825_v1  ;;  %v6562_v33 = vadd.f32 %v18971_v16, %v18895_v3 }
 0x6be   :  { %v6729_v26 = vpop.f32.mrf.mxu3  ;;  %v19796_v62 = vmax.f32 %v19071_v40, 0.0  ;;  %v6903_v1 = vmax.f32 %v19088_v34, 0.0 }
 0x6bf   :  { %v6897_v10 = vmax.f32 %v19074_v57, 0.0  ;;  %v6822_v8 = vadd.f32 %v6729_v26, %v6486_v51 }
 0x6c0   :  { %7017 = vrot.lane.b32.xlu1 %v6887_v48, %s17590_s15 }
 0x6c1   :  { %7063 = vrot.lane.b32.xlu2 %v19796_v62, %s17590_s15  ;;  %7163 = vrot.lane.b32.xlu0 %v6897_v10, %s17590_s15  ;;  %v6751_v11 = vpop.f32.mrf.mxu1  ;;  %v19094_v46 = vadd.f32 %v19051_v12, %v6822_v8  ;;  %v6772_v58 = vpop.f32.mrf.mxu2 }
 0x6c2   :  { %v6789_v6 = vpop.f32.mrf.mxu0  ;;  %v6830_v26 = vadd.f32 %v6751_v11, %v18931_v7  ;;  %v6838_v51 = vadd.f32 %v6772_v58, %v6529_v39 }
 0x6c3   :  { %v6832_v8 = vadd.f32 %v6789_v6, %v6546_v42  ;;  %v6894_v11 = vmax.f32 %v19094_v46, 0.0  ;;  %v6548_v6 = vadd.f32 %v19017_v49, %v18917_v43  ;;  %v6560_v49 = vadd.f32 %v18956_v4, %v18887_v17 }
 0x6c4   :  { %v19102_v37 = vadd.f32 %v19030_v30, %v6830_v26  ;;  %v19119_v15 = vadd.f32 %v19003_v27, %v6838_v51 }
 0x6c5   :  { %v19122_v28 = vadd.f32 %v19033_v59, %v6832_v8 }
 0x6c6   :  { %v6902_v56 = vmax.f32 %v19102_v37, 0.0  ;;  %v6732_v7 = vpop.f32.mrf.mxu3  ;;  %v6910_v42 = vmax.f32 %v19119_v15, 0.0 }
 0x6c7   :  { %v6829_v62 = vadd.f32 %v6732_v7, %v6489_v14  ;;  %v6904_v26 = vmax.f32 %v19122_v28, 0.0 }
 0x6c8   :  { %7121 = vrot.lane.b32.xlu1 %v6903_v1, %s17590_s15 }
 0x6c9   :  { %7019 = vrot.lane.b32.xlu2 %v6894_v11, %s17590_s15  ;;  %7065 = vrot.lane.b32.xlu0 %v6902_v56, %s17590_s15  ;;  %v19125_v53 = vadd.f32 %v19051_v12, %v6829_v62  ;;  %v6753_v13 = vpop.f32.mrf.mxu1  ;;  %v6849_v62 = vperm.slane %v18941_v2, 6 }
 0x6ca   :  { %v6791_v36 = vpop.f32.mrf.mxu0  ;;  %v6837_v58 = vadd.f32 %v6753_v13, %v6510_v38 }
 0x6cb   :  { %v6839_v39 = vadd.f32 %v6791_v36, %v6548_v6  ;;  %v6901_v14 = vmax.f32 %v19125_v53, 0.0 }
 0x6cc   :  { %v19144_v9 = vadd.f32 %v19030_v30, %v6837_v58 }
 0x6cd   :  { %v19147_v43 = vadd.f32 %v19033_v59, %v6839_v39 }
 0x6ce   :  { %v6734_v27 = vpop.f32.mrf.mxu3  ;;  %v6909_v13 = vmax.f32 %v19144_v9, 0.0 }
 0x6cf   :  { %v6836_v51 = vadd.f32 %v6734_v27, %v6491_v21  ;;  %v6911_v7 = vmax.f32 %v19147_v43, 0.0  ;;  %v6567_v27 = vadd.f32 %v19009_v61, %v18909_v18 }
 0x6d0   :  { %7165 = vrot.lane.b32.xlu1 %v6904_v26, %s17590_s15 }
 0x6d1   :  { %7123 = vrot.lane.b32.xlu2 %v6910_v42, %s17590_s15  ;;  %7021 = vrot.lane.b32.xlu0 %v6901_v14, %s17590_s15  ;;  %v19165_v17 = vadd.f32 %v19051_v12, %v6836_v51  ;;  %v6565_v12 = vadd.f32 %v18987_v20, %v18903_v45 }
 0x6d3   :  { %v6908_v30 = vmax.f32 %v19165_v17, 0.0 }
 0x6d6   :  { %v6803_v8 = vpop.f32.mrf.mxu3 }
 0x6d7   :  { %v6819_v36 = vadd.f32 %v6803_v8, %v6560_v49 }
 0x6d8   :  { %7067 = vrot.lane.b32.xlu1 %v6909_v13, %s17590_s15 }
 0x6d9   :  { %7167 = vrot.lane.b32.xlu2 %v6911_v7, %s17590_s15  ;;  %v19162_v52 = vadd.f32 %v6849_v62, %v6819_v36 }
 0x6db   :  { %v6891_v2 = vmax.f32 %v19162_v52, 0.0 }
 0x6dd   :  { %7217 = vrot.lane.b32.xlu0 %v6891_v2, %s17590_s15 }
 0x6de   :  { %v6805_v4 = vpop.f32.mrf.mxu3 }
 0x6df   :  { %v6826_v59 = vadd.f32 %v6805_v4, %v6562_v33 }
 0x6e0   :  { %7023 = vrot.lane.b32.xlu1 %v6908_v30, %s17590_s15 }
 0x6e1   :  { %v19177_v38 = vadd.f32 %v6849_v62, %v6826_v59 }
 0x6e3   :  { %v6898_v3 = vmax.f32 %v19177_v38, 0.0 }
 0x6e6   :  { %v6808_v6 = vpop.f32.mrf.mxu3 }
 0x6e7   :  { %v6833_v16 = vadd.f32 %v6808_v6, %v6565_v12  ;;  %v19822_v12 = vmax.f32 %v18975_v55, 0.0 }
 0x6e8   :  { %7219 = vrot.lane.b32.xlu1 %v6898_v3, %s17590_s15 }
 0x6e9   :  { %v19185_v58 = vadd.f32 %v6849_v62, %v6833_v16 }
 0x6eb   :  { %v6905_v39 = vmax.f32 %v19185_v58, 0.0 }
 0x6ed   :  { %7221 = vrot.lane.b32.xlu2 %v6905_v39, %s17590_s15 }
 0x6ee   :  { %v6810_v45 = vpop.f32.mrf.mxu3 }
 0x6ef   :  { %v6840_v20 = vadd.f32 %v6810_v45, %v6567_v27  ;;  %v19825_v45 = vmax.f32 %v19014_v35, 0.0  ;;  %v19827_v35 = vmax.f32 %v19037_v50, 0.0  ;;  %v19828_v50 = vmax.f32 %v19043_v0, 0.0 }
 0x6f1   :  { %v19193_v21 = vadd.f32 %v6849_v62, %v6840_v20 }
 0x6f3   :  { %v6912_v49 = vmax.f32 %v19193_v21, 0.0 }
 0x6f5   :  { %7223 = vrot.lane.b32.xlu0 %v6912_v49, %s17590_s15 }
 0x6fa   :  { %v6922_v51 = vpop.permute.xlu2 %6921 }
 0x6fb   :  { %v6931_v8 = vmax.f32 %v6899_v54, %v6922_v51 }
 0x6fd   :  { %6935 = vst.msk [vmem:[#allocation2 + $0x40] sm:$0xff] %vm999_vm4, %v6931_v8  ;;  %6945 = vrot.lane.b32.xlu2 %v6931_v8, %s17590_s15  ;;  %v19826_v8 = vmax.f32 %v19040_v60, 0.0 }
 0x702   :  { %v6918_v18 = vpop.permute.xlu0 %6917 }
 0x703   :  { %v6929_v61 = vmax.f32 %v6885_v24, %v6918_v18  ;;  %v6966_v62 = vpop.permute.xlu2 %6965 }
 0x705   :  { %6933 = vst.msk [vmem:[#allocation2] sm:$0xff] %vm999_vm4, %v6929_v61  ;;  %6941 = vrot.lane.b32.xlu0 %v6929_v61, %s17590_s15 }
 0x70a   :  { %v6920_v36 = vpop.permute.xlu1 %6919 }
 0x70b   :  { %v6930_v33 = vmax.f32 %v6892_v23, %v6920_v36  ;;  %v7118_v4 = vpop.permute.xlu2 %7117  ;;  %v6962_v32 = vpop.permute.xlu0 %6961 }
 0x70c   :  { %v7129_v47 = vmax.f32 %v6889_v31, %v7118_v4  ;;  %v6973_v24 = vmax.f32 %v6886_v63, %v6962_v32  ;;  %v19823_v31 = vmax.f32 %v18989_v25, 0.0  ;;  %v6975_v63 = vmax.f32 %v19824_v41, %v6966_v62 }
 0x70d   :  { %6934 = vst.msk [vmem:[#allocation2 + $0x20] sm:$0xff] %vm999_vm4, %v6930_v33  ;;  %6943 = vrot.lane.b32.xlu1 %v6930_v33, %s17590_s15  ;;  %v19829_v32 = vmax.f32 %v19071_v40, 0.0 }
 0x70e   :  { %7133 = vst.msk [vmem:[#allocation2 + $0x10] sm:$0xff] %vm999_vm4, %v7129_v47 }
 0x713   :  { %v7162_v54 = vpop.permute.xlu2 %7161  ;;  %v6964_v59 = vpop.permute.xlu1 %6963 }
 0x714   :  { %v6974_v5 = vmax.f32 %v19822_v12, %v6964_v59 }
 0x715   :  { %6981 = vrot.lane.b32.xlu1 %v6973_v24, %s17587_s29 }
 0x716   :  { %6983 = vrot.lane.b32.xlu2 %v6974_v5, %s17587_s29 }
 0x71a   :  { %v6924_v23 = vpop.permute.xlu0 %6923 }
 0x71b   :  { %v7064_v22 = vpop.permute.xlu2 %7063  ;;  %v6932_v6 = vmax.f32 %v19823_v31, %v6924_v23 }
 0x71c   :  { %v7074_v57 = vmax.f32 %v19829_v32, %v7064_v22  ;;  %v14423_v32 = vld [vmem:[#allocation11 + $0x5b8] sm:$0xf0] }
 0x71d   :  { %6936 = vst.msk [vmem:[#allocation2 + $0x60] sm:$0x3] %vm1003_vm5, %v6932_v6  ;;  %6997 = vrot.lane.b32.xlu1 %v6973_v24, %s17591_s16  ;;  %6947 = vrot.lane.b32.xlu0 %v6932_v6, %s17590_s15 }
 0x71e   :  { %6999 = vrot.lane.b32.xlu2 %v6974_v5, %s17591_s16 }
 0x723   :  { %v7020_v55 = vpop.permute.xlu2 %7019  ;;  %v6968_v16 = vpop.permute.xlu0 %6967 }
 0x724   :  { %v7030_v27 = vmax.f32 %v6894_v11, %v7020_v55  ;;  %v6976_v25 = vmax.f32 %v19825_v45, %v6968_v16  ;;  %v14641_v55 = vld [vmem:[#allocation11 + $0x7b0] sm:$0xf]  ;;  %v17100_v16 = vld [vmem:[#allocation11 + $0x7c4] sm:$0xf0]  ;;  %v17058_v45 = vld [vmem:[#allocation11 + $0x634] sm:$0xf] }
 0x725   :  { %6985 = vrot.lane.b32.xlu0 %v6975_v63, %s17587_s29 }
 0x726   :  { %7034 = vst.msk [vmem:[#allocation2 + $0x28] sm:$0xff] %vm999_vm4, %v7030_v27  ;;  %7141 = vrot.lane.b32.xlu2 %v7129_v47, %s17590_s15  ;;  %6987 = vrot.lane.b32.xlu1 %v6976_v25, %s17587_s29 }
 0x72a   :  { %v7062_v51 = vpop.permute.xlu1 %7061 }
 0x72b   :  { %v7124_v20 = vpop.permute.xlu2 %7123  ;;  %v7073_v46 = vmax.f32 %v19826_v8, %v7062_v51  ;;  %v7120_v11 = vpop.permute.xlu0 %7119  ;;  %v14621_v51 = vld [vmem:[#allocation11 + $0x780] sm:$0xf] }
 0x72c   :  { %v7132_v19 = vmax.f32 %v6910_v42, %v7124_v20  ;;  %v7130_v18 = vmax.f32 %v19827_v35, %v7120_v11  ;;  %v7173_v42 = vmax.f32 %v19828_v50, %v7162_v54  ;;  %v14463_v11 = vld [vmem:[#allocation11 + $0x618] sm:$0xf0]  ;;  %v14801_v50 = vld [vmem:[#allocation11 + $0x930] sm:$0xf] }
 0x72d   :  { %7001 = vrot.lane.b32.xlu0 %v6975_v63, %s17591_s16 }
 0x72e   :  { %7136 = vst.msk [vmem:[#allocation2 + $0x70] sm:$0x3] %vm1003_vm5, %v7132_v19  ;;  %7081 = vrot.lane.b32.xlu2 %v7073_v46, %s17587_s29  ;;  %7003 = vrot.lane.b32.xlu1 %v6976_v25, %s17591_s16  ;;  %v14483_v25 = vld [vmem:[#allocation11 + $0x648] sm:$0xf0] }
 0x72f   :  { %7134 = vst.msk [vmem:[#allocation2 + $0x30] sm:$0xff] %vm999_vm4, %v7130_v18  ;;  %v14486_v20 = vor.u32 %v17058_v45, %v14483_v25  ;;  %v17033_v45 = vld [vmem:[#allocation11 + $0x544] sm:$0xf]  ;;  %v14383_v25 = vld [vmem:[#allocation11 + $0x558] sm:$0xf0] }
 0x731   :  { %8408 = vmatpush.bf16.msrb.mxu3 %v14486_v20  ;;  %v14386_v20 = vor.u32 %v17033_v45, %v14383_v25  ;;  %v17105_v45 = vld [vmem:[#allocation11 + $0x7f4] sm:$0xf0]  ;;  %v17138_v25 = vld [vmem:[#allocation11 + $0x934] sm:$0xf] }
 0x732   :  { %v7018_v61 = vpop.permute.xlu1 %7017 }
 0x733   :  { %v7029_v15 = vmax.f32 %v6887_v48, %v7018_v61  ;;  %v7164_v60 = vpop.permute.xlu0 %7163  ;;  %v7168_v48 = vpop.permute.xlu2 %7167  ;;  %v17090_v61 = vld [vmem:[#allocation11 + $0x764] sm:$0xf0] }
 0x734   :  { %v7174_v4 = vmax.f32 %v6897_v10, %v7164_v60  ;;  %v7176_v9 = vmax.f32 %v6911_v7, %v7168_v48  ;;  %v14443_v60 = vld [vmem:[#allocation11 + $0x5e8] sm:$0xf0] }
 0x735   :  { %7143 = vrot.lane.b32.xlu0 %v7130_v18, %s17590_s15  ;;  %7033 = vst.msk [vmem:[#allocation2 + $0x8] sm:$0xff] %vm999_vm4, %v7029_v15  ;;  %v14601_v18 = vld [vmem:[#allocation11 + $0x750] sm:$0xf] }
 0x736   :  { %7097 = vrot.lane.b32.xlu2 %v7073_v46, %s17591_s16  ;;  %7041 = vrot.lane.b32.xlu1 %v7029_v15, %s17590_s15  ;;  %v17053_v46 = vld [vmem:[#allocation11 + $0x604] sm:$0xf]  ;;  %v17048_v15 = vld [vmem:[#allocation11 + $0x5d4] sm:$0xf] }
 0x737   :  { %v14466_v35 = vor.u32 %v17053_v46, %v14463_v11  ;;  %v14521_v46 = vld [vmem:[#allocation11 + $0x690] sm:$0xf]  ;;  %v17070_v11 = vld [vmem:[#allocation11 + $0x6a4] sm:$0xf0] }
 0x739   :  { %8409 = vmatpush.bf16.msrb.mxu3 %v14466_v35  ;;  %v17028_v35 = vld [vmem:[#allocation11 + $0x514] sm:$0xf] }
 0x73a   :  { %v7122_v62 = vpop.permute.xlu1 %7121 }
 0x73b   :  { %v7131_v36 = vmax.f32 %v6903_v1, %v7122_v62  ;;  %v7066_v33 = vpop.permute.xlu0 %7065 }
 0x73c   :  { %v7075_v53 = vmax.f32 %v6902_v56, %v7066_v33  ;;  %v14602_v33 = vor.u32 %v17090_v61, %v14601_v18  ;;  %v14522_v18 = vor.u32 %v17070_v11, %v14521_v46  ;;  %v14363_v61 = vld [vmem:[#allocation11 + $0x528] sm:$0xf0]  ;;  %v14429_v46 = vld [vmem:[#allocation11 + $0x5a8] sm:$0xf] }
 0x73d   :  { %7181 = vrot.lane.b32.xlu0 %v7173_v42, %s17587_s29  ;;  %7135 = vst.msk [vmem:[#allocation2 + $0x50] sm:$0xff] %vm999_vm4, %v7131_v36 }
 0x73e   :  { %7043 = vrot.lane.b32.xlu2 %v7030_v27, %s17590_s15  ;;  %7145 = vrot.lane.b32.xlu1 %v7131_v36, %s17590_s15  ;;  %v14642_v27 = vor.u32 %v17100_v16, %v14641_v55  ;;  %v17075_v55 = vld [vmem:[#allocation11 + $0x6d4] sm:$0xf0] }
 0x740   :  { %8366 = vmatpush.bf16.msra.mxu2 %v14642_v27 }
 0x742   :  { %v7166_v44 = vpop.permute.xlu1 %7165 }
 0x743   :  { %v7022_v0 = vpop.permute.xlu0 %7021 }
 0x744   :  { %v7031_v47 = vmax.f32 %v6901_v14, %v7022_v0  ;;  %v7175_v14 = vmax.f32 %v6904_v26, %v7166_v44  ;;  %v14581_v0 = vld [vmem:[#allocation11 + $0x720] sm:$0xf] }
 0x745   :  { %7197 = vrot.lane.b32.xlu0 %v7173_v42, %s17591_s16  ;;  %v17140_v42 = vld [vmem:[#allocation11 + $0x944] sm:$0xf0] }
 0x746   :  { %7147 = vrot.lane.b32.xlu2 %v7132_v19, %s17590_s15  ;;  %7183 = vrot.lane.b32.xlu1 %v7174_v4, %s17587_s29  ;;  %7035 = vst.msk [vmem:[#allocation2 + $0x48] sm:$0xff] %vm999_vm4, %v7031_v47  ;;  %v17095_v19 = vld [vmem:[#allocation11 + $0x794] sm:$0xf0]  ;;  %v14802_v62 = vor.u32 %v17140_v42, %v14801_v50  ;;  %v14366_v50 = vor.u32 %v17028_v35, %v14363_v61  ;;  %v14401_v61 = vld [vmem:[#allocation11 + $0x570] sm:$0xf] }
 0x747   :  { %v7222_v34 = vpop.permute.xlu2 %7221  ;;  %v14622_v8 = vor.u32 %v17095_v19, %v14621_v51  ;;  %v14741_v51 = vld [vmem:[#allocation11 + $0x8a0] sm:$0xf]  ;;  %v17125_v19 = vld [vmem:[#allocation11 + $0x8b4] sm:$0xf0] }
 0x748   :  { %v7231_v1 = vmax.f32 %v6905_v39, %v7222_v34  ;;  %8380 = vmatpush.bf16.msrb.mxu0 %v14802_v62  ;;  %v17043_v34 = vld [vmem:[#allocation11 + $0x5a4] sm:$0xf]  ;;  %v14721_v62 = vld [vmem:[#allocation11 + $0x870] sm:$0xf] }
 0x749   :  { %8367 = vmatpush.bf16.msra.mxu2 %v14622_v8  ;;  %v14742_v8 = vor.u32 %v17125_v19, %v14741_v51  ;;  %v17083_v19 = vld [vmem:[#allocation11 + $0x724] sm:$0xf] }
 0x74a   :  { %7235 = vst.msk [vmem:[#allocation2 + $0x58] sm:$0xff] %vm999_vm4, %v7231_v1  ;;  %v7068_v10 = vpop.permute.xlu1 %7067 }
 0x74b   :  { %v7076_v37 = vmax.f32 %v6909_v13, %v7068_v10  ;;  %v17135_v10 = vld [vmem:[#allocation11 + $0x914] sm:$0xf0] }
 0x74d   :  { %7083 = vrot.lane.b32.xlu0 %v7074_v57, %s17587_s29  ;;  %8368 = vmatpush.bf16.msra.mxu2 %v14602_v33 }
 0x74e   :  { %7185 = vrot.lane.b32.xlu2 %v7175_v14, %s17587_s29  ;;  %7085 = vrot.lane.b32.xlu1 %v7075_v53, %s17587_s29 }
 0x74f   :  { %v7218_v58 = vpop.permute.xlu0 %7217 }
 0x750   :  { %v7229_v40 = vmax.f32 %v6891_v2, %v7218_v58 }
 0x752   :  { %7233 = vst.msk [vmem:[#allocation2 + $0x18] sm:$0xff] %vm999_vm4, %v7229_v40  ;;  %v7024_v39 = vpop.permute.xlu1 %7023  ;;  %v14561_v40 = vld [vmem:[#allocation11 + $0x6f0] sm:$0xf] }
 0x753   :  { %v7032_v56 = vmax.f32 %v6908_v30, %v7024_v39  ;;  %v17080_v39 = vld [vmem:[#allocation11 + $0x704] sm:$0xf0] }
 0x755   :  { %7099 = vrot.lane.b32.xlu0 %v7074_v57, %s17591_s16  ;;  %7036 = vst.msk [vmem:[#allocation2 + $0x68] sm:$0x3] %vm1003_vm5, %v7032_v56  ;;  %v14781_v57 = vld [vmem:[#allocation11 + $0x900] sm:$0xf] }
 0x756   :  { %7087 = vrot.lane.b32.xlu2 %v7076_v37, %s17587_s29  ;;  %7101 = vrot.lane.b32.xlu1 %v7075_v53, %s17591_s16  ;;  %v14782_v58 = vor.u32 %v17135_v10, %v14781_v57  ;;  %v17098_v10 = vld [vmem:[#allocation11 + $0x7b4] sm:$0xf] }
 0x757   :  { %v6946_v28 = vpop.permute.xlu2 %6945 }
 0x758   :  { %6955 = vst.msk [vmem:[#allocation2 + $0x40] sm:$0xff] %vm1021_vm6, %v6946_v28  ;;  %v14562_v28 = vor.u32 %v17080_v39, %v14561_v40  ;;  %8381 = vmatpush.bf16.msrb.mxu0 %v14782_v58  ;;  %v14489_v58 = vld [vmem:[#allocation11 + $0x638] sm:$0xf]  ;;  %v17061_v40 = vld [vmem:[#allocation11 + $0x64c] sm:$0xf0] }
 0x759   :  { %v14461_v39 = vld [vmem:[#allocation11 + $0x600] sm:$0xf] }
 0x75a   :  { %v7220_v26 = vpop.permute.xlu1 %7219 }
 0x75b   :  { %v7230_v52 = vmax.f32 %v6898_v3, %v7220_v26  ;;  %v14403_v26 = vld [vmem:[#allocation11 + $0x588] sm:$0xf0] }
 0x75d   :  { %7045 = vrot.lane.b32.xlu0 %v7031_v47, %s17590_s15  ;;  %7234 = vst.msk [vmem:[#allocation2 + $0x38] sm:$0xff] %vm999_vm4, %v7230_v52  ;;  %v17085_v47 = vld [vmem:[#allocation11 + $0x734] sm:$0xf0]  ;;  %v14761_v52 = vld [vmem:[#allocation11 + $0x8d0] sm:$0xf] }
 0x75e   :  { %7103 = vrot.lane.b32.xlu2 %v7076_v37, %s17591_s16  ;;  %7047 = vrot.lane.b32.xlu1 %v7032_v56, %s17590_s15  ;;  %v14582_v1 = vor.u32 %v17085_v47, %v14581_v0  ;;  %v17038_v37 = vld [vmem:[#allocation11 + $0x574] sm:$0xf]  ;;  %v14501_v0 = vld [vmem:[#allocation11 + $0x660] sm:$0xf]  ;;  %v17065_v47 = vld [vmem:[#allocation11 + $0x674] sm:$0xf0] }
 0x760   :  { %8369 = vmatpush.bf16.msra.mxu2 %v14582_v1  ;;  %v17023_v1 = vld [vmem:[#allocation11 + $0x4e4] sm:$0xf] }
 0x764   :  { %8370 = vmatpush.bf16.msra.mxu2 %v14562_v28 }
 0x765   :  { %7187 = vrot.lane.b32.xlu0 %v7176_v9, %s17587_s29 }
 0x766   :  { %7201 = vrot.lane.b32.xlu2 %v7175_v14, %s17591_s16  ;;  %7199 = vrot.lane.b32.xlu1 %v7174_v4, %s17591_s16  ;;  %v14446_v4 = vor.u32 %v17048_v15, %v14443_v60  ;;  %v14426_v14 = vor.u32 %v17043_v34, %v14423_v32  ;;  %v14481_v15 = vld [vmem:[#allocation11 + $0x630] sm:$0xf]  ;;  %v17060_v60 = vld [vmem:[#allocation11 + $0x644] sm:$0xf0]  ;;  %v14502_v34 = vor.u32 %v17065_v47, %v14501_v0  ;;  %v14343_v32 = vld [vmem:[#allocation11 + $0x4f8] sm:$0xf0] }
 0x767   :  { %v7224_v13 = vpop.permute.xlu0 %7223  ;;  %v14482_v42 = vor.u32 %v17060_v60, %v14481_v15  ;;  %v14346_v57 = vor.u32 %v17023_v1, %v14343_v32  ;;  %v17040_v15 = vld [vmem:[#allocation11 + $0x584] sm:$0xf0] }
 0x768   :  { %v7232_v17 = vmax.f32 %v6912_v49, %v7224_v13  ;;  %8410 = vmatpush.bf16.msrb.mxu3 %v14446_v4  ;;  %v17130_v13 = vld [vmem:[#allocation11 + $0x8e4] sm:$0xf0] }
 0x769   :  { %8352 = vmatpush.bf16.msra.mxu1 %v14482_v42 }
 0x76a   :  { %7236 = vst.msk [vmem:[#allocation2 + $0x78] sm:$0x3] %vm1003_vm5, %v7232_v17  ;;  %vm19840_vm5 = vmmov %vm19838_vm3 }
 0x76c   :  { %8411 = vmatpush.bf16.msrb.mxu3 %v14426_v14 }
 0x76d   :  { %7203 = vrot.lane.b32.xlu0 %v7176_v9, %s17591_s16  ;;  %v14406_v9 = vor.u32 %v17038_v37, %v14403_v26  ;;  %v17055_v37 = vld [vmem:[#allocation11 + $0x614] sm:$0xf0] }
 0x76e   :  { %v14462_v26 = vor.u32 %v17055_v37, %v14461_v39  ;;  %v14409_v37 = vld [vmem:[#allocation11 + $0x578] sm:$0xf] }
 0x770   :  { %v6984_v2 = vpop.permute.xlu2 %6983  ;;  %8412 = vmatpush.bf16.msrb.mxu3 %v14406_v9  ;;  %v17093_v9 = vld [vmem:[#allocation11 + $0x784] sm:$0xf]  ;;  %8353 = vmatpush.bf16.msra.mxu1 %v14462_v26  ;;  %v14381_v26 = vld [vmem:[#allocation11 + $0x540] sm:$0xf] }
 0x774   :  { %8413 = vmatpush.bf16.msrb.mxu3 %v14386_v20  ;;  %v14803_v20 = vld [vmem:[#allocation11 + $0x948] sm:$0xf0] }
 0x775   :  { %v14806_v11 = vor.u32 %v17138_v25, %v14803_v20 }
 0x777   :  { %v6942_v30 = vpop.permute.xlu0 %6941 }
 0x778   :  { %v7000_v38 = vpop.permute.xlu2 %6999  ;;  %6953 = vst.msk [vmem:[#allocation2] sm:$0xff] %vm1021_vm6, %v6942_v30  ;;  %8414 = vmatpush.bf16.msrb.mxu3 %v14366_v50 }
 0x77c   :  { %8415 = vmatpush.bf16.msrb.mxu3 %v14346_v57 }
 0x77f   :  { %v6944_v43 = vpop.permute.xlu1 %6943 }
 0x780   :  { %v7142_v7 = vpop.permute.xlu2 %7141  ;;  %6954 = vst.msk [vmem:[#allocation2 + $0x20] sm:$0xff] %vm1021_vm6, %v6944_v43 }
 0x781   :  { %7153 = vst.msk [vmem:[#allocation2 + $0x10] sm:$0xff] %vm1021_vm6, %v7142_v7 }
 0x782   :  { %6994 = vst.msk [vmem:[#allocation2 + $0x20] sm:$0xff] %vm1063_vm7, %v6984_v2  ;;  %v14762_v2 = vor.u32 %v17130_v13, %v14761_v52  ;;  %v17115_v52 = vld [vmem:[#allocation11 + $0x854] sm:$0xf0]  ;;  %v14623_v13 = vld [vmem:[#allocation11 + $0x798] sm:$0xf0] }
 0x783   :  { %7010 = vst.msk [vmem:[#allocation2 + $0x20] sm:$0xff] %vm1081_vm8, %v7000_v38 }
 0x784   :  { %8382 = vmatpush.bf16.msrb.mxu0 %v14762_v2 }
 0x787   :  { %v6982_v3 = vpop.permute.xlu1 %6981 }
 0x788   :  { %v7082_v21 = vpop.permute.xlu2 %7081  ;;  %6993 = vst.msk [vmem:[#allocation2] sm:$0xff] %vm1063_vm7, %v6982_v3  ;;  %8383 = vmatpush.bf16.msrb.mxu0 %v14742_v8  ;;  %v14583_v8 = vld [vmem:[#allocation11 + $0x738] sm:$0xf0] }
 0x789   :  { %v14586_v35 = vor.u32 %v17083_v19, %v14583_v8  ;;  %v17118_v19 = vld [vmem:[#allocation11 + $0x874] sm:$0xf]  ;;  %v14723_v8 = vld [vmem:[#allocation11 + $0x888] sm:$0xf0] }
 0x78f   :  { %v6998_v49 = vpop.permute.xlu1 %6997  ;;  %v6948_v24 = vpop.permute.xlu0 %6947 }
 0x790   :  { %v7098_v54 = vpop.permute.xlu2 %7097  ;;  %7009 = vst.msk [vmem:[#allocation2] sm:$0xff] %vm1081_vm8, %v6998_v49 }
 0x791   :  { %6956 = vst.msk [vmem:[#allocation2 + $0x60] sm:$0x3] %vm1025_vm9, %v6948_v24 }
 0x797   :  { %v6986_v59 = vpop.permute.xlu0 %6985 }
 0x798   :  { %v7044_v12 = vpop.permute.xlu2 %7043  ;;  %v6988_v5 = vpop.permute.xlu1 %6987  ;;  %6995 = vst.msk [vmem:[#allocation2 + $0x40] sm:$0xff] %vm1063_vm7, %v6986_v59 }
 0x799   :  { %7054 = vst.msk [vmem:[#allocation2 + $0x28] sm:$0xff] %vm1021_vm6, %v7044_v12 }
 0x79a   :  { %6996 = vst.msk [vmem:[#allocation2 + $0x60] sm:$0x3] %vm1067_vm10, %v6988_v5 }
 0x79f   :  { %v7002_v23 = vpop.permute.xlu0 %7001 }
 0x7a0   :  { %v7148_v22 = vpop.permute.xlu2 %7147  ;;  %v7004_v31 = vpop.permute.xlu1 %7003  ;;  %7011 = vst.msk [vmem:[#allocation2 + $0x40] sm:$0xff] %vm1081_vm8, %v7002_v23 }
 0x7a1   :  { %7156 = vst.msk [vmem:[#allocation2 + $0x70] sm:$0x3] %vm1025_vm9, %v7148_v22 }
 0x7a2   :  { %7012 = vst.msk [vmem:[#allocation2 + $0x60] sm:$0x3] %vm19830_vm0, %v7004_v31 }
 0x7a7   :  { %v7144_v6 = vpop.permute.xlu0 %7143 }
 0x7a8   :  { %v7186_v41 = vpop.permute.xlu2 %7185  ;;  %v7042_v63 = vpop.permute.xlu1 %7041  ;;  %7154 = vst.msk [vmem:[#allocation2 + $0x30] sm:$0xff] %vm1021_vm6, %v7144_v6 }
 0x7a9   :  { %7053 = vst.msk [vmem:[#allocation2 + $0x8] sm:$0xff] %vm1021_vm6, %v7042_v63  ;;  %v14541_v63 = vld [vmem:[#allocation11 + $0x6c0] sm:$0xf] }
 0x7aa   :  { %7093 = vst.msk [vmem:[#allocation2 + $0x8] sm:$0xff] %vm1063_vm7, %v7082_v21  ;;  %v14542_v27 = vor.u32 %v17075_v55, %v14541_v63  ;;  %v14421_v63 = vld [vmem:[#allocation11 + $0x5a0] sm:$0xf]  ;;  %v17045_v55 = vld [vmem:[#allocation11 + $0x5b4] sm:$0xf0] }
 0x7ab   :  { %7109 = vst.msk [vmem:[#allocation2 + $0x8] sm:$0xff] %vm1081_vm8, %v7098_v54 }
 0x7ac   :  { %8371 = vmatpush.bf16.msra.mxu2 %v14542_v27  ;;  %v14422_v27 = vor.u32 %v17045_v55, %v14421_v63  ;;  %v17031_v63 = vld [vmem:[#allocation11 + $0x52c] sm:$0xf0]  ;;  %v14341_v55 = vld [vmem:[#allocation11 + $0x4e0] sm:$0xf] }
 0x7af   :  { %v7182_v36 = vpop.permute.xlu0 %7181 }
 0x7b0   :  { %v19326_v48 = vpop.permute.xlu2 %7087  ;;  %v7146_v44 = vpop.permute.xlu1 %7145  ;;  %7193 = vst.msk [vmem:[#allocation2 + $0x10] sm:$0xff] %vm1063_vm7, %v7182_v36  ;;  %v17120_v36 = vld [vmem:[#allocation11 + $0x884] sm:$0xf0]  ;;  %8372 = vmatpush.bf16.msra.mxu2 %v14522_v18  ;;  %v17046_v18 = vld [vmem:[#allocation11 + $0x5bc] sm:$0xf0] }
 0x7b1   :  { %7155 = vst.msk [vmem:[#allocation2 + $0x50] sm:$0xff] %vm1021_vm6, %v7146_v44  ;;  %v14722_v33 = vor.u32 %v17120_v36, %v14721_v62  ;;  %v14430_v42 = vor.u32 %v17046_v18, %v14429_v46  ;;  %v17063_v46 = vld [vmem:[#allocation11 + $0x664] sm:$0xf]  ;;  %v14349_v18 = vld [vmem:[#allocation11 + $0x4e8] sm:$0xf] }
 0x7b2   :  { %7195 = vst.msk [vmem:[#allocation2 + $0x50] sm:$0xff] %vm1063_vm7, %v7186_v41 }
 0x7b3   :  { %8384 = vmatpush.bf16.msrb.mxu0 %v14722_v33 }
 0x7b4   :  { %8373 = vmatpush.bf16.msra.mxu2 %v14502_v34 }
 0x7b7   :  { %v7198_v53 = vpop.permute.xlu0 %7197 }
 0x7b8   :  { %v7184_v56 = vpop.permute.xlu1 %7183  ;;  %7209 = vst.msk [vmem:[#allocation2 + $0x10] sm:$0xff] %vm1081_vm8, %v7198_v53  ;;  %v19333_v17 = vpop.permute.xlu2 %7103  ;;  %v14643_v53 = vld [vmem:[#allocation11 + $0x7c8] sm:$0xf0] }
 0x7b9   :  { %7194 = vst.msk [vmem:[#allocation2 + $0x30] sm:$0xff] %vm1063_vm7, %v7184_v56  ;;  %v14646_v14 = vor.u32 %v17098_v10, %v14643_v53  ;;  %v14701_v56 = vld [vmem:[#allocation11 + $0x840] sm:$0xf]  ;;  %v17133_v10 = vld [vmem:[#allocation11 + $0x904] sm:$0xf] }
 0x7ba   :  { %v14702_v2 = vor.u32 %v17115_v52, %v14701_v56  ;;  %v17041_v56 = vld [vmem:[#allocation11 + $0x58c] sm:$0xf0]  ;;  %v17035_v52 = vld [vmem:[#allocation11 + $0x554] sm:$0xf0] }
 0x7bb   :  { %8422 = vmatpush.bf16.msrb.mxu2 %v14646_v14  ;;  %v14783_v14 = vld [vmem:[#allocation11 + $0x918] sm:$0xf0] }
 0x7bc   :  { %8385 = vmatpush.bf16.msrb.mxu0 %v14702_v2  ;;  %v17073_v2 = vld [vmem:[#allocation11 + $0x6c4] sm:$0xf] }
 0x7bf   :  { %v7237_v30 = vld [vmem:[#allocation2] ss:$8 sm:$0xf]  ;;  %v7238_v38 = vld [vmem:[#allocation2 + $0x1] ss:$8 sm:$0xf]  ;;  %v7084_v43 = vpop.permute.xlu0 %7083 }
 0x7c0   :  { %v7239_v7 = vmax.f32 %v7237_v30, %v7238_v38  ;;  %v7242_v3 = vld [vmem:[#allocation2 + $0x2] ss:$8 sm:$0xf]  ;;  %v7243_v21 = vld [vmem:[#allocation2 + $0x3] ss:$8 sm:$0xf]  ;;  %v7086_v49 = vpop.permute.xlu1 %7085  ;;  %v7202_v6 = vpop.permute.xlu2 %7201  ;;  %v14626_v30 = vor.u32 %v17093_v9, %v14623_v13  ;;  %v14382_v13 = vor.u32 %v17035_v52, %v14381_v26 }
 0x7c1   :  { %v7244_v24 = vmax.f32 %v7242_v3, %v7243_v21  ;;  %v7247_v54 = vld [vmem:[#allocation2 + $0x4] ss:$8 sm:$0xf]  ;;  %v7248_v59 = vld [vmem:[#allocation2 + $0x5] ss:$8 sm:$0xf] }
 0x7c2   :  { %v7249_v12 = vmax.f32 %v7247_v54, %v7248_v59  ;;  %v7252_v5 = vld [vmem:[#allocation2 + $0x6] ss:$8 sm:$0xf]  ;;  %v7253_v23 = vld [vmem:[#allocation2 + $0x7] ss:$8 sm:$0xf]  ;;  %8423 = vmatpush.bf16.msrb.mxu2 %v14626_v30 }
 0x7c3   :  { %v7254_v22 = vmax.f32 %v7252_v5, %v7253_v23  ;;  %7240 = vst.msk [vmem:[#allocation3] ss:$8 sm:$0xf] %vm18249_vm12, %v7239_v7  ;;  %v14469_v38 = vld [vmem:[#allocation11 + $0x608] sm:$0xf] }
 0x7c4   :  { %7245 = vst.msk [vmem:[#allocation3 + $0x1] ss:$8 sm:$0xf] %vm18249_vm12, %v7244_v24  ;;  %v14441_v3 = vld [vmem:[#allocation11 + $0x5d0] sm:$0xf] }
 0x7c5   :  { %7250 = vst.msk [vmem:[#allocation3 + $0x2] ss:$8 sm:$0xf] %vm18249_vm12, %v7249_v12  ;;  %v17050_v21 = vld [vmem:[#allocation11 + $0x5e4] sm:$0xf0] }
 0x7c6   :  { %7255 = vst.msk [vmem:[#allocation3 + $0x3] ss:$8 sm:$0xf] %vm18249_vm12, %v7254_v22  ;;  %v14681_v24 = vld [vmem:[#allocation11 + $0x810] sm:$0xf] }
 0x7c7   :  { %7211 = vst.msk [vmem:[#allocation2 + $0x50] sm:$0xff] %vm1081_vm8, %v7202_v6  ;;  %v7100_v41 = vpop.permute.xlu0 %7099  ;;  %v17110_v54 = vld [vmem:[#allocation11 + $0x824] sm:$0xf0]  ;;  %v17088_v59 = vld [vmem:[#allocation11 + $0x754] sm:$0xf] }
 0x7c8   :  { %7094 = vst.msk [vmem:[#allocation2 + $0x28] sm:$0xff] %vm1063_vm7, %v7084_v43  ;;  %v7102_v16 = vpop.permute.xlu1 %7101  ;;  %v17056_v43 = vld [vmem:[#allocation11 + $0x61c] sm:$0xf0]  ;;  %v14682_v12 = vor.u32 %v17110_v54, %v14681_v24  ;;  %v14603_v5 = vld [vmem:[#allocation11 + $0x768] sm:$0xf0] }
 0x7c9   :  { %7110 = vst.msk [vmem:[#allocation2 + $0x28] sm:$0xff] %vm1081_vm8, %v7100_v41  ;;  %v14470_v7 = vor.u32 %v17056_v43, %v14469_v38  ;;  %v14449_v23 = vld [vmem:[#allocation11 + $0x5d8] sm:$0xf]  ;;  %v17051_v22 = vld [vmem:[#allocation11 + $0x5ec] sm:$0xf0]  ;;  %v14606_v6 = vor.u32 %v17088_v59, %v14603_v5 }
 0x7ca   :  { %v14450_v41 = vor.u32 %v17051_v22, %v14449_v23  ;;  %8386 = vmatpush.bf16.msrb.mxu0 %v14682_v12  ;;  %v17128_v9 = vld [vmem:[#allocation11 + $0x8d4] sm:$0xf]  ;;  %v14543_v30 = vld [vmem:[#allocation11 + $0x6d8] sm:$0xf0]  ;;  %v17030_v24 = vld [vmem:[#allocation11 + $0x524] sm:$0xf0] }
 0x7cb   :  { %8424 = vmatpush.bf16.msrb.mxu2 %v14606_v6  ;;  %v14546_v43 = vor.u32 %v17073_v2, %v14543_v30  ;;  %v17123_v54 = vld [vmem:[#allocation11 + $0x8a4] sm:$0xf]  ;;  %v14743_v59 = vld [vmem:[#allocation11 + $0x8b8] sm:$0xf0]  ;;  %v17068_v23 = vld [vmem:[#allocation11 + $0x694] sm:$0xf] }
 0x7cc   :  { %v14746_v5 = vor.u32 %v17123_v54, %v14743_v59  ;;  %v14523_v22 = vld [vmem:[#allocation11 + $0x6a8] sm:$0xf0]  ;;  %v14369_v6 = vld [vmem:[#allocation11 + $0x518] sm:$0xf] }
 0x7cd   :  { %v14370_v25 = vor.u32 %v17031_v63, %v14369_v6 }
 0x7cf   :  { %v7046_v44 = vpop.permute.xlu0 %7045  ;;  %8425 = vmatpush.bf16.msrb.mxu2 %v14586_v35  ;;  %v14503_v35 = vld [vmem:[#allocation11 + $0x678] sm:$0xf0] }
 0x7d0   :  { %v7048_v4 = vpop.permute.xlu1 %7047  ;;  %7055 = vst.msk [vmem:[#allocation2 + $0x48] sm:$0xff] %vm1021_vm6, %v7046_v44  ;;  %v14402_v44 = vor.u32 %v17040_v15, %v14401_v61  ;;  %v17026_v61 = vld [vmem:[#allocation11 + $0x4fc] sm:$0xf0]  ;;  %v14506_v15 = vor.u32 %v17063_v46, %v14503_v35  ;;  %v14843_v46 = vld [vmem:[#allocation11 + $0x9a8] sm:$0xf0] }
 0x7d1   :  { %7056 = vst.msk [vmem:[#allocation2 + $0x68] sm:$0x3] %vm1025_vm9, %v7048_v4 }
 0x7d2   :  { %7096 = vst.msk [vmem:[#allocation2 + $0x68] sm:$0x3] %vm1067_vm10, %v19326_v48  ;;  %v14490_v48 = vor.u32 %v17061_v40, %v14489_v58  ;;  %v14786_v58 = vor.u32 %v17133_v10, %v14783_v14  ;;  %v17078_v40 = vld [vmem:[#allocation11 + $0x6f4] sm:$0xf]  ;;  %v14703_v14 = vld [vmem:[#allocation11 + $0x858] sm:$0xf0] }
 0x7d3   :  { %7112 = vst.msk [vmem:[#allocation2 + $0x68] sm:$0x3] %vm19832_vm1, %v19333_v17 }
 0x7d4   :  { %7095 = vst.msk [vmem:[#allocation2 + $0x48] sm:$0xff] %vm1063_vm7, %v7086_v49  ;;  %8464 = vmatpush.bf16.msra.mxu3 %v14490_v48  ;;  %v14442_v49 = vor.u32 %v17050_v21, %v14441_v3  ;;  %v14563_v48 = vld [vmem:[#allocation11 + $0x708] sm:$0xf0]  ;;  %v17036_v3 = vld [vmem:[#allocation11 + $0x55c] sm:$0xf0] }
 0x7d5   :  { %7111 = vst.msk [vmem:[#allocation2 + $0x48] sm:$0xff] %vm1081_vm8, %v7102_v16  ;;  %v14661_v16 = vld [vmem:[#allocation11 + $0x7e0] sm:$0xf]  ;;  %v14566_v39 = vor.u32 %v17078_v40, %v14563_v48  ;;  %v14361_v21 = vld [vmem:[#allocation11 + $0x510] sm:$0xf] }
 0x7d6   :  { %8354 = vmatpush.bf16.msra.mxu1 %v14442_v49  ;;  %v14662_v51 = vor.u32 %v17105_v45, %v14661_v16  ;;  %v14362_v12 = vor.u32 %v17030_v24, %v14361_v21  ;;  %v17025_v16 = vld [vmem:[#allocation11 + $0x4f4] sm:$0xf0]  ;;  %v17103_v21 = vld [vmem:[#allocation11 + $0x7e4] sm:$0xf] }
 0x7d7   :  { %v7188_v28 = vpop.permute.xlu0 %7187  ;;  %8426 = vmatpush.bf16.msrb.mxu2 %v14566_v39  ;;  %v14841_v39 = vld [vmem:[#allocation11 + $0x990] sm:$0xf] }
 0x7d8   :  { %v7200_v17 = vpop.permute.xlu1 %7199  ;;  %7196 = vst.msk [vmem:[#allocation2 + $0x70] sm:$0x3] %vm1067_vm10, %v7188_v28  ;;  %8465 = vmatpush.bf16.msra.mxu3 %v14470_v7  ;;  %8387 = vmatpush.bf16.msrb.mxu0 %v14662_v51  ;;  %v14410_v28 = vor.u32 %v17041_v56, %v14409_v37  ;;  %v14389_v7 = vld [vmem:[#allocation11 + $0x548] sm:$0xf]  ;;  %v14342_v51 = vor.u32 %v17025_v16, %v14341_v55  ;;  %v17108_v56 = vld [vmem:[#allocation11 + $0x814] sm:$0xf] }
 0x7d9   :  { %7210 = vst.msk [vmem:[#allocation2 + $0x30] sm:$0xff] %vm1081_vm8, %v7200_v17  ;;  %v14763_v17 = vld [vmem:[#allocation11 + $0x8e8] sm:$0xf0]  ;;  %v14390_v49 = vor.u32 %v17036_v3, %v14389_v7  ;;  %v17150_v37 = vld [vmem:[#allocation11 + $0x9a4] sm:$0xf0] }
 0x7da   :  { %8355 = vmatpush.bf16.msra.mxu1 %v14422_v27  ;;  %v14766_v38 = vor.u32 %v17128_v9, %v14763_v17  ;;  %v14842_v26 = vor.u32 %v17150_v37, %v14841_v39  ;;  %v17145_v17 = vld [vmem:[#allocation11 + $0x974] sm:$0xf0] }
 0x7db   :  { %8427 = vmatpush.bf16.msrb.mxu2 %v14546_v43  ;;  %v14809_v16 = vld [vmem:[#allocation11 + $0x938] sm:$0xf] }
 0x7dc   :  { %8466 = vmatpush.bf16.msra.mxu3 %v14450_v41  ;;  %8436 = vmatpush.bf16.msra.mxu0 %v14806_v11  ;;  %v14526_v41 = vor.u32 %v17068_v23, %v14523_v22  ;;  %v14726_v11 = vor.u32 %v17118_v19, %v14723_v8  ;;  %v17148_v19 = vld [vmem:[#allocation11 + $0x994] sm:$0xf] }
 0x7de   :  { %8356 = vmatpush.bf16.msra.mxu1 %v14402_v44  ;;  %v7287_v44 = vld [vmem:[#allocation2 + $0x44] ss:$8 sm:$0xf] }
 0x7df   :  { %v7204_v53 = vpop.permute.xlu0 %7203  ;;  %8428 = vmatpush.bf16.msrb.mxu2 %v14526_v41 }
 0x7e0   :  { %v7257_v60 = vld [vmem:[#allocation2 + $0x20] ss:$8 sm:$0xf]  ;;  %v7258_v50 = vld [vmem:[#allocation2 + $0x21] ss:$8 sm:$0xf]  ;;  %8467 = vmatpush.bf16.msra.mxu3 %v14430_v42  ;;  %8437 = vmatpush.bf16.msra.mxu0 %v14786_v58 }
 0x7e1   :  { %v7259_v62 = vmax.f32 %v7257_v60, %v7258_v50  ;;  %v7262_v36 = vld [vmem:[#allocation2 + $0x22] ss:$8 sm:$0xf]  ;;  %v7263_v33 = vld [vmem:[#allocation2 + $0x23] ss:$8 sm:$0xf]  ;;  %v14350_v50 = vor.u32 %v17026_v61, %v14349_v18 }
 0x7e2   :  { %v7264_v4 = vmax.f32 %v7262_v36, %v7263_v33  ;;  %v7267_v0 = vld [vmem:[#allocation2 + $0x24] ss:$8 sm:$0xf]  ;;  %v7268_v47 = vld [vmem:[#allocation2 + $0x25] ss:$8 sm:$0xf]  ;;  %8357 = vmatpush.bf16.msra.mxu1 %v14382_v13 }
 0x7e3   :  { %v7269_v34 = vmax.f32 %v7267_v0, %v7268_v47  ;;  %v7272_v1 = vld [vmem:[#allocation2 + $0x26] ss:$8 sm:$0xf]  ;;  %v7273_v32 = vld [vmem:[#allocation2 + $0x27] ss:$8 sm:$0xf]  ;;  %8429 = vmatpush.bf16.msrb.mxu2 %v14506_v15 }
 0x7e4   :  { %v7274_v57 = vmax.f32 %v7272_v1, %v7273_v32  ;;  %7260 = vst.msk [vmem:[#allocation3 + $0x4] ss:$8 sm:$0xf] %vm18249_vm12, %v7259_v62  ;;  %8468 = vmatpush.bf16.msra.mxu3 %v14410_v28  ;;  %8438 = vmatpush.bf16.msra.mxu0 %v14766_v38  ;;  %v7277_v60 = vld [vmem:[#allocation2 + $0x40] ss:$8 sm:$0xf] }
 0x7e5   :  { %7265 = vst.msk [vmem:[#allocation3 + $0x5] ss:$8 sm:$0xf] %vm18249_vm12, %v7264_v4  ;;  %v7278_v42 = vld [vmem:[#allocation2 + $0x41] ss:$8 sm:$0xf] }
 0x7e6   :  { %7270 = vst.msk [vmem:[#allocation3 + $0x6] ss:$8 sm:$0xf] %vm18249_vm12, %v7269_v34  ;;  %8358 = vmatpush.bf16.msra.mxu1 %v14362_v12  ;;  %v7282_v62 = vld [vmem:[#allocation2 + $0x42] ss:$8 sm:$0xf]  ;;  %v7279_v36 = vmax.f32 %v7277_v60, %v7278_v42 }
 0x7e7   :  { %7275 = vst.msk [vmem:[#allocation3 + $0x7] ss:$8 sm:$0xf] %vm18249_vm12, %v7274_v57  ;;  %v7283_v33 = vld [vmem:[#allocation2 + $0x43] ss:$8 sm:$0xf] }
 0x7e8   :  { %7212 = vst.msk [vmem:[#allocation2 + $0x70] sm:$0x3] %vm19833_vm2, %v7204_v53  ;;  %8469 = vmatpush.bf16.msra.mxu3 %v14390_v49  ;;  %8439 = vmatpush.bf16.msra.mxu0 %v14746_v5  ;;  %v7284_v4 = vmax.f32 %v7282_v62, %v7283_v33  ;;  %v7288_v0 = vld [vmem:[#allocation2 + $0x45] ss:$8 sm:$0xf] }
 0x7e9   :  { %v7292_v47 = vld [vmem:[#allocation2 + $0x46] ss:$8 sm:$0xf]  ;;  %7280 = vst.msk [vmem:[#allocation3 + $0x20] ss:$8 sm:$0xf] %vm18249_vm12, %v7279_v36  ;;  %v7289_v34 = vmax.f32 %v7287_v44, %v7288_v0 }
 0x7ea   :  { %8359 = vmatpush.bf16.msra.mxu1 %v14342_v51  ;;  %v7293_v1 = vld [vmem:[#allocation2 + $0x47] ss:$8 sm:$0xf]  ;;  %7285 = vst.msk [vmem:[#allocation3 + $0x21] ss:$8 sm:$0xf] %vm18249_vm12, %v7284_v4 }
 0x7eb   :  { %v7294_v32 = vmax.f32 %v7292_v47, %v7293_v1  ;;  %7290 = vst.msk [vmem:[#allocation3 + $0x22] ss:$8 sm:$0xf] %vm18249_vm12, %v7289_v34  ;;  %v17113_v57 = vld [vmem:[#allocation11 + $0x844] sm:$0xf] }
 0x7ec   :  { %8470 = vmatpush.bf16.msra.mxu3 %v14370_v25  ;;  %8440 = vmatpush.bf16.msra.mxu0 %v14726_v11  ;;  %v14706_v48 = vor.u32 %v17113_v57, %v14703_v14  ;;  %v14683_v28 = vld [vmem:[#allocation11 + $0x828] sm:$0xf0]  ;;  %v14821_v13 = vld [vmem:[#allocation11 + $0x960] sm:$0xf]  ;;  %v14663_v49 = vld [vmem:[#allocation11 + $0x7f8] sm:$0xf0]  ;;  %v14846_v57 = vor.u32 %v17148_v19, %v14843_v46 }
 0x7ed   :  { %7295 = vst.msk [vmem:[#allocation3 + $0x23] ss:$8 sm:$0xf] %vm18249_vm12, %v7294_v32  ;;  %v14686_v52 = vor.u32 %v17108_v56, %v14683_v28  ;;  %v14822_v43 = vor.u32 %v17145_v17, %v14821_v13  ;;  %v14666_v54 = vor.u32 %v17103_v21, %v14663_v49  ;;  %v14491_v51 = vld [vmem:[#allocation11 + $0x650] sm:$0xf0] }
 0x7ee   :  { %v7302_v10 = vld [vmem:[#allocation3] sm:$0xff]  ;;  %v7303_v53 = vld [vmem:[#allocation3 + $0x8] sm:$0xff]  ;;  %v7304_v58 = vld [vmem:[#allocation3 + $0x10] sm:$0xff]  ;;  %8400 = vmatpush.bf16.msrb.mxu1 %v14842_v26 }
 0x7ef   :  { %v7297_v27 = vld [vmem:[#allocation2 + $0x60] ss:$8 sm:$0xf]  ;;  %v7298_v45 = vld [vmem:[#allocation2 + $0x61] ss:$8 sm:$0xf]  ;;  %v7310_v9 = vpack.c.bf16 %v7303_v53, %v7302_v10 }
 0x7f0   :  { %v7299_v20 = vmax.f32 %v7297_v27, %v7298_v45  ;;  %8471 = vmatpush.bf16.msra.mxu3 %v14350_v50  ;;  %v7305_v40 = vld [vmem:[#allocation3 + $0x18] sm:$0xff]  ;;  %8441 = vmatpush.bf16.msra.mxu0 %v14706_v48  ;;  %v17141_v27 = vld [vmem:[#allocation11 + $0x94c] sm:$0xf0]  ;;  %v14789_v0 = vld [vmem:[#allocation11 + $0x908] sm:$0xf] }
 0x7f1   :  { %v19375_v38 = vpack.c.bf16 %v7305_v40, %v7304_v58  ;;  %v7630_v59 = vunpack.c.l.b16 %v7310_v9  ;;  %v7631_v5 = vunpack.c.h.b16 %v7310_v9  ;;  %v17059_v45 = vld [vmem:[#allocation11 + $0x63c] sm:$0xf]  ;;  %v14849_v11 = vld [vmem:[#allocation11 + $0x998] sm:$0xf]  ;;  %v17151_v60 = vld [vmem:[#allocation11 + $0x9ac] sm:$0xf0]  ;;  %v14810_v62 = vor.u32 %v17141_v27, %v14809_v16 }
 0x7f2   :  { %7300 = vst.msk [vmem:[#allocation3 + $0x24] ss:$8 sm:$0xf] %vm18249_vm12, %v7299_v20  ;;  %8401 = vmatpush.bf16.msrb.mxu1 %v14822_v43  ;;  %v14494_v4 = vor.u32 %v17059_v45, %v14491_v51  ;;  %v17136_v47 = vld [vmem:[#allocation11 + $0x91c] sm:$0xf0]  ;;  %v14850_v10 = vor.u32 %v17151_v60, %v14849_v11 }
 0x7f3   :  { %v7632_v22 = vunpack.c.l.b16 %v19375_v38  ;;  %v17054_v1 = vld [vmem:[#allocation11 + $0x60c] sm:$0xf]  ;;  %v14471_v32 = vld [vmem:[#allocation11 + $0x620] sm:$0xf0]  ;;  %v7633_v14 = vunpack.c.h.b16 %v19375_v38  ;;  %v14823_v58 = vld [vmem:[#allocation11 + $0x978] sm:$0xf0]  ;;  %v14790_v39 = vor.u32 %v17136_v47, %v14789_v0 }
 0x7f4   :  { %8442 = vmatpush.bf16.msra.mxu0 %v14686_v52  ;;  %v17143_v53 = vld [vmem:[#allocation11 + $0x964] sm:$0xf]  ;;  %v14829_v40 = vld [vmem:[#allocation11 + $0x968] sm:$0xf]  ;;  %v17146_v48 = vld [vmem:[#allocation11 + $0x97c] sm:$0xf0]  ;;  %v14474_v37 = vor.u32 %v17054_v1, %v14471_v32 }
 0x7f5   :  { %v14769_v56 = vld [vmem:[#allocation11 + $0x8d8] sm:$0xf]  ;;  %v17131_v26 = vld [vmem:[#allocation11 + $0x8ec] sm:$0xf0]  ;;  %v17049_v52 = vld [vmem:[#allocation11 + $0x5dc] sm:$0xf]  ;;  %v14826_v13 = vor.u32 %v17143_v53, %v14823_v58  ;;  %v14830_v17 = vor.u32 %v17146_v48, %v14829_v40 }
 0x7f6   :  { %v14451_v9 = vld [vmem:[#allocation11 + $0x5f0] sm:$0xf0]  ;;  %v17126_v43 = vld [vmem:[#allocation11 + $0x8bc] sm:$0xf0]  ;;  %v14649_v21 = vld [vmem:[#allocation11 + $0x7b8] sm:$0xf] }
 0x7f7   :  { %v17099_v16 = vld [vmem:[#allocation11 + $0x7bc] sm:$0xf]  ;;  %v14651_v27 = vld [vmem:[#allocation11 + $0x7d0] sm:$0xf0]  ;;  %v14629_v51 = vld [vmem:[#allocation11 + $0x788] sm:$0xf] }
 0x7f8   :  { %8443 = vmatpush.bf16.msra.mxu0 %v14666_v54  ;;  %v17096_v19 = vld [vmem:[#allocation11 + $0x79c] sm:$0xf0]  ;;  %v14654_v46 = vor.u32 %v17099_v16, %v14651_v27  ;;  %v14709_v11 = vld [vmem:[#allocation11 + $0x848] sm:$0xf]  ;;  %v14631_v60 = vld [vmem:[#allocation11 + $0x7a0] sm:$0xf0] }
 0x7f9   :  { %v7306_v2 = vld [vmem:[#allocation3 + $0x20] sm:$0x1f]  ;;  %v7307_v31 = vld [vmem:[#allocation3 + $0x28] sm:$0x1f]  ;;  %v7308_v30 = vld [vmem:[#allocation3 + $0x30] sm:$0x1f] }
 0x7fa   :  { %v7312_v7 = vpack.c.bf16 %v7307_v31, %v7306_v2  ;;  %v7309_v3 = vld [vmem:[#allocation3 + $0x38] sm:$0x1f]  ;;  %v14770_v2 = vor.u32 %v17131_v26, %v14769_v56  ;;  %v14454_v31 = vor.u32 %v17049_v52, %v14451_v9  ;;  %v17111_v1 = vld [vmem:[#allocation11 + $0x82c] sm:$0xf0]  ;;  %v14611_v53 = vld [vmem:[#allocation11 + $0x770] sm:$0xf0] }
 0x7fb   :  { %v7313_v24 = vpack.c.bf16 %v7309_v3, %v7308_v30  ;;  %v14749_v30 = vld [vmem:[#allocation11 + $0x8a8] sm:$0xf]  ;;  %v14431_v3 = vld [vmem:[#allocation11 + $0x5c0] sm:$0xf0]  ;;  %v14689_v47 = vld [vmem:[#allocation11 + $0x818] sm:$0xf] }
 0x7fc   :  { %v7634_v12 = vunpack.c.l.b16 %v7312_v7  ;;  %v7635_v23 = vunpack.c.h.b16 %v7312_v7  ;;  %v17044_v7 = vld [vmem:[#allocation11 + $0x5ac] sm:$0xf]  ;;  %v14750_v49 = vor.u32 %v17126_v43, %v14749_v30  ;;  %v17029_v32 = vld [vmem:[#allocation11 + $0x51c] sm:$0xf]  ;;  %v14690_v58 = vor.u32 %v17111_v1, %v14689_v47  ;;  %v14589_v40 = vld [vmem:[#allocation11 + $0x728] sm:$0xf] }
 0x7fd   :  { %v7636_v6 = vunpack.c.l.b16 %v7313_v24  ;;  %v7637_v44 = vunpack.c.h.b16 %v7313_v24  ;;  %v14434_v24 = vor.u32 %v17044_v7, %v14431_v3  ;;  %v17086_v48 = vld [vmem:[#allocation11 + $0x73c] sm:$0xf0]  ;;  %v17024_v52 = vld [vmem:[#allocation11 + $0x4ec] sm:$0xf]  ;;  %v14351_v9 = vld [vmem:[#allocation11 + $0x500] sm:$0xf0] }
 0x7fe   :  { %v19378_v41 = vpack.c.b16 %v7634_v12, %v7630_v59  ;;  %v19380_v63 = vpack.c.b16 %v7635_v23, %v7631_v5  ;;  %v17101_v59 = vld [vmem:[#allocation11 + $0x7cc] sm:$0xf0]  ;;  %v14729_v12 = vld [vmem:[#allocation11 + $0x878] sm:$0xf]  ;;  %v17106_v26 = vld [vmem:[#allocation11 + $0x7fc] sm:$0xf0]  ;;  %v14590_v43 = vor.u32 %v17086_v48, %v14589_v40  ;;  %v14354_v3 = vor.u32 %v17024_v52, %v14351_v9 }
 0x7ff   :  { %v19382_v55 = vpack.c.b16 %v7636_v6, %v7632_v22  ;;  %v19401_v28 = vpack.c.b16 %v7637_v44, %v7633_v14  ;;  %v17121_v23 = vld [vmem:[#allocation11 + $0x88c] sm:$0xf0]  ;;  %v17039_v22 = vld [vmem:[#allocation11 + $0x57c] sm:$0xf]  ;;  %v14411_v6 = vld [vmem:[#allocation11 + $0x590] sm:$0xf0] }
 0x800   :  { %v7645_v25 = vshll.u32 %v19378_v41, 16  ;;  %v7652_v20 = vshll.u32 %v19380_v63, 16  ;;  %v7643_v35 = vshrl.u32 %v19378_v41, 16  ;;  %v7650_v61 = vshrl.u32 %v19380_v63, 16  ;;  %v17091_v44 = vld [vmem:[#allocation11 + $0x76c] sm:$0xf0] }
 0x801   :  { %v7659_v8 = vshll.u32 %v19382_v55, 16  ;;  %v7657_v50 = vshrl.u32 %v19382_v55, 16  ;;  %v7666_v38 = vshll.u32 %v19401_v28, 16  ;;  %v7664_v5 = vshrl.u32 %v19401_v28, 16  ;;  %v14657_v30 = vld [vmem:[#allocation11 + $0x7c0] sm:$0xf] }
 0x802   :  { %v7647_v18 = vrot.slane %v7645_v25, 1  ;;  %v7654_v15 = vrot.slane %v7652_v20, 1  ;;  %v14650_v25 = vor.u32 %v17101_v59, %v14649_v21  ;;  %v14730_v20 = vor.u32 %v17121_v23, %v14729_v12  ;;  %v17079_v12 = vld [vmem:[#allocation11 + $0x6fc] sm:$0xf]  ;;  %v17144_v23 = vld [vmem:[#allocation11 + $0x96c] sm:$0xf] }
 0x803   :  { %v7661_v42 = vrot.slane %v7659_v8, 1  ;;  %v7668_v54 = vrot.slane %v7666_v38, 1  ;;  %v14414_v8 = vor.u32 %v17039_v22, %v14411_v6  ;;  %v17102_v38 = vld [vmem:[#allocation11 + $0x7d4] sm:$0xf0]  ;;  %v14831_v22 = vld [vmem:[#allocation11 + $0x980] sm:$0xf0] }
 0x804   :  { %v19390_v36 = vor.u32 %v7647_v18, %v7643_v35  ;;  %v19392_v33 = vor.u32 %v7654_v15, %v7650_v61  ;;  %v17116_v35 = vld [vmem:[#allocation11 + $0x85c] sm:$0xf0]  ;;  %v17034_v18 = vld [vmem:[#allocation11 + $0x54c] sm:$0xf]  ;;  %v14391_v61 = vld [vmem:[#allocation11 + $0x560] sm:$0xf0]  ;;  %v14658_v59 = vor.u32 %v17102_v38, %v14657_v30 }
 0x805   :  { %v19394_v34 = vor.u32 %v7661_v42, %v7657_v50  ;;  %v19405_v45 = vor.u32 %v7668_v54, %v7664_v5  ;;  %v17094_v15 = vld [vmem:[#allocation11 + $0x78c] sm:$0xf]  ;;  %v14630_v50 = vor.u32 %v17096_v19, %v14629_v51  ;;  %v14710_v42 = vor.u32 %v17116_v35, %v14709_v11  ;;  %v14571_v5 = vld [vmem:[#allocation11 + $0x710] sm:$0xf0]  ;;  %v14637_v6 = vld [vmem:[#allocation11 + $0x790] sm:$0xf] }
 0x806   :  { %8360 = vmatmul.bf16.vlgmr.msra.gmra.mxu1 %v19390_v36  ;;  %8374 = vmatmul.bf16.vlgmr.msra.gmra.mxu2 %v19392_v33  ;;  %v14634_v0 = vor.u32 %v17094_v15, %v14631_v60  ;;  %v17097_v16 = vld [vmem:[#allocation11 + $0x7a4] sm:$0xf0]  ;;  %v14574_v51 = vor.u32 %v17079_v12, %v14571_v5  ;;  %v17074_v35 = vld [vmem:[#allocation11 + $0x6cc] sm:$0xf]  ;;  %v14617_v15 = vld [vmem:[#allocation11 + $0x760] sm:$0xf] }
 0x807   :  { %8388 = vmatmul.bf16.vlgmr.msrb.gmra.mxu0 %v19394_v34  ;;  %8416 = vmatmul.bf16.vlgmr.msrb.gmra.mxu3 %v19390_v36  ;;  %v14549_v19 = vld [vmem:[#allocation11 + $0x6c8] sm:$0xf]  ;;  %v14638_v11 = vor.u32 %v17097_v16, %v14637_v6  ;;  %v17092_v60 = vld [vmem:[#allocation11 + $0x774] sm:$0xf0]  ;;  %v17069_v1 = vld [vmem:[#allocation11 + $0x69c] sm:$0xf] }
 0x808   :  { %8492 = vmatpush.bf16.msra.mxu2 %v14810_v62  ;;  %8520 = vmatpush.bf16.msrb.mxu3 %v14494_v4  ;;  %v14609_v62 = vld [vmem:[#allocation11 + $0x758] sm:$0xf]  ;;  %v14394_v4 = vor.u32 %v17034_v18, %v14391_v61  ;;  %v14551_v18 = vld [vmem:[#allocation11 + $0x6e0] sm:$0xf0]  ;;  %v14618_v47 = vor.u32 %v17092_v60, %v14617_v15  ;;  %v14509_v48 = vld [vmem:[#allocation11 + $0x668] sm:$0xf] }
 0x809   :  { %8456 = vmatpush.bf16.msra.mxu1 %v14846_v57  ;;  %8512 = vmatpush.bf16.msrb.mxu0 %v14850_v10  ;;  %v14371_v57 = vld [vmem:[#allocation11 + $0x530] sm:$0xf0]  ;;  %v17089_v10 = vld [vmem:[#allocation11 + $0x75c] sm:$0xf]  ;;  %v14610_v14 = vor.u32 %v17091_v44, %v14609_v62  ;;  %v17057_v62 = vld [vmem:[#allocation11 + $0x624] sm:$0xf0]  ;;  %v14554_v44 = vor.u32 %v17074_v35, %v14551_v18 }
 0x80a   :  { %v14614_v56 = vor.u32 %v17089_v10, %v14611_v53  ;;  %v14597_v10 = vld [vmem:[#allocation11 + $0x730] sm:$0xf]  ;;  %v17087_v53 = vld [vmem:[#allocation11 + $0x744] sm:$0xf0]  ;;  %v17052_v40 = vld [vmem:[#allocation11 + $0x5f4] sm:$0xf0] }
 0x80b   :  { %v14598_v52 = vor.u32 %v17087_v53, %v14597_v10  ;;  %v17139_v9 = vld [vmem:[#allocation11 + $0x93c] sm:$0xf]  ;;  %v14817_v30 = vld [vmem:[#allocation11 + $0x940] sm:$0xf]  ;;  %v17142_v38 = vld [vmem:[#allocation11 + $0x954] sm:$0xf0] }
 0x80c   :  { %8493 = vmatpush.bf16.msra.mxu2 %v14790_v39  ;;  %8521 = vmatpush.bf16.msrb.mxu3 %v14474_v37  ;;  %v14669_v39 = vld [vmem:[#allocation11 + $0x7e8] sm:$0xf]  ;;  %v14374_v37 = vor.u32 %v17029_v32, %v14371_v57  ;;  %v14531_v32 = vld [vmem:[#allocation11 + $0x6b0] sm:$0xf0]  ;;  %v14791_v12 = vld [vmem:[#allocation11 + $0x920] sm:$0xf0] }
 0x80d   :  { %8457 = vmatpush.bf16.msra.mxu1 %v14826_v13  ;;  %8513 = vmatpush.bf16.msrb.mxu0 %v14830_v17  ;;  %v17084_v13 = vld [vmem:[#allocation11 + $0x72c] sm:$0xf]  ;;  %v14591_v17 = vld [vmem:[#allocation11 + $0x740] sm:$0xf0]  ;;  %v14670_v7 = vor.u32 %v17106_v26, %v14669_v39  ;;  %v14534_v39 = vor.u32 %v17069_v1, %v14531_v32  ;;  %v14557_v5 = vld [vmem:[#allocation11 + $0x6d0] sm:$0xf] }
 0x80e   :  { %v14594_v21 = vor.u32 %v17084_v13, %v14591_v17  ;;  %v14511_v26 = vld [vmem:[#allocation11 + $0x680] sm:$0xf0]  ;;  %v14811_v13 = vld [vmem:[#allocation11 + $0x950] sm:$0xf0]  ;;  %v14577_v17 = vld [vmem:[#allocation11 + $0x700] sm:$0xf] }
 0x80f   :  { %v14797_v6 = vld [vmem:[#allocation11 + $0x910] sm:$0xf]  ;;  %v17137_v16 = vld [vmem:[#allocation11 + $0x924] sm:$0xf0]  ;;  %v17072_v18 = vld [vmem:[#allocation11 + $0x6b4] sm:$0xf0] }
 0x810   :  { %8494 = vmatpush.bf16.msra.mxu2 %v14770_v2  ;;  %8522 = vmatpush.bf16.msrb.mxu3 %v14454_v31  ;;  %v17149_v2 = vld [vmem:[#allocation11 + $0x99c] sm:$0xf]  ;;  %v14851_v31 = vld [vmem:[#allocation11 + $0x9b0] sm:$0xf0]  ;;  %v17132_v15 = vld [vmem:[#allocation11 + $0x8f4] sm:$0xf0] }
 0x811   :  { %v14854_v54 = vor.u32 %v17149_v2, %v14851_v31  ;;  %v17082_v31 = vld [vmem:[#allocation11 + $0x714] sm:$0xf0]  ;;  %v14397_v60 = vld [vmem:[#allocation11 + $0x550] sm:$0xf]  ;;  %v17067_v1 = vld [vmem:[#allocation11 + $0x684] sm:$0xf0] }
 0x812   :  { %v17127_v10 = vld [vmem:[#allocation11 + $0x8c4] sm:$0xf0]  ;;  %v14377_v53 = vld [vmem:[#allocation11 + $0x520] sm:$0xf] }
 0x814   :  { %8495 = vmatpush.bf16.msra.mxu2 %v14750_v49  ;;  %8523 = vmatpush.bf16.msrb.mxu3 %v14434_v24  ;;  %v14569_v49 = vld [vmem:[#allocation11 + $0x6f8] sm:$0xf]  ;;  %v17081_v24 = vld [vmem:[#allocation11 + $0x70c] sm:$0xf0] }
 0x815   :  { %v14570_v27 = vor.u32 %v17081_v24, %v14569_v49  ;;  %v14814_v49 = vor.u32 %v17139_v9, %v14811_v13  ;;  %v14578_v24 = vor.u32 %v17082_v31, %v14577_v17  ;;  %v14737_v13 = vld [vmem:[#allocation11 + $0x880] sm:$0xf]  ;;  %v17122_v17 = vld [vmem:[#allocation11 + $0x894] sm:$0xf0]  ;;  %v17027_v31 = vld [vmem:[#allocation11 + $0x504] sm:$0xf0] }
 0x816   :  { %14859 = vmatmul.msk.bf16.vlgmr.msrb.gmra.mxu1 %vm999_vm4, %v19405_v45  ;;  %8430 = vmatmul.bf16.vlgmr.msrb.gmra.mxu2 %v19392_v33 }
 0x817   :  { %8444 = vmatmul.bf16.vlgmr.msra.gmra.mxu0 %v19394_v34  ;;  %8472 = vmatmul.bf16.vlgmr.msra.gmra.mxu3 %v19390_v36 }
 0x818   :  { %8478 = vmatpush.bf16.msrb.mxu1 %v14650_v25  ;;  %8496 = vmatpush.bf16.msra.mxu2 %v14730_v20  ;;  %v14497_v25 = vld [vmem:[#allocation11 + $0x640] sm:$0xf]  ;;  %v17062_v20 = vld [vmem:[#allocation11 + $0x654] sm:$0xf0] }
 0x819   :  { %8524 = vmatpush.bf16.msrb.mxu3 %v14414_v8  ;;  %8534 = vmatpush.bf16.msra.mxu0 %v14654_v46  ;;  %v17076_v8 = vld [vmem:[#allocation11 + $0x6dc] sm:$0xf0]  ;;  %v14834_v46 = vor.u32 %v17144_v23, %v14831_v22  ;;  %v14498_v61 = vor.u32 %v17062_v20, %v14497_v25  ;;  %v17077_v22 = vld [vmem:[#allocation11 + $0x6e4] sm:$0xf0]  ;;  %v17042_v25 = vld [vmem:[#allocation11 + $0x594] sm:$0xf0] }
 0x81c   :  { %8479 = vmatpush.bf16.msrb.mxu1 %v14630_v50  ;;  %8497 = vmatpush.bf16.msra.mxu2 %v14710_v42  ;;  %v14550_v50 = vor.u32 %v17076_v8, %v14549_v19  ;;  %v14477_v42 = vld [vmem:[#allocation11 + $0x610] sm:$0xf]  ;;  %v14798_v19 = vor.u32 %v17137_v16, %v14797_v6  ;;  %v17129_v8 = vld [vmem:[#allocation11 + $0x8dc] sm:$0xf]  ;;  %v17000_v6 = vld [vmem:[#allocation11 + $0x404] sm:$0xf0] }
 0x81d   :  { %8525 = vmatpush.bf16.msrb.mxu3 %v14394_v4  ;;  %8535 = vmatpush.bf16.msra.mxu0 %v14634_v0  ;;  %v14529_v4 = vld [vmem:[#allocation11 + $0x698] sm:$0xf]  ;;  %v17071_v0 = vld [vmem:[#allocation11 + $0x6ac] sm:$0xf0]  ;;  %v14478_v57 = vor.u32 %v17057_v62, %v14477_v42  ;;  %v17124_v62 = vld [vmem:[#allocation11 + $0x8ac] sm:$0xf] }
 0x820   :  { %8480 = vmatpush.bf16.msrb.mxu1 %v14610_v14  ;;  %8498 = vmatpush.bf16.msra.mxu2 %v14690_v58  ;;  %v14530_v14 = vor.u32 %v17071_v0, %v14529_v4  ;;  %v14457_v58 = vld [vmem:[#allocation11 + $0x5e0] sm:$0xf]  ;;  %v14751_v0 = vld [vmem:[#allocation11 + $0x8c0] sm:$0xf0] }
 0x821   :  { %8526 = vmatpush.bf16.msrb.mxu3 %v14374_v37  ;;  %8536 = vmatpush.bf16.msra.mxu0 %v14614_v56  ;;  %v17066_v37 = vld [vmem:[#allocation11 + $0x67c] sm:$0xf0]  ;;  %v17064_v56 = vld [vmem:[#allocation11 + $0x66c] sm:$0xf]  ;;  %v14458_v2 = vor.u32 %v17052_v40, %v14457_v58  ;;  %v15326_v58 = vld [vmem:[#allocation11 + $0x450] sm:$0xf] }
 0x822   :  { %v17010_v40 = vld [vmem:[#allocation11 + $0x464] sm:$0xf0] }
 0x823   :  { %v15327_v9 = vor.u32 %v17010_v40, %v15326_v58  ;;  %v15106_v40 = vld [vmem:[#allocation11 + $0x240] sm:$0xf] }
 0x824   :  { %8481 = vmatpush.bf16.msrb.mxu1 %v14590_v43  ;;  %8499 = vmatpush.bf16.msra.mxu2 %v14670_v7  ;;  %v14510_v43 = vor.u32 %v17066_v37, %v14509_v48  ;;  %v14437_v7 = vld [vmem:[#allocation11 + $0x5b0] sm:$0xf]  ;;  %v14754_v48 = vor.u32 %v17124_v62, %v14751_v0  ;;  %v14671_v62 = vld [vmem:[#allocation11 + $0x800] sm:$0xf0] }
 0x825   :  { %8527 = vmatpush.bf16.msrb.mxu3 %v14354_v3  ;;  %8537 = vmatpush.bf16.msra.mxu0 %v14594_v21  ;;  %v17047_v3 = vld [vmem:[#allocation11 + $0x5c4] sm:$0xf0]  ;;  %v14514_v21 = vor.u32 %v17064_v56, %v14511_v26  ;;  %v17119_v56 = vld [vmem:[#allocation11 + $0x87c] sm:$0xf]  ;;  %v14731_v26 = vld [vmem:[#allocation11 + $0x890] sm:$0xf0] }
 0x826   :  { %14860 = vmatmul.msk.bf16.vlgmr.msra.gmra.mxu1 %vm999_vm4, %v19405_v45  ;;  %v14438_v23 = vor.u32 %v17047_v3, %v14437_v7  ;;  %v15166_v7 = vld [vmem:[#allocation11 + $0x2d0] sm:$0xf]  ;;  %v16970_v3 = vld [vmem:[#allocation11 + $0x2e4] sm:$0xf0] }
 0x827   :  { %8500 = vmatmul.bf16.vlgmr.msra.gmra.mxu2 %v19394_v34  ;;  %14861 = vmatmul.msk.bf16.vlgmr.msrb.gmra.mxu0 %vm999_vm4, %v19405_v45 }
 0x828   :  { %8568 = vmatpush.bf16.msrb.mxu2 %v14854_v54  ;;  %8482 = vmatpush.bf16.msrb.mxu1 %v14570_v27  ;;  %v14818_v54 = vor.u32 %v17142_v38, %v14817_v30  ;;  %v14417_v27 = vld [vmem:[#allocation11 + $0x580] sm:$0xf]  ;;  %v17005_v38 = vld [vmem:[#allocation11 + $0x434] sm:$0xf0] }
 0x829   :  { %8590 = vmatpush.bf16.msra.mxu3 %v14658_v59  ;;  %8538 = vmatpush.bf16.msra.mxu0 %v14574_v51  ;;  %v17134_v59 = vld [vmem:[#allocation11 + $0x90c] sm:$0xf]  ;;  %v14558_v51 = vor.u32 %v17077_v22, %v14557_v5  ;;  %v14418_v35 = vor.u32 %v17042_v25, %v14417_v27  ;;  %v15306_v30 = vld [vmem:[#allocation11 + $0x420] sm:$0xf]  ;;  %v17117_v5 = vld [vmem:[#allocation11 + $0x864] sm:$0xf0] }
 0x82a   :  { %8528 = vmatmul.bf16.vlgmr.msrb.gmra.mxu3 %v19390_v36  ;;  %v14794_v20 = vor.u32 %v17134_v59, %v14791_v12  ;;  %v15307_v59 = vor.u32 %v17005_v38, %v15306_v30  ;;  %v14717_v12 = vld [vmem:[#allocation11 + $0x850] sm:$0xf]  ;;  %v15146_v27 = vld [vmem:[#allocation11 + $0x2a0] sm:$0xf]  ;;  %v16965_v25 = vld [vmem:[#allocation11 + $0x2b4] sm:$0xf0] }
 0x82b   :  { %v15286_v22 = vld [vmem:[#allocation11 + $0x3f0] sm:$0xf]  ;;  %v16930_v38 = vld [vmem:[#allocation11 + $0x164] sm:$0xf0] }
 0x82c   :  { %8569 = vmatpush.bf16.msrb.mxu2 %v14834_v46  ;;  %8483 = vmatpush.bf16.msrb.mxu1 %v14550_v50  ;;  %v14771_v46 = vld [vmem:[#allocation11 + $0x8f0] sm:$0xf0]  ;;  %v17037_v50 = vld [vmem:[#allocation11 + $0x564] sm:$0xf0]  ;;  %v15006_v30 = vld [vmem:[#allocation11 + $0x150] sm:$0xf] }
 0x82d   :  { %8591 = vmatpush.bf16.msra.mxu3 %v14638_v11  ;;  %8539 = vmatpush.bf16.msra.mxu0 %v14554_v44  ;;  %v14537_v11 = vld [vmem:[#allocation11 + $0x6a0] sm:$0xf]  ;;  %v14774_v42 = vor.u32 %v17129_v8, %v14771_v46  ;;  %v14398_v32 = vor.u32 %v17037_v50, %v14397_v60  ;;  %v15287_v8 = vor.u32 %v17000_v6, %v15286_v22  ;;  %v16960_v60 = vld [vmem:[#allocation11 + $0x284] sm:$0xf0]  ;;  %v17104_v50 = vld [vmem:[#allocation11 + $0x7ec] sm:$0xf] }
 0x82e   :  { %v14538_v44 = vor.u32 %v17072_v18, %v14537_v11  ;;  %v14697_v46 = vld [vmem:[#allocation11 + $0x820] sm:$0xf]  ;;  %v17112_v11 = vld [vmem:[#allocation11 + $0x834] sm:$0xf0]  ;;  %v14674_v58 = vor.u32 %v17104_v50, %v14671_v62  ;;  %v14968_v50 = vld [vmem:[#allocation11 + $0x108] sm:$0xf0] }
 0x82f   :  { %v15266_v18 = vld [vmem:[#allocation11 + $0x3c0] sm:$0xf]  ;;  %v15368_v62 = vld [vmem:[#allocation11 + $0x4c8] sm:$0xf0] }
 0x830   :  { %8576 = vmatpush.bf16.msra.mxu2 %v14498_v61  ;;  %8484 = vmatpush.bf16.msrb.mxu1 %v14530_v14  ;;  %v14777_v61 = vld [vmem:[#allocation11 + $0x8e0] sm:$0xf]  ;;  %v17032_v14 = vld [vmem:[#allocation11 + $0x534] sm:$0xf0] }
 0x831   :  { %8592 = vmatpush.bf16.msra.mxu3 %v14618_v47  ;;  %8540 = vmatpush.bf16.msra.mxu0 %v14534_v39  ;;  %v14778_v4 = vor.u32 %v17132_v15, %v14777_v61  ;;  %v14517_v47 = vld [vmem:[#allocation11 + $0x670] sm:$0xf]  ;;  %v16995_v61 = vld [vmem:[#allocation11 + $0x3d4] sm:$0xf0]  ;;  %v14986_v22 = vld [vmem:[#allocation11 + $0x120] sm:$0xf] }
 0x832   :  { %v14518_v39 = vor.u32 %v17067_v1, %v14517_v47  ;;  %v15267_v0 = vor.u32 %v16995_v61, %v15266_v18  ;;  %v14857_v47 = vld [vmem:[#allocation11 + $0x9a0] sm:$0xf]  ;;  %v17152_v1 = vld [vmem:[#allocation11 + $0x9b4] sm:$0xf0]  ;;  %v14966_v18 = vld [vmem:[#allocation11 + $0xf0] sm:$0xf] }
 0x833   :  { %v16920_v61 = vld [vmem:[#allocation11 + $0x104] sm:$0xf0] }
 0x834   :  { %8577 = vmatpush.bf16.msra.mxu2 %v14478_v57  ;;  %8485 = vmatpush.bf16.msrb.mxu1 %v14510_v43  ;;  %v14757_v57 = vld [vmem:[#allocation11 + $0x8b0] sm:$0xf]  ;;  %v14734_v43 = vor.u32 %v17119_v56, %v14731_v26 }
 0x835   :  { %8593 = vmatpush.bf16.msra.mxu3 %v14598_v52  ;;  %8541 = vmatpush.bf16.msra.mxu0 %v14514_v21  ;;  %v14758_v37 = vor.u32 %v17127_v10, %v14757_v57  ;;  %v14378_v52 = vor.u32 %v17032_v14, %v14377_v53  ;;  %v14738_v21 = vor.u32 %v17122_v17, %v14737_v13  ;;  %v16990_v10 = vld [vmem:[#allocation11 + $0x3a4] sm:$0xf0]  ;;  %v15366_v53 = vld [vmem:[#allocation11 + $0x4b0] sm:$0xf]  ;;  %v16985_v13 = vld [vmem:[#allocation11 + $0x374] sm:$0xf0] }
 0x836   :  { %v17020_v14 = vld [vmem:[#allocation11 + $0x4c4] sm:$0xf0] }
 0x837   :  { %8486 = vmatmul.bf16.vlgmr.msrb.gmra.mxu1 %v19392_v33  ;;  %14862 = vmatmul.msk.bf16.vlgmr.msrb.gmra.mxu2 %vm999_vm4, %v19405_v45  ;;  %v15367_v26 = vor.u32 %v17020_v14, %v15366_v53  ;;  %v16935_v53 = vld [vmem:[#allocation11 + $0x194] sm:$0xf0]  ;;  %v16913_v14 = vld [vmem:[#allocation11 + $0xc4] sm:$0xf] }
 0x838   :  { %8578 = vmatpush.bf16.msra.mxu2 %v14458_v2  ;;  %8548 = vmatpush.bf16.msra.mxu1 %v14814_v49  ;;  %v14357_v2 = vld [vmem:[#allocation11 + $0x4f0] sm:$0xf]  ;;  %v17114_v49 = vld [vmem:[#allocation11 + $0x84c] sm:$0xf] }
 0x839   :  { %8594 = vmatpush.bf16.msra.mxu3 %v14578_v24  ;;  %8604 = vmatpush.bf16.msrb.mxu0 %v14818_v54  ;;  %v14711_v24 = vld [vmem:[#allocation11 + $0x860] sm:$0xf0]  ;;  %v14358_v54 = vor.u32 %v17027_v31, %v14357_v2  ;;  %v15346_v2 = vld [vmem:[#allocation11 + $0x480] sm:$0xf]  ;;  %v17015_v31 = vld [vmem:[#allocation11 + $0x494] sm:$0xf0] }
 0x83a   :  { %8542 = vmatmul.bf16.vlgmr.msra.gmra.mxu0 %v19392_v33  ;;  %v14714_v16 = vor.u32 %v17114_v49, %v14711_v24  ;;  %v15008_v49 = vld [vmem:[#allocation11 + $0x168] sm:$0xf0] }
 0x83c   :  { %8579 = vmatpush.bf16.msra.mxu2 %v14438_v23  ;;  %8549 = vmatpush.bf16.msra.mxu1 %v14794_v20  ;;  %v15167_v23 = vor.u32 %v16970_v3, %v15166_v7  ;;  %v14718_v20 = vor.u32 %v17117_v5, %v14717_v12  ;;  %v16950_v7 = vld [vmem:[#allocation11 + $0x224] sm:$0xf0]  ;;  %v15206_v5 = vld [vmem:[#allocation11 + $0x330] sm:$0xf] }
 0x83d   :  { %8595 = vmatpush.bf16.msra.mxu3 %v14558_v51  ;;  %8605 = vmatpush.bf16.msrb.mxu0 %v14798_v19  ;;  %v17109_v51 = vld [vmem:[#allocation11 + $0x81c] sm:$0xf]  ;;  %v14691_v19 = vld [vmem:[#allocation11 + $0x830] sm:$0xf0] }
 0x83e   :  { %v14694_v15 = vor.u32 %v17109_v51, %v14691_v19  ;;  %v14988_v51 = vld [vmem:[#allocation11 + $0x138] sm:$0xf0] }
 0x840   :  { %8580 = vmatpush.bf16.msra.mxu2 %v14418_v35  ;;  %8550 = vmatpush.bf16.msra.mxu1 %v14774_v42  ;;  %v15147_v35 = vor.u32 %v16965_v25, %v15146_v27  ;;  %v14698_v42 = vor.u32 %v17112_v11, %v14697_v46  ;;  %v15066_v27 = vld [vmem:[#allocation11 + $0x1e0] sm:$0xf]  ;;  %v16945_v25 = vld [vmem:[#allocation11 + $0x1f4] sm:$0xf0] }
 0x841   :  { %8596 = vmatpush.bf16.msra.mxu3 %v14538_v44  ;;  %8606 = vmatpush.bf16.msrb.mxu0 %v14778_v4  ;;  %v14677_v44 = vld [vmem:[#allocation11 + $0x7f0] sm:$0xf]  ;;  %v17107_v4 = vld [vmem:[#allocation11 + $0x804] sm:$0xf0]  ;;  %v15067_v11 = vor.u32 %v16945_v25, %v15066_v27  ;;  %v15288_v25 = vld [vmem:[#allocation11 + $0x408] sm:$0xf0] }
 0x844   :  { %8581 = vmatpush.bf16.msra.mxu2 %v14398_v32  ;;  %8551 = vmatpush.bf16.msra.mxu1 %v14754_v48  ;;  %v15246_v32 = vld [vmem:[#allocation11 + $0x390] sm:$0xf]  ;;  %v16955_v48 = vld [vmem:[#allocation11 + $0x254] sm:$0xf0] }
 0x845   :  { %8597 = vmatpush.bf16.msra.mxu3 %v14518_v39  ;;  %8607 = vmatpush.bf16.msrb.mxu0 %v14758_v37  ;;  %v14858_v39 = vor.u32 %v17152_v1, %v14857_v47  ;;  %v14837_v37 = vld [vmem:[#allocation11 + $0x970] sm:$0xf]  ;;  %v15247_v56 = vor.u32 %v16990_v10, %v15246_v32  ;;  %v15107_v17 = vor.u32 %v16955_v48, %v15106_v40  ;;  %v14946_v47 = vld [vmem:[#allocation11 + $0xc0] sm:$0xf]  ;;  %v16915_v1 = vld [vmem:[#allocation11 + $0xd4] sm:$0xf0] }
 0x846   :  { %v15026_v10 = vld [vmem:[#allocation11 + $0x180] sm:$0xf]  ;;  %v17013_v40 = vld [vmem:[#allocation11 + $0x484] sm:$0xf]  ;;  %v15348_v48 = vld [vmem:[#allocation11 + $0x498] sm:$0xf0] }
 0x848   :  { %8582 = vmatpush.bf16.msra.mxu2 %v14378_v52  ;;  %8598 = vmatmul.bf16.vlgmr.msra.gmra.mxu3 %v19392_v33  ;;  %v15126_v33 = vld [vmem:[#allocation11 + $0x270] sm:$0xf]  ;;  %v17147_v52 = vld [vmem:[#allocation11 + $0x984] sm:$0xf0] }
 0x849   :  { %9341 = vmatpush.bf16.msrb.mxu3 %v15327_v9  ;;  %8552 = vmatpush.bf16.msra.mxu1 %v14734_v43  ;;  %v15127_v57 = vor.u32 %v16960_v60, %v15126_v33  ;;  %v15226_v9 = vld [vmem:[#allocation11 + $0x360] sm:$0xf]  ;;  %v15086_v43 = vld [vmem:[#allocation11 + $0x210] sm:$0xf]  ;;  %v14838_v3 = vor.u32 %v17147_v52, %v14837_v37  ;;  %v16940_v33 = vld [vmem:[#allocation11 + $0x1c4] sm:$0xf0]  ;;  %v15027_v37 = vor.u32 %v16935_v53, %v15026_v10 }
 0x84a   :  { %8608 = vmatpush.bf16.msrb.mxu0 %v14738_v21  ;;  %v16928_v21 = vld [vmem:[#allocation11 + $0x154] sm:$0xf]  ;;  %v15227_v24 = vor.u32 %v16985_v13, %v15226_v9  ;;  %v15087_v12 = vor.u32 %v16950_v7, %v15086_v43  ;;  %v16931_v52 = vld [vmem:[#allocation11 + $0x16c] sm:$0xf0]  ;;  %v15351_v13 = vor.u32 %v17013_v40, %v15348_v48  ;;  %v17003_v7 = vld [vmem:[#allocation11 + $0x424] sm:$0xf] }
 0x84b   :  { %v15011_v6 = vor.u32 %v16928_v21, %v15008_v49  ;;  %v16918_v60 = vld [vmem:[#allocation11 + $0xf4] sm:$0xf]  ;;  %v15308_v21 = vld [vmem:[#allocation11 + $0x438] sm:$0xf0]  ;;  %v14994_v49 = vld [vmem:[#allocation11 + $0x128] sm:$0xf] }
 0x84c   :  { %8583 = vmatpush.bf16.msra.mxu2 %v14358_v54  ;;  %v15347_v54 = vor.u32 %v17015_v31, %v15346_v2  ;;  %v14971_v32 = vor.u32 %v16918_v60, %v14968_v50  ;;  %v16910_v2 = vld [vmem:[#allocation11 + $0xa4] sm:$0xf0]  ;;  %v16908_v31 = vld [vmem:[#allocation11 + $0x94] sm:$0xf]  ;;  %v16916_v60 = vld [vmem:[#allocation11 + $0xdc] sm:$0xf0] }
 0x84d   :  { %9342 = vmatpush.bf16.msrb.mxu3 %v15307_v59  ;;  %8553 = vmatpush.bf16.msra.mxu1 %v14714_v16  ;;  %v15007_v59 = vor.u32 %v16930_v38, %v15006_v30  ;;  %v16925_v16 = vld [vmem:[#allocation11 + $0x134] sm:$0xf0]  ;;  %v14928_v30 = vld [vmem:[#allocation11 + $0xa8] sm:$0xf0]  ;;  %v16971_v53 = vld [vmem:[#allocation11 + $0x2ec] sm:$0xf0] }
 0x84e   :  { %8609 = vmatpush.bf16.msrb.mxu0 %v14718_v20  ;;  %v16923_v20 = vld [vmem:[#allocation11 + $0x124] sm:$0xf]  ;;  %v14987_v46 = vor.u32 %v16925_v16, %v14986_v22  ;;  %v15311_v22 = vor.u32 %v17003_v7, %v15308_v21  ;;  %v16998_v16 = vld [vmem:[#allocation11 + $0x3f4] sm:$0xf]  ;;  %v15174_v10 = vld [vmem:[#allocation11 + $0x2d8] sm:$0xf] }
 0x84f   :  { %8584 = vmatmul.bf16.vlgmr.msra.gmra.mxu2 %v19390_v36  ;;  %v14678_v36 = vor.u32 %v17107_v4, %v14677_v44  ;;  %v14967_v4 = vor.u32 %v16920_v61, %v14966_v18  ;;  %v16993_v61 = vld [vmem:[#allocation11 + $0x3c4] sm:$0xf]  ;;  %v14934_v40 = vld [vmem:[#allocation11 + $0x98] sm:$0xf]  ;;  %v16911_v48 = vld [vmem:[#allocation11 + $0xac] sm:$0xf0] }
 0x850   :  { %9327 = vmatpush.bf16.msrb.mxu2 %v15167_v23  ;;  %v16980_v23 = vld [vmem:[#allocation11 + $0x344] sm:$0xf0]  ;;  %v15128_v21 = vld [vmem:[#allocation11 + $0x288] sm:$0xf0] }
 0x851   :  { %9343 = vmatpush.bf16.msrb.mxu3 %v15287_v8  ;;  %8554 = vmatpush.bf16.msra.mxu1 %v14694_v15  ;;  %v15207_v19 = vor.u32 %v16980_v23, %v15206_v5  ;;  %v15186_v8 = vld [vmem:[#allocation11 + $0x300] sm:$0xf]  ;;  %v15046_v15 = vld [vmem:[#allocation11 + $0x1b0] sm:$0xf]  ;;  %v16903_v5 = vld [vmem:[#allocation11 + $0x64] sm:$0xf] }
 0x852   :  { %8610 = vmatpush.bf16.msrb.mxu0 %v14698_v42  ;;  %v17018_v42 = vld [vmem:[#allocation11 + $0x4b4] sm:$0xf]  ;;  %v14908_v23 = vld [vmem:[#allocation11 + $0x78] sm:$0xf0] }
 0x854   :  { %9328 = vmatpush.bf16.msrb.mxu2 %v15147_v35  ;;  %v16975_v35 = vld [vmem:[#allocation11 + $0x314] sm:$0xf0] }
 0x855   :  { %9344 = vmatpush.bf16.msrb.mxu3 %v15267_v0  ;;  %8555 = vmatpush.bf16.msra.mxu1 %v14674_v58  ;;  %v15187_v44 = vor.u32 %v16975_v35, %v15186_v8  ;;  %v15047_v0 = vor.u32 %v16940_v33, %v15046_v15  ;;  %v14948_v58 = vld [vmem:[#allocation11 + $0xd8] sm:$0xf0]  ;;  %v16900_v8 = vld [vmem:[#allocation11 + $0x44] sm:$0xf0]  ;;  %v15291_v35 = vor.u32 %v16998_v16, %v15288_v25 }
 0x856   :  { %8611 = vmatpush.bf16.msrb.mxu0 %v14678_v36  ;;  %v17008_v36 = vld [vmem:[#allocation11 + $0x454] sm:$0xf]  ;;  %v14951_v9 = vor.u32 %v16913_v14, %v14948_v58  ;;  %v15268_v15 = vld [vmem:[#allocation11 + $0x3d8] sm:$0xf0]  ;;  %v14954_v33 = vld [vmem:[#allocation11 + $0xc8] sm:$0xf] }
 0x857   :  { %v15248_v58 = vld [vmem:[#allocation11 + $0x3a8] sm:$0xf0]  ;;  %v15108_v25 = vld [vmem:[#allocation11 + $0x258] sm:$0xf0] }
 0x858   :  { %9329 = vmatpush.bf16.msrb.mxu2 %v15127_v57  ;;  %8556 = vmatmul.bf16.vlgmr.msra.gmra.mxu1 %v19394_v34  ;;  %v15371_v57 = vor.u32 %v17018_v42, %v15368_v62  ;;  %v14866_v42 = vld [vmem:[#allocation11] sm:$0xf]  ;;  %v16895_v62 = vld [vmem:[#allocation11 + $0x14] sm:$0xf0] }
 0x859   :  { %8624 = vmatpush.bf16.msrb.mxu1 %v14858_v39  ;;  %9345 = vmatpush.bf16.msrb.mxu3 %v15247_v56  ;;  %v14947_v39 = vor.u32 %v16915_v1, %v14946_v47  ;;  %v15328_v56 = vld [vmem:[#allocation11 + $0x468] sm:$0xf0]  ;;  %v15271_v1 = vor.u32 %v16993_v61, %v15268_v15  ;;  %v14867_v14 = vor.u32 %v16895_v62, %v14866_v42  ;;  %v16969_v15 = vld [vmem:[#allocation11 + $0x2dc] sm:$0xf] }
 0x85a   :  { %9361 = vmatpush.bf16.msra.mxu0 %v15367_v26  ;;  %v15014_v26 = vld [vmem:[#allocation11 + $0x158] sm:$0xf]  ;;  %v15331_v38 = vor.u32 %v17008_v36, %v15328_v56  ;;  %v15168_v47 = vld [vmem:[#allocation11 + $0x2e8] sm:$0xf0]  ;;  %v16963_v56 = vld [vmem:[#allocation11 + $0x2a4] sm:$0xf] }
 0x85b   :  { %8612 = vmatmul.bf16.vlgmr.msrb.gmra.mxu0 %v19394_v34  ;;  %v14991_v34 = vor.u32 %v16923_v20, %v14988_v51  ;;  %v15015_v43 = vor.u32 %v16931_v52, %v15014_v26  ;;  %v14974_v20 = vld [vmem:[#allocation11 + $0xf8] sm:$0xf]  ;;  %v16921_v51 = vld [vmem:[#allocation11 + $0x10c] sm:$0xf0]  ;;  %v15148_v26 = vld [vmem:[#allocation11 + $0x2b8] sm:$0xf0] }
 0x85c   :  { %9330 = vmatpush.bf16.msrb.mxu2 %v15107_v17  ;;  %v14926_v17 = vld [vmem:[#allocation11 + $0x90] sm:$0xf]  ;;  %v14975_v18 = vor.u32 %v16921_v51, %v14974_v20  ;;  %v16973_v20 = vld [vmem:[#allocation11 + $0x304] sm:$0xf]  ;;  %v15088_v42 = vld [vmem:[#allocation11 + $0x228] sm:$0xf0] }
 0x85d   :  { %8625 = vmatpush.bf16.msrb.mxu1 %v14838_v3  ;;  %9346 = vmatpush.bf16.msrb.mxu3 %v15227_v24  ;;  %v14927_v3 = vor.u32 %v16910_v2, %v14926_v17  ;;  %v16926_v24 = vld [vmem:[#allocation11 + $0x13c] sm:$0xf0]  ;;  %v15154_v17 = vld [vmem:[#allocation11 + $0x2a8] sm:$0xf] }
 0x85e   :  { %9362 = vmatpush.bf16.msra.mxu0 %v15347_v54  ;;  %v14931_v54 = vor.u32 %v16908_v31, %v14928_v30  ;;  %v16966_v2 = vld [vmem:[#allocation11 + $0x2bc] sm:$0xf0]  ;;  %v15228_v31 = vld [vmem:[#allocation11 + $0x378] sm:$0xf0]  ;;  %v14914_v30 = vld [vmem:[#allocation11 + $0x68] sm:$0xf] }
 0x85f   :  { %v15155_v7 = vor.u32 %v16966_v2, %v15154_v17 }
 0x860   :  { %9331 = vmatpush.bf16.msrb.mxu2 %v15087_v12  ;;  %v16905_v12 = vld [vmem:[#allocation11 + $0x74] sm:$0xf0] }
 0x861   :  { %9313 = vmatpush.bf16.msra.mxu1 %v15007_v59  ;;  %9347 = vmatpush.bf16.msrb.mxu3 %v15207_v19  ;;  %v14906_v59 = vld [vmem:[#allocation11 + $0x60] sm:$0xf]  ;;  %v14911_v19 = vor.u32 %v16903_v5, %v14908_v23  ;;  %v15208_v5 = vld [vmem:[#allocation11 + $0x348] sm:$0xf0]  ;;  %v14894_v23 = vld [vmem:[#allocation11 + $0x38] sm:$0xf] }
 0x862   :  { %9369 = vmatpush.bf16.msrb.mxu0 %v15011_v6  ;;  %v14995_v6 = vor.u32 %v16926_v24, %v14994_v49  ;;  %v14907_v27 = vor.u32 %v16905_v12, %v14906_v59  ;;  %v15134_v59 = vld [vmem:[#allocation11 + $0x278] sm:$0xf]  ;;  %v16961_v12 = vld [vmem:[#allocation11 + $0x28c] sm:$0xf0] }
 0x863   :  { %v15135_v16 = vor.u32 %v16961_v12, %v15134_v59 }
 0x864   :  { %9332 = vmatpush.bf16.msrb.mxu2 %v15067_v11  ;;  %v14888_v11 = vld [vmem:[#allocation11 + $0x48] sm:$0xf0] }
 0x865   :  { %9314 = vmatpush.bf16.msra.mxu1 %v14987_v46  ;;  %9348 = vmatpush.bf16.msrb.mxu3 %v15187_v44  ;;  %v16898_v46 = vld [vmem:[#allocation11 + $0x34] sm:$0xf]  ;;  %v16893_v44 = vld [vmem:[#allocation11 + $0x4] sm:$0xf] }
 0x866   :  { %9370 = vmatpush.bf16.msrb.mxu0 %v14991_v34  ;;  %v14891_v50 = vor.u32 %v16898_v46, %v14888_v11  ;;  %v16956_v46 = vld [vmem:[#allocation11 + $0x25c] sm:$0xf0]  ;;  %v14874_v11 = vld [vmem:[#allocation11 + $0x8] sm:$0xf] }
 0x868   :  { %9333 = vmatpush.bf16.msrb.mxu2 %v15047_v0  ;;  %9349 = vmatmul.bf16.vlgmr.msrb.gmra.mxu3 %v19382_v55  ;;  %v16968_v0 = vld [vmem:[#allocation11 + $0x2d4] sm:$0xf] }
 0x869   :  { %9315 = vmatpush.bf16.msra.mxu1 %v14967_v4  ;;  %9417 = vmatpush.bf16.msra.mxu3 %v15371_v57  ;;  %v14868_v4 = vld [vmem:[#allocation11 + $0x18] sm:$0xf0]  ;;  %v16988_v57 = vld [vmem:[#allocation11 + $0x394] sm:$0xf] }
 0x86a   :  { %9371 = vmatpush.bf16.msrb.mxu0 %v14971_v32  ;;  %14863 = vmatmul.msk.bf16.vlgmr.msrb.gmra.mxu1 %vm999_vm4, %v19405_v45  ;;  %v14886_v45 = vld [vmem:[#allocation11 + $0x30] sm:$0xf]  ;;  %v14955_v32 = vor.u32 %v16916_v60, %v14954_v33  ;;  %v14871_v36 = vor.u32 %v16893_v44, %v14868_v4  ;;  %v15251_v52 = vor.u32 %v16988_v57, %v15248_v58  ;;  %v15176_v33 = vld [vmem:[#allocation11 + $0x2f0] sm:$0xf0]  ;;  %v15094_v4 = vld [vmem:[#allocation11 + $0x218] sm:$0xf] }
 0x86b   :  { %15384 = vmatmul.msk.bf16.vlgmr.msra.gmra.mxu0 %vm999_vm4, %v19401_v28  ;;  %v14887_v34 = vor.u32 %v16900_v8, %v14886_v45  ;;  %v15188_v45 = vld [vmem:[#allocation11 + $0x318] sm:$0xf0]  ;;  %v15114_v8 = vld [vmem:[#allocation11 + $0x248] sm:$0xf]  ;;  %v17016_v57 = vld [vmem:[#allocation11 + $0x49c] sm:$0xf0] }
 0x86c   :  { %9334 = vmatpush.bf16.msrb.mxu2 %v15027_v37  ;;  %v15175_v37 = vor.u32 %v16971_v53, %v15174_v10  ;;  %v15115_v60 = vor.u32 %v16956_v46, %v15114_v8  ;;  %v15191_v62 = vor.u32 %v16973_v20, %v15188_v45  ;;  %v16964_v53 = vld [vmem:[#allocation11 + $0x2ac] sm:$0xf]  ;;  %v16929_v58 = vld [vmem:[#allocation11 + $0x15c] sm:$0xf]  ;;  %v15334_v45 = vld [vmem:[#allocation11 + $0x458] sm:$0xf] }
 0x86d   :  { %9316 = vmatpush.bf16.msra.mxu1 %v14947_v39  ;;  %9418 = vmatpush.bf16.msra.mxu3 %v15351_v13  ;;  %v15171_v39 = vor.u32 %v16968_v0, %v15168_v47  ;;  %v16983_v13 = vld [vmem:[#allocation11 + $0x364] sm:$0xf]  ;;  %v15179_v47 = vor.u32 %v16969_v15, %v15176_v33  ;;  %v15028_v20 = vld [vmem:[#allocation11 + $0x198] sm:$0xf0]  ;;  %v17011_v8 = vld [vmem:[#allocation11 + $0x46c] sm:$0xf0] }
 0x86e   :  { %9372 = vmatpush.bf16.msrb.mxu0 %v14951_v9  ;;  %v14935_v9 = vor.u32 %v16911_v48, %v14934_v40  ;;  %v15231_v49 = vor.u32 %v16983_v13, %v15228_v31  ;;  %v15016_v40 = vld [vmem:[#allocation11 + $0x170] sm:$0xf0]  ;;  %v16943_v48 = vld [vmem:[#allocation11 + $0x1e4] sm:$0xf]  ;;  %v16946_v13 = vld [vmem:[#allocation11 + $0x1fc] sm:$0xf0] }
 0x86f   :  { %9335 = vmatmul.bf16.vlgmr.msrb.gmra.mxu2 %v19380_v63  ;;  %v15019_v17 = vor.u32 %v16929_v58, %v15016_v40  ;;  %v16959_v31 = vld [vmem:[#allocation11 + $0x27c] sm:$0xf]  ;;  %v15076_v40 = vld [vmem:[#allocation11 + $0x200] sm:$0xf0] }
 0x870   :  { %9397 = vmatpush.bf16.msra.mxu2 %v15331_v38  ;;  %v16906_v38 = vld [vmem:[#allocation11 + $0x7c] sm:$0xf0] }
 0x871   :  { %9425 = vmatpush.bf16.msrb.mxu3 %v15015_v43  ;;  %9317 = vmatpush.bf16.msra.mxu1 %v14927_v3  ;;  %v15151_v43 = vor.u32 %v16963_v56, %v15148_v26  ;;  %v16958_v3 = vld [vmem:[#allocation11 + $0x274] sm:$0xf]  ;;  %v14915_v24 = vor.u32 %v16906_v38, %v14914_v30  ;;  %v16924_v38 = vld [vmem:[#allocation11 + $0x12c] sm:$0xf] }
 0x872   :  { %9373 = vmatpush.bf16.msrb.mxu0 %v14931_v54  ;;  %v16978_v54 = vld [vmem:[#allocation11 + $0x334] sm:$0xf] }
 0x873   :  { %v15211_v51 = vor.u32 %v16978_v54, %v15208_v5  ;;  %v15136_v30 = vld [vmem:[#allocation11 + $0x290] sm:$0xf0]  ;;  %v16941_v54 = vld [vmem:[#allocation11 + $0x1cc] sm:$0xf0] }
 0x874   :  { %9398 = vmatpush.bf16.msra.mxu2 %v15311_v22  ;;  %v16901_v22 = vld [vmem:[#allocation11 + $0x4c] sm:$0xf0] }
 0x875   :  { %9426 = vmatpush.bf16.msrb.mxu3 %v14995_v6  ;;  %9318 = vmatpush.bf16.msra.mxu1 %v14907_v27  ;;  %v15131_v6 = vor.u32 %v16958_v3, %v15128_v21  ;;  %v16953_v27 = vld [vmem:[#allocation11 + $0x244] sm:$0xf]  ;;  %v15048_v3 = vld [vmem:[#allocation11 + $0x1c8] sm:$0xf0] }
 0x876   :  { %9374 = vmatpush.bf16.msrb.mxu0 %v14911_v19  ;;  %v14895_v19 = vor.u32 %v16901_v22, %v14894_v23  ;;  %v15111_v61 = vor.u32 %v16953_v27, %v15108_v25  ;;  %v16954_v23 = vld [vmem:[#allocation11 + $0x24c] sm:$0xf]  ;;  %v15116_v22 = vld [vmem:[#allocation11 + $0x260] sm:$0xf0]  ;;  %v14976_v27 = vld [vmem:[#allocation11 + $0x110] sm:$0xf0] }
 0x877   :  { %v16933_v25 = vld [vmem:[#allocation11 + $0x184] sm:$0xf] }
 0x878   :  { %9399 = vmatpush.bf16.msra.mxu2 %v15291_v35  ;;  %15385 = vmatmul.msk.bf16.vlgmr.msra.gmra.mxu3 %vm999_vm4, %v19401_v28  ;;  %v16896_v35 = vld [vmem:[#allocation11 + $0x1c] sm:$0xf0] }
 0x879   :  { %9427 = vmatpush.bf16.msrb.mxu3 %v14975_v18  ;;  %9319 = vmatpush.bf16.msra.mxu1 %v14887_v34  ;;  %v15374_v18 = vld [vmem:[#allocation11 + $0x4b8] sm:$0xf]  ;;  %v17021_v34 = vld [vmem:[#allocation11 + $0x4cc] sm:$0xf0]  ;;  %v14875_v44 = vor.u32 %v16896_v35, %v14874_v11  ;;  %v15119_v11 = vor.u32 %v16954_v23, %v15116_v22  ;;  %v15034_v35 = vld [vmem:[#allocation11 + $0x188] sm:$0xf] }
 0x87a   :  { %9375 = vmatpush.bf16.msrb.mxu0 %v14891_v50  ;;  %v16948_v50 = vld [vmem:[#allocation11 + $0x214] sm:$0xf]  ;;  %v15375_v0 = vor.u32 %v17021_v34, %v15374_v18  ;;  %v16936_v18 = vld [vmem:[#allocation11 + $0x19c] sm:$0xf0]  ;;  %v16934_v22 = vld [vmem:[#allocation11 + $0x18c] sm:$0xf] }
 0x87b   :  { %v15091_v10 = vor.u32 %v16948_v50, %v15088_v42  ;;  %v15096_v50 = vld [vmem:[#allocation11 + $0x230] sm:$0xf0]  ;;  %v17009_v42 = vld [vmem:[#allocation11 + $0x45c] sm:$0xf]  ;;  %v16996_v23 = vld [vmem:[#allocation11 + $0x3dc] sm:$0xf0] }
 0x87c   :  { %9400 = vmatpush.bf16.msra.mxu2 %v15271_v1  ;;  %v16951_v1 = vld [vmem:[#allocation11 + $0x22c] sm:$0xf0] }
 0x87d   :  { %9428 = vmatpush.bf16.msrb.mxu3 %v14955_v32  ;;  %9320 = vmatpush.bf16.msra.mxu1 %v14867_v14  ;;  %v15354_v32 = vld [vmem:[#allocation11 + $0x488] sm:$0xf]  ;;  %v15156_v14 = vld [vmem:[#allocation11 + $0x2c0] sm:$0xf0] }
 0x87e   :  { %9376 = vmatpush.bf16.msrb.mxu0 %v14871_v36  ;;  %v15068_v36 = vld [vmem:[#allocation11 + $0x1f8] sm:$0xf0]  ;;  %v15355_v26 = vor.u32 %v17016_v57, %v15354_v32  ;;  %v15314_v57 = vld [vmem:[#allocation11 + $0x428] sm:$0xf] }
 0x87f   :  { %v15071_v2 = vor.u32 %v16943_v48, %v15068_v36  ;;  %v17004_v48 = vld [vmem:[#allocation11 + $0x42c] sm:$0xf]  ;;  %v15316_v36 = vld [vmem:[#allocation11 + $0x440] sm:$0xf0] }
 0x880   :  { %9401 = vmatpush.bf16.msra.mxu2 %v15251_v52  ;;  %9321 = vmatmul.bf16.vlgmr.msra.gmra.mxu1 %v19378_v41  ;;  %v15159_v52 = vor.u32 %v16964_v53, %v15156_v14  ;;  %v16944_v53 = vld [vmem:[#allocation11 + $0x1ec] sm:$0xf] }
 0x881   :  { %9383 = vmatpush.bf16.msrb.mxu1 %v15171_v39  ;;  %9429 = vmatpush.bf16.msrb.mxu3 %v14935_v9  ;;  %v15095_v39 = vor.u32 %v16951_v1, %v15094_v4  ;;  %v15074_v9 = vld [vmem:[#allocation11 + $0x1e8] sm:$0xf]  ;;  %v16914_v4 = vld [vmem:[#allocation11 + $0xcc] sm:$0xf] }
 0x882   :  { %9439 = vmatpush.bf16.msra.mxu0 %v15175_v37  ;;  %v15075_v21 = vor.u32 %v16946_v13, %v15074_v9  ;;  %v15079_v13 = vor.u32 %v16944_v53, %v15076_v40  ;;  %v15182_v53 = vld [vmem:[#allocation11 + $0x2e0] sm:$0xf] }
 0x883   :  { %9377 = vmatmul.bf16.vlgmr.msrb.gmra.mxu0 %v19378_v41  ;;  %v8361_v37 = vpop.f32.mrf.mxu1 }
 0x884   :  { %9402 = vmatpush.bf16.msra.mxu2 %v15231_v49  ;;  %v8389_v56 = vpop.f32.mrf.mxu0  ;;  %v15139_v49 = vor.u32 %v16959_v31, %v15136_v30  ;;  %v17001_v31 = vld [vmem:[#allocation11 + $0x40c] sm:$0xf0]  ;;  %v16939_v30 = vld [vmem:[#allocation11 + $0x1bc] sm:$0xf] }
 0x885   :  { %9384 = vmatpush.bf16.msrb.mxu1 %v15151_v43  ;;  %9430 = vmatpush.bf16.msrb.mxu3 %v14915_v24  ;;  %v14996_v43 = vld [vmem:[#allocation11 + $0x140] sm:$0xf0]  ;;  %v15054_v24 = vld [vmem:[#allocation11 + $0x1b8] sm:$0xf] }
 0x886   :  { %9440 = vmatpush.bf16.msra.mxu0 %v15155_v7  ;;  %v16938_v7 = vld [vmem:[#allocation11 + $0x1b4] sm:$0xf]  ;;  %v14999_v59 = vor.u32 %v16924_v38, %v14996_v43 }
 0x887   :  { %v15051_v5 = vor.u32 %v16938_v7, %v15048_v3  ;;  %v15056_v43 = vld [vmem:[#allocation11 + $0x1d0] sm:$0xf0]  ;;  %v16999_v7 = vld [vmem:[#allocation11 + $0x3fc] sm:$0xf] }
 0x888   :  { %9403 = vmatpush.bf16.msra.mxu2 %v15211_v51  ;;  %v15055_v51 = vor.u32 %v16941_v54, %v15054_v24  ;;  %v15296_v3 = vld [vmem:[#allocation11 + $0x410] sm:$0xf0] }
 0x889   :  { %9385 = vmatpush.bf16.msrb.mxu1 %v15131_v6  ;;  %9431 = vmatpush.bf16.msrb.mxu3 %v14895_v19  ;;  %v8375_v12 = vpop.f32.mrf.mxu2  ;;  %v16919_v6 = vld [vmem:[#allocation11 + $0xfc] sm:$0xf] }
 0x88a   :  { %9441 = vmatpush.bf16.msra.mxu0 %v15135_v16  ;;  %v8376_v16 = vadd.f32 %v8375_v12, %v8361_v37  ;;  %v19442_v15 = vpop.f32.mrf.mxu3  ;;  %v14979_v33 = vor.u32 %v16919_v6, %v14976_v27  ;;  %v14936_v37 = vld [vmem:[#allocation11 + $0xb0] sm:$0xf0]  ;;  %v15059_v12 = vor.u32 %v16939_v30, %v15056_v43  ;;  %v15036_v6 = vld [vmem:[#allocation11 + $0x1a0] sm:$0xf0]  ;;  %v16967_v43 = vld [vmem:[#allocation11 + $0x2c4] sm:$0xf0] }
 0x88b   :  { %v19438_v19 = vpop.f32.mrf.mxu1 }
 0x88c   :  { %9404 = vmatpush.bf16.msra.mxu2 %v15191_v62  ;;  %v19440_v46 = vpop.f32.mrf.mxu0  ;;  %v8390_v34 = vadd.f32 %v8389_v56, %v8376_v16  ;;  %v15336_v62 = vld [vmem:[#allocation11 + $0x470] sm:$0xf0] }
 0x88d   :  { %9386 = vmatpush.bf16.msrb.mxu1 %v15111_v61  ;;  %9432 = vmatpush.bf16.msrb.mxu3 %v14875_v44  ;;  %v16949_v61 = vld [vmem:[#allocation11 + $0x21c] sm:$0xf]  ;;  %v15335_v44 = vor.u32 %v17011_v8, %v15334_v45  ;;  %v15339_v32 = vor.u32 %v17009_v42, %v15336_v62  ;;  %v14896_v8 = vld [vmem:[#allocation11 + $0x50] sm:$0xf0]  ;;  %v16991_v42 = vld [vmem:[#allocation11 + $0x3ac] sm:$0xf0] }
 0x88e   :  { %9442 = vmatpush.bf16.msra.mxu0 %v15115_v60  ;;  %v15031_v60 = vor.u32 %v16933_v25, %v15028_v20  ;;  %v15099_v1 = vor.u32 %v16949_v61, %v15096_v50  ;;  %v16994_v25 = vld [vmem:[#allocation11 + $0x3cc] sm:$0xf]  ;;  %v15276_v20 = vld [vmem:[#allocation11 + $0x3e0] sm:$0xf0]  ;;  %v15254_v50 = vld [vmem:[#allocation11 + $0x398] sm:$0xf] }
 0x88f   :  { %9405 = vmatmul.bf16.vlgmr.msra.gmra.mxu2 %v19382_v55 }
 0x890   :  { %9473 = vmatpush.bf16.msrb.mxu2 %v15375_v0  ;;  %9433 = vmatmul.bf16.vlgmr.msrb.gmra.mxu3 %v19378_v41  ;;  %v14956_v0 = vld [vmem:[#allocation11 + $0xe0] sm:$0xf0] }
 0x891   :  { %9495 = vmatpush.bf16.msra.mxu3 %v15179_v47  ;;  %9387 = vmatpush.bf16.msrb.mxu1 %v15091_v10  ;;  %v15035_v47 = vor.u32 %v16936_v18, %v15034_v35  ;;  %v17006_v10 = vld [vmem:[#allocation11 + $0x43c] sm:$0xf0]  ;;  %v14959_v14 = vor.u32 %v16914_v4, %v14956_v0  ;;  %v19444_v58 = vpop.f32.mrf.mxu2  ;;  %v17012_v35 = vld [vmem:[#allocation11 + $0x474] sm:$0xf0]  ;;  %v15256_v0 = vld [vmem:[#allocation11 + $0x3b0] sm:$0xf0] }
 0x892   :  { %9443 = vmatpush.bf16.msra.mxu0 %v15095_v39  ;;  %v16909_v39 = vld [vmem:[#allocation11 + $0x9c] sm:$0xf]  ;;  %v19452_v24 = vpop.f32.mrf.mxu3 }
 0x893   :  { %v8403_v56 = vpop.f32.mrf.mxu1  ;;  %v14939_v38 = vor.u32 %v16909_v39, %v14936_v37 }
 0x894   :  { %9474 = vmatpush.bf16.msrb.mxu2 %v15355_v26  ;;  %v15315_v26 = vor.u32 %v17006_v10, %v15314_v57  ;;  %v8445_v9 = vpop.f32.mrf.mxu0  ;;  %v17007_v57 = vld [vmem:[#allocation11 + $0x444] sm:$0xf0]  ;;  %v15255_v10 = vor.u32 %v16991_v42, %v15254_v50  ;;  %v15262_v50 = vld [vmem:[#allocation11 + $0x3a0] sm:$0xf] }
 0x895   :  { %9496 = vmatpush.bf16.msra.mxu3 %v15159_v52  ;;  %9388 = vmatpush.bf16.msrb.mxu1 %v15071_v2  ;;  %v19446_v52 = vadd.f32 %v8403_v56, %v8390_v34  ;;  %v15294_v2 = vld [vmem:[#allocation11 + $0x3f8] sm:$0xf] }
 0x896   :  { %9444 = vmatpush.bf16.msra.mxu0 %v15075_v21  ;;  %v16904_v21 = vld [vmem:[#allocation11 + $0x6c] sm:$0xf]  ;;  %v15295_v54 = vor.u32 %v17001_v31, %v15294_v2  ;;  %v15302_v2 = vld [vmem:[#allocation11 + $0x400] sm:$0xf]  ;;  %v17002_v31 = vld [vmem:[#allocation11 + $0x414] sm:$0xf0] }
 0x898   :  { %9481 = vmatpush.bf16.msra.mxu2 %v15019_v17  ;;  %v15319_v17 = vor.u32 %v17004_v48, %v15316_v36  ;;  %v15234_v48 = vld [vmem:[#allocation11 + $0x368] sm:$0xf]  ;;  %v16986_v36 = vld [vmem:[#allocation11 + $0x37c] sm:$0xf0] }
 0x899   :  { %9497 = vmatpush.bf16.msra.mxu3 %v15139_v49  ;;  %9389 = vmatpush.bf16.msrb.mxu1 %v15051_v5  ;;  %v14916_v49 = vld [vmem:[#allocation11 + $0x80] sm:$0xf0]  ;;  %v15299_v5 = vor.u32 %v16999_v7, %v15296_v3  ;;  %v8431_v27 = vpop.f32.mrf.mxu2  ;;  %v15235_v30 = vor.u32 %v16986_v36, %v15234_v48 }
 0x89a   :  { %9445 = vmatpush.bf16.msra.mxu0 %v15055_v51  ;;  %v14919_v16 = vor.u32 %v16904_v21, %v14916_v49  ;;  %v16899_v51 = vld [vmem:[#allocation11 + $0x3c] sm:$0xf]  ;;  %v8432_v45 = vadd.f32 %v8431_v27, %v19442_v15  ;;  %v19459_v39 = vpop.f32.mrf.mxu3  ;;  %v15214_v21 = vld [vmem:[#allocation11 + $0x338] sm:$0xf]  ;;  %v16981_v49 = vld [vmem:[#allocation11 + $0x34c] sm:$0xf0] }
 0x89b   :  { %v19455_v18 = vpop.f32.mrf.mxu1  ;;  %v16989_v15 = vld [vmem:[#allocation11 + $0x39c] sm:$0xf]  ;;  %v15215_v27 = vor.u32 %v16981_v49, %v15214_v21  ;;  %v17190_v21 = vld [vmem:[#allocation11 + $0xb24] sm:$0xf0] }
 0x89c   :  { %9482 = vmatpush.bf16.msra.mxu2 %v14999_v59  ;;  %v15274_v59 = vld [vmem:[#allocation11 + $0x3c8] sm:$0xf]  ;;  %v19457_v34 = vpop.f32.mrf.mxu0  ;;  %v8446_v62 = vadd.f32 %v8445_v9, %v8432_v45  ;;  %v15259_v40 = vor.u32 %v16989_v15, %v15256_v0  ;;  %v16984_v9 = vld [vmem:[#allocation11 + $0x36c] sm:$0xf]  ;;  %v17022_v15 = vld [vmem:[#allocation11 + $0x4d4] sm:$0xf0] }
 0x89d   :  { %9498 = vmatpush.bf16.msra.mxu3 %v15119_v11  ;;  %9390 = vmatpush.bf16.msrb.mxu1 %v15031_v60  ;;  %v15342_v11 = vld [vmem:[#allocation11 + $0x460] sm:$0xf]  ;;  %v15275_v61 = vor.u32 %v16996_v23, %v15274_v59  ;;  %v15279_v60 = vor.u32 %v16994_v25, %v15276_v20  ;;  %v15216_v23 = vld [vmem:[#allocation11 + $0x350] sm:$0xf0]  ;;  %v16962_v20 = vld [vmem:[#allocation11 + $0x294] sm:$0xf0] }
 0x89e   :  { %9446 = vmatpush.bf16.msra.mxu0 %v15035_v47  ;;  %v15343_v4 = vor.u32 %v17012_v35, %v15342_v11  ;;  %v16894_v47 = vld [vmem:[#allocation11 + $0xc] sm:$0xf]  ;;  %v15142_v25 = vld [vmem:[#allocation11 + $0x280] sm:$0xf]  ;;  %v15196_v35 = vld [vmem:[#allocation11 + $0x320] sm:$0xf0] }
 0x89f   :  { %15386 = vmatmul.msk.bf16.vlgmr.msrb.gmra.mxu2 %vm999_vm4, %v19401_v28  ;;  %v16974_v11 = vld [vmem:[#allocation11 + $0x30c] sm:$0xf] }
 0x8a0   :  { %9483 = vmatpush.bf16.msra.mxu2 %v14979_v33  ;;  %9391 = vmatmul.bf16.vlgmr.msrb.gmra.mxu1 %v19380_v63  ;;  %v15039_v33 = vor.u32 %v16934_v22, %v15036_v6  ;;  %v15282_v6 = vld [vmem:[#allocation11 + $0x3d0] sm:$0xf] }
 0x8a1   :  { %9453 = vmatpush.bf16.msra.mxu1 %v15335_v44  ;;  %9499 = vmatpush.bf16.msra.mxu3 %v15099_v1  ;;  %v14899_v44 = vor.u32 %v16899_v51, %v14896_v8  ;;  %v14876_v1 = vld [vmem:[#allocation11 + $0x20] sm:$0xf0]  ;;  %v15194_v51 = vld [vmem:[#allocation11 + $0x308] sm:$0xf]  ;;  %v16976_v8 = vld [vmem:[#allocation11 + $0x31c] sm:$0xf0] }
 0x8a2   :  { %9509 = vmatpush.bf16.msrb.mxu0 %v15339_v32  ;;  %v15322_v32 = vld [vmem:[#allocation11 + $0x430] sm:$0xf]  ;;  %v14879_v37 = vor.u32 %v16894_v47, %v14876_v1  ;;  %v19471_v0 = vpop.f32.mrf.mxu3  ;;  %v15195_v47 = vor.u32 %v16976_v8, %v15194_v51 }
 0x8a3   :  { %9447 = vmatmul.bf16.vlgmr.msra.gmra.mxu0 %v19380_v63  ;;  %v15323_v56 = vor.u32 %v17007_v57, %v15322_v32  ;;  %v8459_v7 = vpop.f32.mrf.mxu1  ;;  %v15122_v1 = vld [vmem:[#allocation11 + $0x250] sm:$0xf]  ;;  %v16957_v32 = vld [vmem:[#allocation11 + $0x264] sm:$0xf0] }
 0x8a4   :  { %9484 = vmatpush.bf16.msra.mxu2 %v14959_v14  ;;  %v16972_v14 = vld [vmem:[#allocation11 + $0x2f4] sm:$0xf0]  ;;  %v19466_v59 = vpop.f32.mrf.mxu0  ;;  %v15082_v51 = vld [vmem:[#allocation11 + $0x1f0] sm:$0xf] }
 0x8a5   :  { %9454 = vmatpush.bf16.msra.mxu1 %v15315_v26  ;;  %9500 = vmatpush.bf16.msra.mxu3 %v15079_v13  ;;  %v19461_v26 = vpop.f32.mrf.mxu2  ;;  %v15236_v13 = vld [vmem:[#allocation11 + $0x380] sm:$0xf0] }
 0x8a6   :  { %9510 = vmatpush.bf16.msrb.mxu0 %v15319_v17  ;;  %v15183_v17 = vor.u32 %v16972_v14, %v15182_v53  ;;  %v15239_v3 = vor.u32 %v16984_v9, %v15236_v13  ;;  %v17014_v14 = vld [vmem:[#allocation11 + $0x48c] sm:$0xf]  ;;  %v16987_v9 = vld [vmem:[#allocation11 + $0x384] sm:$0xf0]  ;;  %v15123_v13 = vor.u32 %v16957_v32, %v15122_v1  ;;  %v14982_v1 = vld [vmem:[#allocation11 + $0x100] sm:$0xf] }
 0x8a7   :  { %v16922_v32 = vld [vmem:[#allocation11 + $0x114] sm:$0xf0] }
 0x8a8   :  { %9485 = vmatpush.bf16.msra.mxu2 %v14939_v38  ;;  %v15162_v38 = vld [vmem:[#allocation11 + $0x2b0] sm:$0xf] }
 0x8a9   :  { %9455 = vmatpush.bf16.msra.mxu1 %v15295_v54  ;;  %9501 = vmatpush.bf16.msra.mxu3 %v15059_v12  ;;  %v19464_v54 = vadd.f32 %v8459_v7, %v8446_v62  ;;  %v15303_v12 = vor.u32 %v17002_v31, %v15302_v2  ;;  %v15163_v22 = vor.u32 %v16967_v43, %v15162_v38  ;;  %v17017_v2 = vld [vmem:[#allocation11 + $0x4a4] sm:$0xf0]  ;;  %v15022_v31 = vld [vmem:[#allocation11 + $0x160] sm:$0xf]  ;;  %v16952_v43 = vld [vmem:[#allocation11 + $0x234] sm:$0xf0] }
 0x8aa   :  { %9511 = vmatpush.bf16.msrb.mxu0 %v15299_v5  ;;  %v16979_v5 = vld [vmem:[#allocation11 + $0x33c] sm:$0xf]  ;;  %v15143_v62 = vor.u32 %v16962_v20, %v15142_v25  ;;  %v15102_v38 = vld [vmem:[#allocation11 + $0x220] sm:$0xf]  ;;  %v16927_v20 = vld [vmem:[#allocation11 + $0x144] sm:$0xf0] }
 0x8ab   :  { %v15219_v45 = vor.u32 %v16979_v5, %v15216_v23  ;;  %v19473_v57 = vpop.f32.mrf.mxu1 }
 0x8ac   :  { %9486 = vmatpush.bf16.msra.mxu2 %v14919_v16  ;;  %v16997_v16 = vld [vmem:[#allocation11 + $0x3e4] sm:$0xf0] }
 0x8ad   :  { %9456 = vmatpush.bf16.msra.mxu1 %v15275_v61  ;;  %9502 = vmatpush.bf16.msra.mxu3 %v15039_v33  ;;  %v15283_v61 = vor.u32 %v16997_v16, %v15282_v6  ;;  %v17019_v33 = vld [vmem:[#allocation11 + $0x4bc] sm:$0xf]  ;;  %v19469_v42 = vpop.f32.mrf.mxu2  ;;  %v15222_v6 = vld [vmem:[#allocation11 + $0x340] sm:$0xf]  ;;  %v16982_v16 = vld [vmem:[#allocation11 + $0x354] sm:$0xf0] }
 0x8ae   :  { %9512 = vmatpush.bf16.msrb.mxu0 %v15279_v60  ;;  %v15376_v60 = vld [vmem:[#allocation11 + $0x4d0] sm:$0xf0] }
 0x8af   :  { %v15379_v53 = vor.u32 %v17019_v33, %v15376_v60 }
 0x8b0   :  { %9487 = vmatpush.bf16.msra.mxu2 %v14899_v44  ;;  %9503 = vmatmul.bf16.vlgmr.msra.gmra.mxu3 %v19380_v63  ;;  %v16992_v44 = vld [vmem:[#allocation11 + $0x3b4] sm:$0xf0] }
 0x8b1   :  { %9565 = vmatpush.bf16.msrb.mxu3 %v15343_v4  ;;  %9457 = vmatpush.bf16.msra.mxu1 %v15255_v10  ;;  %v15382_v4 = vld [vmem:[#allocation11 + $0x4c0] sm:$0xf]  ;;  %v15199_v10 = vor.u32 %v16974_v11, %v15196_v35  ;;  %v15263_v48 = vor.u32 %v16992_v44, %v15262_v50  ;;  %v17185_v35 = vld [vmem:[#allocation11 + $0xaf4] sm:$0xf0]  ;;  %v15223_v50 = vor.u32 %v16982_v16, %v15222_v6  ;;  %v17270_v16 = vld [vmem:[#allocation11 + $0xe24] sm:$0xf0] }
 0x8b2   :  { %9513 = vmatpush.bf16.msrb.mxu0 %v15259_v40  ;;  %v19475_v40 = vpop.f32.mrf.mxu0  ;;  %v15383_v36 = vor.u32 %v17022_v15, %v15382_v4  ;;  %v15511_v11 = vld [vmem:[#allocation11 + $0xae0] sm:$0xf] }
 0x8b4   :  { %9488 = vmatpush.bf16.msra.mxu2 %v14879_v37  ;;  %v15356_v37 = vld [vmem:[#allocation11 + $0x4a0] sm:$0xf0]  ;;  %v8487_v8 = vpop.f32.mrf.mxu1 }
 0x8b5   :  { %9566 = vmatpush.bf16.msrb.mxu3 %v15323_v56  ;;  %9458 = vmatpush.bf16.msra.mxu1 %v15235_v30  ;;  %v15242_v56 = vld [vmem:[#allocation11 + $0x370] sm:$0xf]  ;;  %v16932_v30 = vld [vmem:[#allocation11 + $0x174] sm:$0xf0]  ;;  %v15359_v7 = vor.u32 %v17014_v14, %v15356_v37  ;;  %v19478_v5 = vpop.f32.mrf.mxu2  ;;  %v8488_v33 = vadd.f32 %v8487_v8, %v19459_v39  ;;  %v15062_v14 = vld [vmem:[#allocation11 + $0x1c0] sm:$0xf] }
 0x8b6   :  { %9514 = vmatpush.bf16.msrb.mxu0 %v15239_v3  ;;  %v15531_v3 = vld [vmem:[#allocation11 + $0xb10] sm:$0xf]  ;;  %v15243_v49 = vor.u32 %v16987_v9, %v15242_v56  ;;  %v15023_v23 = vor.u32 %v16932_v30, %v15022_v31  ;;  %v17180_v39 = vld [vmem:[#allocation11 + $0xac4] sm:$0xf0]  ;;  %v16912_v8 = vld [vmem:[#allocation11 + $0xb4] sm:$0xf0] }
 0x8b7   :  { %9489 = vmatmul.bf16.vlgmr.msra.gmra.mxu2 %v19378_v41  ;;  %v15532_v25 = vor.u32 %v17190_v21, %v15531_v3  ;;  %v15891_v37 = vld [vmem:[#allocation11 + $0xe70] sm:$0xf]  ;;  %v17280_v56 = vld [vmem:[#allocation11 + $0xe84] sm:$0xf0]  ;;  %v15471_v21 = vld [vmem:[#allocation11 + $0xa80] sm:$0xf] }
 0x8b8   :  { %9551 = vmatpush.bf16.msrb.mxu2 %v15183_v17  ;;  %v15362_v17 = vld [vmem:[#allocation11 + $0x490] sm:$0xf]  ;;  %v16917_v30 = vld [vmem:[#allocation11 + $0xe4] sm:$0xf0] }
 0x8b9   :  { %9567 = vmatpush.bf16.msrb.mxu3 %v15303_v12  ;;  %9459 = vmatpush.bf16.msra.mxu1 %v15215_v27  ;;  %v15363_v12 = vor.u32 %v17017_v2, %v15362_v17  ;;  %v15002_v27 = vld [vmem:[#allocation11 + $0x130] sm:$0xf]  ;;  %v14983_v17 = vor.u32 %v16922_v32, %v14982_v1  ;;  %v16937_v3 = vld [vmem:[#allocation11 + $0x1a4] sm:$0xf0] }
 0x8ba   :  { %9515 = vmatpush.bf16.msrb.mxu0 %v15219_v45  ;;  %v16947_v45 = vld [vmem:[#allocation11 + $0x204] sm:$0xf0]  ;;  %v8543_v60 = vpop.f32.mrf.mxu0  ;;  %v15003_v4 = vor.u32 %v16927_v20, %v15002_v27  ;;  %v14962_v31 = vld [vmem:[#allocation11 + $0xd0] sm:$0xf]  ;;  %v17188_v27 = vld [vmem:[#allocation11 + $0xb14] sm:$0xf] }
 0x8bb   :  { %v15083_v15 = vor.u32 %v16947_v45, %v15082_v51  ;;  %v14942_v45 = vld [vmem:[#allocation11 + $0xa0] sm:$0xf]  ;;  %v14922_v32 = vld [vmem:[#allocation11 + $0x70] sm:$0xf] }
 0x8bc   :  { %9552 = vmatpush.bf16.msrb.mxu2 %v15163_v22  ;;  %v15103_v22 = vor.u32 %v16952_v43, %v15102_v38  ;;  %v15892_v43 = vor.u32 %v17280_v56, %v15891_v37  ;;  %v15811_v37 = vld [vmem:[#allocation11 + $0xdb0] sm:$0xf] }
 0x8bd   :  { %9568 = vmatpush.bf16.msrb.mxu3 %v15283_v61  ;;  %9460 = vmatpush.bf16.msra.mxu1 %v15195_v47  ;;  %v8529_v61 = vpop.f32.mrf.mxu3  ;;  %v16977_v47 = vld [vmem:[#allocation11 + $0x324] sm:$0xf0] }
 0x8be   :  { %9516 = vmatpush.bf16.msrb.mxu0 %v15199_v10  ;;  %v19482_v44 = vadd.f32 %v8543_v60, %v8529_v61  ;;  %v8502_v10 = vadd.f32 %v19469_v42, %v8488_v33  ;;  %v19488_v42 = vpop.f32.mrf.mxu2  ;;  %v15831_v60 = vld [vmem:[#allocation11 + $0xde0] sm:$0xf] }
 0x8c0   :  { %9553 = vmatpush.bf16.msrb.mxu2 %v15143_v62  ;;  %9461 = vmatmul.bf16.vlgmr.msra.gmra.mxu1 %v19382_v55  ;;  %v15202_v62 = vld [vmem:[#allocation11 + $0x310] sm:$0xf] }
 0x8c1   :  { %9529 = vmatpush.bf16.msrb.mxu1 %v15379_v53  ;;  %9569 = vmatpush.bf16.msrb.mxu3 %v15263_v48  ;;  %v15512_v53 = vor.u32 %v17185_v35, %v15511_v11  ;;  %v16942_v48 = vld [vmem:[#allocation11 + $0x1d4] sm:$0xf0]  ;;  %v15203_v9 = vor.u32 %v16977_v47, %v15202_v62  ;;  %v15451_v11 = vld [vmem:[#allocation11 + $0xa50] sm:$0xf]  ;;  %v17170_v35 = vld [vmem:[#allocation11 + $0xa64] sm:$0xf0] }
 0x8c2   :  { %9585 = vmatpush.bf16.msra.mxu0 %v15383_v36  ;;  %v15491_v36 = vld [vmem:[#allocation11 + $0xab0] sm:$0xf]  ;;  %v15063_v2 = vor.u32 %v16942_v48, %v15062_v14  ;;  %v17265_v62 = vld [vmem:[#allocation11 + $0xdf4] sm:$0xf0]  ;;  %v15452_v1 = vor.u32 %v17170_v35, %v15451_v11  ;;  %v17230_v35 = vld [vmem:[#allocation11 + $0xca4] sm:$0xf0] }
 0x8c3   :  { %9517 = vmatmul.bf16.vlgmr.msrb.gmra.mxu0 %v19382_v55  ;;  %v15492_v38 = vor.u32 %v17180_v39, %v15491_v36  ;;  %v17165_v14 = vld [vmem:[#allocation11 + $0xa34] sm:$0xf0]  ;;  %v15832_v36 = vor.u32 %v17265_v62, %v15831_v60  ;;  %v15691_v11 = vld [vmem:[#allocation11 + $0xc90] sm:$0xf]  ;;  %v17228_v62 = vld [vmem:[#allocation11 + $0xc94] sm:$0xf] }
 0x8c4   :  { %9554 = vmatpush.bf16.msrb.mxu2 %v15123_v13  ;;  %v19486_v13 = vadd.f32 %v19466_v59, %v8502_v10  ;;  %v15851_v59 = vld [vmem:[#allocation11 + $0xe10] sm:$0xf]  ;;  %v16907_v10 = vld [vmem:[#allocation11 + $0x84] sm:$0xf0] }
 0x8c5   :  { %9530 = vmatpush.bf16.msrb.mxu1 %v15359_v7  ;;  %9570 = vmatpush.bf16.msrb.mxu3 %v15243_v49  ;;  %v15042_v7 = vld [vmem:[#allocation11 + $0x190] sm:$0xf]  ;;  %v17175_v49 = vld [vmem:[#allocation11 + $0xa94] sm:$0xf0]  ;;  %v15852_v61 = vor.u32 %v17270_v16, %v15851_v59  ;;  %v19497_v48 = vpop.f32.mrf.mxu3  ;;  %v14923_v56 = vor.u32 %v16907_v10, %v14922_v32  ;;  %v19505_v59 = vpop.f32.mrf.mxu0  ;;  %v17173_v16 = vld [vmem:[#allocation11 + $0xa84] sm:$0xf] }
 0x8c6   :  { %9586 = vmatpush.bf16.msra.mxu0 %v15363_v12  ;;  %v15871_v12 = vld [vmem:[#allocation11 + $0xe40] sm:$0xf]  ;;  %v15043_v6 = vor.u32 %v16937_v3, %v15042_v7  ;;  %v15472_v20 = vor.u32 %v17175_v49, %v15471_v21  ;;  %v19491_v47 = vpop.f32.mrf.mxu2  ;;  %v17160_v7 = vld [vmem:[#allocation11 + $0xa04] sm:$0xf0]  ;;  %v19500_v3 = vpop.f32.mrf.mxu1  ;;  %v17168_v10 = vld [vmem:[#allocation11 + $0xa54] sm:$0xf] }
 0x8c7   :  { %v17250_v32 = vld [vmem:[#allocation11 + $0xd64] sm:$0xf0] }
 0x8c8   :  { %9555 = vmatpush.bf16.msrb.mxu2 %v15103_v22  ;;  %v14963_v22 = vor.u32 %v16917_v30, %v14962_v31  ;;  %v14902_v30 = vld [vmem:[#allocation11 + $0x40] sm:$0xf] }
 0x8c9   :  { %9537 = vmatpush.bf16.msra.mxu1 %v15023_v23  ;;  %9571 = vmatpush.bf16.msrb.mxu3 %v15223_v50  ;;  %v17275_v23 = vld [vmem:[#allocation11 + $0xe54] sm:$0xf0]  ;;  %v14943_v50 = vor.u32 %v16912_v8, %v14942_v45  ;;  %v15391_v45 = vld [vmem:[#allocation11 + $0x9c0] sm:$0xf] }
 0x8ca   :  { %10435 = vmatpush.bf16.msrb.mxu0 %v15532_v25  ;;  %v15533_v25 = vld [vmem:[#allocation11 + $0xb28] sm:$0xf0]  ;;  %v15872_v51 = vor.u32 %v17275_v23, %v15871_v12  ;;  %v15791_v12 = vld [vmem:[#allocation11 + $0xd80] sm:$0xf]  ;;  %v19503_v23 = vrot.slane %v19401_v28, 1 }
 0x8cb   :  { %v15536_v33 = vor.u32 %v17188_v27, %v15533_v25  ;;  %v15473_v27 = vld [vmem:[#allocation11 + $0xa98] sm:$0xf0]  ;;  %v17155_v8 = vld [vmem:[#allocation11 + $0x9d4] sm:$0xf0] }
 0x8cc   :  { %9556 = vmatpush.bf16.msrb.mxu2 %v15083_v15  ;;  %v15513_v15 = vld [vmem:[#allocation11 + $0xaf8] sm:$0xf0]  ;;  %v15476_v60 = vor.u32 %v17173_v16, %v15473_v27  ;;  %v19513_v16 = vrot.slane %v19378_v41, 1 }
 0x8cd   :  { %9538 = vmatpush.bf16.msra.mxu1 %v15003_v4  ;;  %9572 = vmatpush.bf16.msrb.mxu3 %v15203_v9  ;;  %v17183_v4 = vld [vmem:[#allocation11 + $0xae4] sm:$0xf]  ;;  %v17260_v9 = vld [vmem:[#allocation11 + $0xdc4] sm:$0xf0] }
 0x8ce   :  { %10436 = vmatpush.bf16.msrb.mxu0 %v15512_v53  ;;  %v15431_v53 = vld [vmem:[#allocation11 + $0xa20] sm:$0xf]  ;;  %v15516_v39 = vor.u32 %v17183_v4, %v15513_v15  ;;  %v15812_v21 = vor.u32 %v17260_v9, %v15811_v37  ;;  %v15693_v4 = vld [vmem:[#allocation11 + $0xca8] sm:$0xf0] }
 0x8cf   :  { %v15432_v31 = vor.u32 %v17165_v14, %v15431_v53  ;;  %v15453_v53 = vld [vmem:[#allocation11 + $0xa68] sm:$0xf0]  ;;  %v15392_v14 = vor.u32 %v17155_v8, %v15391_v45  ;;  %v15671_v37 = vld [vmem:[#allocation11 + $0xc60] sm:$0xf]  ;;  %v15731_v8 = vld [vmem:[#allocation11 + $0xcf0] sm:$0xf] }
 0x8d0   :  { %9557 = vmatpush.bf16.msrb.mxu2 %v15063_v2  ;;  %9573 = vmatmul.bf16.vlgmr.msrb.gmra.mxu3 %v19382_v55  ;;  %v15493_v2 = vld [vmem:[#allocation11 + $0xac8] sm:$0xf0] }
 0x8d1   :  { %9539 = vmatpush.bf16.msra.mxu1 %v14983_v17  ;;  %10483 = vmatpush.bf16.msra.mxu3 %v15892_v43  ;;  %v17178_v17 = vld [vmem:[#allocation11 + $0xab4] sm:$0xf]  ;;  %v15411_v43 = vld [vmem:[#allocation11 + $0x9f0] sm:$0xf] }
 0x8d2   :  { %10437 = vmatpush.bf16.msrb.mxu0 %v15492_v38  ;;  %15387 = vmatmul.msk.bf16.vlgmr.msrb.gmra.mxu1 %vm999_vm4, %v19401_v28  ;;  %v16902_v38 = vld [vmem:[#allocation11 + $0x54] sm:$0xf0]  ;;  %v15496_v49 = vor.u32 %v17178_v17, %v15493_v2  ;;  %v15412_v25 = vor.u32 %v17160_v7, %v15411_v43  ;;  %v15456_v17 = vor.u32 %v17168_v10, %v15453_v53  ;;  %v15633_v53 = vld [vmem:[#allocation11 + $0xc18] sm:$0xf0] }
 0x8d3   :  { %15388 = vmatmul.msk.bf16.vlgmr.msra.gmra.mxu0 %vm999_vm4, %v19401_v28  ;;  %v8585_v28 = vpop.f32.mrf.mxu2  ;;  %v17235_v10 = vld [vmem:[#allocation11 + $0xcd4] sm:$0xf0] }
 0x8d4   :  { %9558 = vmatpush.bf16.msrb.mxu2 %v15043_v6  ;;  %v17255_v6 = vld [vmem:[#allocation11 + $0xd94] sm:$0xf0] }
 0x8d5   :  { %9540 = vmatpush.bf16.msra.mxu1 %v14963_v22  ;;  %10484 = vmatpush.bf16.msra.mxu3 %v15872_v51  ;;  %v14903_v22 = vor.u32 %v16902_v38, %v14902_v30  ;;  %v16897_v51 = vld [vmem:[#allocation11 + $0x24] sm:$0xf0]  ;;  %v8557_v2 = vpop.f32.mrf.mxu1  ;;  %v17223_v30 = vld [vmem:[#allocation11 + $0xc64] sm:$0xf]  ;;  %v15673_v38 = vld [vmem:[#allocation11 + $0xc78] sm:$0xf0] }
 0x8d6   :  { %10438 = vmatpush.bf16.msrb.mxu0 %v15472_v20  ;;  %v14882_v20 = vld [vmem:[#allocation11 + $0x10] sm:$0xf]  ;;  %v8558_v43 = vadd.f32 %v8557_v2, %v19482_v44  ;;  %v15676_v27 = vor.u32 %v17223_v30, %v15673_v38  ;;  %v17210_v38 = vld [vmem:[#allocation11 + $0xbe4] sm:$0xf0] }
 0x8d7   :  { %9559 = vmatmul.bf16.vlgmr.msrb.gmra.mxu2 %v19380_v63  ;;  %v17231_v2 = vld [vmem:[#allocation11 + $0xcac] sm:$0xf0] }
 0x8d8   :  { %10463 = vmatpush.bf16.msra.mxu2 %v15852_v61  ;;  %v8599_v61 = vpop.f32.mrf.mxu3  ;;  %v8613_v7 = vpop.f32.mrf.mxu0  ;;  %v15611_v30 = vld [vmem:[#allocation11 + $0xbd0] sm:$0xf] }
 0x8d9   :  { %10491 = vmatpush.bf16.msrb.mxu3 %v15536_v33  ;;  %9541 = vmatpush.bf16.msra.mxu1 %v14943_v50  ;;  %v15792_v33 = vor.u32 %v17255_v6, %v15791_v12  ;;  %v15771_v50 = vld [vmem:[#allocation11 + $0xd50] sm:$0xf]  ;;  %v8600_v15 = vadd.f32 %v8599_v61, %v8585_v28  ;;  %v15433_v12 = vld [vmem:[#allocation11 + $0xa38] sm:$0xf0]  ;;  %v17240_v61 = vld [vmem:[#allocation11 + $0xd04] sm:$0xf0] }
 0x8da   :  { %10439 = vmatpush.bf16.msrb.mxu0 %v15452_v1  ;;  %v14883_v1 = vor.u32 %v16897_v51, %v14882_v20  ;;  %v15772_v9 = vor.u32 %v17250_v32, %v15771_v50  ;;  %v17220_v20 = vld [vmem:[#allocation11 + $0xc44] sm:$0xf0]  ;;  %v19516_v51 = vadd.f32 %v19488_v42, %v8558_v43  ;;  %v17158_v28 = vld [vmem:[#allocation11 + $0x9f4] sm:$0xf]  ;;  %v15631_v42 = vld [vmem:[#allocation11 + $0xc00] sm:$0xf] }
 0x8dc   :  { %10464 = vmatpush.bf16.msra.mxu2 %v15832_v36  ;;  %v15692_v36 = vor.u32 %v17230_v35, %v15691_v11  ;;  %v17218_v11 = vld [vmem:[#allocation11 + $0xc34] sm:$0xf]  ;;  %v15653_v35 = vld [vmem:[#allocation11 + $0xc48] sm:$0xf0] }
 0x8dd   :  { %10492 = vmatpush.bf16.msrb.mxu3 %v15516_v39  ;;  %9542 = vmatpush.bf16.msra.mxu1 %v14923_v56  ;;  %v15696_v39 = vor.u32 %v17228_v62, %v15693_v4  ;;  %v17225_v56 = vld [vmem:[#allocation11 + $0xc74] sm:$0xf0]  ;;  %v15656_v50 = vor.u32 %v17218_v11, %v15653_v35  ;;  %v15711_v4 = vld [vmem:[#allocation11 + $0xcc0] sm:$0xf]  ;;  %v19520_v32 = vpop.f32.mrf.mxu1  ;;  %v17191_v35 = vld [vmem:[#allocation11 + $0xb2c] sm:$0xf0] }
 0x8de   :  { %10440 = vmatpush.bf16.msrb.mxu0 %v15432_v31  ;;  %v15751_v31 = vld [vmem:[#allocation11 + $0xd20] sm:$0xf]  ;;  %v15672_v6 = vor.u32 %v17225_v56, %v15671_v37  ;;  %v17215_v62 = vld [vmem:[#allocation11 + $0xc14] sm:$0xf0]  ;;  %v17278_v37 = vld [vmem:[#allocation11 + $0xe74] sm:$0xf] }
 0x8df   :  { %v15632_v56 = vor.u32 %v17215_v62, %v15631_v42  ;;  %v15539_v11 = vld [vmem:[#allocation11 + $0xb18] sm:$0xf]  ;;  %v17203_v62 = vld [vmem:[#allocation11 + $0xba4] sm:$0xf] }
 0x8e0   :  { %10465 = vmatpush.bf16.msra.mxu2 %v15812_v21  ;;  %15909 = vmatmul.msk.bf16.vlgmr.msra.gmra.mxu3 %vm999_vm4, %v19503_v23  ;;  %v17245_v21 = vld [vmem:[#allocation11 + $0xd34] sm:$0xf0]  ;;  %v19524_v43 = vpop.f32.mrf.mxu3 }
 0x8e1   :  { %10493 = vmatpush.bf16.msrb.mxu3 %v15496_v49  ;;  %9543 = vmatpush.bf16.msra.mxu1 %v14903_v22  ;;  %v17163_v49 = vld [vmem:[#allocation11 + $0xa24] sm:$0xf]  ;;  %v19510_v22 = vadd.f32 %v8613_v7, %v8600_v15  ;;  %v15752_v44 = vor.u32 %v17245_v21, %v15751_v31  ;;  %v15732_v15 = vor.u32 %v17240_v61, %v15731_v8  ;;  %v17226_v8 = vld [vmem:[#allocation11 + $0xc7c] sm:$0xf0] }
 0x8e2   :  { %10441 = vmatpush.bf16.msrb.mxu0 %v15412_v25  ;;  %v15651_v25 = vld [vmem:[#allocation11 + $0xc30] sm:$0xf]  ;;  %v15436_v45 = vor.u32 %v17163_v49, %v15433_v12  ;;  %v15712_v7 = vor.u32 %v17235_v10, %v15711_v4  ;;  %v17208_v49 = vld [vmem:[#allocation11 + $0xbd4] sm:$0xf]  ;;  %v15591_v61 = vld [vmem:[#allocation11 + $0xba0] sm:$0xf]  ;;  %v15540_v10 = vor.u32 %v17191_v35, %v15539_v11 }
 0x8e3   :  { %v15593_v4 = vld [vmem:[#allocation11 + $0xbb8] sm:$0xf0]  ;;  %v17193_v11 = vld [vmem:[#allocation11 + $0xb44] sm:$0xf] }
 0x8e4   :  { %10466 = vmatpush.bf16.msra.mxu2 %v15792_v33  ;;  %v15413_v33 = vld [vmem:[#allocation11 + $0xa08] sm:$0xf0]  ;;  %v15553_v35 = vld [vmem:[#allocation11 + $0xb58] sm:$0xf0] }
 0x8e5   :  { %10494 = vmatpush.bf16.msrb.mxu3 %v15476_v60  ;;  %9544 = vmatpush.bf16.msra.mxu1 %v14883_v1  ;;  %v15652_v60 = vor.u32 %v17220_v20, %v15651_v25  ;;  %v15416_v1 = vor.u32 %v17158_v28, %v15413_v33  ;;  %v17273_v25 = vld [vmem:[#allocation11 + $0xe44] sm:$0xf]  ;;  %v15873_v20 = vld [vmem:[#allocation11 + $0xe58] sm:$0xf0]  ;;  %v17205_v28 = vld [vmem:[#allocation11 + $0xbb4] sm:$0xf0] }
 0x8e6   :  { %10442 = vmatpush.bf16.msrb.mxu0 %v15392_v14  ;;  %v19522_v14 = vpop.f32.mrf.mxu0 }
 0x8e8   :  { %10467 = vmatpush.bf16.msra.mxu2 %v15772_v9  ;;  %9545 = vmatmul.bf16.vlgmr.msra.gmra.mxu1 %v19378_v41  ;;  %v17213_v41 = vld [vmem:[#allocation11 + $0xc04] sm:$0xf]  ;;  %v15893_v9 = vld [vmem:[#allocation11 + $0xe88] sm:$0xf0] }
 0x8e9   :  { %10449 = vmatpush.bf16.msrb.mxu1 %v15692_v36  ;;  %10495 = vmatpush.bf16.msrb.mxu3 %v15456_v17  ;;  %v17153_v36 = vld [vmem:[#allocation11 + $0x9c4] sm:$0xf]  ;;  %v15699_v17 = vld [vmem:[#allocation11 + $0xc98] sm:$0xf]  ;;  %v15636_v31 = vor.u32 %v17213_v41, %v15633_v53  ;;  %v15896_v12 = vor.u32 %v17278_v37, %v15893_v9  ;;  %v15592_v41 = vor.u32 %v17205_v28, %v15591_v61  ;;  %v17186_v37 = vld [vmem:[#allocation11 + $0xafc] sm:$0xf0] }
 0x8ea   :  { %10505 = vmatpush.bf16.msra.mxu0 %v15696_v39  ;;  %v15393_v39 = vld [vmem:[#allocation11 + $0x9d8] sm:$0xf0]  ;;  %v15659_v53 = vld [vmem:[#allocation11 + $0xc38] sm:$0xf]  ;;  %v17200_v9 = vld [vmem:[#allocation11 + $0xb84] sm:$0xf0] }
 0x8eb   :  { %10443 = vmatmul.bf16.vlgmr.msrb.gmra.mxu0 %v19513_v16  ;;  %v15396_v21 = vor.u32 %v17153_v36, %v15393_v39  ;;  %v17221_v36 = vld [vmem:[#allocation11 + $0xc4c] sm:$0xf0]  ;;  %v15519_v39 = vld [vmem:[#allocation11 + $0xae8] sm:$0xf]  ;;  %v15619_v61 = vld [vmem:[#allocation11 + $0xbd8] sm:$0xf] }
 0x8ec   :  { %10468 = vmatpush.bf16.msra.mxu2 %v15752_v44  ;;  %v15612_v44 = vor.u32 %v17210_v38, %v15611_v30  ;;  %v17198_v30 = vld [vmem:[#allocation11 + $0xb74] sm:$0xf]  ;;  %v15573_v38 = vld [vmem:[#allocation11 + $0xb88] sm:$0xf0] }
 0x8ed   :  { %10450 = vmatpush.bf16.msrb.mxu1 %v15672_v6  ;;  %10496 = vmatpush.bf16.msrb.mxu3 %v15436_v45  ;;  %v15700_v6 = vor.u32 %v17231_v2, %v15699_v17  ;;  %v15679_v45 = vld [vmem:[#allocation11 + $0xc68] sm:$0xf]  ;;  %v19536_v17 = vpop.f32.mrf.mxu3  ;;  %v15596_v2 = vor.u32 %v17203_v62, %v15593_v4  ;;  %v17271_v62 = vld [vmem:[#allocation11 + $0xe2c] sm:$0xf0] }
 0x8ee   :  { %10506 = vmatpush.bf16.msra.mxu0 %v15676_v27  ;;  %v15613_v27 = vld [vmem:[#allocation11 + $0xbe8] sm:$0xf0]  ;;  %v15680_v42 = vor.u32 %v17226_v8, %v15679_v45 }
 0x8ef   :  { %v15616_v33 = vor.u32 %v17208_v49, %v15613_v27  ;;  %v15639_v49 = vld [vmem:[#allocation11 + $0xc08] sm:$0xf]  ;;  %v15551_v27 = vld [vmem:[#allocation11 + $0xb40] sm:$0xf]  ;;  %v15853_v45 = vld [vmem:[#allocation11 + $0xe28] sm:$0xf0] }
 0x8f0   :  { %10469 = vmatpush.bf16.msra.mxu2 %v15732_v15  ;;  %v8627_v15 = vpop.f32.mrf.mxu1 }
 0x8f1   :  { %10451 = vmatpush.bf16.msrb.mxu1 %v15652_v60  ;;  %10497 = vmatpush.bf16.msrb.mxu3 %v15416_v1  ;;  %v19527_v60 = vrot.slane %v19382_v55, 1  ;;  %v19529_v1 = vpop.f32.mrf.mxu0  ;;  %v19534_v55 = vadd.f32 %v8627_v15, %v19510_v22  ;;  %v15499_v22 = vld [vmem:[#allocation11 + $0xab8] sm:$0xf] }
 0x8f2   :  { %10507 = vmatpush.bf16.msra.mxu0 %v15656_v50  ;;  %v15876_v50 = vor.u32 %v17273_v25, %v15873_v20  ;;  %v17195_v25 = vld [vmem:[#allocation11 + $0xb54] sm:$0xf0]  ;;  %v15576_v20 = vor.u32 %v17198_v30, %v15573_v38  ;;  %v19544_v30 = vpop.f32.mrf.mxu2 }
 0x8f4   :  { %10470 = vmatpush.bf16.msra.mxu2 %v15712_v7  ;;  %v15520_v7 = vor.u32 %v17186_v37, %v15519_v39  ;;  %v15556_v39 = vor.u32 %v17193_v11, %v15553_v35  ;;  %v17201_v11 = vld [vmem:[#allocation11 + $0xb8c] sm:$0xf0] }
 0x8f5   :  { %10452 = vmatpush.bf16.msrb.mxu1 %v15632_v56  ;;  %10498 = vmatpush.bf16.msrb.mxu3 %v15396_v21  ;;  %v15571_v56 = vld [vmem:[#allocation11 + $0xb70] sm:$0xf] }
 0x8f6   :  { %10508 = vmatpush.bf16.msra.mxu0 %v15636_v31  ;;  %v15660_v31 = vor.u32 %v17221_v36, %v15659_v53  ;;  %v15572_v21 = vor.u32 %v17200_v9, %v15571_v56  ;;  %v19542_v36 = vpop.f32.mrf.mxu3  ;;  %v17263_v9 = vld [vmem:[#allocation11 + $0xde4] sm:$0xf] }
 0x8f7   :  { %10471 = vmatmul.bf16.vlgmr.msra.gmra.mxu2 %v19527_v60  ;;  %19835 = vst [vmem:[#allocation25_spill] sm:$0xff] %v19542_v36  ;;  %v17209_v36 = vld [vmem:[#allocation11 + $0xbdc] sm:$0xf] }
 0x8f8   :  { %10539 = vmatpush.bf16.msrb.mxu2 %v15896_v12  ;;  %10499 = vmatmul.bf16.vlgmr.msrb.gmra.mxu3 %v19513_v16  ;;  %v17216_v12 = vld [vmem:[#allocation11 + $0xc1c] sm:$0xf0]  ;;  %v19538_v4 = vpop.f32.mrf.mxu1 }
 0x8f9   :  { %10561 = vmatpush.bf16.msra.mxu3 %v15700_v6  ;;  %10453 = vmatpush.bf16.msrb.mxu1 %v15612_v44  ;;  %v17181_v6 = vld [vmem:[#allocation11 + $0xacc] sm:$0xf0]  ;;  %v17268_v44 = vld [vmem:[#allocation11 + $0xe14] sm:$0xf]  ;;  %v15640_v8 = vor.u32 %v17216_v12, %v15639_v49  ;;  %v19540_v53 = vpop.f32.mrf.mxu0  ;;  %v17266_v49 = vld [vmem:[#allocation11 + $0xdfc] sm:$0xf0] }
 0x8fa   :  { %10509 = vmatpush.bf16.msra.mxu0 %v15616_v33  ;;  %v15500_v28 = vor.u32 %v17181_v6, %v15499_v22  ;;  %v15552_v33 = vor.u32 %v17195_v25, %v15551_v27  ;;  %v15856_v15 = vor.u32 %v17268_v44, %v15853_v45  ;;  %19834 = vst [vmem:[#allocation27_spill] sm:$0xff] %v19540_v53  ;;  %v15459_v12 = vld [vmem:[#allocation11 + $0xa58] sm:$0xf]  ;;  %v17171_v22 = vld [vmem:[#allocation11 + $0xa6c] sm:$0xf0]  ;;  %v19547_v6 = vrot.slane %v19380_v63, 1 }
 0x8fb   :  { %v17258_v25 = vld [vmem:[#allocation11 + $0xdb4] sm:$0xf]  ;;  %v15813_v45 = vld [vmem:[#allocation11 + $0xdc8] sm:$0xf0]  ;;  %v15460_v35 = vor.u32 %v17171_v22, %v15459_v12  ;;  %v15439_v63 = vld [vmem:[#allocation11 + $0xa28] sm:$0xf] }
 0x8fc   :  { %10540 = vmatpush.bf16.msrb.mxu2 %v15876_v50  ;;  %v17211_v50 = vld [vmem:[#allocation11 + $0xbec] sm:$0xf0]  ;;  %v15419_v12 = vld [vmem:[#allocation11 + $0x9f8] sm:$0xf]  ;;  %v17189_v53 = vld [vmem:[#allocation11 + $0xb1c] sm:$0xf] }
 0x8fd   :  { %10562 = vmatpush.bf16.msra.mxu3 %v15680_v42  ;;  %10454 = vmatpush.bf16.msrb.mxu1 %v15592_v41  ;;  %v15859_v42 = vld [vmem:[#allocation11 + $0xe18] sm:$0xf]  ;;  %v17176_v41 = vld [vmem:[#allocation11 + $0xa9c] sm:$0xf0]  ;;  %v15620_v37 = vor.u32 %v17211_v50, %v15619_v61 }
 0x8fe   :  { %10510 = vmatpush.bf16.msra.mxu0 %v15596_v2  ;;  %v15860_v56 = vor.u32 %v17271_v62, %v15859_v42  ;;  %v15833_v2 = vld [vmem:[#allocation11 + $0xdf8] sm:$0xf0]  ;;  %v15819_v61 = vld [vmem:[#allocation11 + $0xdb8] sm:$0xf]  ;;  %v15816_v62 = vor.u32 %v17258_v25, %v15813_v45 }
 0x8ff   :  { %v15836_v27 = vor.u32 %v17263_v9, %v15833_v2  ;;  %v15559_v9 = vld [vmem:[#allocation11 + $0xb48] sm:$0xf]  ;;  %v17196_v2 = vld [vmem:[#allocation11 + $0xb5c] sm:$0xf0]  ;;  %v17269_v25 = vld [vmem:[#allocation11 + $0xe1c] sm:$0xf] }
 0x900   :  { %10547 = vmatpush.bf16.msra.mxu2 %v15540_v10  ;;  %v15479_v10 = vld [vmem:[#allocation11 + $0xa88] sm:$0xf]  ;;  %v9322_v50 = vpop.f32.mrf.mxu1 }
 0x901   :  { %10563 = vmatpush.bf16.msra.mxu3 %v15660_v31  ;;  %10455 = vmatpush.bf16.msrb.mxu1 %v15572_v21  ;;  %v15599_v31 = vld [vmem:[#allocation11 + $0xba8] sm:$0xf]  ;;  %v15480_v38 = vor.u32 %v17176_v41, %v15479_v10  ;;  %v9378_v42 = vpop.f32.mrf.mxu0  ;;  %v17253_v10 = vld [vmem:[#allocation11 + $0xd84] sm:$0xf]  ;;  %v9323_v41 = vadd.f32 %v9322_v50, %v19446_v52  ;;  %v17156_v50 = vld [vmem:[#allocation11 + $0x9dc] sm:$0xf0] }
 0x902   :  { %10511 = vmatpush.bf16.msra.mxu0 %v15576_v20  ;;  %v15839_v21 = vld [vmem:[#allocation11 + $0xde8] sm:$0xf] }
 0x903   :  { %v15840_v44 = vor.u32 %v17266_v49, %v15839_v21  ;;  %v15799_v21 = vld [vmem:[#allocation11 + $0xd88] sm:$0xf]  ;;  %v17256_v49 = vld [vmem:[#allocation11 + $0xd9c] sm:$0xf0] }
 0x904   :  { %10548 = vmatpush.bf16.msra.mxu2 %v15520_v7  ;;  %v17206_v7 = vld [vmem:[#allocation11 + $0xbbc] sm:$0xf0]  ;;  %v15800_v45 = vor.u32 %v17256_v49, %v15799_v21 }
 0x905   :  { %10564 = vmatpush.bf16.msra.mxu3 %v15640_v8  ;;  %10456 = vmatpush.bf16.msrb.mxu1 %v15552_v33  ;;  %v15600_v20 = vor.u32 %v17206_v7, %v15599_v31  ;;  %v15579_v8 = vld [vmem:[#allocation11 + $0xb78] sm:$0xf]  ;;  %v17166_v33 = vld [vmem:[#allocation11 + $0xa3c] sm:$0xf0]  ;;  %v9336_v31 = vpop.f32.mrf.mxu2 }
 0x906   :  { %10512 = vmatpush.bf16.msra.mxu0 %v15556_v39  ;;  %v19555_v39 = vadd.f32 %v9378_v42, %v19464_v54  ;;  %v15440_v7 = vor.u32 %v17166_v33, %v15439_v63  ;;  %v9337_v22 = vadd.f32 %v9336_v31, %v9323_v41  ;;  %v17251_v63 = vld [vmem:[#allocation11 + $0xd6c] sm:$0xf0]  ;;  %v15399_v33 = vld [vmem:[#allocation11 + $0x9c8] sm:$0xf]  ;;  %v17264_v42 = vld [vmem:[#allocation11 + $0xdec] sm:$0xf] }
 0x907   :  { %15910 = vmatmul.msk.bf16.vlgmr.msrb.gmra.mxu2 %vm999_vm4, %v19503_v23  ;;  %v15841_v41 = vld [vmem:[#allocation11 + $0xe00] sm:$0xf0]  ;;  %v17246_v21 = vld [vmem:[#allocation11 + $0xd3c] sm:$0xf0] }
 0x908   :  { %10549 = vmatpush.bf16.msra.mxu2 %v15500_v28  ;;  %10457 = vmatmul.bf16.vlgmr.msrb.gmra.mxu1 %v19547_v6  ;;  %v17261_v28 = vld [vmem:[#allocation11 + $0xdcc] sm:$0xf0]  ;;  %v9351_v54 = vadd.f32 %v19536_v17, %v9337_v22  ;;  %v15844_v31 = vor.u32 %v17264_v42, %v15841_v41  ;;  %v15821_v22 = vld [vmem:[#allocation11 + $0xdd0] sm:$0xf0]  ;;  %v17233_v41 = vld [vmem:[#allocation11 + $0xcc4] sm:$0xf] }
 0x909   :  { %10519 = vmatpush.bf16.msra.mxu1 %v15856_v15  ;;  %10565 = vmatpush.bf16.msra.mxu3 %v15620_v37  ;;  %v15580_v15 = vor.u32 %v17201_v11, %v15579_v8  ;;  %v15820_v37 = vor.u32 %v17261_v28, %v15819_v61  ;;  %v17248_v8 = vld [vmem:[#allocation11 + $0xd54] sm:$0xf]  ;;  %v15773_v11 = vld [vmem:[#allocation11 + $0xd68] sm:$0xf0]  ;;  %v15779_v28 = vld [vmem:[#allocation11 + $0xd58] sm:$0xf] }
 0x90a   :  { %10575 = vmatpush.bf16.msrb.mxu0 %v15860_v56  ;;  %v15793_v56 = vld [vmem:[#allocation11 + $0xd98] sm:$0xf0]  ;;  %v15776_v17 = vor.u32 %v17248_v8, %v15773_v11  ;;  %v15739_v11 = vld [vmem:[#allocation11 + $0xcf8] sm:$0xf]  ;;  %v15661_v42 = vld [vmem:[#allocation11 + $0xc50] sm:$0xf0] }
 0x90b   :  { %10513 = vmatmul.bf16.vlgmr.msra.gmra.mxu0 %v19547_v6  ;;  %v15796_v52 = vor.u32 %v17253_v10, %v15793_v56  ;;  %v15701_v10 = vld [vmem:[#allocation11 + $0xcb0] sm:$0xf0]  ;;  %v17243_v56 = vld [vmem:[#allocation11 + $0xd24] sm:$0xf] }
 0x90c   :  { %10550 = vmatpush.bf16.msra.mxu2 %v15480_v38  ;;  %v19557_v38 = vpop.f32.mrf.mxu3 }
 0x90d   :  { %10520 = vmatpush.bf16.msra.mxu1 %v15836_v27  ;;  %10566 = vmatpush.bf16.msra.mxu3 %v15600_v20  ;;  %v17161_v27 = vld [vmem:[#allocation11 + $0xa0c] sm:$0xf0]  ;;  %v15861_v20 = vld [vmem:[#allocation11 + $0xe30] sm:$0xf0] }
 0x90e   :  { %10576 = vmatpush.bf16.msrb.mxu0 %v15840_v44  ;;  %v15560_v44 = vor.u32 %v17196_v2, %v15559_v9  ;;  %v15864_v61 = vor.u32 %v17269_v25, %v15861_v20  ;;  %v15753_v9 = vld [vmem:[#allocation11 + $0xd38] sm:$0xf0]  ;;  %v15400_v2 = vor.u32 %v17156_v50, %v15399_v33  ;;  %v17224_v20 = vld [vmem:[#allocation11 + $0xc6c] sm:$0xf] }
 0x90f   :  { %v15756_v25 = vor.u32 %v17243_v56, %v15753_v9  ;;  %v17219_v50 = vld [vmem:[#allocation11 + $0xc3c] sm:$0xf]  ;;  %v15899_v9 = vld [vmem:[#allocation11 + $0xe78] sm:$0xf] }
 0x910   :  { %10551 = vmatpush.bf16.msra.mxu2 %v15460_v35  ;;  %v15420_v35 = vor.u32 %v17161_v27, %v15419_v12  ;;  %v17259_v12 = vld [vmem:[#allocation11 + $0xdbc] sm:$0xf] }
 0x911   :  { %10521 = vmatpush.bf16.msra.mxu1 %v15816_v62  ;;  %10567 = vmatpush.bf16.msra.mxu3 %v15580_v15  ;;  %v19561_v62 = vadd.f32 %v19529_v1, %v9351_v54  ;;  %v17229_v15 = vld [vmem:[#allocation11 + $0xc9c] sm:$0xf]  ;;  %v19563_v1 = vpop.f32.mrf.mxu2  ;;  %v15824_v8 = vor.u32 %v17259_v12, %v15821_v22  ;;  %v15901_v12 = vld [vmem:[#allocation11 + $0xe90] sm:$0xf0] }
 0x912   :  { %10577 = vmatpush.bf16.msrb.mxu0 %v15820_v37  ;;  %v15780_v37 = vor.u32 %v17251_v63, %v15779_v28  ;;  %v15704_v49 = vor.u32 %v17229_v15, %v15701_v10  ;;  %v17254_v28 = vld [vmem:[#allocation11 + $0xd8c] sm:$0xf]  ;;  %v15801_v63 = vld [vmem:[#allocation11 + $0xda0] sm:$0xf0]  ;;  %v15713_v15 = vld [vmem:[#allocation11 + $0xcd8] sm:$0xf0] }
 0x913   :  { %v15719_v10 = vld [vmem:[#allocation11 + $0xcc8] sm:$0xf]  ;;  %v15804_v56 = vor.u32 %v17254_v28, %v15801_v63 }
 0x914   :  { %10552 = vmatpush.bf16.msra.mxu2 %v15440_v7  ;;  %v15759_v7 = vld [vmem:[#allocation11 + $0xd28] sm:$0xf]  ;;  %v19565_v27 = vpop.f32.mrf.mxu3 }
 0x915   :  { %10522 = vmatpush.bf16.msra.mxu1 %v15796_v52  ;;  %10568 = vmatpush.bf16.msra.mxu3 %v15560_v44  ;;  %v15681_v52 = vld [vmem:[#allocation11 + $0xc80] sm:$0xf0]  ;;  %v15760_v54 = vor.u32 %v17246_v21, %v15759_v7  ;;  %v17238_v44 = vld [vmem:[#allocation11 + $0xcf4] sm:$0xf]  ;;  %v15664_v7 = vor.u32 %v17219_v50, %v15661_v42  ;;  %v17244_v50 = vld [vmem:[#allocation11 + $0xd2c] sm:$0xf] }
 0x916   :  { %10578 = vmatpush.bf16.msrb.mxu0 %v15800_v45  ;;  %v15733_v45 = vld [vmem:[#allocation11 + $0xd08] sm:$0xf0]  ;;  %v15781_v21 = vld [vmem:[#allocation11 + $0xd70] sm:$0xf0]  ;;  %v15761_v42 = vld [vmem:[#allocation11 + $0xd40] sm:$0xf0] }
 0x917   :  { %v15736_v33 = vor.u32 %v17238_v44, %v15733_v45  ;;  %v19571_v44 = vpop.f32.mrf.mxu1 }
 0x918   :  { %10553 = vmatpush.bf16.msra.mxu2 %v15420_v35  ;;  %10569 = vmatmul.bf16.vlgmr.msra.gmra.mxu3 %v19547_v6  ;;  %v17241_v35 = vld [vmem:[#allocation11 + $0xd0c] sm:$0xf0] }
 0x919   :  { %10631 = vmatpush.bf16.msrb.mxu3 %v15864_v61  ;;  %10523 = vmatpush.bf16.msra.mxu1 %v15776_v17  ;;  %v15684_v61 = vor.u32 %v17224_v20, %v15681_v52  ;;  %v15740_v17 = vor.u32 %v17241_v35, %v15739_v11  ;;  %v19569_v22 = vpop.f32.mrf.mxu2  ;;  %v15716_v20 = vor.u32 %v17233_v41, %v15713_v15  ;;  %v17214_v52 = vld [vmem:[#allocation11 + $0xc0c] sm:$0xf]  ;;  %v15879_v35 = vld [vmem:[#allocation11 + $0xe48] sm:$0xf] }
 0x91a   :  { %10579 = vmatpush.bf16.msrb.mxu0 %v15780_v37  ;;  %v17236_v37 = vld [vmem:[#allocation11 + $0xcdc] sm:$0xf0]  ;;  %v17274_v15 = vld [vmem:[#allocation11 + $0xe4c] sm:$0xf] }
 0x91c   :  { %10554 = vmatpush.bf16.msra.mxu2 %v15400_v2  ;;  %v17281_v2 = vld [vmem:[#allocation11 + $0xe8c] sm:$0xf0] }
 0x91d   :  { %10632 = vmatpush.bf16.msrb.mxu3 %v15844_v31  ;;  %10524 = vmatpush.bf16.msra.mxu1 %v15756_v25  ;;  %v17249_v31 = vld [vmem:[#allocation11 + $0xd5c] sm:$0xf]  ;;  %v9434_v25 = vpop.f32.mrf.mxu3  ;;  %v15900_v11 = vor.u32 %v17281_v2, %v15899_v9  ;;  %v17192_v9 = vld [vmem:[#allocation11 + $0xb34] sm:$0xf0]  ;;  %v15764_v2 = vor.u32 %v17244_v50, %v15761_v42 }
 0x91e   :  { %10580 = vmatpush.bf16.msrb.mxu0 %v15760_v54  ;;  %v15641_v54 = vld [vmem:[#allocation11 + $0xc20] sm:$0xf0]  ;;  %v9435_v45 = vadd.f32 %v9434_v25, %v19486_v13  ;;  %v15784_v28 = vor.u32 %v17249_v31, %v15781_v21  ;;  %v15621_v13 = vld [vmem:[#allocation11 + $0xbf0] sm:$0xf0]  ;;  %v15884_v31 = vor.u32 %v17274_v15, %v15881_v29  ;;  %v17184_v25 = vld [vmem:[#allocation11 + $0xaec] sm:$0xf] }
 0x91f   :  { %10555 = vmatmul.bf16.vlgmr.msra.gmra.mxu2 %v19513_v16  ;;  %v15644_v41 = vor.u32 %v17214_v52, %v15641_v54  ;;  %v15624_v21 = vor.u32 %v17209_v36, %v15621_v13  ;;  %v15521_v54 = vld [vmem:[#allocation11 + $0xb00] sm:$0xf0]  ;;  %v17187_v29 = vld [vmem:[#allocation11 + $0xb04] sm:$0xf0]  ;;  %v17179_v15 = vld [vmem:[#allocation11 + $0xabc] sm:$0xf] }
 0x920   :  { %10617 = vmatpush.bf16.msrb.mxu2 %v15704_v49  ;;  %v17279_v49 = vld [vmem:[#allocation11 + $0xe7c] sm:$0xf]  ;;  %v15524_v50 = vor.u32 %v17184_v25, %v15521_v54  ;;  %v15481_v54 = vld [vmem:[#allocation11 + $0xaa0] sm:$0xf0] }
 0x921   :  { %10633 = vmatpush.bf16.msrb.mxu3 %v15824_v8  ;;  %10525 = vmatpush.bf16.msra.mxu1 %v15736_v33  ;;  %v15720_v8 = vor.u32 %v17236_v37, %v15719_v10  ;;  %v15904_v63 = vor.u32 %v17279_v49, %v15901_v12  ;;  %v17276_v33 = vld [vmem:[#allocation11 + $0xe5c] sm:$0xf0]  ;;  %v17239_v49 = vld [vmem:[#allocation11 + $0xcfc] sm:$0xf]  ;;  %v15741_v12 = vld [vmem:[#allocation11 + $0xd10] sm:$0xf0] }
 0x922   :  { %10581 = vmatpush.bf16.msrb.mxu0 %v15740_v17  ;;  %v15541_v17 = vld [vmem:[#allocation11 + $0xb30] sm:$0xf0]  ;;  %v15880_v10 = vor.u32 %v17276_v33, %v15879_v35  ;;  %v15547_v37 = vld [vmem:[#allocation11 + $0xb20] sm:$0xf] }
 0x923   :  { %v15548_v52 = vor.u32 %v17192_v9, %v15547_v37  ;;  %v15581_v37 = vld [vmem:[#allocation11 + $0xb90] sm:$0xf0]  ;;  %v15507_v9 = vld [vmem:[#allocation11 + $0xac0] sm:$0xf] }
 0x924   :  { %10618 = vmatpush.bf16.msrb.mxu2 %v15684_v61  ;;  %v19574_v61 = vpop.f32.mrf.mxu0 }
 0x925   :  { %10634 = vmatpush.bf16.msrb.mxu3 %v15804_v56  ;;  %10526 = vmatpush.bf16.msra.mxu1 %v15716_v20  ;;  %v8490_v56 = vadd.f32 %v19500_v3, %v19471_v0  ;;  %v19580_v20 = vpop.f32.mrf.mxu2  ;;  %v15601_v0 = vld [vmem:[#allocation11 + $0xbc0] sm:$0xf0]  ;;  %v9392_v3 = vpop.f32.mrf.mxu1 }
 0x926   :  { %10582 = vmatpush.bf16.msrb.mxu0 %v15720_v8  ;;  %v17204_v8 = vld [vmem:[#allocation11 + $0xbac] sm:$0xf] }
 0x927   :  { %v8504_v35 = vadd.f32 %v19478_v5, %v8490_v56  ;;  %v15604_v42 = vor.u32 %v17204_v8, %v15601_v0  ;;  %v15907_v56 = vld [vmem:[#allocation11 + $0xe80] sm:$0xf]  ;;  %v17194_v8 = vld [vmem:[#allocation11 + $0xb4c] sm:$0xf]  ;;  %v15561_v0 = vld [vmem:[#allocation11 + $0xb60] sm:$0xf0] }
 0x928   :  { %10619 = vmatpush.bf16.msrb.mxu2 %v15664_v7  ;;  %10527 = vmatmul.bf16.vlgmr.msra.gmra.mxu1 %v19527_v60  ;;  %v15544_v7 = vor.u32 %v17189_v53, %v15541_v17  ;;  %v9393_v53 = vadd.f32 %v9392_v3, %v19555_v39  ;;  %v15501_v17 = vld [vmem:[#allocation11 + $0xad0] sm:$0xf0]  ;;  %v17182_v39 = vld [vmem:[#allocation11 + $0xad4] sm:$0xf0] }
 0x929   :  { %10595 = vmatpush.bf16.msrb.mxu1 %v15900_v11  ;;  %10635 = vmatpush.bf16.msrb.mxu3 %v15784_v28  ;;  %v15527_v11 = vld [vmem:[#allocation11 + $0xaf0] sm:$0xf]  ;;  %v15744_v28 = vor.u32 %v17239_v49, %v15741_v12  ;;  %v15504_v49 = vor.u32 %v17179_v15, %v15501_v17  ;;  %v17169_v15 = vld [vmem:[#allocation11 + $0xa5c] sm:$0xf]  ;;  %v15461_v17 = vld [vmem:[#allocation11 + $0xa70] sm:$0xf0] }
 0x92a   :  { %10651 = vmatpush.bf16.msra.mxu0 %v15904_v63  ;;  %v17234_v63 = vld [vmem:[#allocation11 + $0xccc] sm:$0xf]  ;;  %v9407_v13 = vadd.f32 %v19569_v22, %v9393_v53  ;;  %v15528_v5 = vor.u32 %v17187_v29, %v15527_v11  ;;  %v17177_v29 = vld [vmem:[#allocation11 + $0xaa4] sm:$0xf0] }
 0x92b   :  { %10583 = vmatmul.bf16.vlgmr.msrb.gmra.mxu0 %v19527_v60  ;;  %v17174_v22 = vld [vmem:[#allocation11 + $0xa8c] sm:$0xf] }
 0x92c   :  { %10620 = vmatpush.bf16.msrb.mxu2 %v15644_v41  ;;  %v9448_v36 = vpop.f32.mrf.mxu0  ;;  %v15721_v41 = vld [vmem:[#allocation11 + $0xce0] sm:$0xf0] }
 0x92d   :  { %10596 = vmatpush.bf16.msrb.mxu1 %v15880_v10  ;;  %10636 = vmatpush.bf16.msrb.mxu3 %v15764_v2  ;;  %v19584_v33 = vadd.f32 %v9448_v36, %v9435_v45  ;;  %v17199_v10 = vld [vmem:[#allocation11 + $0xb7c] sm:$0xf]  ;;  %v17282_v2 = vld [vmem:[#allocation11 + $0xe94] sm:$0xf0]  ;;  %v15724_v45 = vor.u32 %v17234_v63, %v15721_v41  ;;  %v19591_v25 = vpop.f32.mrf.mxu2  ;;  %v15867_v36 = vld [vmem:[#allocation11 + $0xe20] sm:$0xf]  ;;  %v15564_v63 = vor.u32 %v17194_v8, %v15561_v0 }
 0x92e   :  { %10652 = vmatpush.bf16.msra.mxu0 %v15884_v31  ;;  %v9436_v31 = vpop.f32.mrf.mxu3  ;;  %v15584_v12 = vor.u32 %v17199_v10, %v15581_v37  ;;  %v15908_v3 = vor.u32 %v17282_v2, %v15907_v56  ;;  %v17172_v10 = vld [vmem:[#allocation11 + $0xa74] sm:$0xf0]  ;;  %v15847_v37 = vld [vmem:[#allocation11 + $0xdf0] sm:$0xf]  ;;  %v15464_v56 = vor.u32 %v17169_v15, %v15461_v17 }
 0x92f   :  { %v15407_v15 = vld [vmem:[#allocation11 + $0x9d0] sm:$0xf] }
 0x930   :  { %10621 = vmatpush.bf16.msrb.mxu2 %v15624_v21  ;;  %v8518_v21 = vadd.f32 %v19475_v40, %v8504_v35  ;;  %v17272_v40 = vld [vmem:[#allocation11 + $0xe34] sm:$0xf0] }
 0x931   :  { %10603 = vmatpush.bf16.msra.mxu1 %v15544_v7  ;;  %v19588_v7 = vadd.f32 %v19557_v38, %v9407_v13  ;;  %10637 = vmatpush.bf16.msrb.mxu3 %v15744_v28  ;;  %v15487_v38 = vld [vmem:[#allocation11 + $0xa90] sm:$0xf]  ;;  %v15484_v28 = vor.u32 %v17174_v22, %v15481_v54  ;;  %v15868_v13 = vor.u32 %v17272_v40, %v15867_v36  ;;  %v17262_v54 = vld [vmem:[#allocation11 + $0xdd4] sm:$0xf0]  ;;  %v19603_v36 = vpop.f32.mrf.mxu1 }
 0x932   :  { %10659 = vmatpush.bf16.msrb.mxu0 %v15548_v52  ;;  %v15508_v52 = vor.u32 %v17182_v39, %v15507_v9  ;;  %v9437_v11 = vadd.f32 %v9436_v31, %v8518_v21  ;;  %v15488_v41 = vor.u32 %v17177_v29, %v15487_v38  ;;  %v17267_v9 = vld [vmem:[#allocation11 + $0xe04] sm:$0xf0]  ;;  %v17164_v31 = vld [vmem:[#allocation11 + $0xa2c] sm:$0xf]  ;;  %v15427_v29 = vld [vmem:[#allocation11 + $0xa00] sm:$0xf] }
 0x933   :  { %v15848_v21 = vor.u32 %v17267_v9, %v15847_v37  ;;  %v15807_v40 = vld [vmem:[#allocation11 + $0xd90] sm:$0xf] }
 0x934   :  { %10622 = vmatpush.bf16.msrb.mxu2 %v15604_v42  ;;  %v9450_v53 = vpop.f32.mrf.mxu0  ;;  %v17277_v42 = vld [vmem:[#allocation11 + $0xe64] sm:$0xf0] }
 0x935   :  { %10604 = vmatpush.bf16.msra.mxu1 %v15524_v50  ;;  %10638 = vmatpush.bf16.msrb.mxu3 %v15724_v45  ;;  %v19593_v35 = vadd.f32 %v9450_v53, %v9437_v11  ;;  %v15887_v50 = vld [vmem:[#allocation11 + $0xe50] sm:$0xf]  ;;  %v15441_v45 = vld [vmem:[#allocation11 + $0xa40] sm:$0xf0]  ;;  %v19600_v22 = vpop.f32.mrf.mxu2  ;;  %v15421_v11 = vld [vmem:[#allocation11 + $0xa10] sm:$0xf0] }
 0x936   :  { %10660 = vmatpush.bf16.msrb.mxu0 %v15528_v5  ;;  %v15467_v5 = vld [vmem:[#allocation11 + $0xa60] sm:$0xf]  ;;  %v15888_v39 = vor.u32 %v17277_v42, %v15887_v50  ;;  %v15444_v8 = vor.u32 %v17164_v31, %v15441_v45  ;;  %v17162_v53 = vld [vmem:[#allocation11 + $0xa14] sm:$0xf0]  ;;  %v17154_v42 = vld [vmem:[#allocation11 + $0x9cc] sm:$0xf]  ;;  %v9504_v37 = vpop.f32.mrf.mxu3 }
 0x937   :  { %v15468_v2 = vor.u32 %v17172_v10, %v15467_v5  ;;  %v15428_v50 = vor.u32 %v17162_v53, %v15427_v29  ;;  %v15707_v5 = vld [vmem:[#allocation11 + $0xca0] sm:$0xf]  ;;  %v17232_v10 = vld [vmem:[#allocation11 + $0xcb4] sm:$0xf0] }
 0x938   :  { %10623 = vmatpush.bf16.msrb.mxu2 %v15584_v12  ;;  %10639 = vmatmul.bf16.vlgmr.msrb.gmra.mxu3 %v19527_v60  ;;  %v17167_v12 = vld [vmem:[#allocation11 + $0xa44] sm:$0xf0] }
 0x939   :  { %10605 = vmatpush.bf16.msra.mxu1 %v15504_v49  ;;  %10707 = vmatpush.bf16.msra.mxu3 %v15908_v3  ;;  %v15447_v49 = vld [vmem:[#allocation11 + $0xa30] sm:$0xf]  ;;  %v17159_v3 = vld [vmem:[#allocation11 + $0x9fc] sm:$0xf] }
 0x93a   :  { %10661 = vmatpush.bf16.msrb.mxu0 %v15508_v52  ;;  %15911 = vmatmul.msk.bf16.vlgmr.msrb.gmra.mxu1 %vm999_vm4, %v19503_v23  ;;  %v15827_v52 = vld [vmem:[#allocation11 + $0xdc0] sm:$0xf]  ;;  %v15448_v0 = vor.u32 %v17167_v12, %v15447_v49  ;;  %v15708_v49 = vor.u32 %v17232_v10, %v15707_v5  ;;  %v17217_v5 = vld [vmem:[#allocation11 + $0xc24] sm:$0xf0]  ;;  %v15727_v10 = vld [vmem:[#allocation11 + $0xcd0] sm:$0xf] }
 0x93b   :  { %15912 = vmatmul.msk.bf16.vlgmr.msra.gmra.mxu0 %vm999_vm4, %v19503_v23  ;;  %v15828_v38 = vor.u32 %v17262_v54, %v15827_v52 }
 0x93c   :  { %10624 = vmatpush.bf16.msrb.mxu2 %v15564_v63  ;;  %v15424_v63 = vor.u32 %v17159_v3, %v15421_v11  ;;  %v15767_v11 = vld [vmem:[#allocation11 + $0xd30] sm:$0xf] }
 0x93d   :  { %10606 = vmatpush.bf16.msra.mxu1 %v15484_v28  ;;  %10708 = vmatpush.bf16.msra.mxu3 %v15888_v39  ;;  %v17257_v28 = vld [vmem:[#allocation11 + $0xda4] sm:$0xf0]  ;;  %v9490_v9 = vpop.f32.mrf.mxu2  ;;  %v15787_v39 = vld [vmem:[#allocation11 + $0xd60] sm:$0xf]  ;;  %v9462_v3 = vpop.f32.mrf.mxu1 }
 0x93e   :  { %10662 = vmatpush.bf16.msrb.mxu0 %v15488_v41  ;;  %v15401_v41 = vld [vmem:[#allocation11 + $0x9e0] sm:$0xf0]  ;;  %v15808_v17 = vor.u32 %v17257_v28, %v15807_v40  ;;  %v9491_v31 = vadd.f32 %v9490_v9, %v19516_v51  ;;  %v15667_v40 = vld [vmem:[#allocation11 + $0xc40] sm:$0xf]  ;;  %v17222_v28 = vld [vmem:[#allocation11 + $0xc54] sm:$0xf0] }
 0x93f   :  { %10625 = vmatmul.bf16.vlgmr.msrb.gmra.mxu2 %v19547_v6  ;;  %v15404_v45 = vor.u32 %v17154_v42, %v15401_v41  ;;  %v17242_v42 = vld [vmem:[#allocation11 + $0xd14] sm:$0xf0]  ;;  %v9506_v41 = vpop.f32.mrf.mxu3 }
 0x940   :  { %10687 = vmatpush.bf16.msra.mxu2 %v15868_v13  ;;  %v17157_v13 = vld [vmem:[#allocation11 + $0x9e4] sm:$0xf0]  ;;  %v9505_v54 = vadd.f32 %v9504_v37, %v9491_v31  ;;  %v9518_v51 = vpop.f32.mrf.mxu0 }
 0x941   :  { %10607 = vmatpush.bf16.msra.mxu1 %v15464_v56  ;;  %v17252_v56 = vld [vmem:[#allocation11 + $0xd74] sm:$0xf0]  ;;  %v17237_v37 = vld [vmem:[#allocation11 + $0xce4] sm:$0xf0] }
 0x942   :  { %10663 = vmatpush.bf16.msrb.mxu0 %v15468_v2  ;;  %v8546_v2 = vadd.f32 %v19505_v59, %v19497_v48  ;;  %v15788_v52 = vor.u32 %v17252_v56, %v15787_v39  ;;  %v17247_v48 = vld [vmem:[#allocation11 + $0xd44] sm:$0xf0]  ;;  %v9463_v59 = vadd.f32 %v9462_v3, %v19584_v33  ;;  %v15728_v31 = vor.u32 %v17237_v37, %v15727_v10  ;;  %v17202_v3 = vld [vmem:[#allocation11 + $0xb94] sm:$0xf0] }
 0x943   :  { %v15768_v53 = vor.u32 %v17247_v48, %v15767_v11  ;;  %v15567_v11 = vld [vmem:[#allocation11 + $0xb50] sm:$0xf]  ;;  %v17197_v48 = vld [vmem:[#allocation11 + $0xb64] sm:$0xf0] }
 0x944   :  { %10688 = vmatpush.bf16.msra.mxu2 %v15848_v21  ;;  %v15408_v21 = vor.u32 %v17157_v13, %v15407_v15  ;;  %v8560_v12 = vadd.f32 %v19520_v32, %v8546_v2  ;;  %v19613_v32 = vadd.f32 %v19591_v25, %v9463_v59  ;;  %v15668_v15 = vor.u32 %v17222_v28, %v15667_v40  ;;  %v15647_v13 = vld [vmem:[#allocation11 + $0xc10] sm:$0xf] }
 0x945   :  { %10608 = vmatpush.bf16.msra.mxu1 %v15444_v8  ;;  %v15687_v8 = vld [vmem:[#allocation11 + $0xc70] sm:$0xf]  ;;  %v15648_v2 = vor.u32 %v17217_v5, %v15647_v13  ;;  %v8602_v40 = vadd.f32 %v19524_v43, %v19544_v30 }
 0x946   :  { %10664 = vmatpush.bf16.msrb.mxu0 %v15448_v0  ;;  %v17227_v0 = vld [vmem:[#allocation11 + $0xc84] sm:$0xf0] }
 0x947   :  { %v15688_v29 = vor.u32 %v17227_v0, %v15687_v8  ;;  %v15587_v0 = vld [vmem:[#allocation11 + $0xb80] sm:$0xf] }
 0x948   :  { %10689 = vmatpush.bf16.msra.mxu2 %v15828_v38  ;;  %15913 = vmatmul.msk.bf16.vlgmr.msra.gmra.mxu3 %vm999_vm4, %v19503_v23  ;;  %v9519_v38 = vadd.f32 %v9518_v51, %v9505_v54  ;;  %v8574_v23 = vadd.f32 %v19491_v47, %v8560_v12  ;;  %v9464_v47 = vpop.f32.mrf.mxu1  ;;  %v9520_v39 = vpop.f32.mrf.mxu0  ;;  %v15607_v12 = vld [vmem:[#allocation11 + $0xbb0] sm:$0xf]  ;;  %v15568_v51 = vor.u32 %v17197_v48, %v15567_v11  ;;  %vm19839_vm4 = vmmov %vm19838_vm3 }
 0x949   :  { %10609 = vmatpush.bf16.msra.mxu1 %v15424_v63  ;;  %v9492_v63 = vpop.f32.mrf.mxu2  ;;  %v9465_v9 = vadd.f32 %v9464_v47, %v19593_v35 }
 0x94a   :  { %10665 = vmatpush.bf16.msrb.mxu0 %v15428_v50  ;;  %v15747_v50 = vld [vmem:[#allocation11 + $0xd00] sm:$0xf]  ;;  %v9493_v33 = vadd.f32 %v9492_v63, %v8574_v23 }
 0x94c   :  { %10690 = vmatpush.bf16.msra.mxu2 %v15808_v17  ;;  %v15748_v17 = vor.u32 %v17242_v42, %v15747_v50  ;;  %v9507_v25 = vadd.f32 %v9506_v41, %v9493_v33  ;;  %v8616_v50 = vadd.f32 %v19522_v14, %v8602_v40 }
 0x94d   :  { %10610 = vmatpush.bf16.msra.mxu1 %v15404_v45  ;;  %v15627_v45 = vld [vmem:[#allocation11 + $0xbe0] sm:$0xf] }
 0x94e   :  { %10666 = vmatpush.bf16.msrb.mxu0 %v15408_v21  ;;  %v9521_v56 = vadd.f32 %v9520_v39, %v9507_v25  ;;  %v17212_v21 = vld [vmem:[#allocation11 + $0xbf4] sm:$0xf0]  ;;  %v8630_v33 = vadd.f32 %v19538_v4, %v8616_v50 }
 0x950   :  { %10691 = vmatpush.bf16.msra.mxu2 %v15788_v52  ;;  %10611 = vmatmul.bf16.vlgmr.msra.gmra.mxu1 %v19513_v16  ;;  %v17207_v52 = vld [vmem:[#allocation11 + $0xbc4] sm:$0xf0]  ;;  %v9532_v35 = vpop.f32.mrf.mxu1  ;;  %v9588_v63 = vpop.f32.mrf.mxu0 }
 0x951   :  { %10673 = vmatpush.bf16.msrb.mxu1 %v15708_v49  ;;  %10667 = vmatmul.bf16.vlgmr.msrb.gmra.mxu0 %v19513_v16  ;;  %v19620_v16 = vadd.f32 %v19600_v22, %v9465_v9  ;;  %v15628_v49 = vor.u32 %v17212_v21, %v15627_v45  ;;  %v15608_v54 = vor.u32 %v17207_v52, %v15607_v12 }
 0x952   :  { %v19623_v8 = vadd.f32 %v9532_v35, %v9519_v38  ;;  %v15588_v22 = vor.u32 %v17202_v3, %v15587_v0  ;;  %v19646_v3 = vld [vmem:[#allocation12] sm:$0x3f] }
 0x953   :  { %v9574_v38 = vpop.f32.mrf.mxu3 }
 0x954   :  { %10692 = vmatpush.bf16.msra.mxu2 %v15768_v53 }
 0x955   :  { %10674 = vmatpush.bf16.msrb.mxu1 %v15688_v29 }
 0x958   :  { %10693 = vmatpush.bf16.msra.mxu2 %v15748_v17  ;;  %v9534_v59 = vpop.f32.mrf.mxu1 }
 0x959   :  { %10675 = vmatpush.bf16.msrb.mxu1 %v15668_v15  ;;  %v19625_v29 = vadd.f32 %v9534_v59, %v9521_v56 }
 0x95b   :  { %v9576_v13 = vpop.f32.mrf.mxu3 }
 0x95c   :  { %10694 = vmatpush.bf16.msra.mxu2 %v15728_v31 }
 0x95d   :  { %10676 = vmatpush.bf16.msrb.mxu1 %v15648_v2  ;;  %v8434_v2 = vadd.f32 %v19461_v26, %v19452_v24  ;;  %v10728_v24 = vperm.slane %v19646_v3, 1 }
 0x95f   :  { %10695 = vmatmul.bf16.vlgmr.msra.gmra.mxu2 %v19527_v60  ;;  %v9560_v60 = vpop.f32.mrf.mxu2  ;;  %v8448_v21 = vadd.f32 %v19457_v34, %v8434_v2 }
 0x961   :  { %10677 = vmatpush.bf16.msrb.mxu1 %v15628_v49  ;;  %v8462_v49 = vadd.f32 %v19473_v57, %v8448_v21 }
 0x963   :  { %v10486_v30 = vpop.f32.mrf.mxu3  ;;  %v9381_v35 = vadd.f32 %v19574_v61, %v8462_v49 }
 0x965   :  { %10678 = vmatpush.bf16.msrb.mxu1 %v15608_v54  ;;  %v9546_v23 = vpop.f32.mrf.mxu1 }
 0x966   :  { %v9547_v53 = vadd.f32 %v9546_v23, %v19534_v55  ;;  %v9590_v55 = vpop.f32.mrf.mxu0 }
 0x968   :  { %v9561_v28 = vadd.f32 %v9560_v60, %v9547_v53 }
 0x969   :  { %10679 = vmatpush.bf16.msrb.mxu1 %v15588_v22  ;;  %v9395_v22 = vadd.f32 %v19603_v36, %v9381_v35 }
 0x96a   :  { %v9575_v42 = vadd.f32 %v9574_v38, %v9561_v28 }
 0x96b   :  { %v19639_v39 = vpop.f32.mrf.mxu3  ;;  %v9409_v57 = vadd.f32 %v19580_v20, %v9395_v22  ;;  %v19836_v22 = vld [vmem:[#allocation25_spill] sm:$0xff] }
 0x96c   :  { %v19633_v41 = vadd.f32 %v9588_v63, %v9575_v42 }
 0x96d   :  { %10680 = vmatpush.bf16.msrb.mxu1 %v15568_v51  ;;  %v9548_v15 = vpop.f32.mrf.mxu1  ;;  %v9423_v36 = vadd.f32 %v19565_v27, %v9409_v57 }
 0x96e   :  { %v9549_v17 = vadd.f32 %v9548_v15, %v8630_v33  ;;  %v10444_v43 = vpop.f32.mrf.mxu0 }
 0x970   :  { %10681 = vmatmul.bf16.vlgmr.msrb.gmra.mxu1 %v19547_v6  ;;  %v9562_v6 = vpop.f32.mrf.mxu2 }
 0x971   :  { %v9563_v25 = vadd.f32 %v9562_v6, %v9549_v17  ;;  %v10727_v6 = vperm.slane %v19646_v3, 0 }
 0x973   :  { %v9577_v5 = vadd.f32 %v9576_v13, %v9563_v25 }
 0x975   :  { %v19635_v47 = vadd.f32 %v9590_v55, %v9577_v5 }
 0x976   :  { %v10446_v9 = vpop.f32.mrf.mxu0 }
 0x97a   :  { %v10472_v10 = vpop.f32.mrf.mxu2 }
 0x97b   :  { %v10500_v31 = vpop.f32.mrf.mxu3 }
 0x982   :  { %v19637_v37 = vpop.f32.mrf.mxu2 }
 0x983   :  { %v10502_v11 = vpop.f32.mrf.mxu3 }
 0x985   :  { %v10458_v14 = vpop.f32.mrf.mxu1 }
 0x986   :  { %v10459_v26 = vadd.f32 %v10458_v14, %v10444_v43 }
 0x988   :  { %v10514_v45 = vpop.f32.mrf.mxu0  ;;  %v10473_v23 = vadd.f32 %v10472_v10, %v10459_v26  ;;  %v8378_v10 = vadd.f32 %v19444_v58, %v19438_v19  ;;  %v19837_v26 = vld [vmem:[#allocation27_spill] sm:$0xff] }
 0x989   :  { %v10515_v12 = vadd.f32 %v10514_v45, %v10500_v31  ;;  %v10729_v31 = vperm.slane %v19646_v3, 2 }
 0x98a   :  { %v10542_v4 = vpop.f32.mrf.mxu2 }
 0x98d   :  { %v10460_v56 = vpop.f32.mrf.mxu1 }
 0x990   :  { %v10516_v48 = vpop.f32.mrf.mxu0 }
 0x991   :  { %v10517_v51 = vadd.f32 %v10516_v48, %v10502_v11  ;;  %v10730_v48 = vperm.slane %v19646_v3, 3 }
 0x992   :  { %v10544_v54 = vpop.f32.mrf.mxu2 }
 0x99b   :  { %v10570_v28 = vpop.f32.mrf.mxu3 }
 0x9a2   :  { %v10556_v53 = vpop.f32.mrf.mxu2 }
 0x9a3   :  { %v10572_v27 = vpop.f32.mrf.mxu3 }
 0x9a5   :  { %v10528_v52 = vpop.f32.mrf.mxu1 }
 0x9a6   :  { %v10529_v0 = vadd.f32 %v10528_v52, %v10515_v12  ;;  %v10461_v12 = vadd.f32 %v10460_v56, %v10446_v9 }
 0x9a8   :  { %v10543_v59 = vadd.f32 %v10542_v4, %v10529_v0  ;;  %v10584_v63 = vpop.f32.mrf.mxu0  ;;  %v8392_v4 = vadd.f32 %v19440_v46, %v8378_v10 }
 0x9aa   :  { %v10716_v34 = vadd.f32 %v10543_v59, %v19588_v7  ;;  %v10487_v7 = vadd.f32 %v10486_v30, %v10473_v23  ;;  %v10558_v25 = vpop.f32.mrf.mxu2  ;;  %v8406_v45 = vadd.f32 %v19455_v18, %v8392_v4  ;;  %v10475_v18 = vadd.f32 %v19637_v37, %v10461_v12 }
 0x9ab   :  { %v10573_v55 = vadd.f32 %v10572_v27, %v10558_v25 }
 0x9ac   :  { %v19652_v60 = vadd.f32 %v10728_v24, %v10716_v34  ;;  %v10715_v17 = vadd.f32 %v10487_v7, %v19561_v62  ;;  %v9325_v19 = vadd.f32 %v19571_v44, %v8406_v45  ;;  %v10489_v9 = vadd.f32 %v19639_v39, %v10475_v18 }
 0x9ad   :  { %v10530_v61 = vpop.f32.mrf.mxu1 }
 0x9ae   :  { %v10531_v38 = vadd.f32 %v10530_v61, %v10517_v51  ;;  %v10748_v40 = vmax.f32 %v19652_v60, 0.0  ;;  %v19667_v5 = vadd.f32 %v10727_v6, %v10715_v17  ;;  %v9339_v46 = vadd.f32 %v19563_v1, %v9325_v19 }
 0x9af   :  { %v10571_v61 = vadd.f32 %v10570_v28, %v10556_v53 }
 0x9b0   :  { %v10545_v50 = vadd.f32 %v10544_v54, %v10531_v38  ;;  %10771 = vrot.lane.b32.xlu1 %v10748_v40, %s17587_s29  ;;  %v10586_v13 = vpop.f32.mrf.mxu0  ;;  %v10747_v14 = vmax.f32 %v19667_v5, 0.0  ;;  %v9353_v11 = vadd.f32 %v19836_v22, %v9339_v46 }
 0x9b1   :  { %v10587_v43 = vadd.f32 %v10586_v13, %v10573_v55 }
 0x9b2   :  { %v10721_v20 = vadd.f32 %v10545_v50, %v9423_v36  ;;  %v9367_v34 = vadd.f32 %v19837_v26, %v9353_v11  ;;  %v10585_v50 = vadd.f32 %v10584_v63, %v10571_v61  ;;  %v17302_v26 = vld [vmem:[#allocation14 + $0x98] sm:$0xff]  ;;  %v17307_v61 = vld [vmem:[#allocation14 + $0xc0] sm:$0xff] }
 0x9b3   :  { %11067 = vmatpush.bf16.msra.mxu1 %v17302_v26 }
 0x9b4   :  { %v19659_v42 = vadd.f32 %v10728_v24, %v10721_v20  ;;  %v10720_v38 = vadd.f32 %v10489_v9, %v9367_v34  ;;  %v17310_v9 = vld [vmem:[#allocation14 + $0xd8] sm:$0xff] }
 0x9b5   :  { %11250 = vmatpush.bf16.msrb.mxu2 %v17310_v9  ;;  %v17319_v9 = vld [vmem:[#allocation14 + $0x120] sm:$0xff] }
 0x9b6   :  { %v10753_v15 = vmax.f32 %v19659_v42, 0.0 }
 0x9b7   :  { %v10598_v33 = vpop.f32.mrf.mxu1 }
 0x9b8   :  { %10773 = vrot.lane.b32.xlu2 %v10753_v15, %s17587_s29  ;;  %v10654_v54 = vpop.f32.mrf.mxu0  ;;  %v10599_v20 = vadd.f32 %v10598_v33, %v10585_v50  ;;  %v17290_v50 = vld [vmem:[#allocation14 + $0x38] sm:$0xff] }
 0x9b9   :  { %11037 = vmatpush.bf16.msrb.mxu3 %v17290_v50 }
 0x9ba   :  { %v10717_v25 = vadd.f32 %v10599_v20, %v19613_v32  ;;  %v17301_v20 = vld [vmem:[#allocation14 + $0x90] sm:$0xff] }
 0x9bb   :  { %v10640_v52 = vpop.f32.mrf.mxu3  ;;  %11068 = vmatpush.bf16.msra.mxu1 %v17301_v20 }
 0x9bc   :  { %v10739_v53 = vadd.f32 %v10729_v31, %v10717_v25  ;;  %v17300_v25 = vld [vmem:[#allocation14 + $0x88] sm:$0xff] }
 0x9be   :  { %v10749_v55 = vmax.f32 %v10739_v53, 0.0  ;;  %v17292_v53 = vld [vmem:[#allocation14 + $0x48] sm:$0xff] }
 0x9bf   :  { %v10600_v30 = vpop.f32.mrf.mxu1  ;;  %11069 = vmatpush.bf16.msra.mxu1 %v17300_v25 }
 0x9c0   :  { %v10601_v62 = vadd.f32 %v10600_v30, %v10587_v43  ;;  %10759 = vrot.lane.b32.xlu2 %v10747_v14, %s17587_s29  ;;  %v10656_v36 = vpop.f32.mrf.mxu0  ;;  %v10731_v30 = vperm.slane %v19646_v3, 4 }
 0x9c2   :  { %v10722_v2 = vadd.f32 %v10601_v62, %v19620_v16  ;;  %v10626_v58 = vpop.f32.mrf.mxu2 }
 0x9c3   :  { %v10642_v51 = vpop.f32.mrf.mxu3 }
 0x9c4   :  { %v19679_v21 = vadd.f32 %v10729_v31, %v10722_v2 }
 0x9c6   :  { %v10754_v49 = vmax.f32 %v19679_v21, 0.0 }
 0x9c8   :  { %10793 = vrot.lane.b32.xlu2 %v10754_v49, %s17587_s29 }
 0x9ca   :  { %v10628_v59 = vpop.f32.mrf.mxu2 }
 0x9cb   :  { %v10710_v43 = vpop.f32.mrf.mxu3 }
 0x9cd   :  { %v10612_v35 = vpop.f32.mrf.mxu1 }
 0x9ce   :  { %v10627_v16 = vadd.f32 %v10626_v58, %v10612_v35  ;;  %v10668_v28 = vpop.f32.mrf.mxu0 }
 0x9d0   :  { %v10641_v0 = vadd.f32 %v10640_v52, %v10627_v16 }
 0x9d2   :  { %v10655_v44 = vadd.f32 %v10654_v54, %v10641_v0 }
 0x9d3   :  { %v10712_v12 = vpop.f32.mrf.mxu3 }
 0x9d4   :  { %v10718_v56 = vadd.f32 %v10655_v44, %v19623_v8  ;;  %v10742_v8 = vadd.f32 %v10727_v6, %v10720_v38 }
 0x9d5   :  { %v10614_v24 = vpop.f32.mrf.mxu1 }
 0x9d6   :  { %v10629_v57 = vadd.f32 %v10628_v59, %v10614_v24  ;;  %v10740_v1 = vadd.f32 %v10730_v48, %v10718_v56  ;;  %v10752_v13 = vmax.f32 %v10742_v8, 0.0  ;;  %v10670_v62 = vpop.f32.mrf.mxu0  ;;  %v17298_v56 = vld [vmem:[#allocation14 + $0x78] sm:$0xff]  ;;  %v17309_v59 = vld [vmem:[#allocation14 + $0xd0] sm:$0xff] }
 0x9d7   :  { %11050 = vmatpush.bf16.msra.mxu0 %v17298_v56  ;;  %v17297_v24 = vld [vmem:[#allocation14 + $0x70] sm:$0xff]  ;;  %11251 = vmatpush.bf16.msrb.mxu2 %v17309_v59  ;;  %v17323_v56 = vld [vmem:[#allocation14 + $0x140] sm:$0xff] }
 0x9d8   :  { %v10643_v23 = vadd.f32 %v10642_v51, %v10629_v57  ;;  %v10750_v37 = vmax.f32 %v10740_v1, 0.0  ;;  %v17308_v1 = vld [vmem:[#allocation14 + $0xc8] sm:$0xff]  ;;  %v17289_v8 = vld [vmem:[#allocation14 + $0x30] sm:$0xff] }
 0x9d9   :  { %v17296_v51 = vld [vmem:[#allocation14 + $0x68] sm:$0xff]  ;;  %11038 = vmatpush.bf16.msrb.mxu3 %v17289_v8 }
 0x9da   :  { %v10657_v7 = vadd.f32 %v10656_v36, %v10643_v23  ;;  %10803 = vrot.lane.b32.xlu0 %v10750_v37, %s17587_s29  ;;  %v17295_v23 = vld [vmem:[#allocation14 + $0x60] sm:$0xff]  ;;  %v17306_v36 = vld [vmem:[#allocation14 + $0xb8] sm:$0xff] }
 0x9db   :  { %11051 = vmatpush.bf16.msra.mxu0 %v17297_v24  ;;  %11252 = vmatpush.bf16.msrb.mxu2 %v17308_v1 }
 0x9dc   :  { %v10723_v39 = vadd.f32 %v10657_v7, %v19625_v29  ;;  %v17294_v7 = vld [vmem:[#allocation14 + $0x58] sm:$0xff] }
 0x9de   :  { %v10745_v17 = vadd.f32 %v10730_v48, %v10723_v39  ;;  %v17305_v39 = vld [vmem:[#allocation14 + $0xb0] sm:$0xff] }
 0x9df   :  { %11052 = vmatpush.bf16.msra.mxu0 %v17296_v51  ;;  %11253 = vmatpush.bf16.msrb.mxu2 %v17307_v61 }
 0x9e0   :  { %v10755_v27 = vmax.f32 %v10745_v17, 0.0  ;;  %v17293_v17 = vld [vmem:[#allocation14 + $0x50] sm:$0xff] }
 0x9e2   :  { %10805 = vrot.lane.b32.xlu1 %v10755_v27, %s17587_s29  ;;  %10761 = vrot.lane.b32.xlu0 %v10752_v13, %s17587_s29  ;;  %v10696_v63 = vpop.f32.mrf.mxu2 }
 0x9e3   :  { %11053 = vmatpush.bf16.msra.mxu0 %v17295_v23  ;;  %11254 = vmatpush.bf16.msrb.mxu2 %v17306_v36 }
 0x9e7   :  { %11054 = vmatpush.bf16.msra.mxu0 %v17294_v7  ;;  %11255 = vmatpush.bf16.msrb.mxu2 %v17305_v39 }
 0x9ea   :  { %10791 = vrot.lane.b32.xlu1 %v10749_v55, %s17587_s29  ;;  %v10698_v19 = vpop.f32.mrf.mxu2 }
 0x9eb   :  { %11055 = vmatpush.bf16.msra.mxu0 %v17293_v17 }
 0x9ed   :  { %v10682_v10 = vpop.f32.mrf.mxu1 }
 0x9ee   :  { %v10683_v33 = vadd.f32 %v10682_v10, %v10668_v28  ;;  %v17299_v28 = vld [vmem:[#allocation14 + $0x80] sm:$0xff] }
 0x9ef   :  { %v17287_v10 = vld [vmem:[#allocation14 + $0x20] sm:$0xff]  ;;  %11056 = vmatpush.bf16.msra.mxu0 %v17292_v53  ;;  %11070 = vmatpush.bf16.msra.mxu1 %v17299_v28 }
 0x9f0   :  { %v10697_v29 = vadd.f32 %v10696_v63, %v10683_v33  ;;  %v17303_v63 = vld [vmem:[#allocation14 + $0xa0] sm:$0xff] }
 0x9f1   :  { %v17291_v33 = vld [vmem:[#allocation14 + $0x40] sm:$0xff] }
 0x9f2   :  { %v10711_v6 = vadd.f32 %v10710_v43, %v10697_v29  ;;  %v17338_v43 = vld [vmem:[#allocation14 + $0x1b8] sm:$0xff] }
 0x9f3   :  { %v17330_v29 = vld [vmem:[#allocation14 + $0x178] sm:$0xff]  ;;  %11057 = vmatpush.bf16.msra.mxu0 %v17291_v33 }
 0x9f4   :  { %v10719_v32 = vadd.f32 %v10711_v6, %v19633_v41  ;;  %v17317_v6 = vld [vmem:[#allocation14 + $0x110] sm:$0xff]  ;;  %v17362_v33 = vld [vmem:[#allocation14 + $0x278] sm:$0xff] }
 0x9f5   :  { %v10684_v4 = vpop.f32.mrf.mxu1 }
 0x9f6   :  { %v10685_v2 = vadd.f32 %v10684_v4, %v10670_v62  ;;  %v10741_v45 = vadd.f32 %v10731_v30, %v10719_v32  ;;  %v17337_v32 = vld [vmem:[#allocation14 + $0x1b0] sm:$0xff] }
 0x9f7   :  { %11458 = vmatpush.bf16.msrb.mxu0 %v17330_v29  ;;  %v17329_v4 = vld [vmem:[#allocation14 + $0x170] sm:$0xff] }
 0x9f8   :  { %v10699_v31 = vadd.f32 %v10698_v19, %v10685_v2  ;;  %v10751_v58 = vmax.f32 %v10741_v45, 0.0  ;;  %v17316_v2 = vld [vmem:[#allocation14 + $0x108] sm:$0xff]  ;;  %v17285_v45 = vld [vmem:[#allocation14 + $0x10] sm:$0xff] }
 0x9f9   :  { %v17336_v19 = vld [vmem:[#allocation14 + $0x1a8] sm:$0xff]  ;;  %v17341_v29 = vld [vmem:[#allocation14 + $0x1d0] sm:$0xff] }
 0x9fa   :  { %v10713_v52 = vadd.f32 %v10712_v12, %v10699_v31  ;;  %10823 = vrot.lane.b32.xlu0 %v10751_v58, %s17587_s29  ;;  %v17328_v31 = vld [vmem:[#allocation14 + $0x168] sm:$0xff] }
 0x9fb   :  { %11459 = vmatpush.bf16.msrb.mxu0 %v17329_v4  ;;  %v17284_v12 = vld [vmem:[#allocation14 + $0x8] sm:$0xff] }
 0x9fc   :  { %v10724_v35 = vadd.f32 %v10713_v52, %v19635_v47  ;;  %v17335_v52 = vld [vmem:[#allocation14 + $0x1a0] sm:$0xff]  ;;  %v17348_v4 = vld [vmem:[#allocation14 + $0x208] sm:$0xff] }
 0x9fe   :  { %v10746_v46 = vadd.f32 %v10731_v30, %v10724_v35  ;;  %v17286_v30 = vld [vmem:[#allocation14 + $0x18] sm:$0xff]  ;;  %v17327_v35 = vld [vmem:[#allocation14 + $0x160] sm:$0xff] }
 0x9ff   :  { %11460 = vmatpush.bf16.msrb.mxu0 %v17328_v31  ;;  %v17347_v31 = vld [vmem:[#allocation14 + $0x200] sm:$0xff] }
 0xa00   :  { %v10756_v16 = vmax.f32 %v10746_v46, 0.0 }
 0xa02   :  { %10825 = vrot.lane.b32.xlu1 %v10756_v16, %s17587_s29 }
 0xa03   :  { %11461 = vmatpush.bf16.msrb.mxu0 %v17327_v35 }
 0xa12   :  { %v10774_v3 = vpop.permute.xlu2 %10773 }
 0xa13   :  { %v10778_v41 = vmax.f32 %v10753_v15, %v10774_v3 }
 0xa15   :  { %10783 = vrot.lane.b32.xlu0 %v10778_v41, %s17587_s29  ;;  %v17314_v41 = vld [vmem:[#allocation14 + $0xf8] sm:$0xff] }
 0xa1a   :  { %v10760_v54 = vpop.permute.xlu2 %10759 }
 0xa1b   :  { %v10765_v18 = vmax.f32 %v10747_v14, %v10760_v54  ;;  %v17283_v54 = vld [vmem:[#allocation14] sm:$0xff] }
 0xa1d   :  { %10767 = vst.msk [vmem:[#allocation4] sm:$0xff] %vm4884_vm13, %v10765_v18  ;;  %v17334_v18 = vld [vmem:[#allocation14 + $0x198] sm:$0xff] }
 0xa22   :  { %v10772_v0 = vpop.permute.xlu1 %10771  ;;  %v10794_v22 = vpop.permute.xlu2 %10793 }
 0xa23   :  { %v10777_v47 = vmax.f32 %v10748_v40, %v10772_v0  ;;  %v10798_v11 = vmax.f32 %v10754_v49, %v10794_v22  ;;  %v17322_v0 = vld [vmem:[#allocation14 + $0x138] sm:$0xff]  ;;  %v17345_v22 = vld [vmem:[#allocation14 + $0x1f0] sm:$0xff] }
 0xa25   :  { %10800 = vst.msk [vmem:[#allocation4 + $0x20] sm:$0x7] %vm19838_vm3, %v10798_v11  ;;  %10781 = vrot.lane.b32.xlu2 %v10777_v47, %s17587_s29  ;;  %v17326_v47 = vld [vmem:[#allocation14 + $0x158] sm:$0xff]  ;;  %v17313_v11 = vld [vmem:[#allocation14 + $0xf0] sm:$0xff] }
 0xa26   :  { %11462 = vmatpush.bf16.msrb.mxu0 %v17326_v47  ;;  %v17377_v47 = vld [vmem:[#allocation14 + $0x2f0] sm:$0xff] }
 0xa4c   :  { %v10804_v42 = vpop.permute.xlu0 %10803 }
 0xa4d   :  { %v10809_v15 = vmax.f32 %v10750_v37, %v10804_v42  ;;  %v17333_v42 = vld [vmem:[#allocation14 + $0x190] sm:$0xff] }
 0xa4f   :  { %10813 = vrot.lane.b32.xlu1 %v10809_v15, %s17587_s29  ;;  %v17321_v15 = vld [vmem:[#allocation14 + $0x130] sm:$0xff] }
 0xa54   :  { %v10806_v5 = vpop.permute.xlu1 %10805  ;;  %v10762_v14 = vpop.permute.xlu0 %10761 }
 0xa55   :  { %v10810_v44 = vmax.f32 %v10755_v27, %v10806_v5  ;;  %v10766_v48 = vmax.f32 %v10752_v13, %v10762_v14  ;;  %v17304_v27 = vld [vmem:[#allocation14 + $0xa8] sm:$0xff]  ;;  %v17325_v5 = vld [vmem:[#allocation14 + $0x150] sm:$0xff] }
 0xa56   :  { %v17288_v13 = vld [vmem:[#allocation14 + $0x28] sm:$0xff]  ;;  %11256 = vmatpush.bf16.msrb.mxu2 %v17304_v27  ;;  %11463 = vmatpush.bf16.msrb.mxu0 %v17325_v5 }
 0xa57   :  { %10768 = vst.msk [vmem:[#allocation4 + $0x18] sm:$0x7] %vm19839_vm4, %v10766_v48  ;;  %10815 = vrot.lane.b32.xlu2 %v10810_v44, %s17587_s29  ;;  %11039 = vmatpush.bf16.msrb.mxu3 %v17288_v13  ;;  %v17312_v44 = vld [vmem:[#allocation14 + $0xe8] sm:$0xff]  ;;  %v17342_v13 = vld [vmem:[#allocation14 + $0x1d8] sm:$0xff] }
 0xa58   :  { %v17332_v48 = vld [vmem:[#allocation14 + $0x188] sm:$0xff] }
 0xa59   :  { %v17376_v5 = vld [vmem:[#allocation14 + $0x2e8] sm:$0xff] }
 0xa5a   :  { %11257 = vmatpush.bf16.msrb.mxu2 %v17303_v63  ;;  %v17350_v63 = vld [vmem:[#allocation14 + $0x218] sm:$0xff] }
 0xa5b   :  { %11040 = vmatpush.bf16.msrb.mxu3 %v17287_v10  ;;  %v17370_v10 = vld [vmem:[#allocation14 + $0x2b8] sm:$0xff] }
 0xa5c   :  { %v10792_v60 = vpop.permute.xlu1 %10791 }
 0xa5d   :  { %v10797_v40 = vmax.f32 %v10749_v55, %v10792_v60  ;;  %v17318_v55 = vld [vmem:[#allocation14 + $0x118] sm:$0xff]  ;;  %v17320_v60 = vld [vmem:[#allocation14 + $0x128] sm:$0xff] }
 0xa5e   :  { %11263 = vmatpush.bf16.msrb.mxu1 %v17318_v55  ;;  %11471 = vmatpush.bf16.msra.mxu2 %v17338_v43 }
 0xa5f   :  { %10799 = vst.msk [vmem:[#allocation4 + $0x8] sm:$0xff] %vm4884_vm13, %v10797_v40  ;;  %11041 = vmatpush.bf16.msrb.mxu3 %v17286_v30  ;;  %v17324_v40 = vld [vmem:[#allocation14 + $0x148] sm:$0xff]  ;;  %v17369_v30 = vld [vmem:[#allocation14 + $0x2b0] sm:$0xff] }
 0xa60   :  { %11464 = vmatpush.bf16.msrb.mxu0 %v17324_v40  ;;  %v17382_v40 = vld [vmem:[#allocation14 + $0x318] sm:$0xff] }
 0xa62   :  { %11264 = vmatpush.bf16.msrb.mxu1 %v17317_v6  ;;  %11472 = vmatpush.bf16.msra.mxu2 %v17337_v32  ;;  %v17349_v6 = vld [vmem:[#allocation14 + $0x210] sm:$0xff] }
 0xa63   :  { %11042 = vmatpush.bf16.msrb.mxu3 %v17285_v45  ;;  %v17361_v32 = vld [vmem:[#allocation14 + $0x270] sm:$0xff]  ;;  %v17360_v45 = vld [vmem:[#allocation14 + $0x268] sm:$0xff] }
 0xa64   :  { %11465 = vmatpush.bf16.msrb.mxu0 %v17323_v56  ;;  %v17374_v56 = vld [vmem:[#allocation14 + $0x2d8] sm:$0xff] }
 0xa66   :  { %11265 = vmatpush.bf16.msrb.mxu1 %v17316_v2  ;;  %11473 = vmatpush.bf16.msra.mxu2 %v17336_v19  ;;  %v17368_v2 = vld [vmem:[#allocation14 + $0x2a8] sm:$0xff]  ;;  %v17339_v19 = vld [vmem:[#allocation14 + $0x1c0] sm:$0xff] }
 0xa67   :  { %11043 = vmatpush.bf16.msrb.mxu3 %v17284_v12  ;;  %v17359_v12 = vld [vmem:[#allocation14 + $0x260] sm:$0xff] }
 0xa6a   :  { %11474 = vmatpush.bf16.msra.mxu2 %v17335_v52  ;;  %v17358_v52 = vld [vmem:[#allocation14 + $0x258] sm:$0xff] }
 0xa6b   :  { %11044 = vmatpush.bf16.msrb.mxu3 %v17283_v54  ;;  %v17366_v54 = vld [vmem:[#allocation14 + $0x298] sm:$0xff] }
 0xa6c   :  { %v10824_v21 = vpop.permute.xlu0 %10823 }
 0xa6d   :  { %v10829_v49 = vmax.f32 %v10751_v58, %v10824_v21  ;;  %v17315_v58 = vld [vmem:[#allocation14 + $0x100] sm:$0xff] }
 0xa6e   :  { %11266 = vmatpush.bf16.msrb.mxu1 %v17315_v58  ;;  %11475 = vmatpush.bf16.msra.mxu2 %v17334_v18  ;;  %v17311_v21 = vld [vmem:[#allocation14 + $0xe0] sm:$0xff] }
 0xa6f   :  { %10831 = vst.msk [vmem:[#allocation4 + $0x10] sm:$0xff] %vm4884_vm13, %v10829_v49  ;;  %11280 = vmatpush.bf16.msra.mxu3 %v17322_v0  ;;  %v17331_v49 = vld [vmem:[#allocation14 + $0x180] sm:$0xff]  ;;  %v17357_v0 = vld [vmem:[#allocation14 + $0x250] sm:$0xff] }
 0xa70   :  { %v17367_v58 = vld [vmem:[#allocation14 + $0x2a0] sm:$0xff] }
 0xa72   :  { %11267 = vmatpush.bf16.msrb.mxu1 %v17314_v41  ;;  %11476 = vmatpush.bf16.msra.mxu2 %v17333_v42  ;;  %v17356_v42 = vld [vmem:[#allocation14 + $0x248] sm:$0xff] }
 0xa73   :  { %11281 = vmatpush.bf16.msra.mxu3 %v17321_v15  ;;  %v17344_v15 = vld [vmem:[#allocation14 + $0x1e8] sm:$0xff] }
 0xa74   :  { %v10826_v34 = vpop.permute.xlu1 %10825 }
 0xa75   :  { %v10830_v57 = vmax.f32 %v10756_v16, %v10826_v34 }
 0xa76   :  { %11268 = vmatpush.bf16.msrb.mxu1 %v17313_v11  ;;  %11477 = vmatpush.bf16.msra.mxu2 %v17332_v48  ;;  %v17365_v11 = vld [vmem:[#allocation14 + $0x290] sm:$0xff]  ;;  %v17343_v48 = vld [vmem:[#allocation14 + $0x1e0] sm:$0xff] }
 0xa77   :  { %10832 = vst.msk [vmem:[#allocation4 + $0x28] sm:$0x7] %vm19840_vm5, %v10830_v57  ;;  %11282 = vmatpush.bf16.msra.mxu3 %v17320_v60  ;;  %v17375_v60 = vld [vmem:[#allocation14 + $0x2e0] sm:$0xff] }
 0xa7a   :  { %11269 = vmatpush.bf16.msrb.mxu1 %v17312_v44  ;;  %11478 = vmatpush.bf16.msra.mxu2 %v17331_v49  ;;  %v17355_v44 = vld [vmem:[#allocation14 + $0x240] sm:$0xff] }
 0xa7b   :  { %11283 = vmatpush.bf16.msra.mxu3 %v17319_v9  ;;  %v17354_v9 = vld [vmem:[#allocation14 + $0x238] sm:$0xff] }
 0xa7e   :  { %11270 = vmatpush.bf16.msrb.mxu1 %v17311_v21  ;;  %v17363_v21 = vld [vmem:[#allocation14 + $0x280] sm:$0xff] }
 0xa7f   :  { %v10782_v37 = vpop.permute.xlu2 %10781 }
 0xa80   :  { %10787 = vst.msk [vmem:[#allocation4] sm:$0xff] %vm4906_vm15, %v10782_v37 }
 0xa87   :  { %v10784_v38 = vpop.permute.xlu0 %10783 }
 0xa88   :  { %10788 = vst.msk [vmem:[#allocation4 + $0x18] sm:$0x7] %vm4908_vm11, %v10784_v38 }
 0xab1   :  { %v10816_v62 = vpop.permute.xlu2 %10815 }
 0xab2   :  { %10820 = vst.msk [vmem:[#allocation4 + $0x20] sm:$0x7] %vm4908_vm11, %v10816_v62  ;;  %v17340_v62 = vld [vmem:[#allocation14 + $0x1c8] sm:$0xff] }
 0xab9   :  { %v10853_v46 = vld [vmem:[#allocation4 + $0x18] ss:$8 sm:$0x7]  ;;  %v10854_v16 = vld [vmem:[#allocation4 + $0x19] ss:$8 sm:$0x7] }
 0xaba   :  { %v10855_v3 = vmax.f32 %v10853_v46, %v10854_v16  ;;  %v17346_v16 = vld [vmem:[#allocation14 + $0x1f8] sm:$0xff] }
 0xabc   :  { %10856 = vst.msk [vmem:[#allocation5 + $0x4] ss:$8 sm:$0x7] %vm18685_vm14, %v10855_v3  ;;  %v17378_v3 = vld [vmem:[#allocation14 + $0x2f8] sm:$0xff] }
 0xac1   :  { %v10814_v14 = vpop.permute.xlu1 %10813 }
 0xac2   :  { %10819 = vst.msk [vmem:[#allocation4 + $0x8] sm:$0xff] %vm4906_vm15, %v10814_v14  ;;  %v17364_v14 = vld [vmem:[#allocation14 + $0x288] sm:$0xff] }
 0xac9   :  { %v10833_v59 = vld [vmem:[#allocation4] ss:$8 sm:$0x7]  ;;  %v10834_v24 = vld [vmem:[#allocation4 + $0x1] ss:$8 sm:$0x7] }
 0xaca   :  { %v10835_v26 = vmax.f32 %v10833_v59, %v10834_v24  ;;  %v10838_v34 = vld [vmem:[#allocation4 + $0x2] ss:$8 sm:$0x7]  ;;  %v10839_v57 = vld [vmem:[#allocation4 + $0x3] ss:$8 sm:$0x7] }
 0xacb   :  { %v10840_v1 = vmax.f32 %v10838_v34, %v10839_v57  ;;  %v10843_v51 = vld [vmem:[#allocation4 + $0x4] ss:$8 sm:$0x7]  ;;  %v10844_v61 = vld [vmem:[#allocation4 + $0x5] ss:$8 sm:$0x7] }
 0xacc   :  { %v10845_v23 = vmax.f32 %v10843_v51, %v10844_v61  ;;  %v10848_v37 = vld [vmem:[#allocation4 + $0x6] ss:$8 sm:$0x7]  ;;  %v10849_v38 = vld [vmem:[#allocation4 + $0x7] ss:$8 sm:$0x7] }
 0xacd   :  { %v10850_v36 = vmax.f32 %v10848_v37, %v10849_v38  ;;  %10836 = vst.msk [vmem:[#allocation5] ss:$8 sm:$0x7] %vm18685_vm14, %v10835_v26  ;;  %v17381_v26 = vld [vmem:[#allocation14 + $0x310] sm:$0xff]  ;;  %v17380_v51 = vld [vmem:[#allocation14 + $0x308] sm:$0xff]  ;;  %v17379_v37 = vld [vmem:[#allocation14 + $0x300] sm:$0xff] }
 0xace   :  { %10841 = vst.msk [vmem:[#allocation5 + $0x1] ss:$8 sm:$0x7] %vm18685_vm14, %v10840_v1  ;;  %v17353_v57 = vld [vmem:[#allocation14 + $0x230] sm:$0xff]  ;;  %v17352_v61 = vld [vmem:[#allocation14 + $0x228] sm:$0xff]  ;;  %v17351_v38 = vld [vmem:[#allocation14 + $0x220] sm:$0xff] }
 0xacf   :  { %10846 = vst.msk [vmem:[#allocation5 + $0x2] ss:$8 sm:$0x7] %vm18685_vm14, %v10845_v23  ;;  %v17373_v1 = vld [vmem:[#allocation14 + $0x2d0] sm:$0xff]  ;;  %v17372_v23 = vld [vmem:[#allocation14 + $0x2c8] sm:$0xff] }
 0xad0   :  { %10851 = vst.msk [vmem:[#allocation5 + $0x3] ss:$8 sm:$0x7] %vm18685_vm14, %v10850_v36  ;;  %v17371_v36 = vld [vmem:[#allocation14 + $0x2c0] sm:$0xff] }
 0xad7   :  { %v10858_v50 = vld [vmem:[#allocation5] sm:$0x1f]  ;;  %v10859_v7 = vld [vmem:[#allocation5 + $0x8] sm:$0x1f]  ;;  %v10860_v20 = vld [vmem:[#allocation5 + $0x10] sm:$0x1f] }
 0xad8   :  { %v10861_v39 = vpack.c.bf16 %v10859_v7, %v10858_v50  ;;  %v10862_v8 = vpack.c.bf16 %v10860_v20, %v10860_v20 }
 0xada   :  { %v10906_v17 = vunpack.c.l.b16 %v10861_v39  ;;  %v10907_v25 = vunpack.c.h.b16 %v10861_v39  ;;  %v10908_v27 = vunpack.c.l.b16 %v10862_v8 }
 0xadc   :  { %v19736_v53 = vpack.c.b16 %v10906_v17, %v10906_v17  ;;  %v19738_v28 = vpack.c.b16 %v10907_v25, %v10907_v25  ;;  %v19740_v55 = vpack.c.b16 %v10908_v27, %v10908_v27 }
 0xade   :  { %11045 = vmatmul.bf16.vlgmr.msrb.gmra.mxu3 %v19736_v53  ;;  %11058 = vmatmul.bf16.vlgmr.msra.gmra.mxu0 %v19738_v28  ;;  %v11118_v43 = vshrl.u32 %v19736_v53, 16  ;;  %v11123_v35 = vshrl.u32 %v19740_v55, 16  ;;  %v11330_v46 = vrot.slane %v19736_v53, 1  ;;  %v11121_v41 = vshrl.u32 %v19738_v28, 16 }
 0xadf   :  { %15994 = vmatmul.msk.bf16.vlgmr.msra.gmra.mxu1 %vm4884_vm13, %v19740_v55  ;;  %11488 = vmatpush.bf16.msrb.mxu3 %v17342_v13  ;;  %v11331_v18 = vrot.slane %v19738_v28, 1  ;;  %v11332_v49 = vrot.slane %v19740_v55, 1  ;;  %v11746_v34 = vrot.slane %v19736_v53, 2  ;;  %v11747_v7 = vrot.slane %v19738_v28, 2 }
 0xae0   :  { %11666 = vmatpush.bf16.msra.mxu1 %v17350_v63  ;;  %11258 = vmatmul.bf16.vlgmr.msrb.gmra.mxu2 %v11118_v43  ;;  %v11538_v59 = vrot.slane %v11118_v43, 1  ;;  %v11540_v24 = vrot.slane %v11123_v35, 1  ;;  %v11539_v50 = vrot.slane %v11121_v41, 1  ;;  %v11748_v20 = vrot.slane %v19740_v55, 2 }
 0xae1   :  { %11874 = vmatpush.bf16.msrb.mxu2 %v17370_v10  ;;  %11696 = vmatpush.bf16.msra.mxu0 %v17362_v33 }
 0xae3   :  { %11489 = vmatpush.bf16.msrb.mxu3 %v17341_v29 }
 0xae4   :  { %11667 = vmatpush.bf16.msra.mxu1 %v17349_v6 }
 0xae5   :  { %11875 = vmatpush.bf16.msrb.mxu2 %v17369_v30  ;;  %11697 = vmatpush.bf16.msra.mxu0 %v17361_v32 }
 0xae7   :  { %11490 = vmatpush.bf16.msrb.mxu3 %v17340_v62 }
 0xae8   :  { %11668 = vmatpush.bf16.msra.mxu1 %v17348_v4 }
 0xae9   :  { %11876 = vmatpush.bf16.msrb.mxu2 %v17368_v2  ;;  %11698 = vmatpush.bf16.msra.mxu0 %v17360_v45 }
 0xaeb   :  { %11491 = vmatpush.bf16.msrb.mxu3 %v17339_v19 }
 0xaec   :  { %11669 = vmatpush.bf16.msra.mxu1 %v17347_v31 }
 0xaed   :  { %11877 = vmatpush.bf16.msrb.mxu2 %v17367_v58  ;;  %11699 = vmatpush.bf16.msra.mxu0 %v17359_v12 }
 0xaee   :  { %16075 = vmatmul.msk.bf16.vlgmr.msra.gmra.mxu3 %vm4884_vm13, %v11123_v35  ;;  %11466 = vmatmul.bf16.vlgmr.msrb.gmra.mxu0 %v11330_v46 }
 0xaef   :  { %11271 = vmatmul.bf16.vlgmr.msrb.gmra.mxu1 %v11121_v41  ;;  %11679 = vmatpush.bf16.msra.mxu3 %v17358_v52 }
 0xaf0   :  { %11670 = vmatpush.bf16.msra.mxu1 %v17346_v16  ;;  %11479 = vmatmul.bf16.vlgmr.msra.gmra.mxu2 %v11331_v18 }
 0xaf1   :  { %11887 = vmatpush.bf16.msrb.mxu0 %v17378_v3  ;;  %11878 = vmatpush.bf16.msrb.mxu2 %v17366_v54  ;;  %v10863_v3 = vld [vmem:[#allocation15] sm:$0x1] }
 0xaf3   :  { %11680 = vmatpush.bf16.msra.mxu3 %v17357_v0 }
 0xaf4   :  { %11671 = vmatpush.bf16.msra.mxu1 %v17345_v22 }
 0xaf5   :  { %11888 = vmatpush.bf16.msrb.mxu0 %v17377_v47  ;;  %11879 = vmatpush.bf16.msrb.mxu2 %v17365_v11 }
 0xaf7   :  { %11681 = vmatpush.bf16.msra.mxu3 %v17356_v42 }
 0xaf8   :  { %11672 = vmatpush.bf16.msra.mxu1 %v17344_v15 }
 0xaf9   :  { %11889 = vmatpush.bf16.msrb.mxu0 %v17376_v5  ;;  %11880 = vmatpush.bf16.msrb.mxu2 %v17364_v14 }
 0xafb   :  { %11682 = vmatpush.bf16.msra.mxu3 %v17355_v44 }
 0xafc   :  { %11673 = vmatpush.bf16.msra.mxu1 %v17343_v48 }
 0xafd   :  { %11890 = vmatpush.bf16.msrb.mxu0 %v17375_v60  ;;  %11881 = vmatpush.bf16.msrb.mxu2 %v17363_v21 }
 0xafe   :  { %16156 = vmatmul.msk.bf16.vlgmr.msrb.gmra.mxu3 %vm4884_vm13, %v11332_v49  ;;  %16237 = vmatmul.msk.bf16.vlgmr.msra.gmra.mxu0 %vm4884_vm13, %v11540_v24 }
 0xaff   :  { %11674 = vmatmul.bf16.vlgmr.msra.gmra.mxu1 %v11538_v59  ;;  %11683 = vmatpush.bf16.msra.mxu3 %v17354_v9 }
 0xb00   :  { %11904 = vmatpush.bf16.msrb.mxu1 %v17382_v40  ;;  %11882 = vmatmul.bf16.vlgmr.msrb.gmra.mxu2 %v11746_v34 }
 0xb01   :  { %11891 = vmatpush.bf16.msrb.mxu0 %v17374_v56 }
 0xb03   :  { %11684 = vmatpush.bf16.msra.mxu3 %v17353_v57 }
 0xb04   :  { %11905 = vmatpush.bf16.msrb.mxu1 %v17381_v26 }
 0xb05   :  { %11892 = vmatpush.bf16.msrb.mxu0 %v17373_v1 }
 0xb07   :  { %11685 = vmatpush.bf16.msra.mxu3 %v17352_v61 }
 0xb08   :  { %11906 = vmatpush.bf16.msrb.mxu1 %v17380_v51 }
 0xb09   :  { %11893 = vmatpush.bf16.msrb.mxu0 %v17372_v23 }
 0xb0b   :  { %11686 = vmatpush.bf16.msra.mxu3 %v17351_v38 }
 0xb0c   :  { %11907 = vmatpush.bf16.msrb.mxu1 %v17379_v37 }
 0xb0d   :  { %11894 = vmatpush.bf16.msrb.mxu0 %v17371_v36 }
 0xb0e   :  { %11687 = vmatmul.bf16.vlgmr.msra.gmra.mxu3 %v11539_v50 }
 0xb0f   :  { %16318 = vmatmul.msk.bf16.vlgmr.msrb.gmra.mxu1 %vm4884_vm13, %v11748_v20 }
 0xb10   :  { %11895 = vmatmul.bf16.vlgmr.msrb.gmra.mxu0 %v11747_v7 }
 0xb5b   :  { %v11059_v39 = vpop.f32.mrf.mxu0 }
 0xb5c   :  { %v11072_v8 = vpop.f32.mrf.mxu1 }
 0xb61   :  { %v11046_v17 = vpop.f32.mrf.mxu3 }
 0xb62   :  { %v11060_v31 = vadd.f32 %v11059_v39, %v11046_v17 }
 0xb63   :  { %v11061_v25 = vpop.f32.mrf.mxu0  ;;  %v11259_v27 = vpop.f32.mrf.mxu2 }
 0xb64   :  { %v11074_v13 = vpop.f32.mrf.mxu1  ;;  %v11073_v52 = vadd.f32 %v11072_v8, %v11060_v31 }
 0xb66   :  { %v11076_v18 = vadd.f32 %v11073_v52, %v10863_v3 }
 0xb69   :  { %v11048_v53 = vpop.f32.mrf.mxu3 }
 0xb6b   :  { %v11261_v63 = vpop.f32.mrf.mxu2  ;;  %v11467_v10 = vpop.f32.mrf.mxu0 }
 0xb6c   :  { %v11272_v33 = vpop.f32.mrf.mxu1 }
 0xb6d   :  { %v11273_v35 = vadd.f32 %v11272_v33, %v11259_v27 }
 0xb71   :  { %v11285_v43 = vpop.f32.mrf.mxu3 }
 0xb72   :  { %v11286_v41 = vadd.f32 %v11285_v43, %v11273_v35 }
 0xb73   :  { %v11469_v29 = vpop.f32.mrf.mxu0  ;;  %v11480_v28 = vpop.f32.mrf.mxu2 }
 0xb74   :  { %v11274_v6 = vpop.f32.mrf.mxu1  ;;  %v11481_v54 = vadd.f32 %v11480_v28, %v11467_v10  ;;  %v11289_v47 = vadd.f32 %v11286_v41, %v11076_v18 }
 0xb79   :  { %v11287_v30 = vpop.f32.mrf.mxu3 }
 0xb7b   :  { %v11482_v55 = vpop.f32.mrf.mxu2  ;;  %v11701_v62 = vpop.f32.mrf.mxu0 }
 0xb7c   :  { %v11675_v32 = vpop.f32.mrf.mxu1 }
 0xb81   :  { %v11493_v4 = vpop.f32.mrf.mxu3 }
 0xb82   :  { %v11494_v0 = vadd.f32 %v11493_v4, %v11481_v54 }
 0xb83   :  { %v11883_v45 = vpop.f32.mrf.mxu2  ;;  %v11703_v19 = vpop.f32.mrf.mxu0 }
 0xb84   :  { %v11677_v2 = vpop.f32.mrf.mxu1  ;;  %v11497_v15 = vadd.f32 %v11494_v0, %v11289_v47 }
 0xb89   :  { %v11495_v58 = vpop.f32.mrf.mxu3 }
 0xb8b   :  { %v11885_v12 = vpop.f32.mrf.mxu2 }
 0xb8c   :  { %v11909_v16 = vpop.f32.mrf.mxu1 }
 0xb8d   :  { %v11896_v46 = vpop.f32.mrf.mxu0 }
 0xb8e   :  { %v11897_v11 = vadd.f32 %v11896_v46, %v11883_v45 }
 0xb90   :  { %v11910_v48 = vadd.f32 %v11909_v16, %v11897_v11 }
 0xb91   :  { %v11688_v22 = vpop.f32.mrf.mxu3 }
 0xb92   :  { %v11689_v42 = vadd.f32 %v11688_v22, %v11675_v32 }
 0xb94   :  { %v11702_v5 = vadd.f32 %v11701_v62, %v11689_v42  ;;  %v11911_v44 = vpop.f32.mrf.mxu1 }
 0xb95   :  { %v11898_v14 = vpop.f32.mrf.mxu0 }
 0xb96   :  { %v11705_v60 = vadd.f32 %v11702_v5, %v11497_v15 }
 0xb98   :  { %v11913_v40 = vadd.f32 %v11910_v48, %v11705_v60 }
 0xb99   :  { %v11690_v21 = vpop.f32.mrf.mxu3 }
 0xb9a   :  { %11914 = vst [vmem:[#allocation17 + $0x1] sm:$0x1] %v11913_v40 }
 0xb9b   :  { %11925 = dma.vmem_to_hbm [thread:$0]  %s11921_s23, 32, %s11923_s26, [#allocation8]  }
 0xb9c   :  { %17576 = dma.done.wait [#allocation8], 32  }
 0xb9d   :  { %17577 = vsyncadd [#allocation8], 4294967264 }
 0xb9e   :  { %11930 = vsyncpa [#allocation7], 1 }
 0xb9f   :  { %11931 = vsyncpa [#allocation10], 1 }
 0xba0   :  { %11932 = vsyncpa [#allocation13], 1 }
 0xba1   :  { %11933 = vsyncpa [#allocation16], 1 }
 0xba2   :  { %11934 = vsyncpa [#allocation8], 1 }

</bundles_post_ra>
